<compile_context>
chip_gen: v7x
topology: tpu7x:2x2x1
jax: 0.10.0
libtpu: 0.0.40
codegen_flags: <defaults>
</compile_context>

<pallas_src>
import functools

import jax
import jax.numpy as jnp
from jax.experimental import pallas as pl
from jax.experimental.pallas import tpu as pltpu


# ----------------------------------------------------------------------------
# Helpers
# ----------------------------------------------------------------------------
def _round_up(x, m):
    return (x + m - 1) // m * m


def _pick_tile(dim, max_tile, align):
    """Padded extent + the largest tile <= max_tile (aligned) that divides it."""
    d = _round_up(dim, align)
    t = min(d, max_tile)
    while d % t:
        t -= align
    return t, d


def _tanh_half(v):
    return (jnp.tanh(v) + 1.0) * 0.5


# ----------------------------------------------------------------------------
# Pallas kernels
# ----------------------------------------------------------------------------
def _matmul_kernel(a_ref, b_ref, o_ref, *, activation):
    """bf16 x bf16 -> f32; accumulate directly into the resident output block."""
    k = pl.program_id(2)

    @pl.when(k == 0)
    def _():
        o_ref[...] = jnp.zeros_like(o_ref)

    o_ref[...] += jnp.dot(a_ref[...], b_ref[...],
                          preferred_element_type=jnp.float32)

    if activation is not None:
        @pl.when(k == pl.num_programs(2) - 1)
        def _():
            o_ref[...] = activation(o_ref[...])


def pallas_matmul(a, b, activation=None):
    """(M,K) @ (K,N) with 3-D tiling; bf16 operands, f32 accumulation."""
    M, K = a.shape
    K2, N = b.shape
    assert K == K2
    tm, Mp = _pick_tile(M, 256, 8)
    tn, Np = _pick_tile(N, 256, 128)
    tk, Kp = _pick_tile(K, 1024, 128)

    a_p = jnp.pad(a.astype(jnp.bfloat16), ((0, Mp - M), (0, Kp - K)))
    b_p = jnp.pad(b.astype(jnp.bfloat16), ((0, Kp - K), (0, Np - N)))

    out = pl.pallas_call(
        functools.partial(_matmul_kernel, activation=activation),
        out_shape=jax.ShapeDtypeStruct((Mp, Np), jnp.float32),
        grid=(Mp // tm, Np // tn, Kp // tk),
        in_specs=[
            pl.BlockSpec((tm, tk), lambda i, j, k: (i, k)),
            pl.BlockSpec((tk, tn), lambda i, j, k: (k, j)),
        ],
        out_specs=pl.BlockSpec((tm, tn), lambda i, j, k: (i, j)),
        compiler_params=pltpu.CompilerParams(
            dimension_semantics=("parallel", "parallel", "arbitrary"),
            vmem_limit_bytes=32 * 1024 * 1024),
    )(a_p, b_p)

    if (Mp, Np) != (M, N):
        out = out[:M, :N]
    return out


def _in_kernel(x_ref, o_ref, *, relu):
    x = x_ref[...]                                   # (1, HW, Ct) f32
    mean = jnp.mean(x, axis=1, keepdims=True)
    var = jnp.mean(jnp.square(x - mean), axis=1, keepdims=True)
    y = (x - mean) * jax.lax.rsqrt(var + 1e-5)
    if relu:
        y = jnp.maximum(y, 0.0)
    o_ref[...] = y


def _in_res_kernel(x_ref, r_ref, o_ref, *, relu):
    x = x_ref[...]
    mean = jnp.mean(x, axis=1, keepdims=True)
    var = jnp.mean(jnp.square(x - mean), axis=1, keepdims=True)
    y = (x - mean) * jax.lax.rsqrt(var + 1e-5) + r_ref[...]
    if relu:
        y = jnp.maximum(y, 0.0)
    o_ref[...] = y


def instance_norm_nhwc(x, relu=False, residual=None):
    """InstanceNorm2d(affine=False, eps=1e-5) on NHWC, optional fused ReLU/residual."""
    N, H, W, C = x.shape
    HW = H * W
    ct = C if C <= 128 else 128                      # channel tile (lane-dense)
    grid = (N, C // ct)
    spec = pl.BlockSpec((1, HW, ct), lambda n, c: (n, 0, c))
    cp = pltpu.CompilerParams(dimension_semantics=("parallel", "parallel"))
    x3 = x.reshape(N, HW, C)
    if residual is None:
        out = pl.pallas_call(
            functools.partial(_in_kernel, relu=relu),
            out_shape=jax.ShapeDtypeStruct((N, HW, C), jnp.float32),
            grid=grid, in_specs=[spec], out_specs=spec, compiler_params=cp,
        )(x3)
    else:
        out = pl.pallas_call(
            functools.partial(_in_res_kernel, relu=relu),
            out_shape=jax.ShapeDtypeStruct((N, HW, C), jnp.float32),
            grid=grid, in_specs=[spec, spec], out_specs=spec, compiler_params=cp,
        )(x3, residual.reshape(N, HW, C))
    return out.reshape(N, H, W, C)


# ----------------------------------------------------------------------------
# Conv glue (NHWC patch matrices, matmul in Pallas)
# ----------------------------------------------------------------------------
def reflect_pad(x, p):
    return jnp.pad(x, ((0, 0), (p, p), (p, p), (0, 0)), mode="reflect")


def zero_pad(x, p):
    return jnp.pad(x, ((0, 0), (p, p), (p, p), (0, 0)))


def conv2d_nhwc(x, w, stride=1, dilation=1, activation=None):
    """x: (N,H,W,Cin) already padded; w: (Cout,Cin,KH,KW) PyTorch layout. Bias zero."""
    N, H, W, Cin = x.shape
    Cout, Cin2, KH, KW = w.shape
    OH = (H - (KH - 1) * dilation - 1) // stride + 1
    OW = (W - (KW - 1) * dilation - 1) // stride + 1
    if KH == 1 and KW == 1 and stride == 1:
        col = x.reshape(N * H * W, Cin)
    else:
        cols = []
        for i in range(KH):
            for j in range(KW):
                hi, wj = i * dilation, j * dilation
                cols.append(x[:, hi:hi + (OH - 1) * stride + 1:stride,
                                 wj:wj + (OW - 1) * stride + 1:stride, :])
        col = jnp.concatenate(cols, axis=-1).reshape(N * OH * OW, KH * KW * Cin)
    wmat = w.transpose(2, 3, 1, 0).reshape(KH * KW * Cin, Cout)
    out = pallas_matmul(col, wmat, activation=activation)
    return out.reshape(N, OH, OW, Cout)


def conv_transpose2d_nhwc(x, w_t):
    """ConvTranspose2d(k=4, stride=2, padding=1) via 4 output-parity phase convs.

    x: (N,H,W,Cin); w_t: (Cin,Cout,4,4) (PyTorch ConvTranspose2d layout); bias zero.
    """
    N, H, W, Cin = x.shape
    _, Cout, KH, KW = w_t.shape
    xp = zero_pad(x, 1)                              # (N, H+2, W+2, Cin)
    # phase -> (start offset into xp, kernel-tap indices for the two taps)
    phase = {0: (0, (3, 1)), 1: (1, (2, 0))}
    ys = {}
    for pa in (0, 1):
        ro, krows = phase[pa]
        for pb in (0, 1):
            co, kcols = phase[pb]
            # (Cout, Cin, 2, 2) sub-kernel: w_sub[o,i,a,b] = w_t[i,o,krows[a],kcols[b]]
            w_sub = jnp.stack(
                [jnp.stack([w_t[:, :, krows[a], kcols[b]] for b in (0, 1)], axis=-1)
                 for a in (0, 1)], axis=-2).transpose(1, 0, 2, 3)
            xw = xp[:, ro:ro + H + 1, co:co + W + 1, :]
            ys[(pa, pb)] = conv2d_nhwc(xw, w_sub)    # (N, H, W, Cout)
    row0 = jnp.stack([ys[(0, 0)], ys[(0, 1)]], axis=3)   # (N,H,W,2,Cout)
    row1 = jnp.stack([ys[(1, 0)], ys[(1, 1)]], axis=3)
    out = jnp.stack([row0, row1], axis=2)                # (N,H,2,W,2,Cout)
    return out.reshape(N, 2 * H, 2 * W, Cout)


# ----------------------------------------------------------------------------
# Model blocks (NHWC)
# ----------------------------------------------------------------------------
def aspp(x, p):
    """ASPP(5, 64): image pooling + 1x1 + atrous 3x3 (d=6,12,18) + 1x1 fuse."""
    N, H, W, C = x.shape
    pooled = jnp.mean(x, axis=(1, 2))                               # (N, C)
    img_feat = pallas_matmul(pooled, p["pool_conv"].reshape(64, C).T)   # (N, 64)
    img_feat = jnp.broadcast_to(img_feat[:, None, None, :], (N, H, W, 64))
    b1 = conv2d_nhwc(x, p["b1"])
    b6 = conv2d_nhwc(zero_pad(x, 6), p["b6"], dilation=6)
    b12 = conv2d_nhwc(zero_pad(x, 12), p["b12"], dilation=12)
    b18 = conv2d_nhwc(zero_pad(x, 18), p["b18"], dilation=18)
    cat = jnp.concatenate([img_feat, b1, b6, b12, b18], axis=-1)    # (N,H,W,320)
    return conv2d_nhwc(cat, p["out"])


def resnet_block(x, w1, w2, dilation=2):
    y = conv2d_nhwc(reflect_pad(x, dilation), w1, dilation=dilation)
    y = instance_norm_nhwc(y, relu=True)
    y = conv2d_nhwc(reflect_pad(y, 1), w2)
    return instance_norm_nhwc(y, relu=False, residual=x)   # residual fused


def forward(params, edge, img, mask):
    x = jnp.concatenate([img, edge, mask], axis=1)          # NCHW (N,5,H,W)
    x = x.transpose(0, 2, 3, 1)                             # -> NHWC
    x1 = instance_norm_nhwc(aspp(x, params["aspp"]), relu=True)
    x2 = instance_norm_nhwc(
        conv2d_nhwc(reflect_pad(x1, 1), params["ec2"], stride=2), relu=True)
    x3 = instance_norm_nhwc(
        conv2d_nhwc(reflect_pad(x2, 1), params["ec3"], stride=2), relu=True)
    m = x3
    for (w1, w2) in params["middle"]:
        m = resnet_block(m, w1, w2, dilation=2)
    x4 = m + x3
    x5 = instance_norm_nhwc(conv_transpose2d_nhwc(x4, params["dc1"]), relu=True)
    x6 = instance_norm_nhwc(conv_transpose2d_nhwc(x5, params["dc2"]), relu=True)
    x7 = conv2d_nhwc(reflect_pad(x6, 3), params["dc3"], activation=_tanh_half)
    return x7.transpose(0, 3, 1, 2)                         # back to NCHW


# ----------------------------------------------------------------------------
# Deterministic parameter init (kaiming_normal, fan_in mode; biases are zero)
# ----------------------------------------------------------------------------
def _kaiming(key, shape, fan_in):
    return jax.random.normal(key, shape, jnp.float32) * jnp.sqrt(2.0 / fan_in)


def init_params(key):
    ks = iter(jax.random.split(key, 32))
    nk = lambda: next(ks)
    p = {}
    p["aspp"] = {
        "pool_conv": _kaiming(nk(), (64, 5, 1, 1), 5),
        "b1": _kaiming(nk(), (64, 5, 1, 1), 5),
        "b6": _kaiming(nk(), (64, 5, 3, 3), 5 * 9),
        "b12": _kaiming(nk(), (64, 5, 3, 3), 5 * 9),
        "b18": _kaiming(nk(), (64, 5, 3, 3), 5 * 9),
        "out": _kaiming(nk(), (64, 320, 1, 1), 320),
    }
    p["ec2"] = _kaiming(nk(), (128, 64, 4, 4), 64 * 16)
    p["ec3"] = _kaiming(nk(), (256, 128, 4, 4), 128 * 16)
    p["middle"] = [
        (_kaiming(nk(), (256, 256, 3, 3), 256 * 9),
         _kaiming(nk(), (256, 256, 3, 3), 256 * 9))
        for _ in range(8)
    ]
    # ConvTranspose2d weight: (Cin, Cout, KH, KW); torch fan_in = Cout*KH*KW
    p["dc1"] = _kaiming(nk(), (256, 128, 4, 4), 128 * 16)
    p["dc2"] = _kaiming(nk(), (128, 64, 4, 4), 64 * 16)
    p["dc3"] = _kaiming(nk(), (3, 64, 7, 7), 64 * 49)
    return p


# ----------------------------------------------------------------------------
if __name__ == "__main__":
    key = jax.random.PRNGKey(0)
    kp, ke, ki, km = jax.random.split(key, 4)
    params = init_params(kp)

    N, H, W = 2, 16, 16
    edge = jax.random.normal(ke, (N, 1, H, W), jnp.float32)
    img = jax.random.normal(ki, (N, 3, H, W), jnp.float32)
    mask = (jax.random.uniform(km, (N, 1, H, W)) > 0.5).astype(jnp.float32)

    out = jax.jit(forward)(params, edge, img, mask)
    out = jax.block_until_ready(out)
    assert out.shape == (N, 3, H, W), out.shape
    assert bool(jnp.all(jnp.isfinite(out)))
    assert bool(jnp.all((out >= 0.0) & (out <= 1.0)))
    print("KERNEL_OK")
</pallas_src>

<mosaic_0001>
module attributes {stable_mosaic.version = 11 : i64} {
  func.func @_matmul_kernel(%arg0: i32, %arg1: i32, %arg2: i32, %arg3: memref<256x128xbf16, #tpu.memory_space<vmem>>, %arg4: memref<128x128xbf16, #tpu.memory_space<vmem>>, %arg5: memref<256x128xf32, #tpu.memory_space<vmem>>) attributes {dimension_semantics = [#tpu.dimension_semantics<parallel>, #tpu.dimension_semantics<parallel>, #tpu.dimension_semantics<arbitrary>], iteration_bounds = array<i64: 2, 1, 1>, scalar_prefetch = 0 : i64, scratch_operands = 0 : i64, tpu.core_type = #tpu.core_type<tc>, window_params = [{transform_indices = @transform_0, window_bounds = array<i64: 256, 128>}, {transform_indices = @transform_1, window_bounds = array<i64: 128, 128>}, {transform_indices = @transform_2, window_bounds = array<i64: 256, 128>}]} {
    %c0_i32 = arith.constant 0 : i32
    %0 = arith.cmpi eq, %arg2, %c0_i32 : i32
    %1 = arith.extui %0 : i1 to i32
    %c0_i32_0 = arith.constant 0 : i32
    %2 = arith.cmpi ne, %1, %c0_i32_0 : i32
    scf.if %2 {
      %cst_8 = arith.constant 0.000000e+00 : f32
      %9 = vector.broadcast %cst_8 : f32 to vector<256x128xf32>
      %c0_9 = arith.constant 0 : index
      %c0_10 = arith.constant 0 : index
      %10 = vector.load %arg5[%c0_9, %c0_10] : memref<256x128xf32, #tpu.memory_space<vmem>>, vector<256x128xf32>
      tpu.vector_store %arg5[%c0_9, %c0_10], %9 {strides = array<i32>} : memref<256x128xf32, #tpu.memory_space<vmem>>, vector<256x128xf32>,
    } else {
    }
    %c0 = arith.constant 0 : index
    %c0_1 = arith.constant 0 : index
    %3 = vector.load %arg5[%c0, %c0_1] : memref<256x128xf32, #tpu.memory_space<vmem>>, vector<256x128xf32>
    %c0_2 = arith.constant 0 : index
    %c0_3 = arith.constant 0 : index
    %4 = vector.load %arg3[%c0_2, %c0_3] : memref<256x128xbf16, #tpu.memory_space<vmem>>, vector<256x128xbf16>
    %c0_4 = arith.constant 0 : index
    %c0_5 = arith.constant 0 : index
    %5 = vector.load %arg4[%c0_4, %c0_5] : memref<128x128xbf16, #tpu.memory_space<vmem>>, vector<128x128xbf16>
    %cst = arith.constant dense<0.000000e+00> : vector<256x128xf32>
    %6 = tpu.matmul %4, %5, %cst {dimension_numbers = #tpu.dot_dimension_numbers<[1], [0], [0], [1], [0, 0, 1, 1], [], []>} : vector<256x128xbf16>, vector<128x128xbf16>, vector<256x128xf32> -> vector<256x128xf32>
    %7 = arith.addf %3, %6 : vector<256x128xf32>
    %c0_6 = arith.constant 0 : index
    %c0_7 = arith.constant 0 : index
    %8 = vector.load %arg5[%c0_6, %c0_7] : memref<256x128xf32, #tpu.memory_space<vmem>>, vector<256x128xf32>
    tpu.vector_store %arg5[%c0_6, %c0_7], %7 {strides = array<i32>} : memref<256x128xf32, #tpu.memory_space<vmem>>, vector<256x128xf32>,
    return
  }
  func.func @transform_0(%arg0: i32, %arg1: i32, %arg2: i32) -> (i32, i32) {
    %c0_i32 = arith.constant 0 : i32
    return %arg0, %arg2 : i32, i32
  }
  func.func @transform_1(%arg0: i32, %arg1: i32, %arg2: i32) -> (i32, i32) {
    %c0_i32 = arith.constant 0 : i32
    return %arg2, %arg1 : i32, i32
  }
  func.func @transform_2(%arg0: i32, %arg1: i32, %arg2: i32) -> (i32, i32) {
    %c0_i32 = arith.constant 0 : i32
    return %arg0, %arg1 : i32, i32
  }
}

module attributes {stable_mosaic.version = 11 : i64} {
  func.func @_matmul_kernel(%arg0: i32, %arg1: i32, %arg2: i32, %arg3: memref<8x128xbf16, #tpu.memory_space<vmem>>, %arg4: memref<128x128xbf16, #tpu.memory_space<vmem>>, %arg5: memref<8x128xf32, #tpu.memory_space<vmem>>) attributes {dimension_semantics = [#tpu.dimension_semantics<parallel>, #tpu.dimension_semantics<parallel>, #tpu.dimension_semantics<arbitrary>], iteration_bounds = array<i64: 1, 1, 1>, scalar_prefetch = 0 : i64, scratch_operands = 0 : i64, tpu.core_type = #tpu.core_type<tc>, window_params = [{transform_indices = @transform_0, window_bounds = array<i64: 8, 128>}, {transform_indices = @transform_1, window_bounds = array<i64: 128, 128>}, {transform_indices = @transform_2, window_bounds = array<i64: 8, 128>}]} {
    %c0_i32 = arith.constant 0 : i32
    %0 = arith.cmpi eq, %arg2, %c0_i32 : i32
    %1 = arith.extui %0 : i1 to i32
    %c0_i32_0 = arith.constant 0 : i32
    %2 = arith.cmpi ne, %1, %c0_i32_0 : i32
    scf.if %2 {
      %cst_8 = arith.constant 0.000000e+00 : f32
      %9 = vector.broadcast %cst_8 : f32 to vector<8x128xf32>
      %c0_9 = arith.constant 0 : index
      %c0_10 = arith.constant 0 : index
      %10 = vector.load %arg5[%c0_9, %c0_10] : memref<8x128xf32, #tpu.memory_space<vmem>>, vector<8x128xf32>
      tpu.vector_store %arg5[%c0_9, %c0_10], %9 {strides = array<i32>} : memref<8x128xf32, #tpu.memory_space<vmem>>, vector<8x128xf32>,
    } else {
    }
    %c0 = arith.constant 0 : index
    %c0_1 = arith.constant 0 : index
    %3 = vector.load %arg5[%c0, %c0_1] : memref<8x128xf32, #tpu.memory_space<vmem>>, vector<8x128xf32>
    %c0_2 = arith.constant 0 : index
    %c0_3 = arith.constant 0 : index
    %4 = vector.load %arg3[%c0_2, %c0_3] : memref<8x128xbf16, #tpu.memory_space<vmem>>, vector<8x128xbf16>
    %c0_4 = arith.constant 0 : index
    %c0_5 = arith.constant 0 : index
    %5 = vector.load %arg4[%c0_4, %c0_5] : memref<128x128xbf16, #tpu.memory_space<vmem>>, vector<128x128xbf16>
    %cst = arith.constant dense<0.000000e+00> : vector<8x128xf32>
    %6 = tpu.matmul %4, %5, %cst {dimension_numbers = #tpu.dot_dimension_numbers<[1], [0], [0], [1], [0, 0, 1, 1], [], []>} : vector<8x128xbf16>, vector<128x128xbf16>, vector<8x128xf32> -> vector<8x128xf32>
    %7 = arith.addf %3, %6 : vector<8x128xf32>
    %c0_6 = arith.constant 0 : index
    %c0_7 = arith.constant 0 : index
    %8 = vector.load %arg5[%c0_6, %c0_7] : memref<8x128xf32, #tpu.memory_space<vmem>>, vector<8x128xf32>
    tpu.vector_store %arg5[%c0_6, %c0_7], %7 {strides = array<i32>} : memref<8x128xf32, #tpu.memory_space<vmem>>, vector<8x128xf32>,
    return
  }
  func.func @transform_0(%arg0: i32, %arg1: i32, %arg2: i32) -> (i32, i32) {
    %c0_i32 = arith.constant 0 : i32
    return %arg0, %arg2 : i32, i32
  }
  func.func @transform_1(%arg0: i32, %arg1: i32, %arg2: i32) -> (i32, i32) {
    %c0_i32 = arith.constant 0 : i32
    return %arg2, %arg1 : i32, i32
  }
  func.func @transform_2(%arg0: i32, %arg1: i32, %arg2: i32) -> (i32, i32) {
    %c0_i32 = arith.constant 0 : i32
    return %arg0, %arg1 : i32, i32
  }
}

module attributes {stable_mosaic.version = 11 : i64} {
  func.func @_matmul_kernel(%arg0: i32, %arg1: i32, %arg2: i32, %arg3: memref<256x384xbf16, #tpu.memory_space<vmem>>, %arg4: memref<384x128xbf16, #tpu.memory_space<vmem>>, %arg5: memref<256x128xf32, #tpu.memory_space<vmem>>) attributes {dimension_semantics = [#tpu.dimension_semantics<parallel>, #tpu.dimension_semantics<parallel>, #tpu.dimension_semantics<arbitrary>], iteration_bounds = array<i64: 2, 1, 1>, scalar_prefetch = 0 : i64, scratch_operands = 0 : i64, tpu.core_type = #tpu.core_type<tc>, window_params = [{transform_indices = @transform_0, window_bounds = array<i64: 256, 384>}, {transform_indices = @transform_1, window_bounds = array<i64: 384, 128>}, {transform_indices = @transform_2, window_bounds = array<i64: 256, 128>}]} {
    %c0_i32 = arith.constant 0 : i32
    %0 = arith.cmpi eq, %arg2, %c0_i32 : i32
    %1 = arith.extui %0 : i1 to i32
    %c0_i32_0 = arith.constant 0 : i32
    %2 = arith.cmpi ne, %1, %c0_i32_0 : i32
    scf.if %2 {
      %cst_8 = arith.constant 0.000000e+00 : f32
      %9 = vector.broadcast %cst_8 : f32 to vector<256x128xf32>
      %c0_9 = arith.constant 0 : index
      %c0_10 = arith.constant 0 : index
      %10 = vector.load %arg5[%c0_9, %c0_10] : memref<256x128xf32, #tpu.memory_space<vmem>>, vector<256x128xf32>
      tpu.vector_store %arg5[%c0_9, %c0_10], %9 {strides = array<i32>} : memref<256x128xf32, #tpu.memory_space<vmem>>, vector<256x128xf32>,
    } else {
    }
    %c0 = arith.constant 0 : index
    %c0_1 = arith.constant 0 : index
    %3 = vector.load %arg5[%c0, %c0_1] : memref<256x128xf32, #tpu.memory_space<vmem>>, vector<256x128xf32>
    %c0_2 = arith.constant 0 : index
    %c0_3 = arith.constant 0 : index
    %4 = vector.load %arg3[%c0_2, %c0_3] : memref<256x384xbf16, #tpu.memory_space<vmem>>, vector<256x384xbf16>
    %c0_4 = arith.constant 0 : index
    %c0_5 = arith.constant 0 : index
    %5 = vector.load %arg4[%c0_4, %c0_5] : memref<384x128xbf16, #tpu.memory_space<vmem>>, vector<384x128xbf16>
    %cst = arith.constant dense<0.000000e+00> : vector<256x128xf32>
    %6 = tpu.matmul %4, %5, %cst {dimension_numbers = #tpu.dot_dimension_numbers<[1], [0], [0], [1], [0, 0, 1, 1], [], []>} : vector<256x384xbf16>, vector<384x128xbf16>, vector<256x128xf32> -> vector<256x128xf32>
    %7 = arith.addf %3, %6 : vector<256x128xf32>
    %c0_6 = arith.constant 0 : index
    %c0_7 = arith.constant 0 : index
    %8 = vector.load %arg5[%c0_6, %c0_7] : memref<256x128xf32, #tpu.memory_space<vmem>>, vector<256x128xf32>
    tpu.vector_store %arg5[%c0_6, %c0_7], %7 {strides = array<i32>} : memref<256x128xf32, #tpu.memory_space<vmem>>, vector<256x128xf32>,
    return
  }
  func.func @transform_0(%arg0: i32, %arg1: i32, %arg2: i32) -> (i32, i32) {
    %c0_i32 = arith.constant 0 : i32
    return %arg0, %arg2 : i32, i32
  }
  func.func @transform_1(%arg0: i32, %arg1: i32, %arg2: i32) -> (i32, i32) {
    %c0_i32 = arith.constant 0 : i32
    return %arg2, %arg1 : i32, i32
  }
  func.func @transform_2(%arg0: i32, %arg1: i32, %arg2: i32) -> (i32, i32) {
    %c0_i32 = arith.constant 0 : i32
    return %arg0, %arg1 : i32, i32
  }
}

module attributes {stable_mosaic.version = 11 : i64} {
  func.func @_in_kernel(%arg0: i32, %arg1: i32, %arg2: memref<1x256x64xf32, #tpu.memory_space<vmem>>, %arg3: memref<1x256x64xf32, #tpu.memory_space<vmem>>) attributes {dimension_semantics = [#tpu.dimension_semantics<parallel>, #tpu.dimension_semantics<parallel>], iteration_bounds = array<i64: 2, 1>, scalar_prefetch = 0 : i64, scratch_operands = 0 : i64, tpu.core_type = #tpu.core_type<tc>, window_params = [{transform_indices = @transform_0, window_bounds = array<i64: 1, 256, 64>}, {transform_indices = @transform_1, window_bounds = array<i64: 1, 256, 64>}]} {
    %c0 = arith.constant 0 : index
    %c0_0 = arith.constant 0 : index
    %c0_1 = arith.constant 0 : index
    %0 = vector.load %arg2[%c0, %c0_0, %c0_1] : memref<1x256x64xf32, #tpu.memory_space<vmem>>, vector<1x256x64xf32>
    %cst = arith.constant dense<0.000000e+00> : vector<1x64xf32>
    %1 = vector.multi_reduction <add>, %0, %cst [1] : vector<1x256x64xf32> to vector<1x64xf32>
    %2 = vector.shape_cast %1 : vector<1x64xf32> to vector<1x1x64xf32>
    %cst_2 = arith.constant 2.560000e+02 : f32
    %3 = vector.broadcast %cst_2 : f32 to vector<1x1x64xf32>
    %4 = arith.divf %2, %3 : vector<1x1x64xf32>
    %5 = vector.broadcast %4 : vector<1x1x64xf32> to vector<1x256x64xf32>
    %6 = arith.subf %0, %5 : vector<1x256x64xf32>
    %7 = arith.mulf %6, %6 : vector<1x256x64xf32>
    %cst_3 = arith.constant dense<0.000000e+00> : vector<1x64xf32>
    %8 = vector.multi_reduction <add>, %7, %cst_3 [1] : vector<1x256x64xf32> to vector<1x64xf32>
    %9 = vector.shape_cast %8 : vector<1x64xf32> to vector<1x1x64xf32>
    %cst_4 = arith.constant 2.560000e+02 : f32
    %10 = vector.broadcast %cst_4 : f32 to vector<1x1x64xf32>
    %11 = arith.divf %9, %10 : vector<1x1x64xf32>
    %12 = vector.broadcast %4 : vector<1x1x64xf32> to vector<1x256x64xf32>
    %13 = arith.subf %0, %12 : vector<1x256x64xf32>
    %cst_5 = arith.constant 9.99999974E-6 : f32
    %14 = vector.broadcast %cst_5 : f32 to vector<1x1x64xf32>
    %15 = arith.addf %11, %14 : vector<1x1x64xf32>
    %16 = math.rsqrt %15 : vector<1x1x64xf32>
    %17 = vector.broadcast %16 : vector<1x1x64xf32> to vector<1x256x64xf32>
    %18 = arith.mulf %13, %17 : vector<1x256x64xf32>
    %cst_6 = arith.constant 0.000000e+00 : f32
    %19 = vector.broadcast %cst_6 : f32 to vector<1x256x64xf32>
    %20 = arith.maximumf %18, %19 : vector<1x256x64xf32>
    %c0_7 = arith.constant 0 : index
    %c0_8 = arith.constant 0 : index
    %c0_9 = arith.constant 0 : index
    %21 = vector.load %arg3[%c0_7, %c0_8, %c0_9] : memref<1x256x64xf32, #tpu.memory_space<vmem>>, vector<1x256x64xf32>
    tpu.vector_store %arg3[%c0_7, %c0_8, %c0_9], %20 {strides = array<i32>} : memref<1x256x64xf32, #tpu.memory_space<vmem>>, vector<1x256x64xf32>,
    return
  }
  func.func @transform_0(%arg0: i32, %arg1: i32) -> (i32, i32, i32) {
    %c0_i32 = arith.constant 0 : i32
    %c0_i32_0 = arith.constant 0 : i32
    return %arg0, %c0_i32, %arg1 : i32, i32, i32
  }
  func.func @transform_1(%arg0: i32, %arg1: i32) -> (i32, i32, i32) {
    %c0_i32 = arith.constant 0 : i32
    %c0_i32_0 = arith.constant 0 : i32
    return %arg0, %c0_i32, %arg1 : i32, i32, i32
  }
}

module attributes {stable_mosaic.version = 11 : i64} {
  func.func @_matmul_kernel(%arg0: i32, %arg1: i32, %arg2: i32, %arg3: memref<128x1024xbf16, #tpu.memory_space<vmem>>, %arg4: memref<1024x128xbf16, #tpu.memory_space<vmem>>, %arg5: memref<128x128xf32, #tpu.memory_space<vmem>>) attributes {dimension_semantics = [#tpu.dimension_semantics<parallel>, #tpu.dimension_semantics<parallel>, #tpu.dimension_semantics<arbitrary>], iteration_bounds = array<i64: 1, 1, 1>, scalar_prefetch = 0 : i64, scratch_operands = 0 : i64, tpu.core_type = #tpu.core_type<tc>, window_params = [{transform_indices = @transform_0, window_bounds = array<i64: 128, 1024>}, {transform_indices = @transform_1, window_bounds = array<i64: 1024, 128>}, {transform_indices = @transform_2, window_bounds = array<i64: 128, 128>}]} {
    %c0_i32 = arith.constant 0 : i32
    %0 = arith.cmpi eq, %arg2, %c0_i32 : i32
    %1 = arith.extui %0 : i1 to i32
    %c0_i32_0 = arith.constant 0 : i32
    %2 = arith.cmpi ne, %1, %c0_i32_0 : i32
    scf.if %2 {
      %cst_8 = arith.constant 0.000000e+00 : f32
      %9 = vector.broadcast %cst_8 : f32 to vector<128x128xf32>
      %c0_9 = arith.constant 0 : index
      %c0_10 = arith.constant 0 : index
      %10 = vector.load %arg5[%c0_9, %c0_10] : memref<128x128xf32, #tpu.memory_space<vmem>>, vector<128x128xf32>
      tpu.vector_store %arg5[%c0_9, %c0_10], %9 {strides = array<i32>} : memref<128x128xf32, #tpu.memory_space<vmem>>, vector<128x128xf32>,
    } else {
    }
    %c0 = arith.constant 0 : index
    %c0_1 = arith.constant 0 : index
    %3 = vector.load %arg5[%c0, %c0_1] : memref<128x128xf32, #tpu.memory_space<vmem>>, vector<128x128xf32>
    %c0_2 = arith.constant 0 : index
    %c0_3 = arith.constant 0 : index
    %4 = vector.load %arg3[%c0_2, %c0_3] : memref<128x1024xbf16, #tpu.memory_space<vmem>>, vector<128x1024xbf16>
    %c0_4 = arith.constant 0 : index
    %c0_5 = arith.constant 0 : index
    %5 = vector.load %arg4[%c0_4, %c0_5] : memref<1024x128xbf16, #tpu.memory_space<vmem>>, vector<1024x128xbf16>
    %cst = arith.constant dense<0.000000e+00> : vector<128x128xf32>
    %6 = tpu.matmul %4, %5, %cst {dimension_numbers = #tpu.dot_dimension_numbers<[1], [0], [0], [1], [0, 0, 1, 1], [], []>} : vector<128x1024xbf16>, vector<1024x128xbf16>, vector<128x128xf32> -> vector<128x128xf32>
    %7 = arith.addf %3, %6 : vector<128x128xf32>
    %c0_6 = arith.constant 0 : index
    %c0_7 = arith.constant 0 : index
    %8 = vector.load %arg5[%c0_6, %c0_7] : memref<128x128xf32, #tpu.memory_space<vmem>>, vector<128x128xf32>
    tpu.vector_store %arg5[%c0_6, %c0_7], %7 {strides = array<i32>} : memref<128x128xf32, #tpu.memory_space<vmem>>, vector<128x128xf32>,
    return
  }
  func.func @transform_0(%arg0: i32, %arg1: i32, %arg2: i32) -> (i32, i32) {
    %c0_i32 = arith.constant 0 : i32
    return %arg0, %arg2 : i32, i32
  }
  func.func @transform_1(%arg0: i32, %arg1: i32, %arg2: i32) -> (i32, i32) {
    %c0_i32 = arith.constant 0 : i32
    return %arg2, %arg1 : i32, i32
  }
  func.func @transform_2(%arg0: i32, %arg1: i32, %arg2: i32) -> (i32, i32) {
    %c0_i32 = arith.constant 0 : i32
    return %arg0, %arg1 : i32, i32
  }
}

module attributes {stable_mosaic.version = 11 : i64} {
  func.func @_in_kernel(%arg0: i32, %arg1: i32, %arg2: memref<1x64x128xf32, #tpu.memory_space<vmem>>, %arg3: memref<1x64x128xf32, #tpu.memory_space<vmem>>) attributes {dimension_semantics = [#tpu.dimension_semantics<parallel>, #tpu.dimension_semantics<parallel>], iteration_bounds = array<i64: 2, 1>, scalar_prefetch = 0 : i64, scratch_operands = 0 : i64, tpu.core_type = #tpu.core_type<tc>, window_params = [{transform_indices = @transform_0, window_bounds = array<i64: 1, 64, 128>}, {transform_indices = @transform_1, window_bounds = array<i64: 1, 64, 128>}]} {
    %c0 = arith.constant 0 : index
    %c0_0 = arith.constant 0 : index
    %c0_1 = arith.constant 0 : index
    %0 = vector.load %arg2[%c0, %c0_0, %c0_1] : memref<1x64x128xf32, #tpu.memory_space<vmem>>, vector<1x64x128xf32>
    %cst = arith.constant dense<0.000000e+00> : vector<1x128xf32>
    %1 = vector.multi_reduction <add>, %0, %cst [1] : vector<1x64x128xf32> to vector<1x128xf32>
    %2 = vector.shape_cast %1 : vector<1x128xf32> to vector<1x1x128xf32>
    %cst_2 = arith.constant 6.400000e+01 : f32
    %3 = vector.broadcast %cst_2 : f32 to vector<1x1x128xf32>
    %4 = arith.divf %2, %3 : vector<1x1x128xf32>
    %5 = vector.broadcast %4 : vector<1x1x128xf32> to vector<1x64x128xf32>
    %6 = arith.subf %0, %5 : vector<1x64x128xf32>
    %7 = arith.mulf %6, %6 : vector<1x64x128xf32>
    %cst_3 = arith.constant dense<0.000000e+00> : vector<1x128xf32>
    %8 = vector.multi_reduction <add>, %7, %cst_3 [1] : vector<1x64x128xf32> to vector<1x128xf32>
    %9 = vector.shape_cast %8 : vector<1x128xf32> to vector<1x1x128xf32>
    %cst_4 = arith.constant 6.400000e+01 : f32
    %10 = vector.broadcast %cst_4 : f32 to vector<1x1x128xf32>
    %11 = arith.divf %9, %10 : vector<1x1x128xf32>
    %12 = vector.broadcast %4 : vector<1x1x128xf32> to vector<1x64x128xf32>
    %13 = arith.subf %0, %12 : vector<1x64x128xf32>
    %cst_5 = arith.constant 9.99999974E-6 : f32
    %14 = vector.broadcast %cst_5 : f32 to vector<1x1x128xf32>
    %15 = arith.addf %11, %14 : vector<1x1x128xf32>
    %16 = math.rsqrt %15 : vector<1x1x128xf32>
    %17 = vector.broadcast %16 : vector<1x1x128xf32> to vector<1x64x128xf32>
    %18 = arith.mulf %13, %17 : vector<1x64x128xf32>
    %cst_6 = arith.constant 0.000000e+00 : f32
    %19 = vector.broadcast %cst_6 : f32 to vector<1x64x128xf32>
    %20 = arith.maximumf %18, %19 : vector<1x64x128xf32>
    %c0_7 = arith.constant 0 : index
    %c0_8 = arith.constant 0 : index
    %c0_9 = arith.constant 0 : index
    %21 = vector.load %arg3[%c0_7, %c0_8, %c0_9] : memref<1x64x128xf32, #tpu.memory_space<vmem>>, vector<1x64x128xf32>
    tpu.vector_store %arg3[%c0_7, %c0_8, %c0_9], %20 {strides = array<i32>} : memref<1x64x128xf32, #tpu.memory_space<vmem>>, vector<1x64x128xf32>,
    return
  }
  func.func @transform_0(%arg0: i32, %arg1: i32) -> (i32, i32, i32) {
    %c0_i32 = arith.constant 0 : i32
    %c0_i32_0 = arith.constant 0 : i32
    return %arg0, %c0_i32, %arg1 : i32, i32, i32
  }
  func.func @transform_1(%arg0: i32, %arg1: i32) -> (i32, i32, i32) {
    %c0_i32 = arith.constant 0 : i32
    %c0_i32_0 = arith.constant 0 : i32
    return %arg0, %c0_i32, %arg1 : i32, i32, i32
  }
}

module attributes {stable_mosaic.version = 11 : i64} {
  func.func @_matmul_kernel(%arg0: i32, %arg1: i32, %arg2: i32, %arg3: memref<32x1024xbf16, #tpu.memory_space<vmem>>, %arg4: memref<1024x256xbf16, #tpu.memory_space<vmem>>, %arg5: memref<32x256xf32, #tpu.memory_space<vmem>>) attributes {dimension_semantics = [#tpu.dimension_semantics<parallel>, #tpu.dimension_semantics<parallel>, #tpu.dimension_semantics<arbitrary>], iteration_bounds = array<i64: 1, 1, 2>, scalar_prefetch = 0 : i64, scratch_operands = 0 : i64, tpu.core_type = #tpu.core_type<tc>, window_params = [{transform_indices = @transform_0, window_bounds = array<i64: 32, 1024>}, {transform_indices = @transform_1, window_bounds = array<i64: 1024, 256>}, {transform_indices = @transform_2, window_bounds = array<i64: 32, 256>}]} {
    %c0_i32 = arith.constant 0 : i32
    %0 = arith.cmpi eq, %arg2, %c0_i32 : i32
    %1 = arith.extui %0 : i1 to i32
    %c0_i32_0 = arith.constant 0 : i32
    %2 = arith.cmpi ne, %1, %c0_i32_0 : i32
    scf.if %2 {
      %cst_8 = arith.constant 0.000000e+00 : f32
      %9 = vector.broadcast %cst_8 : f32 to vector<32x256xf32>
      %c0_9 = arith.constant 0 : index
      %c0_10 = arith.constant 0 : index
      %10 = vector.load %arg5[%c0_9, %c0_10] : memref<32x256xf32, #tpu.memory_space<vmem>>, vector<32x256xf32>
      tpu.vector_store %arg5[%c0_9, %c0_10], %9 {strides = array<i32>} : memref<32x256xf32, #tpu.memory_space<vmem>>, vector<32x256xf32>,
    } else {
    }
    %c0 = arith.constant 0 : index
    %c0_1 = arith.constant 0 : index
    %3 = vector.load %arg5[%c0, %c0_1] : memref<32x256xf32, #tpu.memory_space<vmem>>, vector<32x256xf32>
    %c0_2 = arith.constant 0 : index
    %c0_3 = arith.constant 0 : index
    %4 = vector.load %arg3[%c0_2, %c0_3] : memref<32x1024xbf16, #tpu.memory_space<vmem>>, vector<32x1024xbf16>
    %c0_4 = arith.constant 0 : index
    %c0_5 = arith.constant 0 : index
    %5 = vector.load %arg4[%c0_4, %c0_5] : memref<1024x256xbf16, #tpu.memory_space<vmem>>, vector<1024x256xbf16>
    %cst = arith.constant dense<0.000000e+00> : vector<32x256xf32>
    %6 = tpu.matmul %4, %5, %cst {dimension_numbers = #tpu.dot_dimension_numbers<[1], [0], [0], [1], [0, 0, 1, 1], [], []>} : vector<32x1024xbf16>, vector<1024x256xbf16>, vector<32x256xf32> -> vector<32x256xf32>
    %7 = arith.addf %3, %6 : vector<32x256xf32>
    %c0_6 = arith.constant 0 : index
    %c0_7 = arith.constant 0 : index
    %8 = vector.load %arg5[%c0_6, %c0_7] : memref<32x256xf32, #tpu.memory_space<vmem>>, vector<32x256xf32>
    tpu.vector_store %arg5[%c0_6, %c0_7], %7 {strides = array<i32>} : memref<32x256xf32, #tpu.memory_space<vmem>>, vector<32x256xf32>,
    return
  }
  func.func @transform_0(%arg0: i32, %arg1: i32, %arg2: i32) -> (i32, i32) {
    %c0_i32 = arith.constant 0 : i32
    return %arg0, %arg2 : i32, i32
  }
  func.func @transform_1(%arg0: i32, %arg1: i32, %arg2: i32) -> (i32, i32) {
    %c0_i32 = arith.constant 0 : i32
    return %arg2, %arg1 : i32, i32
  }
  func.func @transform_2(%arg0: i32, %arg1: i32, %arg2: i32) -> (i32, i32) {
    %c0_i32 = arith.constant 0 : i32
    return %arg0, %arg1 : i32, i32
  }
}

module attributes {stable_mosaic.version = 11 : i64} {
  func.func @_in_kernel(%arg0: i32, %arg1: i32, %arg2: memref<1x16x128xf32, #tpu.memory_space<vmem>>, %arg3: memref<1x16x128xf32, #tpu.memory_space<vmem>>) attributes {dimension_semantics = [#tpu.dimension_semantics<parallel>, #tpu.dimension_semantics<parallel>], iteration_bounds = array<i64: 2, 2>, scalar_prefetch = 0 : i64, scratch_operands = 0 : i64, tpu.core_type = #tpu.core_type<tc>, window_params = [{transform_indices = @transform_0, window_bounds = array<i64: 1, 16, 128>}, {transform_indices = @transform_1, window_bounds = array<i64: 1, 16, 128>}]} {
    %c0 = arith.constant 0 : index
    %c0_0 = arith.constant 0 : index
    %c0_1 = arith.constant 0 : index
    %0 = vector.load %arg2[%c0, %c0_0, %c0_1] : memref<1x16x128xf32, #tpu.memory_space<vmem>>, vector<1x16x128xf32>
    %cst = arith.constant dense<0.000000e+00> : vector<1x128xf32>
    %1 = vector.multi_reduction <add>, %0, %cst [1] : vector<1x16x128xf32> to vector<1x128xf32>
    %2 = vector.shape_cast %1 : vector<1x128xf32> to vector<1x1x128xf32>
    %cst_2 = arith.constant 1.600000e+01 : f32
    %3 = vector.broadcast %cst_2 : f32 to vector<1x1x128xf32>
    %4 = arith.divf %2, %3 : vector<1x1x128xf32>
    %5 = vector.broadcast %4 : vector<1x1x128xf32> to vector<1x16x128xf32>
    %6 = arith.subf %0, %5 : vector<1x16x128xf32>
    %7 = arith.mulf %6, %6 : vector<1x16x128xf32>
    %cst_3 = arith.constant dense<0.000000e+00> : vector<1x128xf32>
    %8 = vector.multi_reduction <add>, %7, %cst_3 [1] : vector<1x16x128xf32> to vector<1x128xf32>
    %9 = vector.shape_cast %8 : vector<1x128xf32> to vector<1x1x128xf32>
    %cst_4 = arith.constant 1.600000e+01 : f32
    %10 = vector.broadcast %cst_4 : f32 to vector<1x1x128xf32>
    %11 = arith.divf %9, %10 : vector<1x1x128xf32>
    %12 = vector.broadcast %4 : vector<1x1x128xf32> to vector<1x16x128xf32>
    %13 = arith.subf %0, %12 : vector<1x16x128xf32>
    %cst_5 = arith.constant 9.99999974E-6 : f32
    %14 = vector.broadcast %cst_5 : f32 to vector<1x1x128xf32>
    %15 = arith.addf %11, %14 : vector<1x1x128xf32>
    %16 = math.rsqrt %15 : vector<1x1x128xf32>
    %17 = vector.broadcast %16 : vector<1x1x128xf32> to vector<1x16x128xf32>
    %18 = arith.mulf %13, %17 : vector<1x16x128xf32>
    %cst_6 = arith.constant 0.000000e+00 : f32
    %19 = vector.broadcast %cst_6 : f32 to vector<1x16x128xf32>
    %20 = arith.maximumf %18, %19 : vector<1x16x128xf32>
    %c0_7 = arith.constant 0 : index
    %c0_8 = arith.constant 0 : index
    %c0_9 = arith.constant 0 : index
    %21 = vector.load %arg3[%c0_7, %c0_8, %c0_9] : memref<1x16x128xf32, #tpu.memory_space<vmem>>, vector<1x16x128xf32>
    tpu.vector_store %arg3[%c0_7, %c0_8, %c0_9], %20 {strides = array<i32>} : memref<1x16x128xf32, #tpu.memory_space<vmem>>, vector<1x16x128xf32>,
    return
  }
  func.func @transform_0(%arg0: i32, %arg1: i32) -> (i32, i32, i32) {
    %c0_i32 = arith.constant 0 : i32
    %c0_i32_0 = arith.constant 0 : i32
    return %arg0, %c0_i32, %arg1 : i32, i32, i32
  }
  func.func @transform_1(%arg0: i32, %arg1: i32) -> (i32, i32, i32) {
    %c0_i32 = arith.constant 0 : i32
    %c0_i32_0 = arith.constant 0 : i32
    return %arg0, %c0_i32, %arg1 : i32, i32, i32
  }
}

module attributes {stable_mosaic.version = 11 : i64} {
  func.func @_matmul_kernel(%arg0: i32, %arg1: i32, %arg2: i32, %arg3: memref<32x768xbf16, #tpu.memory_space<vmem>>, %arg4: memref<768x256xbf16, #tpu.memory_space<vmem>>, %arg5: memref<32x256xf32, #tpu.memory_space<vmem>>) attributes {dimension_semantics = [#tpu.dimension_semantics<parallel>, #tpu.dimension_semantics<parallel>, #tpu.dimension_semantics<arbitrary>], iteration_bounds = array<i64: 1, 1, 3>, scalar_prefetch = 0 : i64, scratch_operands = 0 : i64, tpu.core_type = #tpu.core_type<tc>, window_params = [{transform_indices = @transform_0, window_bounds = array<i64: 32, 768>}, {transform_indices = @transform_1, window_bounds = array<i64: 768, 256>}, {transform_indices = @transform_2, window_bounds = array<i64: 32, 256>}]} {
    %c0_i32 = arith.constant 0 : i32
    %0 = arith.cmpi eq, %arg2, %c0_i32 : i32
    %1 = arith.extui %0 : i1 to i32
    %c0_i32_0 = arith.constant 0 : i32
    %2 = arith.cmpi ne, %1, %c0_i32_0 : i32
    scf.if %2 {
      %cst_8 = arith.constant 0.000000e+00 : f32
      %9 = vector.broadcast %cst_8 : f32 to vector<32x256xf32>
      %c0_9 = arith.constant 0 : index
      %c0_10 = arith.constant 0 : index
      %10 = vector.load %arg5[%c0_9, %c0_10] : memref<32x256xf32, #tpu.memory_space<vmem>>, vector<32x256xf32>
      tpu.vector_store %arg5[%c0_9, %c0_10], %9 {strides = array<i32>} : memref<32x256xf32, #tpu.memory_space<vmem>>, vector<32x256xf32>,
    } else {
    }
    %c0 = arith.constant 0 : index
    %c0_1 = arith.constant 0 : index
    %3 = vector.load %arg5[%c0, %c0_1] : memref<32x256xf32, #tpu.memory_space<vmem>>, vector<32x256xf32>
    %c0_2 = arith.constant 0 : index
    %c0_3 = arith.constant 0 : index
    %4 = vector.load %arg3[%c0_2, %c0_3] : memref<32x768xbf16, #tpu.memory_space<vmem>>, vector<32x768xbf16>
    %c0_4 = arith.constant 0 : index
    %c0_5 = arith.constant 0 : index
    %5 = vector.load %arg4[%c0_4, %c0_5] : memref<768x256xbf16, #tpu.memory_space<vmem>>, vector<768x256xbf16>
    %cst = arith.constant dense<0.000000e+00> : vector<32x256xf32>
    %6 = tpu.matmul %4, %5, %cst {dimension_numbers = #tpu.dot_dimension_numbers<[1], [0], [0], [1], [0, 0, 1, 1], [], []>} : vector<32x768xbf16>, vector<768x256xbf16>, vector<32x256xf32> -> vector<32x256xf32>
    %7 = arith.addf %3, %6 : vector<32x256xf32>
    %c0_6 = arith.constant 0 : index
    %c0_7 = arith.constant 0 : index
    %8 = vector.load %arg5[%c0_6, %c0_7] : memref<32x256xf32, #tpu.memory_space<vmem>>, vector<32x256xf32>
    tpu.vector_store %arg5[%c0_6, %c0_7], %7 {strides = array<i32>} : memref<32x256xf32, #tpu.memory_space<vmem>>, vector<32x256xf32>,
    return
  }
  func.func @transform_0(%arg0: i32, %arg1: i32, %arg2: i32) -> (i32, i32) {
    %c0_i32 = arith.constant 0 : i32
    return %arg0, %arg2 : i32, i32
  }
  func.func @transform_1(%arg0: i32, %arg1: i32, %arg2: i32) -> (i32, i32) {
    %c0_i32 = arith.constant 0 : i32
    return %arg2, %arg1 : i32, i32
  }
  func.func @transform_2(%arg0: i32, %arg1: i32, %arg2: i32) -> (i32, i32) {
    %c0_i32 = arith.constant 0 : i32
    return %arg0, %arg1 : i32, i32
  }
}

module attributes {stable_mosaic.version = 11 : i64} {
  func.func @_in_res_kernel(%arg0: i32, %arg1: i32, %arg2: memref<1x16x128xf32, #tpu.memory_space<vmem>>, %arg3: memref<1x16x128xf32, #tpu.memory_space<vmem>>, %arg4: memref<1x16x128xf32, #tpu.memory_space<vmem>>) attributes {dimension_semantics = [#tpu.dimension_semantics<parallel>, #tpu.dimension_semantics<parallel>], iteration_bounds = array<i64: 2, 2>, scalar_prefetch = 0 : i64, scratch_operands = 0 : i64, tpu.core_type = #tpu.core_type<tc>, window_params = [{transform_indices = @transform_0, window_bounds = array<i64: 1, 16, 128>}, {transform_indices = @transform_1, window_bounds = array<i64: 1, 16, 128>}, {transform_indices = @transform_2, window_bounds = array<i64: 1, 16, 128>}]} {
    %c0 = arith.constant 0 : index
    %c0_0 = arith.constant 0 : index
    %c0_1 = arith.constant 0 : index
    %0 = vector.load %arg2[%c0, %c0_0, %c0_1] : memref<1x16x128xf32, #tpu.memory_space<vmem>>, vector<1x16x128xf32>
    %cst = arith.constant dense<0.000000e+00> : vector<1x128xf32>
    %1 = vector.multi_reduction <add>, %0, %cst [1] : vector<1x16x128xf32> to vector<1x128xf32>
    %2 = vector.shape_cast %1 : vector<1x128xf32> to vector<1x1x128xf32>
    %cst_2 = arith.constant 1.600000e+01 : f32
    %3 = vector.broadcast %cst_2 : f32 to vector<1x1x128xf32>
    %4 = arith.divf %2, %3 : vector<1x1x128xf32>
    %5 = vector.broadcast %4 : vector<1x1x128xf32> to vector<1x16x128xf32>
    %6 = arith.subf %0, %5 : vector<1x16x128xf32>
    %7 = arith.mulf %6, %6 : vector<1x16x128xf32>
    %cst_3 = arith.constant dense<0.000000e+00> : vector<1x128xf32>
    %8 = vector.multi_reduction <add>, %7, %cst_3 [1] : vector<1x16x128xf32> to vector<1x128xf32>
    %9 = vector.shape_cast %8 : vector<1x128xf32> to vector<1x1x128xf32>
    %cst_4 = arith.constant 1.600000e+01 : f32
    %10 = vector.broadcast %cst_4 : f32 to vector<1x1x128xf32>
    %11 = arith.divf %9, %10 : vector<1x1x128xf32>
    %12 = vector.broadcast %4 : vector<1x1x128xf32> to vector<1x16x128xf32>
    %13 = arith.subf %0, %12 : vector<1x16x128xf32>
    %cst_5 = arith.constant 9.99999974E-6 : f32
    %14 = vector.broadcast %cst_5 : f32 to vector<1x1x128xf32>
    %15 = arith.addf %11, %14 : vector<1x1x128xf32>
    %16 = math.rsqrt %15 : vector<1x1x128xf32>
    %17 = vector.broadcast %16 : vector<1x1x128xf32> to vector<1x16x128xf32>
    %18 = arith.mulf %13, %17 : vector<1x16x128xf32>
    %c0_6 = arith.constant 0 : index
    %c0_7 = arith.constant 0 : index
    %c0_8 = arith.constant 0 : index
    %19 = vector.load %arg3[%c0_6, %c0_7, %c0_8] : memref<1x16x128xf32, #tpu.memory_space<vmem>>, vector<1x16x128xf32>
    %20 = arith.addf %18, %19 : vector<1x16x128xf32>
    %c0_9 = arith.constant 0 : index
    %c0_10 = arith.constant 0 : index
    %c0_11 = arith.constant 0 : index
    %21 = vector.load %arg4[%c0_9, %c0_10, %c0_11] : memref<1x16x128xf32, #tpu.memory_space<vmem>>, vector<1x16x128xf32>
    tpu.vector_store %arg4[%c0_9, %c0_10, %c0_11], %20 {strides = array<i32>} : memref<1x16x128xf32, #tpu.memory_space<vmem>>, vector<1x16x128xf32>,
    return
  }
  func.func @transform_0(%arg0: i32, %arg1: i32) -> (i32, i32, i32) {
    %c0_i32 = arith.constant 0 : i32
    %c0_i32_0 = arith.constant 0 : i32
    return %arg0, %c0_i32, %arg1 : i32, i32, i32
  }
  func.func @transform_1(%arg0: i32, %arg1: i32) -> (i32, i32, i32) {
    %c0_i32 = arith.constant 0 : i32
    %c0_i32_0 = arith.constant 0 : i32
    return %arg0, %c0_i32, %arg1 : i32, i32, i32
  }
  func.func @transform_2(%arg0: i32, %arg1: i32) -> (i32, i32, i32) {
    %c0_i32 = arith.constant 0 : i32
    %c0_i32_0 = arith.constant 0 : i32
    return %arg0, %c0_i32, %arg1 : i32, i32, i32
  }
}

module attributes {stable_mosaic.version = 11 : i64} {
  func.func @_matmul_kernel(%arg0: i32, %arg1: i32, %arg2: i32, %arg3: memref<32x768xbf16, #tpu.memory_space<vmem>>, %arg4: memref<768x256xbf16, #tpu.memory_space<vmem>>, %arg5: memref<32x256xf32, #tpu.memory_space<vmem>>) attributes {dimension_semantics = [#tpu.dimension_semantics<parallel>, #tpu.dimension_semantics<parallel>, #tpu.dimension_semantics<arbitrary>], iteration_bounds = array<i64: 1, 1, 3>, scalar_prefetch = 0 : i64, scratch_operands = 0 : i64, tpu.core_type = #tpu.core_type<tc>, window_params = [{transform_indices = @transform_0, window_bounds = array<i64: 32, 768>}, {transform_indices = @transform_1, window_bounds = array<i64: 768, 256>}, {transform_indices = @transform_2, window_bounds = array<i64: 32, 256>}]} {
    %c0_i32 = arith.constant 0 : i32
    %0 = arith.cmpi eq, %arg2, %c0_i32 : i32
    %1 = arith.extui %0 : i1 to i32
    %c0_i32_0 = arith.constant 0 : i32
    %2 = arith.cmpi ne, %1, %c0_i32_0 : i32
    scf.if %2 {
      %cst_8 = arith.constant 0.000000e+00 : f32
      %9 = vector.broadcast %cst_8 : f32 to vector<32x256xf32>
      %c0_9 = arith.constant 0 : index
      %c0_10 = arith.constant 0 : index
      %10 = vector.load %arg5[%c0_9, %c0_10] : memref<32x256xf32, #tpu.memory_space<vmem>>, vector<32x256xf32>
      tpu.vector_store %arg5[%c0_9, %c0_10], %9 {strides = array<i32>} : memref<32x256xf32, #tpu.memory_space<vmem>>, vector<32x256xf32>,
    } else {
    }
    %c0 = arith.constant 0 : index
    %c0_1 = arith.constant 0 : index
    %3 = vector.load %arg5[%c0, %c0_1] : memref<32x256xf32, #tpu.memory_space<vmem>>, vector<32x256xf32>
    %c0_2 = arith.constant 0 : index
    %c0_3 = arith.constant 0 : index
    %4 = vector.load %arg3[%c0_2, %c0_3] : memref<32x768xbf16, #tpu.memory_space<vmem>>, vector<32x768xbf16>
    %c0_4 = arith.constant 0 : index
    %c0_5 = arith.constant 0 : index
    %5 = vector.load %arg4[%c0_4, %c0_5] : memref<768x256xbf16, #tpu.memory_space<vmem>>, vector<768x256xbf16>
    %cst = arith.constant dense<0.000000e+00> : vector<32x256xf32>
    %6 = tpu.matmul %4, %5, %cst {dimension_numbers = #tpu.dot_dimension_numbers<[1], [0], [0], [1], [0, 0, 1, 1], [], []>} : vector<32x768xbf16>, vector<768x256xbf16>, vector<32x256xf32> -> vector<32x256xf32>
    %7 = arith.addf %3, %6 : vector<32x256xf32>
    %c0_6 = arith.constant 0 : index
    %c0_7 = arith.constant 0 : index
    %8 = vector.load %arg5[%c0_6, %c0_7] : memref<32x256xf32, #tpu.memory_space<vmem>>, vector<32x256xf32>
    tpu.vector_store %arg5[%c0_6, %c0_7], %7 {strides = array<i32>} : memref<32x256xf32, #tpu.memory_space<vmem>>, vector<32x256xf32>,
    return
  }
  func.func @transform_0(%arg0: i32, %arg1: i32, %arg2: i32) -> (i32, i32) {
    %c0_i32 = arith.constant 0 : i32
    return %arg0, %arg2 : i32, i32
  }
  func.func @transform_1(%arg0: i32, %arg1: i32, %arg2: i32) -> (i32, i32) {
    %c0_i32 = arith.constant 0 : i32
    return %arg2, %arg1 : i32, i32
  }
  func.func @transform_2(%arg0: i32, %arg1: i32, %arg2: i32) -> (i32, i32) {
    %c0_i32 = arith.constant 0 : i32
    return %arg0, %arg1 : i32, i32
  }
}

module attributes {stable_mosaic.version = 11 : i64} {
  func.func @_matmul_kernel(%arg0: i32, %arg1: i32, %arg2: i32, %arg3: memref<32x1024xbf16, #tpu.memory_space<vmem>>, %arg4: memref<1024x128xbf16, #tpu.memory_space<vmem>>, %arg5: memref<32x128xf32, #tpu.memory_space<vmem>>) attributes {dimension_semantics = [#tpu.dimension_semantics<parallel>, #tpu.dimension_semantics<parallel>, #tpu.dimension_semantics<arbitrary>], iteration_bounds = array<i64: 1, 1, 1>, scalar_prefetch = 0 : i64, scratch_operands = 0 : i64, tpu.core_type = #tpu.core_type<tc>, window_params = [{transform_indices = @transform_0, window_bounds = array<i64: 32, 1024>}, {transform_indices = @transform_1, window_bounds = array<i64: 1024, 128>}, {transform_indices = @transform_2, window_bounds = array<i64: 32, 128>}]} {
    %c0_i32 = arith.constant 0 : i32
    %0 = arith.cmpi eq, %arg2, %c0_i32 : i32
    %1 = arith.extui %0 : i1 to i32
    %c0_i32_0 = arith.constant 0 : i32
    %2 = arith.cmpi ne, %1, %c0_i32_0 : i32
    scf.if %2 {
      %cst_8 = arith.constant 0.000000e+00 : f32
      %9 = vector.broadcast %cst_8 : f32 to vector<32x128xf32>
      %c0_9 = arith.constant 0 : index
      %c0_10 = arith.constant 0 : index
      %10 = vector.load %arg5[%c0_9, %c0_10] : memref<32x128xf32, #tpu.memory_space<vmem>>, vector<32x128xf32>
      tpu.vector_store %arg5[%c0_9, %c0_10], %9 {strides = array<i32>} : memref<32x128xf32, #tpu.memory_space<vmem>>, vector<32x128xf32>,
    } else {
    }
    %c0 = arith.constant 0 : index
    %c0_1 = arith.constant 0 : index
    %3 = vector.load %arg5[%c0, %c0_1] : memref<32x128xf32, #tpu.memory_space<vmem>>, vector<32x128xf32>
    %c0_2 = arith.constant 0 : index
    %c0_3 = arith.constant 0 : index
    %4 = vector.load %arg3[%c0_2, %c0_3] : memref<32x1024xbf16, #tpu.memory_space<vmem>>, vector<32x1024xbf16>
    %c0_4 = arith.constant 0 : index
    %c0_5 = arith.constant 0 : index
    %5 = vector.load %arg4[%c0_4, %c0_5] : memref<1024x128xbf16, #tpu.memory_space<vmem>>, vector<1024x128xbf16>
    %cst = arith.constant dense<0.000000e+00> : vector<32x128xf32>
    %6 = tpu.matmul %4, %5, %cst {dimension_numbers = #tpu.dot_dimension_numbers<[1], [0], [0], [1], [0, 0, 1, 1], [], []>} : vector<32x1024xbf16>, vector<1024x128xbf16>, vector<32x128xf32> -> vector<32x128xf32>
    %7 = arith.addf %3, %6 : vector<32x128xf32>
    %c0_6 = arith.constant 0 : index
    %c0_7 = arith.constant 0 : index
    %8 = vector.load %arg5[%c0_6, %c0_7] : memref<32x128xf32, #tpu.memory_space<vmem>>, vector<32x128xf32>
    tpu.vector_store %arg5[%c0_6, %c0_7], %7 {strides = array<i32>} : memref<32x128xf32, #tpu.memory_space<vmem>>, vector<32x128xf32>,
    return
  }
  func.func @transform_0(%arg0: i32, %arg1: i32, %arg2: i32) -> (i32, i32) {
    %c0_i32 = arith.constant 0 : i32
    return %arg0, %arg2 : i32, i32
  }
  func.func @transform_1(%arg0: i32, %arg1: i32, %arg2: i32) -> (i32, i32) {
    %c0_i32 = arith.constant 0 : i32
    return %arg2, %arg1 : i32, i32
  }
  func.func @transform_2(%arg0: i32, %arg1: i32, %arg2: i32) -> (i32, i32) {
    %c0_i32 = arith.constant 0 : i32
    return %arg0, %arg1 : i32, i32
  }
}

module attributes {stable_mosaic.version = 11 : i64} {
  func.func @_matmul_kernel(%arg0: i32, %arg1: i32, %arg2: i32, %arg3: memref<128x512xbf16, #tpu.memory_space<vmem>>, %arg4: memref<512x128xbf16, #tpu.memory_space<vmem>>, %arg5: memref<128x128xf32, #tpu.memory_space<vmem>>) attributes {dimension_semantics = [#tpu.dimension_semantics<parallel>, #tpu.dimension_semantics<parallel>, #tpu.dimension_semantics<arbitrary>], iteration_bounds = array<i64: 1, 1, 1>, scalar_prefetch = 0 : i64, scratch_operands = 0 : i64, tpu.core_type = #tpu.core_type<tc>, window_params = [{transform_indices = @transform_0, window_bounds = array<i64: 128, 512>}, {transform_indices = @transform_1, window_bounds = array<i64: 512, 128>}, {transform_indices = @transform_2, window_bounds = array<i64: 128, 128>}]} {
    %c0_i32 = arith.constant 0 : i32
    %0 = arith.cmpi eq, %arg2, %c0_i32 : i32
    %1 = arith.extui %0 : i1 to i32
    %c0_i32_0 = arith.constant 0 : i32
    %2 = arith.cmpi ne, %1, %c0_i32_0 : i32
    scf.if %2 {
      %cst_8 = arith.constant 0.000000e+00 : f32
      %9 = vector.broadcast %cst_8 : f32 to vector<128x128xf32>
      %c0_9 = arith.constant 0 : index
      %c0_10 = arith.constant 0 : index
      %10 = vector.load %arg5[%c0_9, %c0_10] : memref<128x128xf32, #tpu.memory_space<vmem>>, vector<128x128xf32>
      tpu.vector_store %arg5[%c0_9, %c0_10], %9 {strides = array<i32>} : memref<128x128xf32, #tpu.memory_space<vmem>>, vector<128x128xf32>,
    } else {
    }
    %c0 = arith.constant 0 : index
    %c0_1 = arith.constant 0 : index
    %3 = vector.load %arg5[%c0, %c0_1] : memref<128x128xf32, #tpu.memory_space<vmem>>, vector<128x128xf32>
    %c0_2 = arith.constant 0 : index
    %c0_3 = arith.constant 0 : index
    %4 = vector.load %arg3[%c0_2, %c0_3] : memref<128x512xbf16, #tpu.memory_space<vmem>>, vector<128x512xbf16>
    %c0_4 = arith.constant 0 : index
    %c0_5 = arith.constant 0 : index
    %5 = vector.load %arg4[%c0_4, %c0_5] : memref<512x128xbf16, #tpu.memory_space<vmem>>, vector<512x128xbf16>
    %cst = arith.constant dense<0.000000e+00> : vector<128x128xf32>
    %6 = tpu.matmul %4, %5, %cst {dimension_numbers = #tpu.dot_dimension_numbers<[1], [0], [0], [1], [0, 0, 1, 1], [], []>} : vector<128x512xbf16>, vector<512x128xbf16>, vector<128x128xf32> -> vector<128x128xf32>
    %7 = arith.addf %3, %6 : vector<128x128xf32>
    %c0_6 = arith.constant 0 : index
    %c0_7 = arith.constant 0 : index
    %8 = vector.load %arg5[%c0_6, %c0_7] : memref<128x128xf32, #tpu.memory_space<vmem>>, vector<128x128xf32>
    tpu.vector_store %arg5[%c0_6, %c0_7], %7 {strides = array<i32>} : memref<128x128xf32, #tpu.memory_space<vmem>>, vector<128x128xf32>,
    return
  }
  func.func @transform_0(%arg0: i32, %arg1: i32, %arg2: i32) -> (i32, i32) {
    %c0_i32 = arith.constant 0 : i32
    return %arg0, %arg2 : i32, i32
  }
  func.func @transform_1(%arg0: i32, %arg1: i32, %arg2: i32) -> (i32, i32) {
    %c0_i32 = arith.constant 0 : i32
    return %arg2, %arg1 : i32, i32
  }
  func.func @transform_2(%arg0: i32, %arg1: i32, %arg2: i32) -> (i32, i32) {
    %c0_i32 = arith.constant 0 : i32
    return %arg0, %arg1 : i32, i32
  }
}

module attributes {stable_mosaic.version = 11 : i64} {
  func.func @_matmul_kernel(%arg0: i32, %arg1: i32, %arg2: i32, %arg3: memref<256x640xbf16, #tpu.memory_space<vmem>>, %arg4: memref<640x128xbf16, #tpu.memory_space<vmem>>, %arg5: memref<256x128xf32, #tpu.memory_space<vmem>>) attributes {dimension_semantics = [#tpu.dimension_semantics<parallel>, #tpu.dimension_semantics<parallel>, #tpu.dimension_semantics<arbitrary>], iteration_bounds = array<i64: 2, 1, 5>, scalar_prefetch = 0 : i64, scratch_operands = 0 : i64, tpu.core_type = #tpu.core_type<tc>, window_params = [{transform_indices = @transform_0, window_bounds = array<i64: 256, 640>}, {transform_indices = @transform_1, window_bounds = array<i64: 640, 128>}, {transform_indices = @transform_2, window_bounds = array<i64: 256, 128>}]} {
    %c0_i32 = arith.constant 0 : i32
    %0 = arith.cmpi eq, %arg2, %c0_i32 : i32
    %1 = arith.extui %0 : i1 to i32
    %c0_i32_0 = arith.constant 0 : i32
    %2 = arith.cmpi ne, %1, %c0_i32_0 : i32
    scf.if %2 {
      %cst_9 = arith.constant 0.000000e+00 : f32
      %12 = vector.broadcast %cst_9 : f32 to vector<256x128xf32>
      %c0_10 = arith.constant 0 : index
      %c0_11 = arith.constant 0 : index
      %13 = vector.load %arg5[%c0_10, %c0_11] : memref<256x128xf32, #tpu.memory_space<vmem>>, vector<256x128xf32>
      tpu.vector_store %arg5[%c0_10, %c0_11], %12 {strides = array<i32>} : memref<256x128xf32, #tpu.memory_space<vmem>>, vector<256x128xf32>,
    } else {
    }
    %c0 = arith.constant 0 : index
    %c0_1 = arith.constant 0 : index
    %3 = vector.load %arg5[%c0, %c0_1] : memref<256x128xf32, #tpu.memory_space<vmem>>, vector<256x128xf32>
    %c0_2 = arith.constant 0 : index
    %c0_3 = arith.constant 0 : index
    %4 = vector.load %arg3[%c0_2, %c0_3] : memref<256x640xbf16, #tpu.memory_space<vmem>>, vector<256x640xbf16>
    %c0_4 = arith.constant 0 : index
    %c0_5 = arith.constant 0 : index
    %5 = vector.load %arg4[%c0_4, %c0_5] : memref<640x128xbf16, #tpu.memory_space<vmem>>, vector<640x128xbf16>
    %cst = arith.constant dense<0.000000e+00> : vector<256x128xf32>
    %6 = tpu.matmul %4, %5, %cst {dimension_numbers = #tpu.dot_dimension_numbers<[1], [0], [0], [1], [0, 0, 1, 1], [], []>} : vector<256x640xbf16>, vector<640x128xbf16>, vector<256x128xf32> -> vector<256x128xf32>
    %7 = arith.addf %3, %6 : vector<256x128xf32>
    %c0_6 = arith.constant 0 : index
    %c0_7 = arith.constant 0 : index
    %8 = vector.load %arg5[%c0_6, %c0_7] : memref<256x128xf32, #tpu.memory_space<vmem>>, vector<256x128xf32>
    tpu.vector_store %arg5[%c0_6, %c0_7], %7 {strides = array<i32>} : memref<256x128xf32, #tpu.memory_space<vmem>>, vector<256x128xf32>,
    %c4_i32 = arith.constant 4 : i32
    %9 = arith.cmpi eq, %arg2, %c4_i32 : i32
    %10 = arith.extui %9 : i1 to i32
    %c0_i32_8 = arith.constant 0 : i32
    %11 = arith.cmpi ne, %10, %c0_i32_8 : i32
    scf.if %11 {
      %c0_9 = arith.constant 0 : index
      %c0_10 = arith.constant 0 : index
      %12 = vector.load %arg5[%c0_9, %c0_10] : memref<256x128xf32, #tpu.memory_space<vmem>>, vector<256x128xf32>
      %13 = math.tanh %12 : vector<256x128xf32>
      %cst_11 = arith.constant 1.000000e+00 : f32
      %14 = vector.broadcast %cst_11 : f32 to vector<256x128xf32>
      %15 = arith.addf %13, %14 : vector<256x128xf32>
      %cst_12 = arith.constant 5.000000e-01 : f32
      %16 = vector.broadcast %cst_12 : f32 to vector<256x128xf32>
      %17 = arith.mulf %15, %16 : vector<256x128xf32>
      %c0_13 = arith.constant 0 : index
      %c0_14 = arith.constant 0 : index
      %18 = vector.load %arg5[%c0_13, %c0_14] : memref<256x128xf32, #tpu.memory_space<vmem>>, vector<256x128xf32>
      tpu.vector_store %arg5[%c0_13, %c0_14], %17 {strides = array<i32>} : memref<256x128xf32, #tpu.memory_space<vmem>>, vector<256x128xf32>,
    } else {
    }
    return
  }
  func.func @transform_0(%arg0: i32, %arg1: i32, %arg2: i32) -> (i32, i32) {
    %c0_i32 = arith.constant 0 : i32
    return %arg0, %arg2 : i32, i32
  }
  func.func @transform_1(%arg0: i32, %arg1: i32, %arg2: i32) -> (i32, i32) {
    %c0_i32 = arith.constant 0 : i32
    return %arg2, %arg1 : i32, i32
  }
  func.func @transform_2(%arg0: i32, %arg1: i32, %arg2: i32) -> (i32, i32) {
    %c0_i32 = arith.constant 0 : i32
    return %arg0, %arg1 : i32, i32
  }
}

</mosaic_0001>

<bundles_post_ra>
// kernel: forward.57
= control target key start
LH: loop header
LB: loop body
LE: loop exit
PB: predicated region body
PF: predicated region fallthrough
CT: control target
= control target key end

     0   :  { %s1015_s9 = smov 0   ;;  %s1017_s10 = smov 0   ;;  %s1128_s0 = inlined_call_operand.vmem [shape: bf16[512,128], index: 0, kind: input, shape index: {}]   ;;  %s1129_s1 = inlined_call_operand.vmem [shape: bf16[128,128], index: 1, kind: input, shape index: {}]   ;;  %s1130_s2 = inlined_call_operand.vmem [shape: f32[512,128], index: 2, kind: output, shape index: {}]  }
   0x1   :  { %s1019_s11 = smov 0  }
   0x2 LB: > { %s31_s12 = sadd.s32 1, %s994_s10  ;;  %p808_p0 = scmp.ge.s32.totalorder %s998_s11, 1  ;;  %s998_s11 = sphi %s1019_s11, %s12_s11   ;;  %s994_s10 = sphi %s1017_s10, %s1132_s10   ;;  %s990_s9 = sphi %s1015_s9, %s1131_s9  }
   0x3   : > { %p33_p1 = scmp.ge.s32.totalorder %s31_s12, 2  ;;  %p155_p2 = scmp.lt.s32.totalorder %s998_s11, 3 }
   0x5   : > { %s1134_s12 = smov (%p33_p1, %s31_s12), 0  ;;  %p156_p3 = pnand %p808_p0, %p155_p2 }
   0x6   : > { %v952_v0 = vld [vmem:[%s1129_s1] sm:$0xff] (!%p156_p3)   ;;  %s809_s15 = sshll.u32 (!%p156_p3), %s990_s9, 5  ;;  %v953_v1 = vld [vmem:[%s1129_s1 + $0x8] sm:$0xff] (!%p156_p3)   ;;  %v954_v2 = vld [vmem:[%s1129_s1 + $0x10] sm:$0xff] (!%p156_p3)  }
   0x7   : > { %159 = sbr.rel (%p156_p3) target bundleno = 279 (0x117), region = 28  ;;  %p192_p4 = scmp.lt.s32.totalorder (!%p156_p3), %s809_s15, 63  ;;  %863 = vmatprep.subr.bf16.mxu0 (!%p156_p3), %v952_v0  ;;  %911 = vmatprep.subr.bf16.mxu1 (!%p156_p3), %v952_v0  ;;  %v955_v3 = vld [vmem:[%s1129_s1 + $0x18] sm:$0xff] (!%p156_p3)   ;;  %v956_v6 = vld [vmem:[%s1129_s1 + $0x20] sm:$0xff] (!%p156_p3)   ;;  %v957_v7 = vld [vmem:[%s1129_s1 + $0x28] sm:$0xff] (!%p156_p3)  }
   0x8   : > { %864 = vmatpush3.bf16.msra.mxu0 (!%p156_p3), %v952_v0  ;;  %919 = vmatpush3.bf16.msra.mxu1 (!%p156_p3), %v952_v0  ;;  %v958_v8 = vld [vmem:[%s1129_s1 + $0x30] sm:$0xff] (!%p156_p3)   ;;  %v959_v9 = vld [vmem:[%s1129_s1 + $0x38] sm:$0xff] (!%p156_p3)  }
   0x9   : > { %865 = vmatprep.subr.bf16.mxu0 (!%p156_p3), %v953_v1  ;;  %912 = vmatprep.subr.bf16.mxu1 (!%p156_p3), %v953_v1 }
   0xc   : > { %866 = vmatpush3.bf16.msra.mxu0 (!%p156_p3), %v953_v1  ;;  %920 = vmatpush3.bf16.msra.mxu1 (!%p156_p3), %v953_v1 }
   0xd   : > { %867 = vmatprep.subr.bf16.mxu0 (!%p156_p3), %v954_v2  ;;  %913 = vmatprep.subr.bf16.mxu1 (!%p156_p3), %v954_v2 }
   0xe   : > { %s1136_s15 = smov (!%p192_p4, %s809_s15), 63 }
   0xf   : > { %s810_s20 = sshll.u32 %s1136_s15, 2  ;;  %s812_s6 = sshll.u32 %s1136_s15, 3 }
  0x10   : > { %s1048_s23 = scalar_lea.vmem %s1128_s0, %s810_s20  ;;  %868 = vmatpush3.bf16.msra.mxu0 %v954_v2  ;;  %921 = vmatpush3.bf16.msra.mxu1 %v954_v2  ;;  %s1085_s9 = scalar_lea.vmem %s1130_s2, %s812_s6 }
  0x11   : > { %v960_v4 = vld [vmem:[%s1048_s23] sm:$0xff]   ;;  %869 = vmatprep.subr.bf16.mxu0 %v955_v3  ;;  %914 = vmatprep.subr.bf16.mxu1 %v955_v3  ;;  %v962_v10 = vld [vmem:[%s1048_s23 + $0x8] sm:$0xff]   ;;  %v964_v12 = vld [vmem:[%s1048_s23 + $0x10] sm:$0xff]  }
  0x12   : > { %v961_v5 = vld [vmem:[%s1048_s23 + $0x40] sm:$0xff]   ;;  %879 = vmatprep.mubr.bf16.mxu0 %v960_v4  ;;  %v963_v11 = vld [vmem:[%s1048_s23 + $0x48] sm:$0xff]   ;;  %v965_v13 = vld [vmem:[%s1048_s23 + $0x50] sm:$0xff]  }
  0x13   : > { %895 = vmatprep.mubr.bf16.mxu1 %v961_v5  ;;  %v966_v14 = vld [vmem:[%s1048_s23 + $0x18] sm:$0xff]   ;;  %v968_v16 = vld [vmem:[%s1048_s23 + $0x20] sm:$0xff]   ;;  %v970_v18 = vld [vmem:[%s1048_s23 + $0x28] sm:$0xff]  }
  0x14   : > { %870 = vmatpush3.bf16.msra.mxu0 %v955_v3  ;;  %922 = vmatpush3.bf16.msra.mxu1 %v955_v3  ;;  %v967_v15 = vld [vmem:[%s1048_s23 + $0x58] sm:$0xff]   ;;  %v969_v17 = vld [vmem:[%s1048_s23 + $0x60] sm:$0xff]   ;;  %v971_v19 = vld [vmem:[%s1048_s23 + $0x68] sm:$0xff]  }
  0x15   : > { %871 = vmatprep.subr.bf16.mxu0 %v956_v6  ;;  %915 = vmatprep.subr.bf16.mxu1 %v956_v6  ;;  %v972_v20 = vld [vmem:[%s1048_s23 + $0x30] sm:$0xff]   ;;  %v974_v22 = vld [vmem:[%s1048_s23 + $0x38] sm:$0xff]  }
  0x16   : > { %v973_v21 = vld [vmem:[%s1048_s23 + $0x70] sm:$0xff]   ;;  %v975_v23 = vld [vmem:[%s1048_s23 + $0x78] sm:$0xff]  }
  0x18   : > { %872 = vmatpush3.bf16.msra.mxu0 %v956_v6  ;;  %923 = vmatpush3.bf16.msra.mxu1 %v956_v6 }
  0x19   : > { %873 = vmatprep.subr.bf16.mxu0 %v957_v7  ;;  %916 = vmatprep.subr.bf16.mxu1 %v957_v7 }
  0x1c   : > { %874 = vmatpush3.bf16.msra.mxu0 %v957_v7  ;;  %924 = vmatpush3.bf16.msra.mxu1 %v957_v7 }
  0x1d   : > { %875 = vmatprep.subr.bf16.mxu0 %v958_v8  ;;  %917 = vmatprep.subr.bf16.mxu1 %v958_v8 }
  0x20   : > { %876 = vmatpush3.bf16.msra.mxu0 %v958_v8  ;;  %925 = vmatpush3.bf16.msra.mxu1 %v958_v8 }
  0x21   : > { %877 = vmatprep.subr.bf16.mxu0 %v959_v9  ;;  %918 = vmatprep.subr.bf16.mxu1 %v959_v9 }
  0x24   : > { %878 = vmatpush3.bf16.msra.mxu0 %v959_v9  ;;  %926 = vmatpush3.bf16.msra.mxu1 %v959_v9 }
  0x27   : > { %880 = vmatmul.mubr.bf16.vlgmr.msra.gmra.mrb[0].mxu0 %v962_v10  ;;  %896 = vmatmul.mubr.bf16.vlgmr.msra.gmra.mrb[0].mxu1 %v963_v11 }
  0x28   : > { %883 = vmatprep.mubr.bf16.mxu0 %v964_v12  ;;  %899 = vmatprep.mubr.bf16.mxu1 %v965_v13 }
  0x2f   : > { %884 = vmatmul.mubr.bf16.gmra.mrb[4].mxu0 %v966_v14  ;;  %900 = vmatmul.mubr.bf16.gmra.mrb[4].mxu1 %v967_v15 }
  0x30   : > { %887 = vmatprep.mubr.bf16.mxu0 %v968_v16  ;;  %903 = vmatprep.mubr.bf16.mxu1 %v969_v17 }
  0x37   : > { %888 = vmatmul.mubr.bf16.gmra.mrb[8].mxu0 %v970_v18  ;;  %904 = vmatmul.mubr.bf16.gmra.mrb[8].mxu1 %v971_v19 }
  0x38   : > { %891 = vmatprep.mubr.bf16.mxu0 %v972_v20  ;;  %907 = vmatprep.mubr.bf16.mxu1 %v973_v21 }
  0x3f   : > { %892 = vmatmul.mubr.bf16.gmra.mrb[12].mxu0 %v974_v22  ;;  %908 = vmatmul.mubr.bf16.gmra.mrb[12].mxu1 %v975_v23 }
  0xfa   : > { %v881_v24 = vpop.f32.mrb[0].mxu0  ;;  %v897_v25 = vpop.f32.mrb[0].mxu1 }
  0xfb   : > { %v513_v26 = vpop.f32.mrb[1].mxu0  ;;  %v577_v27 = vpop.f32.mrb[1].mxu1  ;;  %674 = vst [vmem:[%s1085_s9 + $0x10] sm:$0xff] %v881_v24  ;;  %690 = vst [vmem:[%s1085_s9 + $0x90] sm:$0xff] %v897_v25 }
  0xfc   : > { %v882_v28 = vpop.f32.mrb[2].mxu0  ;;  %v898_v29 = vpop.f32.mrb[2].mxu1  ;;  %672 = vst [vmem:[%s1085_s9] sm:$0xff] %v513_v26  ;;  %688 = vst [vmem:[%s1085_s9 + $0x80] sm:$0xff] %v577_v27 }
  0xfd   : > { %v516_v30 = vpop.f32.mrb[3].mxu0  ;;  %v580_v31 = vpop.f32.mrb[3].mxu1  ;;  %675 = vst [vmem:[%s1085_s9 + $0x18] sm:$0xff] %v882_v28  ;;  %691 = vst [vmem:[%s1085_s9 + $0x98] sm:$0xff] %v898_v29 }
  0xfe   : > { %673 = vst [vmem:[%s1085_s9 + $0x8] sm:$0xff] %v516_v30  ;;  %689 = vst [vmem:[%s1085_s9 + $0x88] sm:$0xff] %v580_v31 }
 0x102   : > { %v885_v32 = vpop.f32.mrb[4].mxu0  ;;  %v901_v33 = vpop.f32.mrb[4].mxu1 }
 0x103   : > { %v529_v34 = vpop.f32.mrb[5].mxu0  ;;  %v593_v35 = vpop.f32.mrb[5].mxu1  ;;  %678 = vst [vmem:[%s1085_s9 + $0x30] sm:$0xff] %v885_v32  ;;  %694 = vst [vmem:[%s1085_s9 + $0xb0] sm:$0xff] %v901_v33 }
 0x104   : > { %v886_v36 = vpop.f32.mrb[6].mxu0  ;;  %v902_v37 = vpop.f32.mrb[6].mxu1  ;;  %676 = vst [vmem:[%s1085_s9 + $0x20] sm:$0xff] %v529_v34  ;;  %692 = vst [vmem:[%s1085_s9 + $0xa0] sm:$0xff] %v593_v35 }
 0x105   : > { %v532_v38 = vpop.f32.mrb[7].mxu0  ;;  %v596_v39 = vpop.f32.mrb[7].mxu1  ;;  %679 = vst [vmem:[%s1085_s9 + $0x38] sm:$0xff] %v886_v36  ;;  %695 = vst [vmem:[%s1085_s9 + $0xb8] sm:$0xff] %v902_v37 }
 0x106   : > { %677 = vst [vmem:[%s1085_s9 + $0x28] sm:$0xff] %v532_v38  ;;  %693 = vst [vmem:[%s1085_s9 + $0xa8] sm:$0xff] %v596_v39 }
 0x10a   : > { %v889_v40 = vpop.f32.mrb[8].mxu0  ;;  %v905_v41 = vpop.f32.mrb[8].mxu1 }
 0x10b   : > { %v545_v42 = vpop.f32.mrb[9].mxu0  ;;  %v609_v43 = vpop.f32.mrb[9].mxu1  ;;  %682 = vst [vmem:[%s1085_s9 + $0x50] sm:$0xff] %v889_v40  ;;  %698 = vst [vmem:[%s1085_s9 + $0xd0] sm:$0xff] %v905_v41 }
 0x10c   : > { %v890_v44 = vpop.f32.mrb[10].mxu0  ;;  %v906_v45 = vpop.f32.mrb[10].mxu1  ;;  %680 = vst [vmem:[%s1085_s9 + $0x40] sm:$0xff] %v545_v42  ;;  %696 = vst [vmem:[%s1085_s9 + $0xc0] sm:$0xff] %v609_v43 }
 0x10d   : > { %v548_v46 = vpop.f32.mrb[11].mxu0  ;;  %v612_v47 = vpop.f32.mrb[11].mxu1  ;;  %683 = vst [vmem:[%s1085_s9 + $0x58] sm:$0xff] %v890_v44  ;;  %699 = vst [vmem:[%s1085_s9 + $0xd8] sm:$0xff] %v906_v45 }
 0x10e   : > { %681 = vst [vmem:[%s1085_s9 + $0x48] sm:$0xff] %v548_v46  ;;  %697 = vst [vmem:[%s1085_s9 + $0xc8] sm:$0xff] %v612_v47 }
 0x112   : > { %v893_v48 = vpop.f32.mrb[12].mxu0  ;;  %v909_v49 = vpop.f32.mrb[12].mxu1 }
 0x113   : > { %v561_v50 = vpop.f32.mrb[13].mxu0  ;;  %v625_v51 = vpop.f32.mrb[13].mxu1  ;;  %686 = vst [vmem:[%s1085_s9 + $0x70] sm:$0xff] %v893_v48  ;;  %702 = vst [vmem:[%s1085_s9 + $0xf0] sm:$0xff] %v909_v49 }
 0x114   : > { %v894_v52 = vpop.f32.mrb[14].mxu0  ;;  %v910_v53 = vpop.f32.mrb[14].mxu1  ;;  %684 = vst [vmem:[%s1085_s9 + $0x60] sm:$0xff] %v561_v50  ;;  %700 = vst [vmem:[%s1085_s9 + $0xe0] sm:$0xff] %v625_v51 }
 0x115   : > { %v564_v54 = vpop.f32.mrb[15].mxu0  ;;  %v628_v55 = vpop.f32.mrb[15].mxu1  ;;  %687 = vst [vmem:[%s1085_s9 + $0x78] sm:$0xff] %v894_v52  ;;  %703 = vst [vmem:[%s1085_s9 + $0xf8] sm:$0xff] %v910_v53 }
 0x116   : > { %685 = vst [vmem:[%s1085_s9 + $0x68] sm:$0xff] %v564_v54  ;;  %701 = vst [vmem:[%s1085_s9 + $0xe8] sm:$0xff] %v628_v55 }
 0x117 PF: > { %s12_s11 = sadd.s32 1, %s998_s11   ;;  %s1131_s9 = smov %s994_s10 }
 0x118   : > { %p9_p5 = scmp.ge.s32.totalorder %s12_s11, 4   ;;  %s1132_s10 = smov %s1134_s12 }
 0x11a   :  { %11 = sbr.rel (!%p9_p5) target bundleno = 2 (0x2), region = 65 }

// kernel: forward.54
= control target key start
LH: loop header
LB: loop body
LE: loop exit
PB: predicated region body
PF: predicated region fallthrough
CT: control target
= control target key end

     0   :  { %v176_v0 = vmov 0.0   ;;  %vm177_vm0 = vmmov 0   ;;  %s223_s1 = inlined_call_operand.vmem [shape: bf16[128,128], index: 1, kind: input, shape index: {}]   ;;  %s224_s0 = inlined_call_operand.vmem [shape: bf16[8,128], index: 0, kind: input, shape index: {}]   ;;  %s225_s2 = inlined_call_operand.vmem [shape: f32[8,128], index: 2, kind: output, shape index: {}]  }
   0x1   :  { %146 = vmatprep.subr.bf16.mxu0 %v176_v0  ;;  %v168_v1 = vld [vmem:[%s223_s1] sm:$0xff]   ;;  %162 = vmatprep.mubr.msk.bf16.mxu0 %vm177_vm0, %v176_v0  ;;  %v169_v2 = vld [vmem:[%s223_s1 + $0x8] sm:$0xff]   ;;  %v170_v3 = vld [vmem:[%s223_s1 + $0x10] sm:$0xff]  }
   0x2   :  { %147 = vmatpush3.bf16.msra.mxu0 %v168_v1  ;;  %v171_v4 = vld [vmem:[%s223_s1 + $0x18] sm:$0xff]   ;;  %v172_v5 = vld [vmem:[%s223_s1 + $0x20] sm:$0xff]   ;;  %v173_v6 = vld [vmem:[%s223_s1 + $0x28] sm:$0xff]  }
   0x3   :  { %148 = vmatprep.subr.bf16.mxu0 %v176_v0  ;;  %v174_v7 = vld [vmem:[%s223_s1 + $0x30] sm:$0xff]   ;;  %v175_v8 = vld [vmem:[%s223_s1 + $0x38] sm:$0xff]   ;;  %v18_v9 = vld [vmem:[%s224_s0] sm:$0xf] }
   0x6   :  { %149 = vmatpush3.bf16.msra.mxu0 %v169_v2 }
   0x7   :  { %150 = vmatprep.subr.bf16.mxu0 %v176_v0 }
   0xa   :  { %151 = vmatpush3.bf16.msra.mxu0 %v170_v3 }
   0xb   :  { %152 = vmatprep.subr.bf16.mxu0 %v176_v0 }
   0xe   :  { %153 = vmatpush3.bf16.msra.mxu0 %v171_v4 }
   0xf   :  { %154 = vmatprep.subr.bf16.mxu0 %v176_v0 }
  0x12   :  { %155 = vmatpush3.bf16.msra.mxu0 %v172_v5 }
  0x13   :  { %156 = vmatprep.subr.bf16.mxu0 %v176_v0 }
  0x16   :  { %157 = vmatpush3.bf16.msra.mxu0 %v173_v6 }
  0x17   :  { %158 = vmatprep.subr.bf16.mxu0 %v176_v0 }
  0x1a   :  { %159 = vmatpush3.bf16.msra.mxu0 %v174_v7 }
  0x1b   :  { %160 = vmatprep.subr.bf16.mxu0 %v176_v0 }
  0x1e   :  { %161 = vmatpush3.bf16.msra.mxu0 %v175_v8 }
  0x21   :  { %163 = vmatmul.mubr.bf16.vlgmr.msra.gmra.mrb[0].mxu0 %v18_v9 }
  0xf4   :  { %v117_v10 = vpop.f32.mrb[0].mxu0 }
  0xf5   :  { %v164_v11 = vpop.f32.mrb[1].mxu0  ;;  %124 = vst [vmem:[%s225_s2] sm:$0xff] %v117_v10 }
  0xf6   :  { %v120_v12 = vpop.f32.mrb[2].mxu0 }
  0xf7   :  { %v165_v13 = vpop.f32.mrb[3].mxu0 }

// kernel: forward.60
= control target key start
LH: loop header
LB: loop body
LE: loop exit
PB: predicated region body
PF: predicated region fallthrough
CT: control target
= control target key end

     0   :  { %s640_s6 = smov 0   ;;  %s642_s7 = smov 0   ;;  %s1200_s0 = inlined_call_operand.vmem [shape: f32[2,256,64], index: 0, kind: input, shape index: {}]   ;;  %s1201_s1 = inlined_call_operand.vmem [shape: f32[2,256,64], index: 1, kind: output, shape index: {}]  }
   0x1   :  { %s644_s8 = smov 0  }
   0x2 LB: > { %s23_s9 = sadd.s32 1, %s624_s7  ;;  %p571_p0 = scmp.ge.s32.totalorder %s628_s8, 1  ;;  %s628_s8 = sphi %s644_s8, %s11_s8   ;;  %s624_s7 = sphi %s642_s7, %s1203_s7   ;;  %s620_s6 = sphi %s640_s6, %s1202_s6  }
   0x3   : > { %p25_p1 = scmp.ge.s32.totalorder %s23_s9, 2  ;;  %p106_p2 = scmp.lt.s32.totalorder %s628_s8, 3 }
   0x5   : > { %s1205_s9 = smov (%p25_p1, %s23_s9), 0  ;;  %p107_p3 = pnand %p571_p0, %p106_p2 }
   0x6   : > { %p132_p4 = scmp.lt.s32.totalorder (!%p107_p3), %s620_s6, 1  ;;  %vm180_vm0 = vcmask (!%p107_p3), 523264  }
   0x7   : > { %110 = sbr.rel (%p107_p3) target bundleno = 210 (0xd2), region = 24 }
   0xe   : > { %s1207_s6 = smov (!%p132_p4, %s620_s6), 1 }
   0xf   : > { %s578_s10 = sshll.u32 %s1207_s6, 8 }
  0x10   : > { %s666_s13 = scalar_lea.vmem %s1200_s0, %s578_s10  ;;  %s1069_s16 = scalar_lea.vmem %s1201_s1, %s578_s10 }
  0x11   : > { %v669_v0 = vld [vmem:[%s666_s13] sm:$0xff]  ;;  %v672_v1 = vld [vmem:[%s666_s13 + $0x8] sm:$0xff]  ;;  %v675_v2 = vld [vmem:[%s666_s13 + $0x10] sm:$0xff] }
  0x12   : > { %v678_v3 = vld [vmem:[%s666_s13 + $0x18] sm:$0xff]  ;;  %v181_v4 = vsel %vm180_vm0, %v669_v0, 0.0  ;;  %v182_v5 = vsel %vm180_vm0, %v672_v1, 0.0  ;;  %v184_v6 = vsel %vm180_vm0, %v675_v2, 0.0  ;;  %v687_v7 = vld [vmem:[%s666_s13 + $0x20] sm:$0xff]  ;;  %v692_v10 = vld [vmem:[%s666_s13 + $0x28] sm:$0xff] }
  0x13   : > { %v183_v8 = vadd.f32 %v182_v5, %v181_v4  ;;  %v186_v9 = vsel %vm180_vm0, %v678_v3, 0.0  ;;  %v188_v12 = vsel %vm180_vm0, %v687_v7, 0.0  ;;  %v697_v13 = vld [vmem:[%s666_s13 + $0x30] sm:$0xff]  ;;  %v190_v15 = vsel %vm180_vm0, %v692_v10, 0.0  ;;  %v702_v16 = vld [vmem:[%s666_s13 + $0x38] sm:$0xff]  ;;  %v707_v19 = vld [vmem:[%s666_s13 + $0x40] sm:$0xff] }
  0x14   : > { %v192_v18 = vsel %vm180_vm0, %v697_v13, 0.0  ;;  %v194_v21 = vsel %vm180_vm0, %v702_v16, 0.0  ;;  %v712_v22 = vld [vmem:[%s666_s13 + $0x48] sm:$0xff]  ;;  %v196_v24 = vsel %vm180_vm0, %v707_v19, 0.0  ;;  %v717_v25 = vld [vmem:[%s666_s13 + $0x50] sm:$0xff]  ;;  %v722_v28 = vld [vmem:[%s666_s13 + $0x58] sm:$0xff] }
  0x15   : > { %v185_v11 = vadd.f32 %v184_v6, %v183_v8  ;;  %v198_v27 = vsel %vm180_vm0, %v712_v22, 0.0  ;;  %v200_v30 = vsel %vm180_vm0, %v717_v25, 0.0  ;;  %v727_v31 = vld [vmem:[%s666_s13 + $0x60] sm:$0xff]  ;;  %v202_v33 = vsel %vm180_vm0, %v722_v28, 0.0  ;;  %v732_v34 = vld [vmem:[%s666_s13 + $0x68] sm:$0xff]  ;;  %v737_v37 = vld [vmem:[%s666_s13 + $0x70] sm:$0xff] }
  0x16   : > { %v204_v36 = vsel %vm180_vm0, %v727_v31, 0.0  ;;  %v206_v39 = vsel %vm180_vm0, %v732_v34, 0.0  ;;  %v742_v40 = vld [vmem:[%s666_s13 + $0x78] sm:$0xff]  ;;  %v208_v42 = vsel %vm180_vm0, %v737_v37, 0.0  ;;  %v747_v43 = vld [vmem:[%s666_s13 + $0x80] sm:$0xff]  ;;  %v752_v46 = vld [vmem:[%s666_s13 + $0x88] sm:$0xff] }
  0x17   : > { %v187_v14 = vadd.f32 %v186_v9, %v185_v11  ;;  %v210_v45 = vsel %vm180_vm0, %v742_v40, 0.0  ;;  %v212_v48 = vsel %vm180_vm0, %v747_v43, 0.0  ;;  %v757_v49 = vld [vmem:[%s666_s13 + $0x90] sm:$0xff]  ;;  %v214_v51 = vsel %vm180_vm0, %v752_v46, 0.0  ;;  %v762_v52 = vld [vmem:[%s666_s13 + $0x98] sm:$0xff]  ;;  %v767_v55 = vld [vmem:[%s666_s13 + $0xa0] sm:$0xff] }
  0x18   : > { %v216_v54 = vsel %vm180_vm0, %v757_v49, 0.0  ;;  %v218_v57 = vsel %vm180_vm0, %v762_v52, 0.0  ;;  %v772_v58 = vld [vmem:[%s666_s13 + $0xa8] sm:$0xff]  ;;  %v220_v60 = vsel %vm180_vm0, %v767_v55, 0.0  ;;  %v777_v61 = vld [vmem:[%s666_s13 + $0xb0] sm:$0xff]  ;;  %v782_v4 = vld [vmem:[%s666_s13 + $0xb8] sm:$0xff] }
  0x19   : > { %v189_v17 = vadd.f32 %v188_v12, %v187_v14  ;;  %v222_v63 = vsel %vm180_vm0, %v772_v58, 0.0  ;;  %v224_v6 = vsel %vm180_vm0, %v777_v61, 0.0  ;;  %v787_v8 = vld [vmem:[%s666_s13 + $0xc0] sm:$0xff]  ;;  %v226_v11 = vsel %vm180_vm0, %v782_v4, 0.0  ;;  %v792_v12 = vld [vmem:[%s666_s13 + $0xc8] sm:$0xff] }
  0x1b   : > { %v191_v20 = vadd.f32 %v190_v15, %v189_v17  ;;  %v228_v15 = vsel %vm180_vm0, %v787_v8, 0.0  ;;  %v797_v17 = vld [vmem:[%s666_s13 + $0xd0] sm:$0xff] }
  0x1d   : > { %v193_v23 = vadd.f32 %v192_v18, %v191_v20  ;;  %v230_v20 = vsel %vm180_vm0, %v792_v12, 0.0 }
  0x1f   : > { %v195_v26 = vadd.f32 %v194_v21, %v193_v23  ;;  %v802_v21 = vld [vmem:[%s666_s13 + $0xd8] sm:$0xff] }
  0x21   : > { %v197_v29 = vadd.f32 %v196_v24, %v195_v26  ;;  %v232_v24 = vsel %vm180_vm0, %v797_v17, 0.0  ;;  %v807_v26 = vld [vmem:[%s666_s13 + $0xe0] sm:$0xff] }
  0x23   : > { %v199_v32 = vadd.f32 %v198_v27, %v197_v29  ;;  %v234_v29 = vsel %vm180_vm0, %v802_v21, 0.0 }
  0x25   : > { %v201_v35 = vadd.f32 %v200_v30, %v199_v32  ;;  %v812_v30 = vld [vmem:[%s666_s13 + $0xe8] sm:$0xff] }
  0x27   : > { %v203_v38 = vadd.f32 %v202_v33, %v201_v35  ;;  %v236_v33 = vsel %vm180_vm0, %v807_v26, 0.0  ;;  %v817_v35 = vld [vmem:[%s666_s13 + $0xf0] sm:$0xff] }
  0x29   : > { %v205_v41 = vadd.f32 %v204_v36, %v203_v38  ;;  %v238_v38 = vsel %vm180_vm0, %v812_v30, 0.0 }
  0x2b   : > { %v207_v44 = vadd.f32 %v206_v39, %v205_v41  ;;  %v822_v39 = vld [vmem:[%s666_s13 + $0xf8] sm:$0xff] }
  0x2d   : > { %v209_v47 = vadd.f32 %v208_v42, %v207_v44  ;;  %v240_v42 = vsel %vm180_vm0, %v817_v35, 0.0 }
  0x2f   : > { %v211_v50 = vadd.f32 %v210_v45, %v209_v47  ;;  %v242_v45 = vsel %vm180_vm0, %v822_v39, 0.0 }
  0x31   : > { %v213_v53 = vadd.f32 %v212_v48, %v211_v50 }
  0x33   : > { %v215_v56 = vadd.f32 %v214_v51, %v213_v53 }
  0x35   : > { %v217_v59 = vadd.f32 %v216_v54, %v215_v56 }
  0x37   : > { %v219_v62 = vadd.f32 %v218_v57, %v217_v59 }
  0x39   : > { %v221_v5 = vadd.f32 %v220_v60, %v219_v62 }
  0x3b   : > { %v223_v9 = vadd.f32 %v222_v63, %v221_v5 }
  0x3d   : > { %v225_v14 = vadd.f32 %v224_v6, %v223_v9 }
  0x3f   : > { %v227_v18 = vadd.f32 %v226_v11, %v225_v14 }
  0x41   : > { %v229_v23 = vadd.f32 %v228_v15, %v227_v18 }
  0x43   : > { %v231_v27 = vadd.f32 %v230_v20, %v229_v23 }
  0x45   : > { %v233_v32 = vadd.f32 %v232_v24, %v231_v27 }
  0x47   : > { %v235_v36 = vadd.f32 %v234_v29, %v233_v32 }
  0x49   : > { %v237_v41 = vadd.f32 %v236_v33, %v235_v36 }
  0x4b   : > { %v239_v44 = vadd.f32 %v238_v38, %v237_v41 }
  0x4d   : > { %v241_v47 = vadd.f32 %v240_v42, %v239_v44 }
  0x4f   : > { %v243_v48 = vadd.f32 %v242_v45, %v241_v47 }
  0x51   : > { %v244_v50 = vrot.slane %v243_v48, 4 }
  0x53   : > { %v245_v51 = vadd.f32 %v244_v50, %v243_v48 }
  0x55   : > { %v246_v53 = vrot.slane %v245_v51, 2 }
  0x57   : > { %v247_v54 = vadd.f32 %v246_v53, %v245_v51 }
  0x59   : > { %v248_v56 = vrot.slane %v247_v54, 1 }
  0x5b   : > { %v249_v57 = vadd.f32 %v248_v56, %v247_v54 }
  0x5d   : > { %v828_v59 = vmul.f32 0.00390625, %v249_v57 }
  0x5f   : > { %v832_v60 = vsub.f32 %v669_v0, %v828_v59  ;;  %v836_v62 = vsub.f32 %v672_v1, %v828_v59  ;;  %v840_v63 = vsub.f32 %v675_v2, %v828_v59  ;;  %v844_v5 = vsub.f32 %v678_v3, %v828_v59 }
  0x60   : > { %v848_v6 = vsub.f32 %v687_v7, %v828_v59  ;;  %v858_v2 = vsub.f32 %v692_v10, %v828_v59  ;;  %v864_v7 = vsub.f32 %v697_v13, %v828_v59  ;;  %v873_v10 = vsub.f32 %v702_v16, %v828_v59 }
  0x61   : > { %v284_v0 = vmul.f32 %v832_v60, %v832_v60  ;;  %v285_v9 = vmul.f32 %v836_v62, %v836_v62  ;;  %v286_v1 = vmul.f32 %v840_v63, %v840_v63  ;;  %v287_v3 = vmul.f32 %v844_v5, %v844_v5 }
  0x62   : > { %v288_v11 = vmul.f32 %v848_v6, %v848_v6  ;;  %v289_v23 = vmul.f32 %v858_v2, %v858_v2  ;;  %v880_v27 = vsub.f32 %v707_v19, %v828_v59  ;;  %v290_v29 = vmul.f32 %v864_v7, %v864_v7 }
  0x63   : > { %v316_v14 = vsel %vm180_vm0, %v284_v0, 0.0  ;;  %v317_v15 = vsel %vm180_vm0, %v285_v9, 0.0  ;;  %v319_v18 = vsel %vm180_vm0, %v286_v1, 0.0  ;;  %v321_v13 = vsel %vm180_vm0, %v287_v3, 0.0 }
  0x64   : > { %v318_v20 = vadd.f32 %v317_v15, %v316_v14  ;;  %v323_v32 = vsel %vm180_vm0, %v288_v11, 0.0  ;;  %v887_v16 = vsub.f32 %v712_v22, %v828_v59  ;;  %v291_v36 = vmul.f32 %v873_v10, %v873_v10 }
  0x65   : > { %v325_v38 = vsel %vm180_vm0, %v289_v23, 0.0  ;;  %v894_v19 = vsub.f32 %v717_v25, %v828_v59  ;;  %v292_v42 = vmul.f32 %v880_v27, %v880_v27  ;;  %v327_v44 = vsel %vm180_vm0, %v290_v29, 0.0 }
  0x66   : > { %v320_v24 = vadd.f32 %v319_v18, %v318_v20  ;;  %v901_v22 = vsub.f32 %v722_v28, %v828_v59  ;;  %v293_v47 = vmul.f32 %v887_v16, %v887_v16  ;;  %v329_v48 = vsel %vm180_vm0, %v291_v36, 0.0 }
  0x67   : > { %v908_v25 = vsub.f32 %v727_v31, %v828_v59  ;;  %v294_v51 = vmul.f32 %v894_v19, %v894_v19  ;;  %v331_v53 = vsel %vm180_vm0, %v292_v42, 0.0  ;;  %v915_v28 = vsub.f32 %v732_v34, %v828_v59 }
  0x68   : > { %v322_v33 = vadd.f32 %v321_v13, %v320_v24  ;;  %v295_v56 = vmul.f32 %v901_v22, %v901_v22  ;;  %v333_v57 = vsel %vm180_vm0, %v293_v47, 0.0  ;;  %v922_v31 = vsub.f32 %v737_v37, %v828_v59 }
  0x69   : > { %v296_v9 = vmul.f32 %v908_v25, %v908_v25  ;;  %v335_v1 = vsel %vm180_vm0, %v294_v51, 0.0  ;;  %v929_v34 = vsub.f32 %v742_v40, %v828_v59  ;;  %v297_v11 = vmul.f32 %v915_v28, %v915_v28 }
  0x6a   : > { %v324_v41 = vadd.f32 %v323_v32, %v322_v33  ;;  %v337_v14 = vsel %vm180_vm0, %v295_v56, 0.0  ;;  %v936_v37 = vsub.f32 %v747_v43, %v828_v59  ;;  %v298_v18 = vmul.f32 %v922_v31, %v922_v31 }
  0x6b   : > { %v339_v20 = vsel %vm180_vm0, %v296_v9, 0.0  ;;  %v943_v40 = vsub.f32 %v752_v46, %v828_v59  ;;  %v299_v13 = vmul.f32 %v929_v34, %v929_v34  ;;  %v341_v24 = vsel %vm180_vm0, %v297_v11, 0.0 }
  0x6c   : > { %v326_v45 = vadd.f32 %v325_v38, %v324_v41  ;;  %v950_v43 = vsub.f32 %v757_v49, %v828_v59  ;;  %v300_v32 = vmul.f32 %v936_v37, %v936_v37  ;;  %v343_v33 = vsel %vm180_vm0, %v298_v18, 0.0 }
  0x6d   : > { %v957_v46 = vsub.f32 %v762_v52, %v828_v59  ;;  %v301_v38 = vmul.f32 %v943_v40, %v943_v40  ;;  %v345_v41 = vsel %vm180_vm0, %v299_v13, 0.0  ;;  %v964_v49 = vsub.f32 %v767_v55, %v828_v59 }
  0x6e   : > { %v328_v50 = vadd.f32 %v327_v44, %v326_v45  ;;  %v302_v44 = vmul.f32 %v950_v43, %v950_v43  ;;  %v347_v45 = vsel %vm180_vm0, %v300_v32, 0.0  ;;  %v971_v52 = vsub.f32 %v772_v58, %v828_v59 }
  0x6f   : > { %v978_v55 = vsub.f32 %v777_v61, %v828_v59  ;;  %v985_v58 = vsub.f32 %v782_v4, %v828_v59  ;;  %v992_v61 = vsub.f32 %v787_v8, %v828_v59  ;;  %v999_v4 = vsub.f32 %v792_v12, %v828_v59 }
  0x70   : > { %v330_v54 = vadd.f32 %v329_v48, %v328_v50  ;;  %v303_v48 = vmul.f32 %v957_v46, %v957_v46  ;;  %v349_v50 = vsel %vm180_vm0, %v301_v38, 0.0  ;;  %v1006_v8 = vsub.f32 %v797_v17, %v828_v59 }
  0x71   : > { %v1013_v12 = vsub.f32 %v802_v21, %v828_v59  ;;  %v1020_v17 = vsub.f32 %v807_v26, %v828_v59  ;;  %v1027_v21 = vsub.f32 %v812_v30, %v828_v59  ;;  %v1034_v26 = vsub.f32 %v817_v35, %v828_v59 }
  0x72   : > { %v332_v0 = vadd.f32 %v331_v53, %v330_v54  ;;  %v304_v53 = vmul.f32 %v964_v49, %v964_v49  ;;  %v351_v54 = vsel %vm180_vm0, %v302_v44, 0.0  ;;  %v1041_v30 = vsub.f32 %v822_v39, %v828_v59 }
  0x73   : > { %v314_v35 = vmul.f32 %v1034_v26, %v1034_v26 }
  0x74   : > { %v334_v3 = vadd.f32 %v333_v57, %v332_v0  ;;  %v305_v57 = vmul.f32 %v971_v52, %v971_v52  ;;  %v353_v0 = vsel %vm180_vm0, %v303_v48, 0.0 }
  0x75   : > { %v375_v39 = vsel %vm180_vm0, %v314_v35, 0.0 }
  0x76   : > { %v336_v15 = vadd.f32 %v335_v1, %v334_v3  ;;  %v306_v1 = vmul.f32 %v978_v55, %v978_v55  ;;  %v355_v3 = vsel %vm180_vm0, %v304_v53, 0.0 }
  0x78   : > { %v338_v23 = vadd.f32 %v337_v14, %v336_v15  ;;  %v307_v14 = vmul.f32 %v985_v58, %v985_v58  ;;  %v357_v15 = vsel %vm180_vm0, %v305_v57, 0.0  ;;  %v315_v57 = vmul.f32 %v1041_v30, %v1041_v30 }
  0x7a   : > { %v340_v29 = vadd.f32 %v339_v20, %v338_v23  ;;  %v308_v20 = vmul.f32 %v992_v61, %v992_v61  ;;  %v359_v23 = vsel %vm180_vm0, %v306_v1, 0.0  ;;  %v377_v1 = vsel %vm180_vm0, %v315_v57, 0.0 }
  0x7c   : > { %v342_v36 = vadd.f32 %v341_v24, %v340_v29  ;;  %v309_v24 = vmul.f32 %v999_v4, %v999_v4  ;;  %v361_v29 = vsel %vm180_vm0, %v307_v14, 0.0 }
  0x7e   : > { %v344_v42 = vadd.f32 %v343_v33, %v342_v36  ;;  %v310_v33 = vmul.f32 %v1006_v8, %v1006_v8  ;;  %v363_v36 = vsel %vm180_vm0, %v308_v20, 0.0 }
  0x80   : > { %v346_v47 = vadd.f32 %v345_v41, %v344_v42  ;;  %v311_v41 = vmul.f32 %v1013_v12, %v1013_v12  ;;  %v365_v42 = vsel %vm180_vm0, %v309_v24, 0.0 }
  0x82   : > { %v348_v51 = vadd.f32 %v347_v45, %v346_v47  ;;  %v312_v45 = vmul.f32 %v1020_v17, %v1020_v17  ;;  %v367_v47 = vsel %vm180_vm0, %v310_v33, 0.0 }
  0x84   : > { %v350_v56 = vadd.f32 %v349_v50, %v348_v51  ;;  %v313_v50 = vmul.f32 %v1027_v21, %v1027_v21  ;;  %v369_v51 = vsel %vm180_vm0, %v311_v41, 0.0 }
  0x86   : > { %v352_v9 = vadd.f32 %v351_v54, %v350_v56  ;;  %v371_v54 = vsel %vm180_vm0, %v312_v45, 0.0 }
  0x88   : > { %v354_v11 = vadd.f32 %v353_v0, %v352_v9  ;;  %v373_v0 = vsel %vm180_vm0, %v313_v50, 0.0 }
  0x8a   : > { %v356_v18 = vadd.f32 %v355_v3, %v354_v11 }
  0x8c   : > { %v358_v13 = vadd.f32 %v357_v15, %v356_v18 }
  0x8e   : > { %v360_v32 = vadd.f32 %v359_v23, %v358_v13 }
  0x90   : > { %v362_v38 = vadd.f32 %v361_v29, %v360_v32 }
  0x92   : > { %v364_v44 = vadd.f32 %v363_v36, %v362_v38 }
  0x94   : > { %v366_v48 = vadd.f32 %v365_v42, %v364_v44 }
  0x96   : > { %v368_v53 = vadd.f32 %v367_v47, %v366_v48 }
  0x98   : > { %v370_v56 = vadd.f32 %v369_v51, %v368_v53 }
  0x9a   : > { %v372_v9 = vadd.f32 %v371_v54, %v370_v56 }
  0x9c   : > { %v374_v59 = vadd.f32 %v373_v0, %v372_v9 }
  0x9e   : > { %v376_v3 = vadd.f32 %v375_v39, %v374_v59 }
  0xa0   : > { %v378_v11 = vadd.f32 %v377_v1, %v376_v3 }
  0xa2   : > { %v379_v14 = vrot.slane %v378_v11, 4 }
  0xa4   : > { %v380_v15 = vadd.f32 %v379_v14, %v378_v11 }
  0xa6   : > { %v381_v18 = vrot.slane %v380_v15, 2 }
  0xa8   : > { %v382_v20 = vadd.f32 %v381_v18, %v380_v15 }
  0xaa   : > { %v383_v23 = vrot.slane %v382_v20, 1 }
  0xac   : > { %v384_v13 = vadd.f32 %v383_v23, %v382_v20 }
  0xae   : > { %v385_v24 = vmul.f32 0.00390625, %v384_v13 }
  0xb0   : > { %v386_v29 = vadd.f32 1e-05, %v385_v24 }
  0xb2   : > { %604 = vrsqrt.f32 %v386_v29 }
  0xbc   : > { %v1054_v32 = vpop.eup %604 }
  0xbd   : > { %v388_v33 = vmul.f32 %v1054_v32, %v832_v60  ;;  %v389_v36 = vmul.f32 %v1054_v32, %v836_v62  ;;  %v390_v38 = vmul.f32 %v1054_v32, %v840_v63  ;;  %v391_v41 = vmul.f32 %v1054_v32, %v844_v5 }
  0xbe   : > { %v392_v60 = vmul.f32 %v1054_v32, %v848_v6  ;;  %v393_v62 = vmul.f32 %v1054_v32, %v858_v2  ;;  %v394_v63 = vmul.f32 %v1054_v32, %v864_v7  ;;  %v395_v5 = vmul.f32 %v1054_v32, %v873_v10 }
  0xbf   : > { %v420_v42 = vmax.f32 %v388_v33, 0.0  ;;  %v421_v44 = vmax.f32 %v389_v36, 0.0  ;;  %v422_v45 = vmax.f32 %v390_v38, 0.0  ;;  %v423_v47 = vmax.f32 %v391_v41, 0.0 }
  0xc0   : > { %v424_v48 = vmax.f32 %v392_v60, 0.0  ;;  %v425_v50 = vmax.f32 %v393_v62, 0.0  ;;  %v426_v6 = vmax.f32 %v394_v63, 0.0  ;;  %v427_v51 = vmax.f32 %v395_v5, 0.0 }
  0xc1   : > { %452 = vst.msk [vmem:[%s1069_s16] sm:$0xff] %vm180_vm0, %v420_v42  ;;  %453 = vst.msk [vmem:[%s1069_s16 + $0x8] sm:$0xff] %vm180_vm0, %v421_v44  ;;  %v396_v2 = vmul.f32 %v1054_v32, %v880_v27  ;;  %v397_v7 = vmul.f32 %v1054_v32, %v887_v16  ;;  %v398_v10 = vmul.f32 %v1054_v32, %v894_v19 }
  0xc2   : > { %454 = vst.msk [vmem:[%s1069_s16 + $0x10] sm:$0xff] %vm180_vm0, %v422_v45  ;;  %455 = vst.msk [vmem:[%s1069_s16 + $0x18] sm:$0xff] %vm180_vm0, %v423_v47  ;;  %v399_v53 = vmul.f32 %v1054_v32, %v901_v22  ;;  %v400_v27 = vmul.f32 %v1054_v32, %v908_v25  ;;  %v401_v16 = vmul.f32 %v1054_v32, %v915_v28 }
  0xc3   : > { %456 = vst.msk [vmem:[%s1069_s16 + $0x20] sm:$0xff] %vm180_vm0, %v424_v48  ;;  %457 = vst.msk [vmem:[%s1069_s16 + $0x28] sm:$0xff] %vm180_vm0, %v425_v50  ;;  %v402_v19 = vmul.f32 %v1054_v32, %v922_v31  ;;  %v403_v22 = vmul.f32 %v1054_v32, %v929_v34  ;;  %v428_v35 = vmax.f32 %v396_v2, 0.0  ;;  %v429_v54 = vmax.f32 %v397_v7, 0.0 }
  0xc4   : > { %458 = vst.msk [vmem:[%s1069_s16 + $0x30] sm:$0xff] %vm180_vm0, %v426_v6  ;;  %459 = vst.msk [vmem:[%s1069_s16 + $0x38] sm:$0xff] %vm180_vm0, %v427_v51  ;;  %v430_v56 = vmax.f32 %v398_v10, 0.0  ;;  %v431_v57 = vmax.f32 %v399_v53, 0.0  ;;  %v432_v0 = vmax.f32 %v400_v27, 0.0  ;;  %v433_v9 = vmax.f32 %v401_v16, 0.0 }
  0xc5   : > { %v434_v25 = vmax.f32 %v402_v19, 0.0  ;;  %v435_v39 = vmax.f32 %v403_v22, 0.0  ;;  %460 = vst.msk [vmem:[%s1069_s16 + $0x40] sm:$0xff] %vm180_vm0, %v428_v35  ;;  %461 = vst.msk [vmem:[%s1069_s16 + $0x48] sm:$0xff] %vm180_vm0, %v429_v54  ;;  %v404_v28 = vmul.f32 %v1054_v32, %v936_v37  ;;  %v405_v31 = vmul.f32 %v1054_v32, %v943_v40 }
  0xc6   : > { %462 = vst.msk [vmem:[%s1069_s16 + $0x50] sm:$0xff] %vm180_vm0, %v430_v56  ;;  %463 = vst.msk [vmem:[%s1069_s16 + $0x58] sm:$0xff] %vm180_vm0, %v431_v57  ;;  %v406_v34 = vmul.f32 %v1054_v32, %v950_v43  ;;  %v407_v59 = vmul.f32 %v1054_v32, %v957_v46  ;;  %v408_v37 = vmul.f32 %v1054_v32, %v964_v49 }
  0xc7   : > { %464 = vst.msk [vmem:[%s1069_s16 + $0x60] sm:$0xff] %vm180_vm0, %v432_v0  ;;  %465 = vst.msk [vmem:[%s1069_s16 + $0x68] sm:$0xff] %vm180_vm0, %v433_v9  ;;  %v409_v40 = vmul.f32 %v1054_v32, %v971_v52  ;;  %v410_v43 = vmul.f32 %v1054_v32, %v978_v55  ;;  %v411_v46 = vmul.f32 %v1054_v32, %v985_v58  ;;  %v436_v1 = vmax.f32 %v404_v28, 0.0 }
  0xc8   : > { %466 = vst.msk [vmem:[%s1069_s16 + $0x70] sm:$0xff] %vm180_vm0, %v434_v25  ;;  %467 = vst.msk [vmem:[%s1069_s16 + $0x78] sm:$0xff] %vm180_vm0, %v435_v39  ;;  %v437_v3 = vmax.f32 %v405_v31, 0.0  ;;  %v438_v11 = vmax.f32 %v406_v34, 0.0  ;;  %v439_v14 = vmax.f32 %v407_v59, 0.0  ;;  %v440_v15 = vmax.f32 %v408_v37, 0.0 }
  0xc9   : > { %v441_v18 = vmax.f32 %v409_v40, 0.0  ;;  %v442_v49 = vmax.f32 %v410_v43, 0.0  ;;  %v443_v20 = vmax.f32 %v411_v46, 0.0  ;;  %468 = vst.msk [vmem:[%s1069_s16 + $0x80] sm:$0xff] %vm180_vm0, %v436_v1  ;;  %v412_v52 = vmul.f32 %v1054_v32, %v992_v61 }
  0xca   : > { %469 = vst.msk [vmem:[%s1069_s16 + $0x88] sm:$0xff] %vm180_vm0, %v437_v3  ;;  %470 = vst.msk [vmem:[%s1069_s16 + $0x90] sm:$0xff] %vm180_vm0, %v438_v11  ;;  %v413_v55 = vmul.f32 %v1054_v32, %v999_v4  ;;  %v414_v58 = vmul.f32 %v1054_v32, %v1006_v8  ;;  %v415_v23 = vmul.f32 %v1054_v32, %v1013_v12 }
  0xcb   : > { %471 = vst.msk [vmem:[%s1069_s16 + $0x98] sm:$0xff] %vm180_vm0, %v439_v14  ;;  %472 = vst.msk [vmem:[%s1069_s16 + $0xa0] sm:$0xff] %vm180_vm0, %v440_v15  ;;  %v416_v61 = vmul.f32 %v1054_v32, %v1020_v17  ;;  %v417_v4 = vmul.f32 %v1054_v32, %v1027_v21  ;;  %v418_v8 = vmul.f32 %v1054_v32, %v1034_v26  ;;  %v444_v13 = vmax.f32 %v412_v52, 0.0 }
  0xcc   : > { %473 = vst.msk [vmem:[%s1069_s16 + $0xa8] sm:$0xff] %vm180_vm0, %v441_v18  ;;  %474 = vst.msk [vmem:[%s1069_s16 + $0xb0] sm:$0xff] %vm180_vm0, %v442_v49  ;;  %v419_v12 = vmul.f32 %v1054_v32, %v1041_v30  ;;  %v445_v24 = vmax.f32 %v413_v55, 0.0  ;;  %v446_v29 = vmax.f32 %v414_v58, 0.0  ;;  %v447_v33 = vmax.f32 %v415_v23, 0.0 }
  0xcd   : > { %475 = vst.msk [vmem:[%s1069_s16 + $0xb8] sm:$0xff] %vm180_vm0, %v443_v20  ;;  %v448_v36 = vmax.f32 %v416_v61, 0.0  ;;  %v449_v38 = vmax.f32 %v417_v4, 0.0  ;;  %v450_v17 = vmax.f32 %v418_v8, 0.0  ;;  %476 = vst.msk [vmem:[%s1069_s16 + $0xc0] sm:$0xff] %vm180_vm0, %v444_v13 }
  0xce   : > { %v451_v41 = vmax.f32 %v419_v12, 0.0  ;;  %477 = vst.msk [vmem:[%s1069_s16 + $0xc8] sm:$0xff] %vm180_vm0, %v445_v24  ;;  %478 = vst.msk [vmem:[%s1069_s16 + $0xd0] sm:$0xff] %vm180_vm0, %v446_v29 }
  0xcf   : > { %479 = vst.msk [vmem:[%s1069_s16 + $0xd8] sm:$0xff] %vm180_vm0, %v447_v33  ;;  %480 = vst.msk [vmem:[%s1069_s16 + $0xe0] sm:$0xff] %vm180_vm0, %v448_v36 }
  0xd0   : > { %481 = vst.msk [vmem:[%s1069_s16 + $0xe8] sm:$0xff] %vm180_vm0, %v449_v38  ;;  %482 = vst.msk [vmem:[%s1069_s16 + $0xf0] sm:$0xff] %vm180_vm0, %v450_v17 }
  0xd1   : > { %483 = vst.msk [vmem:[%s1069_s16 + $0xf8] sm:$0xff] %vm180_vm0, %v451_v41 }
  0xd2 PF: > { %s11_s8 = sadd.s32 1, %s628_s8   ;;  %s1202_s6 = smov %s624_s7 }
  0xd3   : > { %p8_p5 = scmp.ge.s32.totalorder %s11_s8, 4   ;;  %s1203_s7 = smov %s1205_s9 }
  0xd5   :  { %10 = sbr.rel (!%p8_p5) target bundleno = 2 (0x2), region = 54 }

// kernel: forward.59
= control target key start
LH: loop header
LB: loop body
LE: loop exit
PB: predicated region body
PF: predicated region fallthrough
CT: control target
= control target key end

     0   :  { %s1732_s9 = smov 0   ;;  %s1734_s10 = smov 0   ;;  %s1949_s0 = inlined_call_operand.vmem [shape: bf16[512,384], index: 0, kind: input, shape index: {}]   ;;  %s1950_s1 = inlined_call_operand.vmem [shape: bf16[384,128], index: 1, kind: input, shape index: {}]   ;;  %s1951_s2 = inlined_call_operand.vmem [shape: f32[512,128], index: 2, kind: output, shape index: {}]  }
   0x1   :  { %s1736_s11 = smov 0  }
   0x2 LB: > { %s31_s12 = sadd.s32 1, %s1711_s10  ;;  %p1300_p0 = scmp.ge.s32.totalorder %s1715_s11, 1  ;;  %s1715_s11 = sphi %s1736_s11, %s12_s11   ;;  %s1711_s10 = sphi %s1734_s10, %s1953_s10   ;;  %s1707_s9 = sphi %s1732_s9, %s1952_s9  }
   0x3   : > { %p33_p1 = scmp.ge.s32.totalorder %s31_s12, 2  ;;  %p158_p2 = scmp.lt.s32.totalorder %s1715_s11, 3 }
   0x5   : > { %s1955_s12 = smov (%p33_p1, %s31_s12), 0  ;;  %p159_p3 = pnand %p1300_p0, %p158_p2 }
   0x6   : > { %v1605_v0 = vld [vmem:[%s1950_s1 + $0x40] sm:$0xff] (!%p159_p3)   ;;  %s1301_s15 = sshll.u32 (!%p159_p3), %s1707_s9, 5  ;;  %v1607_v2 = vld [vmem:[%s1950_s1 + $0x48] sm:$0xff] (!%p159_p3)   ;;  %v1609_v4 = vld [vmem:[%s1950_s1 + $0x50] sm:$0xff] (!%p159_p3)  }
   0x7   : > { %162 = sbr.rel (%p159_p3) target bundleno = 347 (0x15b), region = 28  ;;  %v1606_v1 = vld [vmem:[%s1950_s1] sm:$0xff] (!%p159_p3)   ;;  %1379 = vmatprep.subr.bf16.mxu0 (!%p159_p3), %v1605_v0  ;;  %1563 = vmatprep.subr.bf16.mxu1 (!%p159_p3), %v1605_v0  ;;  %p198_p4 = scmp.lt.s32.totalorder (!%p159_p3), %s1301_s15, 63  ;;  %v1608_v3 = vld [vmem:[%s1950_s1 + $0x8] sm:$0xff] (!%p159_p3)   ;;  %v1610_v5 = vld [vmem:[%s1950_s1 + $0x10] sm:$0xff] (!%p159_p3)  }
   0x8   : > { %1380 = vmatpush3.bf16.msra.mxu0 (!%p159_p3), %v1606_v1  ;;  %1571 = vmatpush3.bf16.msra.mxu1 (!%p159_p3), %v1606_v1  ;;  %v1611_v6 = vld [vmem:[%s1950_s1 + $0x58] sm:$0xff] (!%p159_p3)   ;;  %v1613_v8 = vld [vmem:[%s1950_s1 + $0x60] sm:$0xff] (!%p159_p3)   ;;  %v1615_v10 = vld [vmem:[%s1950_s1 + $0x68] sm:$0xff] (!%p159_p3)  }
   0x9   : > { %1381 = vmatprep.subr.bf16.mxu0 (!%p159_p3), %v1607_v2  ;;  %1564 = vmatprep.subr.bf16.mxu1 (!%p159_p3), %v1607_v2  ;;  %v1612_v7 = vld [vmem:[%s1950_s1 + $0x18] sm:$0xff] (!%p159_p3)   ;;  %v1614_v9 = vld [vmem:[%s1950_s1 + $0x20] sm:$0xff] (!%p159_p3)   ;;  %v1616_v13 = vld [vmem:[%s1950_s1 + $0x28] sm:$0xff] (!%p159_p3)  }
   0xa   : > { %v1617_v14 = vld [vmem:[%s1950_s1 + $0x70] sm:$0xff] (!%p159_p3)   ;;  %v1619_v16 = vld [vmem:[%s1950_s1 + $0x78] sm:$0xff] (!%p159_p3)   ;;  %v1627_v18 = vld [vmem:[%s1950_s1 + $0x80] sm:$0xff] (!%p159_p3)  }
   0xb   : > { %v1618_v15 = vld [vmem:[%s1950_s1 + $0x30] sm:$0xff] (!%p159_p3)   ;;  %v1620_v17 = vld [vmem:[%s1950_s1 + $0x38] sm:$0xff] (!%p159_p3)   ;;  %v1628_v22 = vld [vmem:[%s1950_s1 + $0x88] sm:$0xff] (!%p159_p3)  }
   0xc   : > { %1382 = vmatpush3.bf16.msra.mxu0 (!%p159_p3), %v1608_v3  ;;  %1572 = vmatpush3.bf16.msra.mxu1 (!%p159_p3), %v1608_v3  ;;  %v1635_v25 = vld [vmem:[%s1950_s1 + $0x90] sm:$0xff] (!%p159_p3)   ;;  %v1636_v27 = vld [vmem:[%s1950_s1 + $0x98] sm:$0xff] (!%p159_p3)   ;;  %v1643_v30 = vld [vmem:[%s1950_s1 + $0xa0] sm:$0xff] (!%p159_p3)  }
   0xd   : > { %1383 = vmatprep.subr.bf16.mxu0 (!%p159_p3), %v1609_v4  ;;  %1565 = vmatprep.subr.bf16.mxu1 (!%p159_p3), %v1609_v4  ;;  %v1644_v33 = vld [vmem:[%s1950_s1 + $0xa8] sm:$0xff] (!%p159_p3)   ;;  %v1651_v36 = vld [vmem:[%s1950_s1 + $0xb0] sm:$0xff] (!%p159_p3)   ;;  %v1652_v40 = vld [vmem:[%s1950_s1 + $0xb8] sm:$0xff] (!%p159_p3)  }
   0xe   : > { %s1957_s15 = smov (!%p198_p4, %s1301_s15), 63 }
   0xf   : > { %s1579_s28 = smul.u32 12, %s1957_s15 }
  0x10   : > { %1384 = vmatpush3.bf16.msra.mxu0 %v1610_v5  ;;  %1573 = vmatpush3.bf16.msra.mxu1 %v1610_v5 }
  0x11   : > { %1385 = vmatprep.subr.bf16.mxu0 %v1611_v6  ;;  %1566 = vmatprep.subr.bf16.mxu1 %v1611_v6  ;;  %s1783_s7 = scalar_lea.vmem %s1949_s0, %s1579_s28 }
  0x12   : > { %v1623_v11 = vld [vmem:[%s1783_s7 + $0x4] ss:$12 sps:$4 sm:$0xff]   ;;  %v1621_v19 = vld [vmem:[%s1783_s7] ss:$12 sps:$4 sm:$0xff]   ;;  %v1629_v21 = vld [vmem:[%s1783_s7 + $0x1c] ss:$12 sps:$4 sm:$0xff]  }
  0x13   : > { %v1626_v12 = vld [vmem:[%s1783_s7 + $0x124] ss:$12 sps:$4 sm:$0xff]   ;;  %839 = vmatprep.mubr.bf16.mxu0 %v1623_v11  ;;  %v1624_v20 = vld [vmem:[%s1783_s7 + $0x120] ss:$12 sps:$4 sm:$0xff]   ;;  %v1631_v23 = vld [vmem:[%s1783_s7 + $0x13c] ss:$12 sps:$4 sm:$0xff]  }
  0x14   : > { %1386 = vmatpush3.bf16.msra.mxu0 %v1612_v7  ;;  %1574 = vmatpush3.bf16.msra.mxu1 %v1612_v7  ;;  %v1633_v24 = vld [vmem:[%s1783_s7 + $0x18] ss:$12 sps:$4 sm:$0xff]   ;;  %v1637_v28 = vld [vmem:[%s1783_s7 + $0x34] ss:$12 sps:$4 sm:$0xff]   ;;  %v1641_v31 = vld [vmem:[%s1783_s7 + $0x30] ss:$12 sps:$4 sm:$0xff]  }
  0x15   : > { %1387 = vmatprep.subr.bf16.mxu0 %v1613_v8  ;;  %1567 = vmatprep.subr.bf16.mxu1 %v1613_v8  ;;  %v1634_v26 = vld [vmem:[%s1783_s7 + $0x138] ss:$12 sps:$4 sm:$0xff]   ;;  %v1639_v29 = vld [vmem:[%s1783_s7 + $0x154] ss:$12 sps:$4 sm:$0xff]   ;;  %v1642_v32 = vld [vmem:[%s1783_s7 + $0x150] ss:$12 sps:$4 sm:$0xff]  }
  0x16   : > { %935 = vmatprep.mubr.bf16.mxu1 %v1626_v12  ;;  %v1645_v34 = vld [vmem:[%s1783_s7 + $0x4c] ss:$12 sps:$4 sm:$0xff]   ;;  %v1649_v37 = vld [vmem:[%s1783_s7 + $0x48] ss:$12 sps:$4 sm:$0xff]   ;;  %v1653_v39 = vld [vmem:[%s1783_s7 + $0x64] ss:$12 sps:$4 sm:$0xff]  }
  0x17   : > { %v1647_v35 = vld [vmem:[%s1783_s7 + $0x16c] ss:$12 sps:$4 sm:$0xff]   ;;  %v1650_v38 = vld [vmem:[%s1783_s7 + $0x168] ss:$12 sps:$4 sm:$0xff]   ;;  %v1662_v47 = vld [vmem:[%s1783_s7 + $0x50] ss:$12 sps:$4 sm:$0xff]  }
  0x18   : > { %1388 = vmatpush3.bf16.msra.mxu0 %v1614_v9  ;;  %1575 = vmatpush3.bf16.msra.mxu1 %v1614_v9  ;;  %v1655_v41 = vld [vmem:[%s1783_s7 + $0x8] ss:$12 sps:$4 sm:$0xff]   ;;  %v1656_v42 = vld [vmem:[%s1783_s7 + $0x60] ss:$12 sps:$4 sm:$0xff]   ;;  %v1660_v45 = vld [vmem:[%s1783_s7 + $0x38] ss:$12 sps:$4 sm:$0xff]  }
  0x19   : > { %1389 = vmatprep.subr.bf16.mxu0 %v1615_v10  ;;  %1568 = vmatprep.subr.bf16.mxu1 %v1615_v10  ;;  %v1657_v43 = vld [vmem:[%s1783_s7 + $0x20] ss:$12 sps:$4 sm:$0xff]   ;;  %v1658_v44 = vld [vmem:[%s1783_s7 + $0x7c] ss:$12 sps:$4 sm:$0xff]   ;;  %v1661_v46 = vld [vmem:[%s1783_s7 + $0x78] ss:$12 sps:$4 sm:$0xff]  }
  0x1a   : > { %v1663_v48 = vld [vmem:[%s1783_s7 + $0x94] ss:$12 sps:$4 sm:$0xff]   ;;  %v1666_v50 = vld [vmem:[%s1783_s7 + $0x90] ss:$12 sps:$4 sm:$0xff]   ;;  %v1668_v52 = vld [vmem:[%s1783_s7 + $0xac] ss:$12 sps:$4 sm:$0xff]  }
  0x1b   : > { %v1665_v49 = vld [vmem:[%s1783_s7 + $0x68] ss:$12 sps:$4 sm:$0xff]   ;;  %v1667_v51 = vld [vmem:[%s1783_s7 + $0x80] ss:$12 sps:$4 sm:$0xff]   ;;  %v1670_v53 = vld [vmem:[%s1783_s7 + $0x98] ss:$12 sps:$4 sm:$0xff]  }
  0x1c   : > { %1390 = vmatpush3.bf16.msra.mxu0 %v1616_v13  ;;  %1576 = vmatpush3.bf16.msra.mxu1 %v1616_v13  ;;  %v1671_v54 = vld [vmem:[%s1783_s7 + $0xa8] ss:$12 sps:$4 sm:$0xff]   ;;  %v1672_v55 = vld [vmem:[%s1783_s7 + $0xb0] ss:$12 sps:$4 sm:$0xff]   ;;  %v1676_v58 = vld [vmem:[%s1783_s7 + $0xc0] ss:$12 sps:$4 sm:$0xff]  }
  0x1d   : > { %1391 = vmatprep.subr.bf16.mxu0 %v1617_v14  ;;  %1569 = vmatprep.subr.bf16.mxu1 %v1617_v14  ;;  %v1673_v56 = vld [vmem:[%s1783_s7 + $0xc4] ss:$12 sps:$4 sm:$0xff]   ;;  %v1675_v57 = vld [vmem:[%s1783_s7 + $0xc8] ss:$12 sps:$4 sm:$0xff]   ;;  %v1677_v59 = vld [vmem:[%s1783_s7 + $0xe0] ss:$12 sps:$4 sm:$0xff]  }
  0x1e   : > { %v1678_v60 = vld [vmem:[%s1783_s7 + $0xdc] ss:$12 sps:$4 sm:$0xff]   ;;  %v1680_v61 = vld [vmem:[%s1783_s7 + $0xf8] ss:$12 sps:$4 sm:$0xff]   ;;  %v1683_v0 = vld [vmem:[%s1783_s7 + $0xf4] ss:$12 sps:$4 sm:$0xff]  }
  0x1f   : > { %v1681_v62 = vld [vmem:[%s1783_s7 + $0xd8] ss:$12 sps:$4 sm:$0xff]   ;;  %v1682_v63 = vld [vmem:[%s1783_s7 + $0x110] ss:$12 sps:$4 sm:$0xff]   ;;  %v1685_v1 = vld [vmem:[%s1783_s7 + $0x128] ss:$12 sps:$4 sm:$0xff]  }
  0x20   : > { %1392 = vmatpush3.bf16.msra.mxu0 %v1618_v15  ;;  %1577 = vmatpush3.bf16.msra.mxu1 %v1618_v15  ;;  %v1686_v2 = vld [vmem:[%s1783_s7 + $0xf0] ss:$12 sps:$4 sm:$0xff]   ;;  %v1687_v3 = vld [vmem:[%s1783_s7 + $0x140] ss:$12 sps:$4 sm:$0xff]   ;;  %v1690_v5 = vld [vmem:[%s1783_s7 + $0x158] ss:$12 sps:$4 sm:$0xff]  }
  0x21   : > { %1393 = vmatprep.subr.bf16.mxu0 %v1619_v16  ;;  %1570 = vmatprep.subr.bf16.mxu1 %v1619_v16  ;;  %v1688_v4 = vld [vmem:[%s1783_s7 + $0x10c] ss:$12 sps:$4 sm:$0xff]   ;;  %v1691_v6 = vld [vmem:[%s1783_s7 + $0x108] ss:$12 sps:$4 sm:$0xff]   ;;  %v1692_v7 = vld [vmem:[%s1783_s7 + $0x170] ss:$12 sps:$4 sm:$0xff]  }
  0x22   : > { %s1304_s7 = sshll.u32 %s1957_s15, 3 }
  0x23   : > { %s1898_s21 = scalar_lea.vmem %s1951_s2, %s1304_s7 }
  0x24   : > { %1394 = vmatpush3.bf16.msra.mxu0 %v1620_v17  ;;  %1578 = vmatpush3.bf16.msra.mxu1 %v1620_v17 }
  0x25   : > { %1515 = vmatprep.subr.bf16.mxu1 %v1627_v18 }
  0x27   : > { %840 = vmatmul.mubr.bf16.vlgmr.msra.gmra.mrb[0].mxu0 %v1621_v19  ;;  %936 = vmatmul.mubr.bf16.vlgmr.msra.gmra.mrb[0].mxu1 %v1624_v20 }
  0x28   : > { %1516 = vmatpush3.bf16.msra.mxu1 %v1627_v18  ;;  %847 = vmatprep.mubr.bf16.mxu0 %v1629_v21 }
  0x29   : > { %1517 = vmatprep.subr.bf16.mxu1 %v1628_v22  ;;  %943 = vmatprep.mubr.bf16.mxu1 %v1631_v23 }
  0x2c   : > { %1518 = vmatpush3.bf16.msra.mxu1 %v1628_v22 }
  0x2d   : > { %1519 = vmatprep.subr.bf16.mxu1 %v1635_v25 }
  0x2f   : > { %848 = vmatmul.mubr.bf16.gmra.mrb[4].mxu0 %v1633_v24  ;;  %944 = vmatmul.mubr.bf16.gmra.mrb[4].mxu1 %v1634_v26 }
  0x30   : > { %1520 = vmatpush3.bf16.msra.mxu1 %v1635_v25  ;;  %855 = vmatprep.mubr.bf16.mxu0 %v1637_v28 }
  0x31   : > { %1521 = vmatprep.subr.bf16.mxu1 %v1636_v27  ;;  %951 = vmatprep.mubr.bf16.mxu1 %v1639_v29 }
  0x34   : > { %1522 = vmatpush3.bf16.msra.mxu1 %v1636_v27 }
  0x35   : > { %1523 = vmatprep.subr.bf16.mxu1 %v1643_v30 }
  0x37   : > { %856 = vmatmul.mubr.bf16.gmra.mrb[8].mxu0 %v1641_v31  ;;  %952 = vmatmul.mubr.bf16.gmra.mrb[8].mxu1 %v1642_v32 }
  0x38   : > { %1524 = vmatpush3.bf16.msra.mxu1 %v1643_v30  ;;  %863 = vmatprep.mubr.bf16.mxu0 %v1645_v34 }
  0x39   : > { %1525 = vmatprep.subr.bf16.mxu1 %v1644_v33  ;;  %959 = vmatprep.mubr.bf16.mxu1 %v1647_v35 }
  0x3c   : > { %1526 = vmatpush3.bf16.msra.mxu1 %v1644_v33 }
  0x3d   : > { %1527 = vmatprep.subr.bf16.mxu1 %v1651_v36 }
  0x3f   : > { %864 = vmatmul.mubr.bf16.gmra.mrb[12].mxu0 %v1649_v37  ;;  %960 = vmatmul.mubr.bf16.gmra.mrb[12].mxu1 %v1650_v38 }
  0x40   : > { %1528 = vmatpush3.bf16.msra.mxu1 %v1651_v36  ;;  %871 = vmatprep.mubr.bf16.mxu0 %v1653_v39 }
  0x41   : > { %1529 = vmatprep.subr.bf16.mxu1 %v1652_v40  ;;  %1531 = vmatprep.mubr.bf16.mxu1 %v1655_v41 }
  0x44   : > { %1530 = vmatpush3.bf16.msra.mxu1 %v1652_v40 }
  0x47   : > { %872 = vmatmul.mubr.bf16.gmra.mrb[16].mxu0 %v1656_v42  ;;  %1532 = vmatmul.mubr.bf16.vlgmr.msra.gmra.mrb[16].mxu1 %v1657_v43 }
  0x48   : > { %879 = vmatprep.mubr.bf16.mxu0 %v1658_v44  ;;  %1535 = vmatprep.mubr.bf16.mxu1 %v1660_v45 }
  0x4f   : > { %880 = vmatmul.mubr.bf16.gmra.mrb[20].mxu0 %v1661_v46  ;;  %1536 = vmatmul.mubr.bf16.gmra.mrb[20].mxu1 %v1662_v47 }
  0x50   : > { %887 = vmatprep.mubr.bf16.mxu0 %v1663_v48  ;;  %1539 = vmatprep.mubr.bf16.mxu1 %v1665_v49 }
  0x57   : > { %888 = vmatmul.mubr.bf16.gmra.mrb[24].mxu0 %v1666_v50  ;;  %1540 = vmatmul.mubr.bf16.gmra.mrb[24].mxu1 %v1667_v51 }
  0x58   : > { %895 = vmatprep.mubr.bf16.mxu0 %v1668_v52  ;;  %1543 = vmatprep.mubr.bf16.mxu1 %v1670_v53 }
  0x5f   : > { %896 = vmatmul.mubr.bf16.gmra.mrb[28].mxu0 %v1671_v54  ;;  %1544 = vmatmul.mubr.bf16.gmra.mrb[28].mxu1 %v1672_v55 }
  0x60   : > { %903 = vmatprep.mubr.bf16.mxu0 %v1673_v56  ;;  %1547 = vmatprep.mubr.bf16.mxu1 %v1675_v57 }
  0x67   : > { %904 = vmatmul.mubr.bf16.gmra.mrb[32].mxu0 %v1676_v58  ;;  %1548 = vmatmul.mubr.bf16.gmra.mrb[32].mxu1 %v1677_v59 }
  0x68   : > { %911 = vmatprep.mubr.bf16.mxu0 %v1678_v60  ;;  %1551 = vmatprep.mubr.bf16.mxu1 %v1680_v61 }
  0x6f   : > { %912 = vmatmul.mubr.bf16.gmra.mrb[36].mxu0 %v1681_v62  ;;  %1552 = vmatmul.mubr.bf16.gmra.mrb[36].mxu1 %v1682_v63 }
  0x70   : > { %919 = vmatprep.mubr.bf16.mxu0 %v1683_v0  ;;  %1555 = vmatprep.mubr.bf16.mxu1 %v1685_v1 }
  0x77   : > { %920 = vmatmul.mubr.bf16.gmra.mrb[40].mxu0 %v1686_v2  ;;  %1556 = vmatmul.mubr.bf16.gmra.mrb[40].mxu1 %v1687_v3 }
  0x78   : > { %927 = vmatprep.mubr.bf16.mxu0 %v1688_v4  ;;  %1559 = vmatprep.mubr.bf16.mxu1 %v1690_v5 }
  0x7f   : > { %928 = vmatmul.mubr.bf16.gmra.mrb[44].mxu0 %v1691_v6  ;;  %1560 = vmatmul.mubr.bf16.gmra.mrb[44].mxu1 %v1692_v7 }
  0xfa   : > { %v1395_v8 = vpop.f32.mrb[0].mxu0  ;;  %v1467_v9 = vpop.f32.mrb[0].mxu1 }
  0xfb   : > { %v1396_v10 = vpop.f32.mrb[1].mxu0  ;;  %v1468_v11 = vpop.f32.mrb[1].mxu1 }
  0xfc   : > { %v1397_v12 = vadd.f32 %v1396_v10, %v1395_v8  ;;  %v1878_v13 = vadd.f32 %v1468_v11, %v1467_v9  ;;  %v1398_v14 = vpop.f32.mrb[2].mxu0  ;;  %v1470_v15 = vpop.f32.mrb[2].mxu1 }
  0xfd   : > { %v1399_v16 = vpop.f32.mrb[3].mxu0  ;;  %v1471_v17 = vpop.f32.mrb[3].mxu1 }
  0xfe   : > { %v1400_v18 = vadd.f32 %v1399_v16, %v1398_v14  ;;  %v1880_v19 = vadd.f32 %v1471_v17, %v1470_v15 }
 0x102   : > { %v1401_v20 = vpop.f32.mrb[4].mxu0  ;;  %v1473_v21 = vpop.f32.mrb[4].mxu1 }
 0x103   : > { %v1402_v22 = vpop.f32.mrb[5].mxu0  ;;  %v1474_v23 = vpop.f32.mrb[5].mxu1 }
 0x104   : > { %v1403_v24 = vadd.f32 %v1402_v22, %v1401_v20  ;;  %v1882_v25 = vadd.f32 %v1474_v23, %v1473_v21  ;;  %v1404_v26 = vpop.f32.mrb[6].mxu0  ;;  %v1476_v27 = vpop.f32.mrb[6].mxu1 }
 0x105   : > { %v1405_v28 = vpop.f32.mrb[7].mxu0  ;;  %v1477_v29 = vpop.f32.mrb[7].mxu1 }
 0x106   : > { %v1406_v30 = vadd.f32 %v1405_v28, %v1404_v26  ;;  %v1884_v31 = vadd.f32 %v1477_v29, %v1476_v27 }
 0x10a   : > { %v1407_v32 = vpop.f32.mrb[8].mxu0  ;;  %v1479_v33 = vpop.f32.mrb[8].mxu1 }
 0x10b   : > { %v1408_v34 = vpop.f32.mrb[9].mxu0  ;;  %v1480_v35 = vpop.f32.mrb[9].mxu1 }
 0x10c   : > { %v1409_v36 = vadd.f32 %v1408_v34, %v1407_v32  ;;  %v1886_v37 = vadd.f32 %v1480_v35, %v1479_v33  ;;  %v1410_v38 = vpop.f32.mrb[10].mxu0  ;;  %v1482_v39 = vpop.f32.mrb[10].mxu1 }
 0x10d   : > { %v1411_v40 = vpop.f32.mrb[11].mxu0  ;;  %v1483_v41 = vpop.f32.mrb[11].mxu1 }
 0x10e   : > { %v1412_v42 = vadd.f32 %v1411_v40, %v1410_v38  ;;  %v1888_v43 = vadd.f32 %v1483_v41, %v1482_v39 }
 0x112   : > { %v1413_v44 = vpop.f32.mrb[12].mxu0  ;;  %v1485_v45 = vpop.f32.mrb[12].mxu1 }
 0x113   : > { %v1414_v46 = vpop.f32.mrb[13].mxu0  ;;  %v1486_v47 = vpop.f32.mrb[13].mxu1 }
 0x114   : > { %v1415_v48 = vadd.f32 %v1414_v46, %v1413_v44  ;;  %v1890_v49 = vadd.f32 %v1486_v47, %v1485_v45  ;;  %v1416_v50 = vpop.f32.mrb[14].mxu0  ;;  %v1488_v51 = vpop.f32.mrb[14].mxu1 }
 0x115   : > { %v1417_v52 = vpop.f32.mrb[15].mxu0  ;;  %v1489_v53 = vpop.f32.mrb[15].mxu1 }
 0x116   : > { %v1418_v54 = vadd.f32 %v1417_v52, %v1416_v50  ;;  %v1892_v55 = vadd.f32 %v1489_v53, %v1488_v51 }
 0x11a   : > { %v1419_v56 = vpop.f32.mrb[16].mxu0  ;;  %v1533_v57 = vpop.f32.mrb[16].mxu1 }
 0x11b   : > { %v1011_v58 = vadd.f32 %v1533_v57, %v1403_v24  ;;  %v1420_v59 = vpop.f32.mrb[17].mxu0  ;;  %v1002_v60 = vpop.f32.mrb[17].mxu1 }
 0x11c   : > { %v1421_v61 = vadd.f32 %v1420_v59, %v1419_v56  ;;  %v1003_v62 = vadd.f32 %v1397_v12, %v1002_v60  ;;  %v1422_v63 = vpop.f32.mrb[18].mxu0  ;;  %v1534_v0 = vpop.f32.mrb[18].mxu1 }
 0x11d   : > { %v1014_v1 = vadd.f32 %v1534_v0, %v1406_v30  ;;  %v1423_v2 = vpop.f32.mrb[19].mxu0  ;;  %v1005_v3 = vpop.f32.mrb[19].mxu1  ;;  %1163 = vst [vmem:[%s1898_s21 + $0x10] sm:$0xff] %v1011_v58 }
 0x11e   : > { %v1424_v4 = vadd.f32 %v1423_v2, %v1422_v63  ;;  %v1006_v5 = vadd.f32 %v1400_v18, %v1005_v3  ;;  %1161 = vst [vmem:[%s1898_s21] sm:$0xff] %v1003_v62 }
 0x11f   : > { %1164 = vst [vmem:[%s1898_s21 + $0x18] sm:$0xff] %v1014_v1 }
 0x120   : > { %1162 = vst [vmem:[%s1898_s21 + $0x8] sm:$0xff] %v1006_v5 }
 0x122   : > { %v1425_v6 = vpop.f32.mrb[20].mxu0  ;;  %v1537_v7 = vpop.f32.mrb[20].mxu1 }
 0x123   : > { %v1027_v8 = vadd.f32 %v1537_v7, %v1415_v48  ;;  %v1426_v9 = vpop.f32.mrb[21].mxu0  ;;  %v1018_v10 = vpop.f32.mrb[21].mxu1 }
 0x124   : > { %v1427_v11 = vadd.f32 %v1426_v9, %v1425_v6  ;;  %v1019_v12 = vadd.f32 %v1409_v36, %v1018_v10  ;;  %v1428_v14 = vpop.f32.mrb[22].mxu0  ;;  %v1538_v15 = vpop.f32.mrb[22].mxu1 }
 0x125   : > { %v1030_v16 = vadd.f32 %v1538_v15, %v1418_v54  ;;  %v1429_v17 = vpop.f32.mrb[23].mxu0  ;;  %v1021_v18 = vpop.f32.mrb[23].mxu1  ;;  %1167 = vst [vmem:[%s1898_s21 + $0x30] sm:$0xff] %v1027_v8 }
 0x126   : > { %v1430_v20 = vadd.f32 %v1429_v17, %v1428_v14  ;;  %v1022_v21 = vadd.f32 %v1412_v42, %v1021_v18  ;;  %1165 = vst [vmem:[%s1898_s21 + $0x20] sm:$0xff] %v1019_v12 }
 0x127   : > { %1168 = vst [vmem:[%s1898_s21 + $0x38] sm:$0xff] %v1030_v16 }
 0x128   : > { %1166 = vst [vmem:[%s1898_s21 + $0x28] sm:$0xff] %v1022_v21 }
 0x12a   : > { %v1431_v22 = vpop.f32.mrb[24].mxu0  ;;  %v1541_v23 = vpop.f32.mrb[24].mxu1 }
 0x12b   : > { %v1043_v24 = vadd.f32 %v1541_v23, %v1427_v11  ;;  %v1432_v26 = vpop.f32.mrb[25].mxu0  ;;  %v1034_v27 = vpop.f32.mrb[25].mxu1 }
 0x12c   : > { %v1433_v28 = vadd.f32 %v1432_v26, %v1431_v22  ;;  %v1035_v29 = vadd.f32 %v1421_v61, %v1034_v27  ;;  %v1434_v30 = vpop.f32.mrb[26].mxu0  ;;  %v1542_v32 = vpop.f32.mrb[26].mxu1 }
 0x12d   : > { %v1046_v33 = vadd.f32 %v1542_v32, %v1430_v20  ;;  %v1435_v34 = vpop.f32.mrb[27].mxu0  ;;  %v1037_v35 = vpop.f32.mrb[27].mxu1  ;;  %1171 = vst [vmem:[%s1898_s21 + $0x50] sm:$0xff] %v1043_v24 }
 0x12e   : > { %v1436_v36 = vadd.f32 %v1435_v34, %v1434_v30  ;;  %v1038_v38 = vadd.f32 %v1424_v4, %v1037_v35  ;;  %1169 = vst [vmem:[%s1898_s21 + $0x40] sm:$0xff] %v1035_v29 }
 0x12f   : > { %1172 = vst [vmem:[%s1898_s21 + $0x58] sm:$0xff] %v1046_v33 }
 0x130   : > { %1170 = vst [vmem:[%s1898_s21 + $0x48] sm:$0xff] %v1038_v38 }
 0x132   : > { %v1437_v39 = vpop.f32.mrb[28].mxu0  ;;  %v1545_v40 = vpop.f32.mrb[28].mxu1 }
 0x133   : > { %v1438_v41 = vpop.f32.mrb[29].mxu0  ;;  %v1050_v42 = vpop.f32.mrb[29].mxu1 }
 0x134   : > { %v1439_v44 = vadd.f32 %v1438_v41, %v1437_v39  ;;  %v1051_v45 = vadd.f32 %v1433_v28, %v1050_v42  ;;  %v1440_v46 = vpop.f32.mrb[30].mxu0  ;;  %v1546_v47 = vpop.f32.mrb[30].mxu1 }
 0x135   : > { %v1441_v48 = vpop.f32.mrb[31].mxu0  ;;  %v1053_v50 = vpop.f32.mrb[31].mxu1 }
 0x136   : > { %v1059_v51 = vadd.f32 %v1545_v40, %v1439_v44  ;;  %v1442_v52 = vadd.f32 %v1441_v48, %v1440_v46  ;;  %v1054_v53 = vadd.f32 %v1436_v36, %v1053_v50  ;;  %1173 = vst [vmem:[%s1898_s21 + $0x60] sm:$0xff] %v1051_v45 }
 0x138   : > { %v1062_v54 = vadd.f32 %v1546_v47, %v1442_v52  ;;  %1175 = vst [vmem:[%s1898_s21 + $0x70] sm:$0xff] %v1059_v51  ;;  %1174 = vst [vmem:[%s1898_s21 + $0x68] sm:$0xff] %v1054_v53 }
 0x13a   : > { %v1443_v56 = vpop.f32.mrb[32].mxu0  ;;  %v1549_v57 = vpop.f32.mrb[32].mxu1  ;;  %1176 = vst [vmem:[%s1898_s21 + $0x78] sm:$0xff] %v1062_v54 }
 0x13b   : > { %v1444_v58 = vpop.f32.mrb[33].mxu0  ;;  %v1066_v59 = vpop.f32.mrb[33].mxu1 }
 0x13c   : > { %v1445_v60 = vadd.f32 %v1444_v58, %v1443_v56  ;;  %v1446_v61 = vpop.f32.mrb[34].mxu0  ;;  %v1550_v62 = vpop.f32.mrb[34].mxu1 }
 0x13d   : > { %v1447_v63 = vpop.f32.mrb[35].mxu0  ;;  %v1069_v0 = vpop.f32.mrb[35].mxu1 }
 0x13e   : > { %v1067_v1 = vadd.f32 %v1445_v60, %v1066_v59  ;;  %v1448_v2 = vadd.f32 %v1447_v63, %v1446_v61 }
 0x140   : > { %v1070_v3 = vadd.f32 %v1448_v2, %v1069_v0  ;;  %1177 = vst [vmem:[%s1898_s21 + $0x80] sm:$0xff] %v1067_v1 }
 0x142   : > { %v1449_v4 = vpop.f32.mrb[36].mxu0  ;;  %v1553_v5 = vpop.f32.mrb[36].mxu1  ;;  %1178 = vst [vmem:[%s1898_s21 + $0x88] sm:$0xff] %v1070_v3 }
 0x143   : > { %v1450_v6 = vpop.f32.mrb[37].mxu0  ;;  %v1082_v7 = vpop.f32.mrb[37].mxu1 }
 0x144   : > { %v1451_v8 = vadd.f32 %v1450_v6, %v1449_v4  ;;  %v1452_v9 = vpop.f32.mrb[38].mxu0  ;;  %v1554_v10 = vpop.f32.mrb[38].mxu1 }
 0x145   : > { %v1453_v11 = vpop.f32.mrb[39].mxu0  ;;  %v1085_v12 = vpop.f32.mrb[39].mxu1 }
 0x146   : > { %v1075_v14 = vadd.f32 %v1549_v57, %v1451_v8  ;;  %v1454_v15 = vadd.f32 %v1453_v11, %v1452_v9 }
 0x148   : > { %v1078_v16 = vadd.f32 %v1550_v62, %v1454_v15  ;;  %1179 = vst [vmem:[%s1898_s21 + $0x90] sm:$0xff] %v1075_v14 }
 0x14a   : > { %v1455_v17 = vpop.f32.mrb[40].mxu0  ;;  %v1557_v18 = vpop.f32.mrb[40].mxu1  ;;  %1180 = vst [vmem:[%s1898_s21 + $0x98] sm:$0xff] %v1078_v16 }
 0x14b   : > { %v1107_v20 = vadd.f32 %v1557_v18, %v1882_v25  ;;  %v1456_v21 = vpop.f32.mrb[41].mxu0  ;;  %v1098_v22 = vpop.f32.mrb[41].mxu1 }
 0x14c   : > { %v1457_v23 = vadd.f32 %v1456_v21, %v1455_v17  ;;  %v1099_v24 = vadd.f32 %v1878_v13, %v1098_v22  ;;  %v1458_v26 = vpop.f32.mrb[42].mxu0  ;;  %v1558_v27 = vpop.f32.mrb[42].mxu1 }
 0x14d   : > { %v1110_v28 = vadd.f32 %v1558_v27, %v1884_v31  ;;  %v1459_v29 = vpop.f32.mrb[43].mxu0  ;;  %v1101_v30 = vpop.f32.mrb[43].mxu1  ;;  %1187 = vst [vmem:[%s1898_s21 + $0xd0] sm:$0xff] %v1107_v20 }
 0x14e   : > { %v1083_v32 = vadd.f32 %v1457_v23, %v1082_v7  ;;  %v1460_v33 = vadd.f32 %v1459_v29, %v1458_v26  ;;  %v1102_v25 = vadd.f32 %v1880_v19, %v1101_v30  ;;  %1185 = vst [vmem:[%s1898_s21 + $0xc0] sm:$0xff] %v1099_v24 }
 0x14f   : > { %1188 = vst [vmem:[%s1898_s21 + $0xd8] sm:$0xff] %v1110_v28 }
 0x150   : > { %v1086_v34 = vadd.f32 %v1460_v33, %v1085_v12  ;;  %1181 = vst [vmem:[%s1898_s21 + $0xa0] sm:$0xff] %v1083_v32  ;;  %1186 = vst [vmem:[%s1898_s21 + $0xc8] sm:$0xff] %v1102_v25 }
 0x152   : > { %v1461_v35 = vpop.f32.mrb[44].mxu0  ;;  %v1561_v13 = vpop.f32.mrb[44].mxu1  ;;  %1182 = vst [vmem:[%s1898_s21 + $0xa8] sm:$0xff] %v1086_v34 }
 0x153   : > { %v1123_v36 = vadd.f32 %v1561_v13, %v1890_v49  ;;  %v1462_v31 = vpop.f32.mrb[45].mxu0  ;;  %v1114_v38 = vpop.f32.mrb[45].mxu1 }
 0x154   : > { %v1463_v39 = vadd.f32 %v1462_v31, %v1461_v35  ;;  %v1115_v19 = vadd.f32 %v1886_v37, %v1114_v38  ;;  %v1464_v40 = vpop.f32.mrb[46].mxu0  ;;  %v1562_v41 = vpop.f32.mrb[46].mxu1 }
 0x155   : > { %v1126_v42 = vadd.f32 %v1562_v41, %v1892_v55  ;;  %v1465_v44 = vpop.f32.mrb[47].mxu0  ;;  %v1117_v45 = vpop.f32.mrb[47].mxu1  ;;  %1191 = vst [vmem:[%s1898_s21 + $0xf0] sm:$0xff] %v1123_v36 }
 0x156   : > { %v1091_v46 = vadd.f32 %v1553_v5, %v1463_v39  ;;  %v1466_v47 = vadd.f32 %v1465_v44, %v1464_v40  ;;  %v1118_v49 = vadd.f32 %v1888_v43, %v1117_v45  ;;  %1189 = vst [vmem:[%s1898_s21 + $0xe0] sm:$0xff] %v1115_v19 }
 0x157   : > { %1192 = vst [vmem:[%s1898_s21 + $0xf8] sm:$0xff] %v1126_v42 }
 0x158   : > { %v1094_v48 = vadd.f32 %v1554_v10, %v1466_v47  ;;  %1183 = vst [vmem:[%s1898_s21 + $0xb0] sm:$0xff] %v1091_v46  ;;  %1190 = vst [vmem:[%s1898_s21 + $0xe8] sm:$0xff] %v1118_v49 }
 0x15a   : > { %1184 = vst [vmem:[%s1898_s21 + $0xb8] sm:$0xff] %v1094_v48 }
 0x15b PF: > { %s12_s11 = sadd.s32 1, %s1715_s11   ;;  %s1952_s9 = smov %s1711_s10 }
 0x15c   : > { %p9_p5 = scmp.ge.s32.totalorder %s12_s11, 4   ;;  %s1953_s10 = smov %s1955_s12 }
 0x15e   :  { %11 = sbr.rel (!%p9_p5) target bundleno = 2 (0x2), region = 65 }

// kernel: forward.62
= control target key start
LH: loop header
LB: loop body
LE: loop exit
PB: predicated region body
PF: predicated region fallthrough
CT: control target
= control target key end

     0   :  { %s383_s6 = smov 0   ;;  %s385_s7 = smov 0   ;;  %s423_s0 = inlined_call_operand.vmem [shape: f32[2,64,128], index: 0, kind: input, shape index: {}]   ;;  %s424_s1 = inlined_call_operand.vmem [shape: f32[2,64,128], index: 1, kind: output, shape index: {}]  }
   0x1   :  { %s387_s8 = smov 0  }
   0x2 LB: > { %s23_s9 = sadd.s32 1, %s367_s7  ;;  %p314_p0 = scmp.ge.s32.totalorder %s371_s8, 1  ;;  %s371_s8 = sphi %s387_s8, %s11_s8   ;;  %s367_s7 = sphi %s385_s7, %s426_s7   ;;  %s363_s6 = sphi %s383_s6, %s425_s6  }
   0x3   : > { %p25_p1 = scmp.ge.s32.totalorder %s23_s9, 2  ;;  %p106_p2 = scmp.lt.s32.totalorder %s371_s8, 3 }
   0x5   : > { %s428_s9 = smov (%p25_p1, %s23_s9), 0  ;;  %p107_p3 = pnand %p314_p0, %p106_p2 }
   0x6   : > { %p132_p4 = scmp.lt.s32.totalorder (!%p107_p3), %s363_s6, 1 }
   0x7   : > { %110 = sbr.rel (%p107_p3) target bundleno = 99 (0x63), region = 24 }
   0xe   : > { %s430_s6 = smov (!%p132_p4, %s363_s6), 1 }
   0xf   : > { %s321_s10 = sshll.u32 %s430_s6, 6 }
  0x10   : > { %s139_s13 = scalar_lea.vmem %s423_s0, %s321_s10  ;;  %s147_s16 = scalar_lea.vmem %s424_s1, %s321_s10 }
  0x11   : > { %v148_v0 = vld [vmem:[%s139_s13] sm:$0xff]  ;;  %v149_v1 = vld [vmem:[%s139_s13 + $0x8] sm:$0xff]  ;;  %v150_v2 = vld [vmem:[%s139_s13 + $0x10] sm:$0xff] }
  0x12   : > { %v156_v3 = vadd.f32 %v149_v1, %v148_v0  ;;  %v151_v4 = vld [vmem:[%s139_s13 + $0x18] sm:$0xff]  ;;  %v152_v6 = vld [vmem:[%s139_s13 + $0x20] sm:$0xff]  ;;  %v153_v8 = vld [vmem:[%s139_s13 + $0x28] sm:$0xff] }
  0x13   : > { %v154_v10 = vld [vmem:[%s139_s13 + $0x30] sm:$0xff]  ;;  %v155_v12 = vld [vmem:[%s139_s13 + $0x38] sm:$0xff] }
  0x14   : > { %v157_v5 = vadd.f32 %v156_v3, %v150_v2 }
  0x16   : > { %v158_v7 = vadd.f32 %v157_v5, %v151_v4 }
  0x18   : > { %v159_v9 = vadd.f32 %v158_v7, %v152_v6 }
  0x1a   : > { %v160_v11 = vadd.f32 %v159_v9, %v153_v8 }
  0x1c   : > { %v161_v13 = vadd.f32 %v160_v11, %v154_v10 }
  0x1e   : > { %v162_v14 = vadd.f32 %v161_v13, %v155_v12 }
  0x20   : > { %v163_v15 = vrot.slane %v162_v14, 4 }
  0x22   : > { %v164_v16 = vadd.f32 %v163_v15, %v162_v14 }
  0x24   : > { %v165_v17 = vrot.slane %v164_v16, 2 }
  0x26   : > { %v166_v18 = vadd.f32 %v165_v17, %v164_v16 }
  0x28   : > { %v167_v19 = vrot.slane %v166_v18, 1 }
  0x2a   : > { %v168_v20 = vadd.f32 %v167_v19, %v166_v18 }
  0x2c   : > { %v170_v21 = vmul.f32 0.015625, %v168_v20 }
  0x2e   : > { %v171_v22 = vsub.f32 %v148_v0, %v170_v21  ;;  %v172_v23 = vsub.f32 %v149_v1, %v170_v21  ;;  %v173_v24 = vsub.f32 %v150_v2, %v170_v21  ;;  %v174_v25 = vsub.f32 %v151_v4, %v170_v21 }
  0x2f   : > { %v175_v26 = vsub.f32 %v152_v6, %v170_v21  ;;  %v176_v30 = vsub.f32 %v153_v8, %v170_v21  ;;  %v177_v33 = vsub.f32 %v154_v10, %v170_v21  ;;  %v178_v36 = vsub.f32 %v155_v12, %v170_v21 }
  0x30   : > { %v179_v27 = vmul.f32 %v171_v22, %v171_v22  ;;  %v180_v28 = vmul.f32 %v172_v23, %v172_v23  ;;  %v181_v29 = vmul.f32 %v173_v24, %v173_v24  ;;  %v182_v31 = vmul.f32 %v174_v25, %v174_v25 }
  0x31   : > { %v183_v34 = vmul.f32 %v175_v26, %v175_v26  ;;  %v184_v37 = vmul.f32 %v176_v30, %v176_v30  ;;  %v185_v39 = vmul.f32 %v177_v33, %v177_v33  ;;  %v186_v41 = vmul.f32 %v178_v36, %v178_v36 }
  0x32   : > { %v187_v32 = vadd.f32 %v180_v28, %v179_v27 }
  0x34   : > { %v188_v35 = vadd.f32 %v187_v32, %v181_v29 }
  0x36   : > { %v189_v38 = vadd.f32 %v188_v35, %v182_v31 }
  0x38   : > { %v190_v40 = vadd.f32 %v189_v38, %v183_v34 }
  0x3a   : > { %v191_v42 = vadd.f32 %v190_v40, %v184_v37 }
  0x3c   : > { %v192_v43 = vadd.f32 %v191_v42, %v185_v39 }
  0x3e   : > { %v193_v44 = vadd.f32 %v192_v43, %v186_v41 }
  0x40   : > { %v194_v45 = vrot.slane %v193_v44, 4 }
  0x42   : > { %v195_v46 = vadd.f32 %v194_v45, %v193_v44 }
  0x44   : > { %v196_v47 = vrot.slane %v195_v46, 2 }
  0x46   : > { %v197_v48 = vadd.f32 %v196_v47, %v195_v46 }
  0x48   : > { %v198_v49 = vrot.slane %v197_v48, 1 }
  0x4a   : > { %v199_v50 = vadd.f32 %v198_v49, %v197_v48 }
  0x4c   : > { %v200_v51 = vmul.f32 0.015625, %v199_v50 }
  0x4e   : > { %v201_v52 = vadd.f32 1e-05, %v200_v51 }
  0x50   : > { %347 = vrsqrt.f32 %v201_v52 }
  0x5a   : > { %v348_v53 = vpop.eup %347 }
  0x5b   : > { %v203_v54 = vmul.f32 %v348_v53, %v171_v22  ;;  %v204_v55 = vmul.f32 %v348_v53, %v172_v23  ;;  %v205_v56 = vmul.f32 %v348_v53, %v173_v24  ;;  %v206_v57 = vmul.f32 %v348_v53, %v174_v25 }
  0x5c   : > { %v207_v58 = vmul.f32 %v348_v53, %v175_v26  ;;  %v208_v59 = vmul.f32 %v348_v53, %v176_v30  ;;  %v209_v60 = vmul.f32 %v348_v53, %v177_v33  ;;  %v210_v61 = vmul.f32 %v348_v53, %v178_v36 }
  0x5d   : > { %v211_v62 = vmax.f32 %v203_v54, 0.0  ;;  %v212_v63 = vmax.f32 %v204_v55, 0.0  ;;  %v213_v0 = vmax.f32 %v205_v56, 0.0  ;;  %v214_v1 = vmax.f32 %v206_v57, 0.0 }
  0x5e   : > { %v215_v2 = vmax.f32 %v207_v58, 0.0  ;;  %v216_v3 = vmax.f32 %v208_v59, 0.0  ;;  %v217_v4 = vmax.f32 %v209_v60, 0.0  ;;  %v218_v5 = vmax.f32 %v210_v61, 0.0 }
  0x5f   : > { %219 = vst [vmem:[%s147_s16] sm:$0xff] %v211_v62  ;;  %220 = vst [vmem:[%s147_s16 + $0x8] sm:$0xff] %v212_v63 }
  0x60   : > { %221 = vst [vmem:[%s147_s16 + $0x10] sm:$0xff] %v213_v0  ;;  %222 = vst [vmem:[%s147_s16 + $0x18] sm:$0xff] %v214_v1 }
  0x61   : > { %223 = vst [vmem:[%s147_s16 + $0x20] sm:$0xff] %v215_v2  ;;  %224 = vst [vmem:[%s147_s16 + $0x28] sm:$0xff] %v216_v3 }
  0x62   : > { %225 = vst [vmem:[%s147_s16 + $0x30] sm:$0xff] %v217_v4  ;;  %226 = vst [vmem:[%s147_s16 + $0x38] sm:$0xff] %v218_v5 }
  0x63 PF: > { %s11_s8 = sadd.s32 1, %s371_s8   ;;  %s425_s6 = smov %s367_s7 }
  0x64   : > { %p8_p5 = scmp.ge.s32.totalorder %s11_s8, 4   ;;  %s426_s7 = smov %s428_s9 }
  0x66   :  { %10 = sbr.rel (!%p8_p5) target bundleno = 2 (0x2), region = 54 }

// kernel: forward.61
= control target key start
LH: loop header
LB: loop body
LE: loop exit
PB: predicated region body
PF: predicated region fallthrough
CT: control target
= control target key end

     0   :  { %s2312_s1 = inlined_call_operand.vmem [shape: bf16[1024,128], index: 1, kind: input, shape index: {}]   ;;  %s2313_s0 = inlined_call_operand.vmem [shape: bf16[128,1024], index: 0, kind: input, shape index: {}]   ;;  %s2314_s2 = inlined_call_operand.vmem [shape: f32[128,128], index: 2, kind: output, shape index: {}]  }
   0x1   :  { %v1753_v0 = vld [vmem:[%s2312_s1 + $0x40] sm:$0xff]   ;;  %v1757_v4 = vld [vmem:[%s2312_s1 + $0x48] sm:$0xff]   ;;  %v1761_v8 = vld [vmem:[%s2312_s1 + $0x50] sm:$0xff]  }
   0x2   :  { %v1754_v1 = vld [vmem:[%s2312_s1 + $0xc0] sm:$0xff]   ;;  %1496 = vmatprep.subr.bf16.mxu0 %v1753_v0  ;;  %v1758_v5 = vld [vmem:[%s2312_s1 + $0xc8] sm:$0xff]   ;;  %v1762_v9 = vld [vmem:[%s2312_s1 + $0xd0] sm:$0xff]  }
   0x3   :  { %v1755_v2 = vld [vmem:[%s2312_s1] sm:$0xff]   ;;  %1560 = vmatprep.subr.bf16.mxu1 %v1754_v1  ;;  %v1759_v6 = vld [vmem:[%s2312_s1 + $0x8] sm:$0xff]   ;;  %v1763_v10 = vld [vmem:[%s2312_s1 + $0x10] sm:$0xff]  }
   0x4   :  { %v1756_v3 = vld [vmem:[%s2312_s1 + $0x80] sm:$0xff]   ;;  %1497 = vmatpush3.bf16.msra.mxu0 %v1755_v2  ;;  %v1760_v7 = vld [vmem:[%s2312_s1 + $0x88] sm:$0xff]   ;;  %v1764_v11 = vld [vmem:[%s2312_s1 + $0x90] sm:$0xff]  }
   0x5   :  { %1561 = vmatpush3.bf16.msra.mxu1 %v1756_v3  ;;  %1498 = vmatprep.subr.bf16.mxu0 %v1757_v4  ;;  %v1765_v12 = vld [vmem:[%s2312_s1 + $0x58] sm:$0xff]   ;;  %v1769_v16 = vld [vmem:[%s2312_s1 + $0x60] sm:$0xff]   ;;  %v1773_v20 = vld [vmem:[%s2312_s1 + $0x68] sm:$0xff]  }
   0x6   :  { %1562 = vmatprep.subr.bf16.mxu1 %v1758_v5  ;;  %v1766_v13 = vld [vmem:[%s2312_s1 + $0xd8] sm:$0xff]   ;;  %v1770_v17 = vld [vmem:[%s2312_s1 + $0xe0] sm:$0xff]   ;;  %v1774_v21 = vld [vmem:[%s2312_s1 + $0xe8] sm:$0xff]  }
   0x7   :  { %v1767_v14 = vld [vmem:[%s2312_s1 + $0x18] sm:$0xff]   ;;  %v1771_v18 = vld [vmem:[%s2312_s1 + $0x20] sm:$0xff]   ;;  %v1775_v22 = vld [vmem:[%s2312_s1 + $0x28] sm:$0xff]  }
   0x8   :  { %1499 = vmatpush3.bf16.msra.mxu0 %v1759_v6  ;;  %v1768_v15 = vld [vmem:[%s2312_s1 + $0x98] sm:$0xff]   ;;  %v1772_v19 = vld [vmem:[%s2312_s1 + $0xa0] sm:$0xff]   ;;  %v1776_v23 = vld [vmem:[%s2312_s1 + $0xa8] sm:$0xff]  }
   0x9   :  { %1563 = vmatpush3.bf16.msra.mxu1 %v1760_v7  ;;  %1500 = vmatprep.subr.bf16.mxu0 %v1761_v8  ;;  %v1777_v24 = vld [vmem:[%s2312_s1 + $0x70] sm:$0xff]   ;;  %v1781_v28 = vld [vmem:[%s2312_s1 + $0x78] sm:$0xff]   ;;  %v48_v32 = vld [vmem:[%s2313_s0] sm:$0xff] }
   0xa   :  { %1564 = vmatprep.subr.bf16.mxu1 %v1762_v9  ;;  %v1778_v25 = vld [vmem:[%s2312_s1 + $0xf0] sm:$0xff]   ;;  %v1782_v29 = vld [vmem:[%s2312_s1 + $0xf8] sm:$0xff]   ;;  %v52_v33 = vld [vmem:[%s2313_s0 + $0x20] sm:$0xff] }
   0xb   :  { %v1779_v26 = vld [vmem:[%s2312_s1 + $0x30] sm:$0xff]   ;;  %v1783_v30 = vld [vmem:[%s2312_s1 + $0x38] sm:$0xff]   ;;  %v49_v34 = vld [vmem:[%s2313_s0 + $0x8] sm:$0xff]  ;;  %v1368_v35 = vcombine.low %v48_v32, %v52_v33  ;;  %v1369_v36 = vcombine.high %v48_v32, %v52_v33 }
   0xc   :  { %1501 = vmatpush3.bf16.msra.mxu0 %v1763_v10  ;;  %v1780_v27 = vld [vmem:[%s2312_s1 + $0xb0] sm:$0xff]   ;;  %v1784_v31 = vld [vmem:[%s2312_s1 + $0xb8] sm:$0xff]   ;;  %v53_v37 = vld [vmem:[%s2313_s0 + $0x28] sm:$0xff] }
   0xd   :  { %1565 = vmatpush3.bf16.msra.mxu1 %v1764_v11  ;;  %1502 = vmatprep.subr.bf16.mxu0 %v1765_v12  ;;  %v1370_v38 = vcombine.low %v49_v34, %v53_v37  ;;  %v1371_v39 = vcombine.high %v49_v34, %v53_v37  ;;  %v1785_v40 = vld [vmem:[%s2312_s1 + $0x140] sm:$0xff]   ;;  %v57_v47 = vld [vmem:[%s2313_s0 + $0x48] sm:$0xff]  ;;  %v1793_v62 = vld [vmem:[%s2312_s1 + $0x150] sm:$0xff]  }
   0xe   :  { %1566 = vmatprep.subr.bf16.mxu1 %v1766_v13  ;;  %976 = vmatprep.mubr.bf16.mxu0 %v1369_v36  ;;  %v1786_v41 = vld [vmem:[%s2312_s1 + $0x100] sm:$0xff]   ;;  %v61_v48 = vld [vmem:[%s2313_s0 + $0x68] sm:$0xff]  ;;  %v1794_v63 = vld [vmem:[%s2312_s1 + $0x110] sm:$0xff]  }
   0xf   :  { %1073 = vmatprep.mubr.bf16.mxu1 %v1371_v39  ;;  %v1787_v42 = vld [vmem:[%s2312_s1 + $0x1c0] sm:$0xff]   ;;  %v1379_v49 = vcombine.high %v57_v47, %v61_v48  ;;  %v1789_v50 = vld [vmem:[%s2312_s1 + $0x148] sm:$0xff]   ;;  %v1378_v53 = vcombine.low %v57_v47, %v61_v48  ;;  %v1795_v0 = vld [vmem:[%s2312_s1 + $0x1d0] sm:$0xff]  }
  0x10   :  { %1503 = vmatpush3.bf16.msra.mxu0 %v1767_v14  ;;  %v1788_v43 = vld [vmem:[%s2312_s1 + $0x180] sm:$0xff]   ;;  %v1790_v52 = vld [vmem:[%s2312_s1 + $0x108] sm:$0xff]   ;;  %v1796_v1 = vld [vmem:[%s2312_s1 + $0x190] sm:$0xff]  }
  0x11   :  { %1567 = vmatpush3.bf16.msra.mxu1 %v1768_v15  ;;  %1504 = vmatprep.subr.bf16.mxu0 %v1769_v16  ;;  %v56_v44 = vld [vmem:[%s2313_s0 + $0x40] sm:$0xff]  ;;  %v1791_v54 = vld [vmem:[%s2312_s1 + $0x1c8] sm:$0xff]   ;;  %v1797_v10 = vld [vmem:[%s2312_s1 + $0x158] sm:$0xff]  }
  0x12   :  { %1568 = vmatprep.subr.bf16.mxu1 %v1770_v17  ;;  %v60_v45 = vld [vmem:[%s2313_s0 + $0x60] sm:$0xff]  ;;  %v1792_v55 = vld [vmem:[%s2312_s1 + $0x188] sm:$0xff]   ;;  %v1798_v11 = vld [vmem:[%s2312_s1 + $0x118] sm:$0xff]  }
  0x13   :  { %v1377_v46 = vcombine.high %v56_v44, %v60_v45  ;;  %v1376_v51 = vcombine.low %v56_v44, %v60_v45  ;;  %v64_v56 = vld [vmem:[%s2313_s0 + $0x80] sm:$0xff]  ;;  %v65_v58 = vld [vmem:[%s2313_s0 + $0x88] sm:$0xff]  ;;  %v1799_v12 = vld [vmem:[%s2312_s1 + $0x1d8] sm:$0xff]  }
  0x14   :  { %1505 = vmatpush3.bf16.msra.mxu0 %v1771_v18  ;;  %v68_v57 = vld [vmem:[%s2313_s0 + $0xa0] sm:$0xff]  ;;  %v69_v59 = vld [vmem:[%s2313_s0 + $0xa8] sm:$0xff]  ;;  %v1800_v13 = vld [vmem:[%s2312_s1 + $0x198] sm:$0xff]  }
  0x15   :  { %1569 = vmatpush3.bf16.msra.mxu1 %v1772_v19  ;;  %1506 = vmatprep.subr.bf16.mxu0 %v1773_v20  ;;  %v1385_v60 = vcombine.high %v64_v56, %v68_v57  ;;  %v1387_v61 = vcombine.high %v65_v58, %v69_v59  ;;  %v1384_v2 = vcombine.low %v64_v56, %v68_v57  ;;  %v72_v3 = vld [vmem:[%s2313_s0 + $0xc0] sm:$0xff]  ;;  %v73_v5 = vld [vmem:[%s2313_s0 + $0xc8] sm:$0xff]  ;;  %v1810_v39 = vld [vmem:[%s2312_s1 + $0x130] sm:$0xff]  }
  0x16   :  { %1570 = vmatprep.subr.bf16.mxu1 %v1774_v21  ;;  %v76_v4 = vld [vmem:[%s2313_s0 + $0xe0] sm:$0xff]  ;;  %v1386_v6 = vcombine.low %v65_v58, %v69_v59  ;;  %v77_v8 = vld [vmem:[%s2313_s0 + $0xe8] sm:$0xff]  ;;  %v1814_v48 = vld [vmem:[%s2312_s1 + $0x138] sm:$0xff]  }
  0x17   :  { %v1393_v7 = vcombine.high %v72_v3, %v76_v4  ;;  %v1395_v9 = vcombine.high %v73_v5, %v77_v8  ;;  %v80_v14 = vld [vmem:[%s2313_s0 + $0x100] sm:$0xff]  ;;  %v81_v16 = vld [vmem:[%s2313_s0 + $0x108] sm:$0xff]  ;;  %v1392_v19 = vcombine.low %v72_v3, %v76_v4  ;;  %v1394_v21 = vcombine.low %v73_v5, %v77_v8  ;;  %v59_v8 = vld [vmem:[%s2313_s0 + $0x58] sm:$0xff] }
  0x18   :  { %1507 = vmatpush3.bf16.msra.mxu0 %v1775_v22  ;;  %v84_v15 = vld [vmem:[%s2313_s0 + $0x120] sm:$0xff]  ;;  %v85_v17 = vld [vmem:[%s2313_s0 + $0x128] sm:$0xff] }
  0x19   :  { %1571 = vmatpush3.bf16.msra.mxu1 %v1776_v23  ;;  %1508 = vmatprep.subr.bf16.mxu0 %v1777_v24  ;;  %v1801_v18 = vld [vmem:[%s2312_s1 + $0x160] sm:$0xff]   ;;  %v1401_v22 = vcombine.high %v80_v14, %v84_v15  ;;  %v1403_v24 = vcombine.high %v81_v16, %v85_v17  ;;  %v1807_v32 = vld [vmem:[%s2312_s1 + $0x1e8] sm:$0xff]   ;;  %v1400_v34 = vcombine.low %v80_v14, %v84_v15  ;;  %v66_v14 = vld [vmem:[%s2313_s0 + $0x90] sm:$0xff] }
  0x1a   :  { %1572 = vmatprep.subr.bf16.mxu1 %v1778_v25  ;;  %v1802_v20 = vld [vmem:[%s2312_s1 + $0x120] sm:$0xff]   ;;  %v1808_v33 = vld [vmem:[%s2312_s1 + $0x1a8] sm:$0xff]   ;;  %v70_v15 = vld [vmem:[%s2313_s0 + $0xb0] sm:$0xff] }
  0x1b   :  { %v1803_v23 = vld [vmem:[%s2312_s1 + $0x1e0] sm:$0xff]   ;;  %v97_v44 = vld [vmem:[%s2313_s0 + $0x188] sm:$0xff] }
  0x1c   :  { %1509 = vmatpush3.bf16.msra.mxu0 %v1779_v26  ;;  %v1804_v25 = vld [vmem:[%s2312_s1 + $0x1a0] sm:$0xff]   ;;  %v101_v45 = vld [vmem:[%s2313_s0 + $0x1a8] sm:$0xff] }
  0x1d   :  { %1573 = vmatpush3.bf16.msra.mxu1 %v1780_v27  ;;  %1510 = vmatprep.subr.bf16.mxu0 %v1781_v28  ;;  %v88_v26 = vld [vmem:[%s2313_s0 + $0x140] sm:$0xff]  ;;  %v1805_v28 = vld [vmem:[%s2312_s1 + $0x168] sm:$0xff]   ;;  %v1418_v59 = vcombine.low %v97_v44, %v101_v45 }
  0x1e   :  { %1574 = vmatprep.subr.bf16.mxu1 %v1782_v29  ;;  %v92_v27 = vld [vmem:[%s2313_s0 + $0x160] sm:$0xff]  ;;  %v89_v29 = vld [vmem:[%s2313_s0 + $0x148] sm:$0xff] }
  0x1f   :  { %v1409_v36 = vcombine.high %v88_v26, %v92_v27  ;;  %v1408_v47 = vcombine.low %v88_v26, %v92_v27  ;;  %v105_v56 = vld [vmem:[%s2313_s0 + $0x1c8] sm:$0xff]  ;;  %v1388_v26 = vcombine.low %v66_v14, %v70_v15 }
  0x20   :  { %1511 = vmatpush3.bf16.msra.mxu0 %v1783_v30  ;;  %v93_v30 = vld [vmem:[%s2313_s0 + $0x168] sm:$0xff] }
  0x21   :  { %1575 = vmatpush3.bf16.msra.mxu1 %v1784_v31  ;;  %1624 = vmatprep.subr.bf16.mxu0 %v1785_v40  ;;  %v1806_v31 = vld [vmem:[%s2312_s1 + $0x128] sm:$0xff]   ;;  %v1411_v37 = vcombine.high %v89_v29, %v93_v30  ;;  %v1811_v40 = vld [vmem:[%s2312_s1 + $0x1f0] sm:$0xff]  }
  0x22   :  { %1688 = vmatprep.subr.bf16.mxu1 %v1787_v42  ;;  %v100_v42 = vld [vmem:[%s2313_s0 + $0x1a0] sm:$0xff]  ;;  %v109_v57 = vld [vmem:[%s2313_s0 + $0x1e8] sm:$0xff] }
  0x23   :  { %977 = vmatmul.mubr.bf16.vlgmr.msra.gmra.mrb[0].mxu0 %v1368_v35  ;;  %v1402_v35 = vcombine.low %v81_v16, %v85_v17  ;;  %v1426_v3 = vcombine.low %v105_v56, %v109_v57  ;;  %v67_v16 = vld [vmem:[%s2313_s0 + $0x98] sm:$0xff] }
  0x24   :  { %1074 = vmatmul.mubr.bf16.vlgmr.msra.gmra.mrb[0].mxu1 %v1370_v38  ;;  %1625 = vmatpush3.bf16.msra.mxu0 %v1786_v41  ;;  %v1809_v38 = vld [vmem:[%s2312_s1 + $0x170] sm:$0xff]   ;;  %v96_v41 = vld [vmem:[%s2313_s0 + $0x180] sm:$0xff]  ;;  %v71_v17 = vld [vmem:[%s2313_s0 + $0xb8] sm:$0xff] }
  0x25   :  { %1689 = vmatpush3.bf16.msra.mxu1 %v1788_v43  ;;  %984 = vmatprep.mubr.bf16.mxu0 %v1377_v46  ;;  %v1812_v43 = vld [vmem:[%s2312_s1 + $0x1b0] sm:$0xff]   ;;  %v1813_v46 = vld [vmem:[%s2312_s1 + $0x178] sm:$0xff]   ;;  %v1416_v58 = vcombine.low %v96_v41, %v100_v42  ;;  %v1390_v27 = vcombine.low %v67_v16, %v71_v17 }
  0x26   :  { %1081 = vmatprep.mubr.bf16.mxu1 %v1379_v49  ;;  %1626 = vmatprep.subr.bf16.mxu0 %v1789_v50  ;;  %v1410_v49 = vcombine.low %v89_v29, %v93_v30  ;;  %v1417_v50 = vcombine.high %v96_v41, %v100_v42  ;;  %v82_v30 = vld [vmem:[%s2313_s0 + $0x110] sm:$0xff]  ;;  %v95_v41 = vld [vmem:[%s2313_s0 + $0x178] sm:$0xff] }
  0x27   :  { %1690 = vmatprep.subr.bf16.mxu1 %v1791_v54  ;;  %v104_v54 = vld [vmem:[%s2313_s0 + $0x1c0] sm:$0xff] }
  0x28   :  { %1627 = vmatpush3.bf16.msra.mxu0 %v1790_v52  ;;  %v1419_v52 = vcombine.high %v97_v44, %v101_v45 }
  0x29   :  { %1691 = vmatpush3.bf16.msra.mxu1 %v1792_v55  ;;  %1628 = vmatprep.subr.bf16.mxu0 %v1793_v62  ;;  %v108_v55 = vld [vmem:[%s2313_s0 + $0x1e0] sm:$0xff]  ;;  %v50_v62 = vld [vmem:[%s2313_s0 + $0x10] sm:$0xff] }
  0x2a   :  { %1692 = vmatprep.subr.bf16.mxu1 %v1795_v0  ;;  %v51_v0 = vld [vmem:[%s2313_s0 + $0x18] sm:$0xff] }
  0x2b   :  { %985 = vmatmul.mubr.bf16.gmra.mrb[4].mxu0 %v1376_v51  ;;  %v1815_v51 = vld [vmem:[%s2312_s1 + $0x1f8] sm:$0xff]  }
  0x2c   :  { %1082 = vmatmul.mubr.bf16.gmra.mrb[4].mxu1 %v1378_v53  ;;  %992 = vmatprep.mubr.bf16.mxu0 %v1385_v60  ;;  %v1816_v53 = vld [vmem:[%s2312_s1 + $0x1b8] sm:$0xff]   ;;  %v1425_v60 = vcombine.high %v104_v54, %v108_v55 }
  0x2d   :  { %1089 = vmatprep.mubr.bf16.mxu1 %v1387_v61  ;;  %1629 = vmatpush3.bf16.msra.mxu0 %v1794_v63  ;;  %v1427_v61 = vcombine.high %v105_v56, %v109_v57  ;;  %v54_v63 = vld [vmem:[%s2313_s0 + $0x30] sm:$0xff]  ;;  %v107_v56 = vld [vmem:[%s2313_s0 + $0x1d8] sm:$0xff] }
  0x2e   :  { %1693 = vmatpush3.bf16.msra.mxu1 %v1796_v1  ;;  %1630 = vmatprep.subr.bf16.mxu0 %v1797_v10  ;;  %v55_v1 = vld [vmem:[%s2313_s0 + $0x38] sm:$0xff]  ;;  %v1373_v4 = vcombine.high %v50_v62, %v54_v63  ;;  %v1372_v10 = vcombine.low %v50_v62, %v54_v63 }
  0x2f   :  { %1694 = vmatprep.subr.bf16.mxu1 %v1799_v12  ;;  %v1375_v5 = vcombine.high %v51_v0, %v55_v1  ;;  %v111_v57 = vld [vmem:[%s2313_s0 + $0x1f8] sm:$0xff] }
  0x30   :  { %v1430_v63 = vcombine.low %v107_v56, %v111_v57 }
  0x31   :  { %1631 = vmatpush3.bf16.msra.mxu0 %v1798_v11  ;;  %v1374_v11 = vcombine.low %v51_v0, %v55_v1 }
  0x32   :  { %1695 = vmatpush3.bf16.msra.mxu1 %v1800_v13  ;;  %1632 = vmatprep.subr.bf16.mxu0 %v1801_v18 }
  0x33   :  { %993 = vmatmul.mubr.bf16.gmra.mrb[8].mxu0 %v1384_v2  ;;  %1696 = vmatprep.subr.bf16.mxu1 %v1803_v23  ;;  %v1424_v2 = vcombine.low %v104_v54, %v108_v55  ;;  %v78_v23 = vld [vmem:[%s2313_s0 + $0xf0] sm:$0xff] }
  0x34   :  { %1090 = vmatmul.mubr.bf16.gmra.mrb[8].mxu1 %v1386_v6  ;;  %1000 = vmatprep.mubr.bf16.mxu0 %v1393_v7  ;;  %v58_v6 = vld [vmem:[%s2313_s0 + $0x50] sm:$0xff] }
  0x35   :  { %1097 = vmatprep.mubr.bf16.mxu1 %v1395_v9  ;;  %1633 = vmatpush3.bf16.msra.mxu0 %v1802_v20  ;;  %v62_v7 = vld [vmem:[%s2313_s0 + $0x70] sm:$0xff]  ;;  %v63_v9 = vld [vmem:[%s2313_s0 + $0x78] sm:$0xff]  ;;  %v1389_v20 = vcombine.high %v66_v14, %v70_v15 }
  0x36   :  { %1697 = vmatpush3.bf16.msra.mxu1 %v1804_v25  ;;  %1634 = vmatprep.subr.bf16.mxu0 %v1805_v28  ;;  %v1381_v12 = vcombine.high %v58_v6, %v62_v7  ;;  %v1383_v13 = vcombine.high %v59_v8, %v63_v9  ;;  %v1380_v18 = vcombine.low %v58_v6, %v62_v7  ;;  %v79_v25 = vld [vmem:[%s2313_s0 + $0xf8] sm:$0xff]  ;;  %v106_v54 = vld [vmem:[%s2313_s0 + $0x1d0] sm:$0xff] }
  0x37   :  { %1698 = vmatprep.subr.bf16.mxu1 %v1807_v32  ;;  %v83_v32 = vld [vmem:[%s2313_s0 + $0x118] sm:$0xff]  ;;  %v110_v55 = vld [vmem:[%s2313_s0 + $0x1f0] sm:$0xff] }
  0x38   :  { %v1428_v62 = vcombine.low %v106_v54, %v110_v55 }
  0x39   :  { %1635 = vmatpush3.bf16.msra.mxu0 %v1806_v31  ;;  %v86_v31 = vld [vmem:[%s2313_s0 + $0x130] sm:$0xff] }
  0x3a   :  { %1699 = vmatpush3.bf16.msra.mxu1 %v1808_v33  ;;  %1636 = vmatprep.subr.bf16.mxu0 %v1809_v38  ;;  %v87_v33 = vld [vmem:[%s2313_s0 + $0x138] sm:$0xff]  ;;  %v90_v38 = vld [vmem:[%s2313_s0 + $0x150] sm:$0xff]  ;;  %v1404_v42 = vcombine.low %v82_v30, %v86_v31 }
  0x3b   :  { %1001 = vmatmul.mubr.bf16.gmra.mrb[12].mxu0 %v1392_v19  ;;  %1700 = vmatprep.subr.bf16.mxu1 %v1811_v40  ;;  %v1382_v19 = vcombine.low %v59_v8, %v63_v9  ;;  %v91_v40 = vld [vmem:[%s2313_s0 + $0x158] sm:$0xff] }
  0x3c   :  { %1098 = vmatmul.mubr.bf16.gmra.mrb[12].mxu1 %v1394_v21  ;;  %1008 = vmatprep.mubr.bf16.mxu0 %v1401_v22  ;;  %v1391_v21 = vcombine.high %v67_v16, %v71_v17  ;;  %v74_v22 = vld [vmem:[%s2313_s0 + $0xd0] sm:$0xff]  ;;  %v1415_v45 = vcombine.high %v91_v40, %v95_v41 }
  0x3d   :  { %1105 = vmatprep.mubr.bf16.mxu1 %v1403_v24  ;;  %1637 = vmatpush3.bf16.msra.mxu0 %v1810_v39  ;;  %v75_v24 = vld [vmem:[%s2313_s0 + $0xd8] sm:$0xff]  ;;  %v1397_v28 = vcombine.high %v74_v22, %v78_v23  ;;  %v94_v39 = vld [vmem:[%s2313_s0 + $0x170] sm:$0xff] }
  0x3e   :  { %1701 = vmatpush3.bf16.msra.mxu1 %v1812_v43  ;;  %1638 = vmatprep.subr.bf16.mxu0 %v1813_v46  ;;  %v1399_v29 = vcombine.high %v75_v24, %v79_v25  ;;  %v1406_v43 = vcombine.low %v83_v32, %v87_v33  ;;  %v1413_v44 = vcombine.high %v90_v38, %v94_v39  ;;  %v98_v46 = vld [vmem:[%s2313_s0 + $0x190] sm:$0xff] }
  0x3f   :  { %1702 = vmatprep.subr.bf16.mxu1 %v1815_v51  ;;  %v1414_v51 = vcombine.low %v91_v40, %v95_v41 }
  0x41   :  { %1639 = vmatpush3.bf16.msra.mxu0 %v1814_v48  ;;  %v99_v48 = vld [vmem:[%s2313_s0 + $0x198] sm:$0xff] }
  0x42   :  { %1703 = vmatpush3.bf16.msra.mxu1 %v1816_v53 }
  0x43   :  { %1009 = vmatmul.mubr.bf16.gmra.mrb[16].mxu0 %v1400_v34  ;;  %v1396_v34 = vcombine.low %v74_v22, %v78_v23 }
  0x44   :  { %1106 = vmatmul.mubr.bf16.gmra.mrb[16].mxu1 %v1402_v35  ;;  %1016 = vmatprep.mubr.bf16.mxu0 %v1409_v36  ;;  %v1398_v35 = vcombine.low %v75_v24, %v79_v25  ;;  %v1405_v36 = vcombine.high %v82_v30, %v86_v31 }
  0x45   :  { %1113 = vmatprep.mubr.bf16.mxu1 %v1411_v37  ;;  %v1407_v37 = vcombine.high %v83_v32, %v87_v33 }
  0x4b   :  { %1017 = vmatmul.mubr.bf16.gmra.mrb[20].mxu0 %v1408_v47  ;;  %v102_v47 = vld [vmem:[%s2313_s0 + $0x1b0] sm:$0xff] }
  0x4c   :  { %1114 = vmatmul.mubr.bf16.gmra.mrb[20].mxu1 %v1410_v49  ;;  %1024 = vmatprep.mubr.bf16.mxu0 %v1417_v50  ;;  %v103_v49 = vld [vmem:[%s2313_s0 + $0x1b8] sm:$0xff]  ;;  %v1412_v50 = vcombine.low %v90_v38, %v94_v39 }
  0x4d   :  { %1121 = vmatprep.mubr.bf16.mxu1 %v1419_v52  ;;  %v1421_v52 = vcombine.high %v98_v46, %v102_v47  ;;  %v1423_v53 = vcombine.high %v99_v48, %v103_v49 }
  0x53   :  { %1025 = vmatmul.mubr.bf16.gmra.mrb[24].mxu0 %v1416_v58  ;;  %v1420_v58 = vcombine.low %v98_v46, %v102_v47 }
  0x54   :  { %1122 = vmatmul.mubr.bf16.gmra.mrb[24].mxu1 %v1418_v59  ;;  %1032 = vmatprep.mubr.bf16.mxu0 %v1425_v60  ;;  %v1422_v59 = vcombine.low %v99_v48, %v103_v49  ;;  %v1429_v60 = vcombine.high %v106_v54, %v110_v55 }
  0x55   :  { %1129 = vmatprep.mubr.bf16.mxu1 %v1427_v61  ;;  %v1431_v61 = vcombine.high %v107_v56, %v111_v57 }
  0x5b   :  { %1033 = vmatmul.mubr.bf16.gmra.mrb[28].mxu0 %v1424_v2 }
  0x5c   :  { %1130 = vmatmul.mubr.bf16.gmra.mrb[28].mxu1 %v1426_v3  ;;  %1170 = vmatprep.mubr.bf16.mxu0 %v1373_v4 }
  0x5d   :  { %1267 = vmatprep.mubr.bf16.mxu1 %v1375_v5 }
  0x63   :  { %1171 = vmatmul.mubr.bf16.vlgmr.msra.gmra.mrb[32].mxu0 %v1372_v10 }
  0x64   :  { %1268 = vmatmul.mubr.bf16.vlgmr.msra.gmra.mrb[32].mxu1 %v1374_v11  ;;  %1178 = vmatprep.mubr.bf16.mxu0 %v1381_v12 }
  0x65   :  { %1275 = vmatprep.mubr.bf16.mxu1 %v1383_v13 }
  0x6b   :  { %1179 = vmatmul.mubr.bf16.gmra.mrb[36].mxu0 %v1380_v18 }
  0x6c   :  { %1276 = vmatmul.mubr.bf16.gmra.mrb[36].mxu1 %v1382_v19  ;;  %1186 = vmatprep.mubr.bf16.mxu0 %v1389_v20 }
  0x6d   :  { %1283 = vmatprep.mubr.bf16.mxu1 %v1391_v21 }
  0x73   :  { %1187 = vmatmul.mubr.bf16.gmra.mrb[40].mxu0 %v1388_v26 }
  0x74   :  { %1284 = vmatmul.mubr.bf16.gmra.mrb[40].mxu1 %v1390_v27  ;;  %1194 = vmatprep.mubr.bf16.mxu0 %v1397_v28 }
  0x75   :  { %1291 = vmatprep.mubr.bf16.mxu1 %v1399_v29 }
  0x7b   :  { %1195 = vmatmul.mubr.bf16.gmra.mrb[44].mxu0 %v1396_v34 }
  0x7c   :  { %1292 = vmatmul.mubr.bf16.gmra.mrb[44].mxu1 %v1398_v35  ;;  %1202 = vmatprep.mubr.bf16.mxu0 %v1405_v36 }
  0x7d   :  { %1299 = vmatprep.mubr.bf16.mxu1 %v1407_v37 }
  0x83   :  { %1203 = vmatmul.mubr.bf16.gmra.mrb[48].mxu0 %v1404_v42 }
  0x84   :  { %1300 = vmatmul.mubr.bf16.gmra.mrb[48].mxu1 %v1406_v43  ;;  %1210 = vmatprep.mubr.bf16.mxu0 %v1413_v44 }
  0x85   :  { %1307 = vmatprep.mubr.bf16.mxu1 %v1415_v45 }
  0x8b   :  { %1211 = vmatmul.mubr.bf16.gmra.mrb[52].mxu0 %v1412_v50 }
  0x8c   :  { %1308 = vmatmul.mubr.bf16.gmra.mrb[52].mxu1 %v1414_v51  ;;  %1218 = vmatprep.mubr.bf16.mxu0 %v1421_v52 }
  0x8d   :  { %1315 = vmatprep.mubr.bf16.mxu1 %v1423_v53 }
  0x93   :  { %1219 = vmatmul.mubr.bf16.gmra.mrb[56].mxu0 %v1420_v58 }
  0x94   :  { %1316 = vmatmul.mubr.bf16.gmra.mrb[56].mxu1 %v1422_v59  ;;  %1226 = vmatprep.mubr.bf16.mxu0 %v1429_v60 }
  0x95   :  { %1323 = vmatprep.mubr.bf16.mxu1 %v1431_v61 }
  0x9b   :  { %1227 = vmatmul.mubr.bf16.gmra.mrb[60].mxu0 %v1428_v62 }
  0x9c   :  { %1324 = vmatmul.mubr.bf16.gmra.mrb[60].mxu1 %v1430_v63 }
  0xf6   :  { %v1512_v0 = vpop.f32.mrb[0].mxu0 }
  0xf7   :  { %v1576_v1 = vpop.f32.mrb[0].mxu1  ;;  %v1513_v2 = vpop.f32.mrb[1].mxu0 }
  0xf8   :  { %v1514_v3 = vadd.f32 %v1513_v2, %v1512_v0  ;;  %v1577_v4 = vpop.f32.mrb[1].mxu1  ;;  %v1515_v5 = vpop.f32.mrb[2].mxu0 }
  0xf9   :  { %v1578_v6 = vadd.f32 %v1577_v4, %v1576_v1  ;;  %v1579_v7 = vpop.f32.mrb[2].mxu1  ;;  %v1516_v8 = vpop.f32.mrb[3].mxu0 }
  0xfa   :  { %v1517_v9 = vadd.f32 %v1516_v8, %v1515_v5  ;;  %v1580_v10 = vpop.f32.mrb[3].mxu1 }
  0xfb   :  { %v2216_v11 = vadd.f32 %v1578_v6, %v1514_v3  ;;  %v1581_v12 = vadd.f32 %v1580_v10, %v1579_v7 }
  0xfd   :  { %v2218_v13 = vadd.f32 %v1581_v12, %v1517_v9 }
  0xfe   :  { %v1518_v14 = vpop.f32.mrb[4].mxu0 }
  0xff   :  { %v1582_v15 = vpop.f32.mrb[4].mxu1  ;;  %v1519_v16 = vpop.f32.mrb[5].mxu0 }
 0x100   :  { %v1520_v17 = vadd.f32 %v1519_v16, %v1518_v14  ;;  %v1583_v18 = vpop.f32.mrb[5].mxu1  ;;  %v1521_v19 = vpop.f32.mrb[6].mxu0 }
 0x101   :  { %v1584_v20 = vadd.f32 %v1583_v18, %v1582_v15  ;;  %v1585_v21 = vpop.f32.mrb[6].mxu1  ;;  %v1522_v22 = vpop.f32.mrb[7].mxu0 }
 0x102   :  { %v1523_v23 = vadd.f32 %v1522_v22, %v1521_v19  ;;  %v1586_v24 = vpop.f32.mrb[7].mxu1 }
 0x103   :  { %v2220_v25 = vadd.f32 %v1584_v20, %v1520_v17  ;;  %v1587_v26 = vadd.f32 %v1586_v24, %v1585_v21 }
 0x105   :  { %v2222_v27 = vadd.f32 %v1587_v26, %v1523_v23 }
 0x106   :  { %v1524_v28 = vpop.f32.mrb[8].mxu0 }
 0x107   :  { %v1588_v29 = vpop.f32.mrb[8].mxu1  ;;  %v1525_v30 = vpop.f32.mrb[9].mxu0 }
 0x108   :  { %v1526_v31 = vadd.f32 %v1525_v30, %v1524_v28  ;;  %v1589_v32 = vpop.f32.mrb[9].mxu1  ;;  %v1527_v33 = vpop.f32.mrb[10].mxu0 }
 0x109   :  { %v1590_v34 = vadd.f32 %v1589_v32, %v1588_v29  ;;  %v1591_v35 = vpop.f32.mrb[10].mxu1  ;;  %v1528_v36 = vpop.f32.mrb[11].mxu0 }
 0x10a   :  { %v1529_v37 = vadd.f32 %v1528_v36, %v1527_v33  ;;  %v1592_v38 = vpop.f32.mrb[11].mxu1 }
 0x10b   :  { %v2224_v39 = vadd.f32 %v1590_v34, %v1526_v31  ;;  %v1593_v40 = vadd.f32 %v1592_v38, %v1591_v35 }
 0x10d   :  { %v2226_v41 = vadd.f32 %v1593_v40, %v1529_v37 }
 0x10e   :  { %v1530_v42 = vpop.f32.mrb[12].mxu0 }
 0x10f   :  { %v1594_v43 = vpop.f32.mrb[12].mxu1  ;;  %v1531_v44 = vpop.f32.mrb[13].mxu0 }
 0x110   :  { %v1532_v45 = vadd.f32 %v1531_v44, %v1530_v42  ;;  %v1595_v46 = vpop.f32.mrb[13].mxu1  ;;  %v1533_v47 = vpop.f32.mrb[14].mxu0 }
 0x111   :  { %v1596_v48 = vadd.f32 %v1595_v46, %v1594_v43  ;;  %v1597_v49 = vpop.f32.mrb[14].mxu1  ;;  %v1534_v50 = vpop.f32.mrb[15].mxu0 }
 0x112   :  { %v1535_v51 = vadd.f32 %v1534_v50, %v1533_v47  ;;  %v1598_v52 = vpop.f32.mrb[15].mxu1 }
 0x113   :  { %v2228_v53 = vadd.f32 %v1596_v48, %v1532_v45  ;;  %v1599_v54 = vadd.f32 %v1598_v52, %v1597_v49 }
 0x115   :  { %v2230_v55 = vadd.f32 %v1599_v54, %v1535_v51 }
 0x116   :  { %v1536_v56 = vpop.f32.mrb[16].mxu0 }
 0x117   :  { %v1600_v57 = vpop.f32.mrb[16].mxu1  ;;  %v1537_v58 = vpop.f32.mrb[17].mxu0 }
 0x118   :  { %v1538_v59 = vadd.f32 %v1537_v58, %v1536_v56  ;;  %v1601_v60 = vpop.f32.mrb[17].mxu1  ;;  %v1539_v61 = vpop.f32.mrb[18].mxu0 }
 0x119   :  { %v1602_v62 = vadd.f32 %v1601_v60, %v1600_v57  ;;  %v1603_v63 = vpop.f32.mrb[18].mxu1  ;;  %v1540_v0 = vpop.f32.mrb[19].mxu0 }
 0x11a   :  { %v1541_v1 = vadd.f32 %v1540_v0, %v1539_v61  ;;  %v1604_v2 = vpop.f32.mrb[19].mxu1 }
 0x11b   :  { %v2232_v3 = vadd.f32 %v1602_v62, %v1538_v59  ;;  %v1605_v4 = vadd.f32 %v1604_v2, %v1603_v63 }
 0x11d   :  { %v2234_v5 = vadd.f32 %v1605_v4, %v1541_v1 }
 0x11e   :  { %v1542_v6 = vpop.f32.mrb[20].mxu0 }
 0x11f   :  { %v1606_v7 = vpop.f32.mrb[20].mxu1  ;;  %v1543_v8 = vpop.f32.mrb[21].mxu0 }
 0x120   :  { %v1544_v9 = vadd.f32 %v1543_v8, %v1542_v6  ;;  %v1607_v10 = vpop.f32.mrb[21].mxu1  ;;  %v1545_v12 = vpop.f32.mrb[22].mxu0 }
 0x121   :  { %v1608_v14 = vadd.f32 %v1607_v10, %v1606_v7  ;;  %v1609_v15 = vpop.f32.mrb[22].mxu1  ;;  %v1546_v16 = vpop.f32.mrb[23].mxu0 }
 0x122   :  { %v1547_v17 = vadd.f32 %v1546_v16, %v1545_v12  ;;  %v1610_v18 = vpop.f32.mrb[23].mxu1 }
 0x123   :  { %v2236_v19 = vadd.f32 %v1608_v14, %v1544_v9  ;;  %v1611_v20 = vadd.f32 %v1610_v18, %v1609_v15 }
 0x125   :  { %v2238_v21 = vadd.f32 %v1611_v20, %v1547_v17 }
 0x126   :  { %v1548_v22 = vpop.f32.mrb[24].mxu0 }
 0x127   :  { %v1612_v23 = vpop.f32.mrb[24].mxu1  ;;  %v1549_v24 = vpop.f32.mrb[25].mxu0 }
 0x128   :  { %v1550_v26 = vadd.f32 %v1549_v24, %v1548_v22  ;;  %v1613_v28 = vpop.f32.mrb[25].mxu1  ;;  %v1551_v29 = vpop.f32.mrb[26].mxu0 }
 0x129   :  { %v1614_v30 = vadd.f32 %v1613_v28, %v1612_v23  ;;  %v1615_v31 = vpop.f32.mrb[26].mxu1  ;;  %v1552_v32 = vpop.f32.mrb[27].mxu0 }
 0x12a   :  { %v1553_v33 = vadd.f32 %v1552_v32, %v1551_v29  ;;  %v1616_v34 = vpop.f32.mrb[27].mxu1 }
 0x12b   :  { %v2240_v35 = vadd.f32 %v1614_v30, %v1550_v26  ;;  %v1617_v36 = vadd.f32 %v1616_v34, %v1615_v31 }
 0x12d   :  { %v2242_v37 = vadd.f32 %v1617_v36, %v1553_v33 }
 0x12e   :  { %v1554_v38 = vpop.f32.mrb[28].mxu0 }
 0x12f   :  { %v1618_v40 = vpop.f32.mrb[28].mxu1  ;;  %v1555_v42 = vpop.f32.mrb[29].mxu0 }
 0x130   :  { %v1556_v43 = vadd.f32 %v1555_v42, %v1554_v38  ;;  %v1619_v44 = vpop.f32.mrb[29].mxu1  ;;  %v1557_v45 = vpop.f32.mrb[30].mxu0 }
 0x131   :  { %v1620_v46 = vadd.f32 %v1619_v44, %v1618_v40  ;;  %v1621_v47 = vpop.f32.mrb[30].mxu1  ;;  %v1558_v48 = vpop.f32.mrb[31].mxu0 }
 0x132   :  { %v1559_v49 = vadd.f32 %v1558_v48, %v1557_v45  ;;  %v1622_v50 = vpop.f32.mrb[31].mxu1 }
 0x133   :  { %v2244_v51 = vadd.f32 %v1620_v46, %v1556_v43  ;;  %v1623_v52 = vadd.f32 %v1622_v50, %v1621_v47 }
 0x135   :  { %v2246_v54 = vadd.f32 %v1623_v52, %v1559_v49 }
 0x136   :  { %v1640_v56 = vpop.f32.mrb[32].mxu0 }
 0x137   :  { %v1704_v57 = vpop.f32.mrb[32].mxu1  ;;  %v1641_v58 = vpop.f32.mrb[33].mxu0 }
 0x138   :  { %v1642_v59 = vadd.f32 %v1641_v58, %v1640_v56  ;;  %v1705_v60 = vpop.f32.mrb[33].mxu1  ;;  %v1643_v61 = vpop.f32.mrb[34].mxu0 }
 0x139   :  { %v1706_v62 = vadd.f32 %v1705_v60, %v1704_v57  ;;  %v1707_v63 = vpop.f32.mrb[34].mxu1  ;;  %v1644_v0 = vpop.f32.mrb[35].mxu0 }
 0x13a   :  { %v1173_v1 = vadd.f32 %v1642_v59, %v2216_v11  ;;  %v1645_v2 = vadd.f32 %v1644_v0, %v1643_v61  ;;  %v1708_v4 = vpop.f32.mrb[35].mxu1 }
 0x13b   :  { %v1709_v6 = vadd.f32 %v1708_v4, %v1707_v63 }
 0x13c   :  { %v1270_v7 = vadd.f32 %v1706_v62, %v1173_v1  ;;  %v1176_v8 = vadd.f32 %v1645_v2, %v2218_v13 }
 0x13e   :  { %v1273_v9 = vadd.f32 %v1709_v6, %v1176_v8  ;;  %v1646_v10 = vpop.f32.mrb[36].mxu0  ;;  %1348 = vst [vmem:[%s2314_s2] sm:$0xff] %v1270_v7 }
 0x13f   :  { %v1710_v12 = vpop.f32.mrb[36].mxu1  ;;  %v1647_v14 = vpop.f32.mrb[37].mxu0 }
 0x140   :  { %v1648_v15 = vadd.f32 %v1647_v14, %v1646_v10  ;;  %v1711_v16 = vpop.f32.mrb[37].mxu1  ;;  %v1649_v17 = vpop.f32.mrb[38].mxu0  ;;  %1349 = vst [vmem:[%s2314_s2 + $0x8] sm:$0xff] %v1273_v9 }
 0x141   :  { %v1712_v18 = vadd.f32 %v1711_v16, %v1710_v12  ;;  %v1713_v20 = vpop.f32.mrb[38].mxu1  ;;  %v1650_v11 = vpop.f32.mrb[39].mxu0 }
 0x142   :  { %v1181_v13 = vadd.f32 %v1648_v15, %v2220_v25  ;;  %v1651_v22 = vadd.f32 %v1650_v11, %v1649_v17  ;;  %v1714_v23 = vpop.f32.mrb[39].mxu1 }
 0x143   :  { %v1715_v24 = vadd.f32 %v1714_v23, %v1713_v20 }
 0x144   :  { %v1278_v26 = vadd.f32 %v1712_v18, %v1181_v13  ;;  %v1184_v28 = vadd.f32 %v1651_v22, %v2222_v27 }
 0x146   :  { %v1281_v29 = vadd.f32 %v1715_v24, %v1184_v28  ;;  %v1652_v30 = vpop.f32.mrb[40].mxu0  ;;  %1350 = vst [vmem:[%s2314_s2 + $0x10] sm:$0xff] %v1278_v26 }
 0x147   :  { %v1716_v31 = vpop.f32.mrb[40].mxu1  ;;  %v1653_v32 = vpop.f32.mrb[41].mxu0 }
 0x148   :  { %v1654_v33 = vadd.f32 %v1653_v32, %v1652_v30  ;;  %v1717_v34 = vpop.f32.mrb[41].mxu1  ;;  %v1655_v36 = vpop.f32.mrb[42].mxu0  ;;  %1351 = vst [vmem:[%s2314_s2 + $0x18] sm:$0xff] %v1281_v29 }
 0x149   :  { %v1718_v38 = vadd.f32 %v1717_v34, %v1716_v31  ;;  %v1719_v40 = vpop.f32.mrb[42].mxu1  ;;  %v1656_v25 = vpop.f32.mrb[43].mxu0 }
 0x14a   :  { %v1189_v27 = vadd.f32 %v1654_v33, %v2224_v39  ;;  %v1657_v42 = vadd.f32 %v1656_v25, %v1655_v36  ;;  %v1720_v43 = vpop.f32.mrb[43].mxu1 }
 0x14b   :  { %v1721_v44 = vadd.f32 %v1720_v43, %v1719_v40 }
 0x14c   :  { %v1286_v45 = vadd.f32 %v1718_v38, %v1189_v27  ;;  %v1192_v46 = vadd.f32 %v1657_v42, %v2226_v41 }
 0x14e   :  { %v1289_v47 = vadd.f32 %v1721_v44, %v1192_v46  ;;  %v1658_v48 = vpop.f32.mrb[44].mxu0  ;;  %1352 = vst [vmem:[%s2314_s2 + $0x20] sm:$0xff] %v1286_v45 }
 0x14f   :  { %v1722_v49 = vpop.f32.mrb[44].mxu1  ;;  %v1659_v50 = vpop.f32.mrb[45].mxu0 }
 0x150   :  { %v1660_v52 = vadd.f32 %v1659_v50, %v1658_v48  ;;  %v1723_v56 = vpop.f32.mrb[45].mxu1  ;;  %v1661_v57 = vpop.f32.mrb[46].mxu0  ;;  %1353 = vst [vmem:[%s2314_s2 + $0x28] sm:$0xff] %v1289_v47 }
 0x151   :  { %v1724_v58 = vadd.f32 %v1723_v56, %v1722_v49  ;;  %v1725_v59 = vpop.f32.mrb[46].mxu1  ;;  %v1662_v39 = vpop.f32.mrb[47].mxu0 }
 0x152   :  { %v1197_v41 = vadd.f32 %v1660_v52, %v2228_v53  ;;  %v1663_v60 = vadd.f32 %v1662_v39, %v1661_v57  ;;  %v1726_v61 = vpop.f32.mrb[47].mxu1 }
 0x153   :  { %v1727_v62 = vadd.f32 %v1726_v61, %v1725_v59 }
 0x154   :  { %v1294_v63 = vadd.f32 %v1724_v58, %v1197_v41  ;;  %v1200_v0 = vadd.f32 %v1663_v60, %v2230_v55 }
 0x156   :  { %v1297_v1 = vadd.f32 %v1727_v62, %v1200_v0  ;;  %v1664_v2 = vpop.f32.mrb[48].mxu0  ;;  %1354 = vst [vmem:[%s2314_s2 + $0x30] sm:$0xff] %v1294_v63 }
 0x157   :  { %v1728_v4 = vpop.f32.mrb[48].mxu1  ;;  %v1665_v6 = vpop.f32.mrb[49].mxu0 }
 0x158   :  { %v1666_v7 = vadd.f32 %v1665_v6, %v1664_v2  ;;  %v1729_v8 = vpop.f32.mrb[49].mxu1  ;;  %v1667_v9 = vpop.f32.mrb[50].mxu0  ;;  %1355 = vst [vmem:[%s2314_s2 + $0x38] sm:$0xff] %v1297_v1 }
 0x159   :  { %v1730_v10 = vadd.f32 %v1729_v8, %v1728_v4  ;;  %v1731_v12 = vpop.f32.mrb[50].mxu1  ;;  %v1668_v53 = vpop.f32.mrb[51].mxu0 }
 0x15a   :  { %v1205_v55 = vadd.f32 %v1666_v7, %v2232_v3  ;;  %v1669_v14 = vadd.f32 %v1668_v53, %v1667_v9  ;;  %v1732_v15 = vpop.f32.mrb[51].mxu1 }
 0x15b   :  { %v1733_v16 = vadd.f32 %v1732_v15, %v1731_v12 }
 0x15c   :  { %v1302_v17 = vadd.f32 %v1730_v10, %v1205_v55  ;;  %v1208_v18 = vadd.f32 %v1669_v14, %v2234_v5 }
 0x15e   :  { %v1305_v20 = vadd.f32 %v1733_v16, %v1208_v18  ;;  %v1670_v11 = vpop.f32.mrb[52].mxu0  ;;  %1356 = vst [vmem:[%s2314_s2 + $0x40] sm:$0xff] %v1302_v17 }
 0x15f   :  { %v1734_v13 = vpop.f32.mrb[52].mxu1  ;;  %v1671_v22 = vpop.f32.mrb[53].mxu0 }
 0x160   :  { %v1672_v23 = vadd.f32 %v1671_v22, %v1670_v11  ;;  %v1735_v24 = vpop.f32.mrb[53].mxu1  ;;  %v1673_v26 = vpop.f32.mrb[54].mxu0  ;;  %1357 = vst [vmem:[%s2314_s2 + $0x48] sm:$0xff] %v1305_v20 }
 0x161   :  { %v1736_v28 = vadd.f32 %v1735_v24, %v1734_v13  ;;  %v1737_v29 = vpop.f32.mrb[54].mxu1  ;;  %v1674_v3 = vpop.f32.mrb[55].mxu0 }
 0x162   :  { %v1213_v5 = vadd.f32 %v1672_v23, %v2236_v19  ;;  %v1675_v30 = vadd.f32 %v1674_v3, %v1673_v26  ;;  %v1738_v31 = vpop.f32.mrb[55].mxu1 }
 0x163   :  { %v1739_v32 = vadd.f32 %v1738_v31, %v1737_v29 }
 0x164   :  { %v1310_v33 = vadd.f32 %v1736_v28, %v1213_v5  ;;  %v1216_v34 = vadd.f32 %v1675_v30, %v2238_v21 }
 0x166   :  { %v1313_v36 = vadd.f32 %v1739_v32, %v1216_v34  ;;  %v1676_v38 = vpop.f32.mrb[56].mxu0  ;;  %1358 = vst [vmem:[%s2314_s2 + $0x50] sm:$0xff] %v1310_v33 }
 0x167   :  { %v1740_v40 = vpop.f32.mrb[56].mxu1  ;;  %v1677_v25 = vpop.f32.mrb[57].mxu0 }
 0x168   :  { %v1678_v27 = vadd.f32 %v1677_v25, %v1676_v38  ;;  %v1741_v42 = vpop.f32.mrb[57].mxu1  ;;  %v1679_v43 = vpop.f32.mrb[58].mxu0  ;;  %1359 = vst [vmem:[%s2314_s2 + $0x58] sm:$0xff] %v1313_v36 }
 0x169   :  { %v1742_v44 = vadd.f32 %v1741_v42, %v1740_v40  ;;  %v1743_v45 = vpop.f32.mrb[58].mxu1  ;;  %v1680_v19 = vpop.f32.mrb[59].mxu0 }
 0x16a   :  { %v1221_v21 = vadd.f32 %v1678_v27, %v2240_v35  ;;  %v1681_v46 = vadd.f32 %v1680_v19, %v1679_v43  ;;  %v1744_v47 = vpop.f32.mrb[59].mxu1 }
 0x16b   :  { %v1745_v48 = vadd.f32 %v1744_v47, %v1743_v45 }
 0x16c   :  { %v1318_v49 = vadd.f32 %v1742_v44, %v1221_v21  ;;  %v1224_v50 = vadd.f32 %v1681_v46, %v2242_v37 }
 0x16e   :  { %v1321_v52 = vadd.f32 %v1745_v48, %v1224_v50  ;;  %v1682_v56 = vpop.f32.mrb[60].mxu0  ;;  %1360 = vst [vmem:[%s2314_s2 + $0x60] sm:$0xff] %v1318_v49 }
 0x16f   :  { %v1746_v57 = vpop.f32.mrb[60].mxu1  ;;  %v1683_v58 = vpop.f32.mrb[61].mxu0 }
 0x170   :  { %v1684_v59 = vadd.f32 %v1683_v58, %v1682_v56  ;;  %v1747_v39 = vpop.f32.mrb[61].mxu1  ;;  %v1685_v41 = vpop.f32.mrb[62].mxu0  ;;  %1361 = vst [vmem:[%s2314_s2 + $0x68] sm:$0xff] %v1321_v52 }
 0x171   :  { %v1748_v60 = vadd.f32 %v1747_v39, %v1746_v57  ;;  %v1749_v61 = vpop.f32.mrb[62].mxu1  ;;  %v1686_v35 = vpop.f32.mrb[63].mxu0 }
 0x172   :  { %v1229_v37 = vadd.f32 %v1684_v59, %v2244_v51  ;;  %v1687_v62 = vadd.f32 %v1686_v35, %v1685_v41  ;;  %v1750_v63 = vpop.f32.mrb[63].mxu1 }
 0x173   :  { %v1751_v0 = vadd.f32 %v1750_v63, %v1749_v61 }
 0x174   :  { %v1326_v1 = vadd.f32 %v1748_v60, %v1229_v37  ;;  %v1232_v2 = vadd.f32 %v1687_v62, %v2246_v54 }
 0x176   :  { %v1329_v4 = vadd.f32 %v1751_v0, %v1232_v2  ;;  %1362 = vst [vmem:[%s2314_s2 + $0x70] sm:$0xff] %v1326_v1 }
 0x178   :  { %1363 = vst [vmem:[%s2314_s2 + $0x78] sm:$0xff] %v1329_v4 }

// kernel: forward.64
= control target key start
LH: loop header
LB: loop body
LE: loop exit
PB: predicated region body
PF: predicated region fallthrough
CT: control target
= control target key end

     0   :  { %s456_s6 = smov 0   ;;  %s458_s7 = smov 0   ;;  %s556_s0 = inlined_call_operand.vmem [shape: f32[2,16,256], index: 0, kind: input, shape index: {}]   ;;  %s557_s1 = inlined_call_operand.vmem [shape: f32[2,16,256], index: 1, kind: output, shape index: {}]  }
   0x1   :  { %s460_s8 = smov 0   ;;  %s462_s9 = smov 0  }
   0x2   :  { %s464_s10 = smov 0   ;;  %s466_s11 = smov 0  }
   0x3   :  { %s468_s12 = smov 0  }
   0x4 LB: > { %s20_s13 = sadd.s32 1, %s436_s10  ;;  %s23_s14 = sadd.s32 1, %s440_s11  ;;  %s444_s12 = sphi %s468_s12, %s11_s12   ;;  %s440_s11 = sphi %s466_s11, %s564_s11   ;;  %s436_s10 = sphi %s464_s10, %s563_s10   ;;  %s432_s9 = sphi %s462_s9, %s562_s9   ;;  %s428_s8 = sphi %s460_s8, %s561_s8   ;;  %s424_s7 = sphi %s458_s7, %s560_s7   ;;  %s420_s6 = sphi %s456_s6, %s559_s6  }
   0x5   : > { %p21_p0 = scmp.ge.s32.totalorder %s20_s13, 2  ;;  %s317_s15 = sadd.s32 4294967295, %s444_s12  }
   0x6   : > { %p39_p1 = scmp.ne.s32.totalorder %s424_s7, %s420_s6  ;;  %p40_p2 = scmp.eq.s32.totalorder %s444_s12, 0 }
   0x7   : > { %s566_s13 = smov (%p21_p0, %s20_s13), 0  ;;  %s568_s14 = smov (!%p21_p0, %s23_s14), %s440_s11 }
   0x8   : > { %p25_p3 = scmp.ge.s32.totalorder %s568_s14, 2  ;;  %p71_p4 = scmp.eq.s32.totalorder %s317_s15, 3 }
   0x9   : > { %s28_s16 = ssub.s32 %s436_s10, %s566_s13  ;;  %p41_p5 = por %p40_p2, %p39_p1 }
   0xa   : > { %s570_s14 = smov (%p25_p3, %s568_s14), 0  ;;  %p504_p6 = por %p71_p4, %p39_p1 }
   0xb   : > { %s27_s18 = ssub.s32 %s440_s11, %s570_s14  ;;  %s32_s20 = sadd.s32 1, %s424_s7 }
   0xc   : > { %s29_s19 = sor.u32 %s28_s16, %s27_s18  ;;  %p320_p8 = scmp.ge.s32.totalorder %s444_s12, 4 }
   0xd   : > { %p30_p7 = scmp.eq.s32.totalorder %s29_s19, 0 }
   0xe   : > { %93 = sbr.rel (%p320_p8) target bundleno = 28 (0x1c), region = 16 }
   0xf   : > { %s512_s21 = scalar_select %p30_p7, %s424_s7, %s32_s20  }
  0x15   : > { %96 = sbr.rel (!%p41_p5) target bundleno = 28 (0x1c), region = 20  ;;  %s98_s22 = sand.u32 (%p41_p5), 1, %s424_s7  }
  0x16   : > { %s322_s23 = sshll.u32 (%p41_p5), %s440_s11, 2  ;;  %s321_s24 = sshll.u32 (%p41_p5), %s98_s22, 4 }
  0x17   : > { %s102_s25 = sadd.s32 (%p41_p5), %s436_s10, %s322_s23  ;;  %s100_s30 = scalar_lea.vmem (%p41_p5), [#allocation2], %s321_s24 }
  0x18   : > { %s323_s26 = sshll.u32 (%p41_p5), %s102_s25, 3 }
  0x19   : > { %s104_s29 = scalar_lea.vmem (%p41_p5), %s556_s0, %s323_s26 }
  0x1a   : > { %v134_v0 = vld [vmem:[%s104_s29] sm:$0xff] (%p41_p5)  ;;  %v136_v1 = vld [vmem:[%s104_s29 + $0x10] sm:$0xff] (%p41_p5) }
  0x1b   : > { %135 = vst [vmem:[%s100_s30] sm:$0xff] (%p41_p5), %v134_v0  ;;  %137 = vst [vmem:[%s100_s30 + $0x8] sm:$0xff] (%p41_p5), %v136_v1 }
  0x1c PF: > { %p324_p9 = scmp.ge.s32.totalorder %s444_s12, 1  ;;  %p142_p10 = scmp.lt.s32.totalorder %s444_s12, 5 }
  0x1e   : > { %p143_p11 = pnand %p324_p9, %p142_p10 }
  0x1f   : > { %s149_s2 = sand.u32 (!%p143_p11), 1, %s420_s6  }
  0x20   : > { %146 = sbr.rel (%p143_p11) target bundleno = 97 (0x61), region = 58  ;;  %s524_s3 = sshll.u32 (!%p143_p11), %s149_s2, 4 }
  0x21   : > { %s151_s4 = scalar_lea.vmem (!%p143_p11), [#allocation2], %s524_s3  ;;  %s166_s5 = scalar_lea.vmem (!%p143_p11), [#allocation3], %s524_s3 }
  0x22   : > { %v167_v2 = vld [vmem:[%s151_s4] sm:$0xff] (!%p143_p11)  ;;  %v168_v3 = vld [vmem:[%s151_s4 + $0x8] sm:$0xff] (!%p143_p11) }
  0x23   : > { %v169_v4 = vadd.f32 (!%p143_p11), %v168_v3, %v167_v2 }
  0x25   : > { %v170_v5 = vrot.slane (!%p143_p11), %v169_v4, 4 }
  0x27   : > { %v171_v6 = vadd.f32 %v170_v5, %v169_v4  ;;  %s328_s6 = sshll.u32 (%p504_p6), %s432_s9, 2 }
  0x28   : > { %s206_s15 = sadd.s32 (%p504_p6), %s428_s8, %s328_s6 }
  0x29   : > { %v172_v7 = vrot.slane %v171_v6, 2  ;;  %s329_s16 = sshll.u32 (%p504_p6), %s206_s15, 3 }
  0x2a   : > { %s208_s20 = scalar_lea.vmem (%p504_p6), %s557_s1, %s329_s16 }
  0x2b   : > { %v173_v8 = vadd.f32 %v172_v7, %v171_v6 }
  0x2d   : > { %v174_v9 = vrot.slane %v173_v8, 1 }
  0x2f   : > { %v175_v10 = vadd.f32 %v174_v9, %v173_v8 }
  0x31   : > { %v177_v11 = vmul.f32 0.0625, %v175_v10 }
  0x33   : > { %v178_v12 = vsub.f32 %v167_v2, %v177_v11  ;;  %v179_v13 = vsub.f32 %v168_v3, %v177_v11 }
  0x35   : > { %v180_v14 = vmul.f32 %v178_v12, %v178_v12  ;;  %v181_v15 = vmul.f32 %v179_v13, %v179_v13 }
  0x37   : > { %v182_v16 = vadd.f32 %v181_v15, %v180_v14 }
  0x39   : > { %v183_v17 = vrot.slane %v182_v16, 4 }
  0x3b   : > { %v184_v18 = vadd.f32 %v183_v17, %v182_v16 }
  0x3d   : > { %v185_v19 = vrot.slane %v184_v18, 2 }
  0x3f   : > { %v186_v20 = vadd.f32 %v185_v19, %v184_v18 }
  0x41   : > { %v187_v21 = vrot.slane %v186_v20, 1 }
  0x43   : > { %v188_v22 = vadd.f32 %v187_v21, %v186_v20 }
  0x45   : > { %v189_v23 = vmul.f32 0.0625, %v188_v22 }
  0x47   : > { %v190_v24 = vadd.f32 1e-05, %v189_v23 }
  0x49   : > { %388 = vrsqrt.f32 %v190_v24 }
  0x52   : > { %204 = sbr.rel (!%p504_p6) target bundleno = 97 (0x61), region = 66 }
  0x53   : > { %v389_v25 = vpop.eup %388 }
  0x54   : > { %v192_v26 = vmul.f32 %v389_v25, %v178_v12  ;;  %v193_v27 = vmul.f32 %v389_v25, %v179_v13 }
  0x56   : > { %v194_v28 = vmax.f32 %v192_v26, 0.0  ;;  %v195_v29 = vmax.f32 %v193_v27, 0.0 }
  0x58   : > { %196 = vst [vmem:[%s166_s5] sm:$0xff] %v194_v28  ;;  %197 = vst [vmem:[%s166_s5 + $0x8] sm:$0xff] %v195_v29 }
  0x5f   : > { %v238_v30 = vld [vmem:[%s166_s5] sm:$0xff]  ;;  %v240_v31 = vld [vmem:[%s166_s5 + $0x8] sm:$0xff] }
  0x60   : > { %239 = vst [vmem:[%s208_s20] sm:$0xff] %v238_v30  ;;  %241 = vst [vmem:[%s208_s20 + $0x10] sm:$0xff] %v240_v31 }
  0x61 PF: > { %s11_s12 = sadd.s32 1, %s444_s12   ;;  %s559_s6 = smov %s424_s7 }
  0x62   : > { %p8_p12 = scmp.ge.s32.totalorder %s11_s12, 6   ;;  %s560_s7 = smov %s512_s21 }
  0x63   : > { %s561_s8 = smov %s436_s10  ;;  %s562_s9 = smov %s440_s11 }
  0x64   : > { %s563_s10 = smov %s566_s13  ;;  %s564_s11 = smov %s570_s14 }
  0x65   :  { %10 = sbr.rel (!%p8_p12) target bundleno = 4 (0x4), region = 135 }

// kernel: forward.63
= control target key start
LH: loop header
LB: loop body
LE: loop exit
PB: predicated region body
PF: predicated region fallthrough
CT: control target
= control target key end

     0   :  { %s1973_s9 = smov 0   ;;  %s1975_s10 = smov 0   ;;  %s2293_s0 = inlined_call_operand.vmem [shape: bf16[32,2048], index: 0, kind: input, shape index: {}]   ;;  %s2294_s1 = inlined_call_operand.vmem [shape: bf16[2048,256], index: 1, kind: input, shape index: {}]   ;;  %s2295_s2 = inlined_call_operand.vmem [shape: f32[32,256], index: 2, kind: output, shape index: {}]  }
   0x1   :  { %s1977_s11 = smov 0   ;;  %s1979_s12 = smov 0  }
   0x2   :  { %s1981_s13 = smov 0  }
   0x3 LB: > { %s24_s14 = sadd.s32 1, %s1951_s12  ;;  %p47_p1 = scmp.ne.s32.totalorder %s1943_s10, %s1939_s9  ;;  %s1955_s13 = sphi %s1981_s13, %s12_s13   ;;  %s1951_s12 = sphi %s1979_s12, %s2299_s12   ;;  %s1947_s11 = sphi %s1977_s11, %s2298_s11   ;;  %s1943_s10 = sphi %s1975_s10, %s2297_s10   ;;  %s1939_s9 = sphi %s1973_s9, %s2296_s9  }
   0x4   : > { %p25_p0 = scmp.ge.s32.totalorder %s24_s14, 2  ;;  %p48_p2 = scmp.eq.s32.totalorder %s1955_s13, 0 }
   0x5   : > { %s40_s16 = sadd.s32 1, %s1943_s10  ;;  %p1500_p5 = scmp.ge.s32.totalorder %s1955_s13, 2 }
   0x6   : > { %s2301_s14 = smov (%p25_p0, %s24_s14), 0  ;;  %p49_p3 = por %p48_p2, %p47_p1 }
   0x7   : > { %s36_s15 = ssub.s32 %s1951_s12, %s2301_s14  ;;  %129 = sbr.rel (%p1500_p5) target bundleno = 26 (0x1a), region = 16 }
   0x8   : > { %p38_p4 = scmp.eq.s32.totalorder %s36_s15, 0 }
   0xa   : > { %s2008_s17 = scalar_select %p38_p4, %s1943_s10, %s40_s16  }
   0xe   : > { %132 = sbr.rel (!%p49_p3) target bundleno = 26 (0x1a), region = 20  ;;  %s134_s18 = sand.u32 (%p49_p3), 1, %s1943_s10  }
   0xf   : > { %s1658_s19 = sshll.u32 (%p49_p3), %s1951_s12, 5  ;;  %s1501_s20 = sshll.u32 (%p49_p3), %s134_s18, 7 }
  0x10   : > { %s2016_s23 = scalar_lea.vmem (%p49_p3), %s2293_s0, %s1658_s19  ;;  %s136_s24 = scalar_lea.vmem (%p49_p3), [#allocation2], %s1501_s20 }
  0x11   : > { %v155_v0 = vld [vmem:[%s2016_s23] sm:$0xff] (%p49_p3)  ;;  %v157_v1 = vld [vmem:[%s2016_s23 + $0x8] sm:$0xff] (%p49_p3)  ;;  %v159_v2 = vld [vmem:[%s2016_s23 + $0x10] sm:$0xff] (%p49_p3) }
  0x12   : > { %156 = vst [vmem:[%s136_s24] sm:$0xff] (%p49_p3), %v155_v0  ;;  %158 = vst [vmem:[%s136_s24 + $0x8] sm:$0xff] (%p49_p3), %v157_v1  ;;  %v161_v3 = vld [vmem:[%s2016_s23 + $0x18] sm:$0xff] (%p49_p3)  ;;  %v163_v4 = vld [vmem:[%s2016_s23 + $0x40] sm:$0xff] (%p49_p3) }
  0x13   : > { %160 = vst [vmem:[%s136_s24 + $0x10] sm:$0xff] (%p49_p3), %v159_v2  ;;  %v165_v5 = vld [vmem:[%s2016_s23 + $0x48] sm:$0xff] (%p49_p3)  ;;  %162 = vst [vmem:[%s136_s24 + $0x18] sm:$0xff] (%p49_p3), %v161_v3  ;;  %v167_v6 = vld [vmem:[%s2016_s23 + $0x50] sm:$0xff] (%p49_p3) }
  0x14   : > { %164 = vst [vmem:[%s136_s24 + $0x20] sm:$0xff] (%p49_p3), %v163_v4  ;;  %166 = vst [vmem:[%s136_s24 + $0x28] sm:$0xff] (%p49_p3), %v165_v5  ;;  %v169_v7 = vld [vmem:[%s2016_s23 + $0x58] sm:$0xff] (%p49_p3)  ;;  %v171_v8 = vld [vmem:[%s2016_s23 + $0x80] sm:$0xff] (%p49_p3) }
  0x15   : > { %168 = vst [vmem:[%s136_s24 + $0x30] sm:$0xff] %v167_v6  ;;  %170 = vst [vmem:[%s136_s24 + $0x38] sm:$0xff] %v169_v7  ;;  %v173_v9 = vld [vmem:[%s2016_s23 + $0x88] sm:$0xff]  ;;  %v175_v10 = vld [vmem:[%s2016_s23 + $0x90] sm:$0xff] }
  0x16   : > { %172 = vst [vmem:[%s136_s24 + $0x40] sm:$0xff] %v171_v8  ;;  %v177_v11 = vld [vmem:[%s2016_s23 + $0x98] sm:$0xff]  ;;  %174 = vst [vmem:[%s136_s24 + $0x48] sm:$0xff] %v173_v9  ;;  %v179_v12 = vld [vmem:[%s2016_s23 + $0xc0] sm:$0xff] }
  0x17   : > { %176 = vst [vmem:[%s136_s24 + $0x50] sm:$0xff] %v175_v10  ;;  %178 = vst [vmem:[%s136_s24 + $0x58] sm:$0xff] %v177_v11  ;;  %v181_v13 = vld [vmem:[%s2016_s23 + $0xc8] sm:$0xff]  ;;  %v183_v14 = vld [vmem:[%s2016_s23 + $0xd0] sm:$0xff] }
  0x18   : > { %180 = vst [vmem:[%s136_s24 + $0x60] sm:$0xff] %v179_v12  ;;  %182 = vst [vmem:[%s136_s24 + $0x68] sm:$0xff] %v181_v13  ;;  %v185_v15 = vld [vmem:[%s2016_s23 + $0xd8] sm:$0xff] }
  0x19   : > { %184 = vst [vmem:[%s136_s24 + $0x70] sm:$0xff] %v183_v14  ;;  %186 = vst [vmem:[%s136_s24 + $0x78] sm:$0xff] %v185_v15 }
  0x1a PF: > { %p1504_p6 = scmp.ge.s32.totalorder %s1955_s13, 1  ;;  %p206_p7 = scmp.lt.s32.totalorder %s1955_s13, 3 }
  0x1c   : > { %p207_p8 = pnand %p1504_p6, %p206_p7 }
  0x1d   : > { %s213_s25 = sand.u32 (!%p207_p8), 1, %s1939_s9   ;;  %s1506_s26 = sshll.u32 (!%p207_p8), %s1947_s11, 7 }
  0x1e   : > { %210 = sbr.rel (%p207_p8) target bundleno = 402 (0x192), region = 47  ;;  %s1505_s27 = sshll.u32 (!%p207_p8), %s213_s25, 7 }
  0x1f   : > { %p253_p9 = scmp.lt.s32.totalorder (!%p207_p8), %s1506_s26, 255  ;;  %s2043_s4 = scalar_lea.vmem (!%p207_p8), [#allocation2], %s1505_s27 }
  0x20   : > { %p1509_p10 = scmp.ne.s32.totalorder (!%p207_p8), %s1947_s11, 0 }
  0x25   : > { %s2303_s26 = smov (!%p253_p9, %s1506_s26), 255  ;;  %278 = sbr.rel (%p1509_p10) target bundleno = 44 (0x2c), region = 55 }
  0x26   : > { %s1659_s28 = sshll.u32 %s2303_s26, 3  ;;  %v1957_v16 = vmov (!%p1509_p10), 0.0  }
  0x27   : > { %s2041_s3 = scalar_lea.vmem %s2294_s1, %s1659_s28  ;;  %279 = vst [vmem:[%s2295_s2] sm:$0xff] (!%p1509_p10), %v1957_v16  ;;  %280 = vst [vmem:[%s2295_s2 + $0x8] sm:$0xff] (!%p1509_p10), %v1957_v16 }
  0x28   : > { %281 = vst [vmem:[%s2295_s2 + $0x10] sm:$0xff] (!%p1509_p10), %v1957_v16  ;;  %282 = vst [vmem:[%s2295_s2 + $0x18] sm:$0xff] (!%p1509_p10), %v1957_v16 }
  0x29   : > { %283 = vst [vmem:[%s2295_s2 + $0x20] sm:$0xff] (!%p1509_p10), %v1957_v16  ;;  %284 = vst [vmem:[%s2295_s2 + $0x28] sm:$0xff] (!%p1509_p10), %v1957_v16 }
  0x2a   : > { %285 = vst [vmem:[%s2295_s2 + $0x30] sm:$0xff] (!%p1509_p10), %v1957_v16  ;;  %286 = vst [vmem:[%s2295_s2 + $0x38] sm:$0xff] (!%p1509_p10), %v1957_v16 }
  0x2c PF: > { %v1725_v17 = vld [vmem:[%s2041_s3 + $0x4] ss:$8 sps:$4 sm:$0xff]   ;;  %v1729_v19 = vld [vmem:[%s2041_s3] ss:$8 sps:$4 sm:$0xff]   ;;  %v1731_v21 = vld [vmem:[%s2041_s3 + $0x14] ss:$8 sps:$4 sm:$0xff]  }
  0x2d   : > { %v1727_v18 = vld [vmem:[%s2041_s3 + $0x204] ss:$8 sps:$4 sm:$0xff]   ;;  %1159 = vmatprep.subr.bf16.mxu1 %v1725_v17  ;;  %v1730_v20 = vld [vmem:[%s2041_s3 + $0x200] ss:$8 sps:$4 sm:$0xff]   ;;  %v1733_v22 = vld [vmem:[%s2041_s3 + $0x214] ss:$8 sps:$4 sm:$0xff]  }
  0x2e   : > { %1265 = vmatprep.subr.bf16.mxu0 %v1727_v18  ;;  %1160 = vmatpush1.bf16.msra.mxu1 %v1729_v19  ;;  %v1735_v23 = vld [vmem:[%s2041_s3 + $0x10] ss:$8 sps:$4 sm:$0xff]   ;;  %v1737_v25 = vld [vmem:[%s2041_s3 + $0x24] ss:$8 sps:$4 sm:$0xff]   ;;  %v1741_v27 = vld [vmem:[%s2041_s3 + $0x20] ss:$8 sps:$4 sm:$0xff]  }
  0x2f   : > { %1266 = vmatpush1.bf16.msra.mxu0 %v1730_v20  ;;  %1161 = vmatprep.subr.bf16.mxu1 %v1731_v21  ;;  %v1736_v24 = vld [vmem:[%s2041_s3 + $0x210] ss:$8 sps:$4 sm:$0xff]   ;;  %v1739_v26 = vld [vmem:[%s2041_s3 + $0x224] ss:$8 sps:$4 sm:$0xff]   ;;  %v1742_v28 = vld [vmem:[%s2041_s3 + $0x220] ss:$8 sps:$4 sm:$0xff]  }
  0x30   : > { %1267 = vmatprep.subr.bf16.mxu0 %v1733_v22  ;;  %v1743_v29 = vld [vmem:[%s2041_s3 + $0x34] ss:$8 sps:$4 sm:$0xff]   ;;  %v1747_v31 = vld [vmem:[%s2041_s3 + $0x30] ss:$8 sps:$4 sm:$0xff]   ;;  %v1749_v33 = vld [vmem:[%s2041_s3 + $0x44] ss:$8 sps:$4 sm:$0xff]  }
  0x31   : > { %v1745_v30 = vld [vmem:[%s2041_s3 + $0x234] ss:$8 sps:$4 sm:$0xff]   ;;  %v1748_v32 = vld [vmem:[%s2041_s3 + $0x230] ss:$8 sps:$4 sm:$0xff]   ;;  %v1751_v34 = vld [vmem:[%s2041_s3 + $0x244] ss:$8 sps:$4 sm:$0xff]  }
  0x32   : > { %1162 = vmatpush1.bf16.msra.mxu1 %v1735_v23  ;;  %v1753_v35 = vld [vmem:[%s2041_s3 + $0x40] ss:$8 sps:$4 sm:$0xff]   ;;  %v1755_v37 = vld [vmem:[%s2041_s3 + $0x54] ss:$8 sps:$4 sm:$0xff]   ;;  %v1759_v39 = vld [vmem:[%s2041_s3 + $0x50] ss:$8 sps:$4 sm:$0xff]  }
  0x33   : > { %1268 = vmatpush1.bf16.msra.mxu0 %v1736_v24  ;;  %1163 = vmatprep.subr.bf16.mxu1 %v1737_v25  ;;  %v1754_v36 = vld [vmem:[%s2041_s3 + $0x240] ss:$8 sps:$4 sm:$0xff]   ;;  %v1757_v38 = vld [vmem:[%s2041_s3 + $0x254] ss:$8 sps:$4 sm:$0xff]   ;;  %v1760_v40 = vld [vmem:[%s2041_s3 + $0x250] ss:$8 sps:$4 sm:$0xff]  }
  0x34   : > { %1269 = vmatprep.subr.bf16.mxu0 %v1739_v26  ;;  %v1761_v41 = vld [vmem:[%s2041_s3 + $0x64] ss:$8 sps:$4 sm:$0xff]   ;;  %v1765_v43 = vld [vmem:[%s2041_s3 + $0x60] ss:$8 sps:$4 sm:$0xff]   ;;  %v1767_v45 = vld [vmem:[%s2041_s3 + $0x74] ss:$8 sps:$4 sm:$0xff]  }
  0x35   : > { %v1763_v42 = vld [vmem:[%s2041_s3 + $0x264] ss:$8 sps:$4 sm:$0xff]   ;;  %v1766_v44 = vld [vmem:[%s2041_s3 + $0x260] ss:$8 sps:$4 sm:$0xff]   ;;  %v1769_v46 = vld [vmem:[%s2041_s3 + $0x274] ss:$8 sps:$4 sm:$0xff]  }
  0x36   : > { %1164 = vmatpush1.bf16.msra.mxu1 %v1741_v27  ;;  %v1771_v47 = vld [vmem:[%s2041_s3 + $0x70] ss:$8 sps:$4 sm:$0xff]   ;;  %v1773_v49 = vld [vmem:[%s2041_s3 + $0x84] ss:$8 sps:$4 sm:$0xff]   ;;  %v1777_v51 = vld [vmem:[%s2041_s3 + $0x80] ss:$8 sps:$4 sm:$0xff]  }
  0x37   : > { %1270 = vmatpush1.bf16.msra.mxu0 %v1742_v28  ;;  %1165 = vmatprep.subr.bf16.mxu1 %v1743_v29  ;;  %v1772_v48 = vld [vmem:[%s2041_s3 + $0x270] ss:$8 sps:$4 sm:$0xff]   ;;  %v1775_v50 = vld [vmem:[%s2041_s3 + $0x284] ss:$8 sps:$4 sm:$0xff]   ;;  %v1778_v52 = vld [vmem:[%s2041_s3 + $0x280] ss:$8 sps:$4 sm:$0xff]  }
  0x38   : > { %1271 = vmatprep.subr.bf16.mxu0 %v1745_v30  ;;  %v1779_v53 = vld [vmem:[%s2041_s3 + $0x94] ss:$8 sps:$4 sm:$0xff]   ;;  %v1783_v55 = vld [vmem:[%s2041_s3 + $0x90] ss:$8 sps:$4 sm:$0xff]   ;;  %v1785_v57 = vld [vmem:[%s2041_s3 + $0xa4] ss:$8 sps:$4 sm:$0xff]  }
  0x39   : > { %v1781_v54 = vld [vmem:[%s2041_s3 + $0x294] ss:$8 sps:$4 sm:$0xff]   ;;  %v1784_v56 = vld [vmem:[%s2041_s3 + $0x290] ss:$8 sps:$4 sm:$0xff]   ;;  %v1787_v58 = vld [vmem:[%s2041_s3 + $0x2a4] ss:$8 sps:$4 sm:$0xff]  }
  0x3a   : > { %1166 = vmatpush1.bf16.msra.mxu1 %v1747_v31  ;;  %v1789_v59 = vld [vmem:[%s2041_s3 + $0xa0] ss:$8 sps:$4 sm:$0xff]   ;;  %v1791_v61 = vld [vmem:[%s2041_s3 + $0xb4] ss:$8 sps:$4 sm:$0xff]   ;;  %v1795_v63 = vld [vmem:[%s2041_s3 + $0xb0] ss:$8 sps:$4 sm:$0xff]  }
  0x3b   : > { %1272 = vmatpush1.bf16.msra.mxu0 %v1748_v32  ;;  %1167 = vmatprep.subr.bf16.mxu1 %v1749_v33  ;;  %v1790_v60 = vld [vmem:[%s2041_s3 + $0x2a0] ss:$8 sps:$4 sm:$0xff]   ;;  %v1793_v62 = vld [vmem:[%s2041_s3 + $0x2b4] ss:$8 sps:$4 sm:$0xff]   ;;  %v1796_v0 = vld [vmem:[%s2041_s3 + $0x2b0] ss:$8 sps:$4 sm:$0xff]  }
  0x3c   : > { %1273 = vmatprep.subr.bf16.mxu0 %v1751_v34  ;;  %v295_v1 = vld [vmem:[%s2043_s4] sm:$0xff]  ;;  %v297_v6 = vld [vmem:[%s2043_s4 + $0x10] sm:$0xff] }
  0x3d   : > { %v299_v2 = vld [vmem:[%s2043_s4 + $0x20] sm:$0xff]  ;;  %v301_v7 = vld [vmem:[%s2043_s4 + $0x30] sm:$0xff] }
  0x3e   : > { %1168 = vmatpush1.bf16.msra.mxu1 %v1753_v35  ;;  %v1797_v3 = vld [vmem:[%s2041_s3 + $0xc4] ss:$8 sps:$4 sm:$0xff]   ;;  %v1511_v5 = vcombine.high %v295_v1, %v299_v2  ;;  %v1515_v8 = vcombine.high %v297_v6, %v301_v7  ;;  %v1801_v9 = vld [vmem:[%s2041_s3 + $0xc0] ss:$8 sps:$4 sm:$0xff]   ;;  %v1803_v11 = vld [vmem:[%s2041_s3 + $0xd4] ss:$8 sps:$4 sm:$0xff]   ;;  %v1510_v25 = vcombine.low %v295_v1, %v299_v2  ;;  %v1514_v27 = vcombine.low %v297_v6, %v301_v7 }
  0x3f   : > { %1274 = vmatpush1.bf16.msra.mxu0 %v1754_v36  ;;  %1169 = vmatprep.subr.bf16.mxu1 %v1755_v37  ;;  %v1799_v4 = vld [vmem:[%s2041_s3 + $0x2c4] ss:$8 sps:$4 sm:$0xff]   ;;  %v1802_v10 = vld [vmem:[%s2041_s3 + $0x2c0] ss:$8 sps:$4 sm:$0xff]   ;;  %v1805_v12 = vld [vmem:[%s2041_s3 + $0x2d4] ss:$8 sps:$4 sm:$0xff]  }
  0x40   : > { %1275 = vmatprep.subr.bf16.mxu0 %v1757_v38  ;;  %1191 = vmatprep.mubr.bf16.mxu1 %v1511_v5  ;;  %v1807_v13 = vld [vmem:[%s2041_s3 + $0xd0] ss:$8 sps:$4 sm:$0xff]   ;;  %v1809_v15 = vld [vmem:[%s2041_s3 + $0xe4] ss:$8 sps:$4 sm:$0xff]   ;;  %v1813_v17 = vld [vmem:[%s2041_s3 + $0xe0] ss:$8 sps:$4 sm:$0xff]  }
  0x41   : > { %1297 = vmatprep.mubr.bf16.mxu0 %v1515_v8  ;;  %v1808_v14 = vld [vmem:[%s2041_s3 + $0x2d0] ss:$8 sps:$4 sm:$0xff]   ;;  %v1811_v16 = vld [vmem:[%s2041_s3 + $0x2e4] ss:$8 sps:$4 sm:$0xff]   ;;  %v1814_v18 = vld [vmem:[%s2041_s3 + $0x2e0] ss:$8 sps:$4 sm:$0xff]  }
  0x42   : > { %1170 = vmatpush1.bf16.msra.mxu1 %v1759_v39  ;;  %v1815_v19 = vld [vmem:[%s2041_s3 + $0xf4] ss:$8 sps:$4 sm:$0xff]   ;;  %v1819_v21 = vld [vmem:[%s2041_s3 + $0xf0] ss:$8 sps:$4 sm:$0xff]   ;;  %v1823_v23 = vld [vmem:[%s2041_s3 + $0x104] ss:$8 sps:$4 sm:$0xff]  }
  0x43   : > { %1276 = vmatpush1.bf16.msra.mxu0 %v1760_v40  ;;  %1171 = vmatprep.subr.bf16.mxu1 %v1761_v41  ;;  %v1817_v20 = vld [vmem:[%s2041_s3 + $0x2f4] ss:$8 sps:$4 sm:$0xff]   ;;  %v1820_v22 = vld [vmem:[%s2041_s3 + $0x2f0] ss:$8 sps:$4 sm:$0xff]   ;;  %v1826_v24 = vld [vmem:[%s2041_s3 + $0x304] ss:$8 sps:$4 sm:$0xff]  }
  0x44   : > { %1277 = vmatprep.subr.bf16.mxu0 %v1763_v42  ;;  %v1821_v26 = vld [vmem:[%s2041_s3 + $0x100] ss:$8 sps:$4 sm:$0xff]   ;;  %v1829_v29 = vld [vmem:[%s2041_s3 + $0x114] ss:$8 sps:$4 sm:$0xff]   ;;  %v1827_v31 = vld [vmem:[%s2041_s3 + $0x110] ss:$8 sps:$4 sm:$0xff]  }
  0x45   : > { %v1824_v28 = vld [vmem:[%s2041_s3 + $0x300] ss:$8 sps:$4 sm:$0xff]   ;;  %v1832_v30 = vld [vmem:[%s2041_s3 + $0x314] ss:$8 sps:$4 sm:$0xff]   ;;  %v1830_v32 = vld [vmem:[%s2041_s3 + $0x310] ss:$8 sps:$4 sm:$0xff]  }
  0x46   : > { %1172 = vmatpush1.bf16.msra.mxu1 %v1765_v43  ;;  %v1835_v33 = vld [vmem:[%s2041_s3 + $0x124] ss:$8 sps:$4 sm:$0xff]   ;;  %v1833_v35 = vld [vmem:[%s2041_s3 + $0x120] ss:$8 sps:$4 sm:$0xff]   ;;  %v1841_v37 = vld [vmem:[%s2041_s3 + $0x134] ss:$8 sps:$4 sm:$0xff]  }
  0x47   : > { %1278 = vmatpush1.bf16.msra.mxu0 %v1766_v44  ;;  %1173 = vmatprep.subr.bf16.mxu1 %v1767_v45  ;;  %v1838_v34 = vld [vmem:[%s2041_s3 + $0x324] ss:$8 sps:$4 sm:$0xff]   ;;  %v1836_v36 = vld [vmem:[%s2041_s3 + $0x320] ss:$8 sps:$4 sm:$0xff]   ;;  %v1844_v38 = vld [vmem:[%s2041_s3 + $0x334] ss:$8 sps:$4 sm:$0xff]  }
  0x48   : > { %1279 = vmatprep.subr.bf16.mxu0 %v1769_v46  ;;  %v1839_v39 = vld [vmem:[%s2041_s3 + $0x130] ss:$8 sps:$4 sm:$0xff]   ;;  %v1847_v41 = vld [vmem:[%s2041_s3 + $0x144] ss:$8 sps:$4 sm:$0xff]   ;;  %v1845_v43 = vld [vmem:[%s2041_s3 + $0x140] ss:$8 sps:$4 sm:$0xff]  }
  0x49   : > { %v1842_v40 = vld [vmem:[%s2041_s3 + $0x330] ss:$8 sps:$4 sm:$0xff]   ;;  %v1850_v42 = vld [vmem:[%s2041_s3 + $0x344] ss:$8 sps:$4 sm:$0xff]   ;;  %v1848_v44 = vld [vmem:[%s2041_s3 + $0x340] ss:$8 sps:$4 sm:$0xff]  }
  0x4a   : > { %1174 = vmatpush1.bf16.msra.mxu1 %v1771_v47  ;;  %v1853_v45 = vld [vmem:[%s2041_s3 + $0x154] ss:$8 sps:$4 sm:$0xff]   ;;  %v303_v47 = vld [vmem:[%s2043_s4 + $0x40] sm:$0xff]  ;;  %v1863_v5 = vld [vmem:[%s2041_s3 + $0x170] ss:$8 sps:$4 sm:$0xff]  }
  0x4b   : > { %1280 = vmatpush1.bf16.msra.mxu0 %v1772_v48  ;;  %1175 = vmatprep.subr.bf16.mxu1 %v1773_v49  ;;  %v1856_v46 = vld [vmem:[%s2041_s3 + $0x354] ss:$8 sps:$4 sm:$0xff]   ;;  %v307_v48 = vld [vmem:[%s2043_s4 + $0x60] sm:$0xff]  ;;  %v1866_v6 = vld [vmem:[%s2041_s3 + $0x370] ss:$8 sps:$4 sm:$0xff]  }
  0x4c   : > { %1281 = vmatprep.subr.bf16.mxu0 %v1775_v50  ;;  %v1519_v49 = vcombine.high %v303_v47, %v307_v48  ;;  %v305_v50 = vld [vmem:[%s2043_s4 + $0x50] sm:$0xff]  ;;  %v1871_v7 = vld [vmem:[%s2041_s3 + $0x184] ss:$8 sps:$4 sm:$0xff]  }
  0x4d   : > { %v1868_v1 = vld [vmem:[%s2041_s3 + $0x374] ss:$8 sps:$4 sm:$0xff]   ;;  %v1874_v8 = vld [vmem:[%s2041_s3 + $0x384] ss:$8 sps:$4 sm:$0xff]  }
  0x4e   : > { %1176 = vmatpush1.bf16.msra.mxu1 %v1777_v51  ;;  %v309_v51 = vld [vmem:[%s2043_s4 + $0x70] sm:$0xff] }
  0x4f   : > { %1282 = vmatpush1.bf16.msra.mxu0 %v1778_v52  ;;  %1177 = vmatprep.subr.bf16.mxu1 %v1779_v53  ;;  %v1851_v52 = vld [vmem:[%s2041_s3 + $0x150] ss:$8 sps:$4 sm:$0xff]  }
  0x50   : > { %1283 = vmatprep.subr.bf16.mxu0 %v1781_v54  ;;  %v1854_v53 = vld [vmem:[%s2041_s3 + $0x350] ss:$8 sps:$4 sm:$0xff]   ;;  %v1523_v54 = vcombine.high %v305_v50, %v309_v51 }
  0x52   : > { %1178 = vmatpush1.bf16.msra.mxu1 %v1783_v55  ;;  %v1518_v55 = vcombine.low %v303_v47, %v307_v48 }
  0x53   : > { %1284 = vmatpush1.bf16.msra.mxu0 %v1784_v56  ;;  %1179 = vmatprep.subr.bf16.mxu1 %v1785_v57  ;;  %v1522_v56 = vcombine.low %v305_v50, %v309_v51  ;;  %v1859_v57 = vld [vmem:[%s2041_s3 + $0x164] ss:$8 sps:$4 sm:$0xff]  }
  0x54   : > { %1285 = vmatprep.subr.bf16.mxu0 %v1787_v58  ;;  %v1862_v58 = vld [vmem:[%s2041_s3 + $0x364] ss:$8 sps:$4 sm:$0xff]  }
  0x55   : > { %v287_v50 = vld [vmem:[%s2295_s2] sm:$0xff] }
  0x56   : > { %1180 = vmatpush1.bf16.msra.mxu1 %v1789_v59  ;;  %v1857_v59 = vld [vmem:[%s2041_s3 + $0x160] ss:$8 sps:$4 sm:$0xff]  }
  0x57   : > { %1286 = vmatpush1.bf16.msra.mxu0 %v1790_v60  ;;  %1181 = vmatprep.subr.bf16.mxu1 %v1791_v61  ;;  %v1860_v60 = vld [vmem:[%s2041_s3 + $0x360] ss:$8 sps:$4 sm:$0xff]  }
  0x58   : > { %1287 = vmatprep.subr.bf16.mxu0 %v1793_v62  ;;  %v2171_v61 = vld [vmem:[%s2043_s4 + $0x8] sm:$0xff] }
  0x59   : > { %v2174_v62 = vld [vmem:[%s2043_s4 + $0x28] sm:$0xff] }
  0x5a   : > { %1182 = vmatpush1.bf16.msra.mxu1 %v1795_v63  ;;  %v2177_v63 = vld [vmem:[%s2043_s4 + $0x18] sm:$0xff]  ;;  %v1513_v2 = vcombine.high %v2171_v61, %v2174_v62 }
  0x5b   : > { %1288 = vmatpush1.bf16.msra.mxu0 %v1796_v0  ;;  %1183 = vmatprep.subr.bf16.mxu1 %v1797_v3  ;;  %v1865_v0 = vld [vmem:[%s2041_s3 + $0x174] ss:$8 sps:$4 sm:$0xff]  }
  0x5c   : > { %1289 = vmatprep.subr.bf16.mxu0 %v1799_v4  ;;  %v2184_v3 = vld [vmem:[%s2043_s4 + $0x38] sm:$0xff] }
  0x5d   : > { %v1517_v4 = vcombine.high %v2177_v63, %v2184_v3 }
  0x5e   : > { %1184 = vmatpush1.bf16.msra.mxu1 %v1801_v9  ;;  %v1869_v9 = vld [vmem:[%s2041_s3 + $0x180] ss:$8 sps:$4 sm:$0xff]  }
  0x5f   : > { %1290 = vmatpush1.bf16.msra.mxu0 %v1802_v10  ;;  %1185 = vmatprep.subr.bf16.mxu1 %v1803_v11  ;;  %v1872_v10 = vld [vmem:[%s2041_s3 + $0x380] ss:$8 sps:$4 sm:$0xff]   ;;  %v1877_v11 = vld [vmem:[%s2041_s3 + $0x194] ss:$8 sps:$4 sm:$0xff]  }
  0x60   : > { %1291 = vmatprep.subr.bf16.mxu0 %v1805_v12  ;;  %v1880_v12 = vld [vmem:[%s2041_s3 + $0x394] ss:$8 sps:$4 sm:$0xff]  }
  0x62   : > { %1186 = vmatpush1.bf16.msra.mxu1 %v1807_v13  ;;  %v1875_v13 = vld [vmem:[%s2041_s3 + $0x190] ss:$8 sps:$4 sm:$0xff]  }
  0x63   : > { %1292 = vmatpush1.bf16.msra.mxu0 %v1808_v14  ;;  %1187 = vmatprep.subr.bf16.mxu1 %v1809_v15  ;;  %v1878_v14 = vld [vmem:[%s2041_s3 + $0x390] ss:$8 sps:$4 sm:$0xff]   ;;  %v1883_v15 = vld [vmem:[%s2041_s3 + $0x1a4] ss:$8 sps:$4 sm:$0xff]  }
  0x64   : > { %1293 = vmatprep.subr.bf16.mxu0 %v1811_v16  ;;  %v1886_v16 = vld [vmem:[%s2041_s3 + $0x3a4] ss:$8 sps:$4 sm:$0xff]  }
  0x66   : > { %1188 = vmatpush1.bf16.msra.mxu1 %v1813_v17  ;;  %v1881_v17 = vld [vmem:[%s2041_s3 + $0x1a0] ss:$8 sps:$4 sm:$0xff]  }
  0x67   : > { %1294 = vmatpush1.bf16.msra.mxu0 %v1814_v18  ;;  %1189 = vmatprep.subr.bf16.mxu1 %v1815_v19  ;;  %v1884_v18 = vld [vmem:[%s2041_s3 + $0x3a0] ss:$8 sps:$4 sm:$0xff]   ;;  %v1889_v19 = vld [vmem:[%s2041_s3 + $0x1b4] ss:$8 sps:$4 sm:$0xff]  }
  0x68   : > { %1295 = vmatprep.subr.bf16.mxu0 %v1817_v20  ;;  %v1892_v20 = vld [vmem:[%s2041_s3 + $0x3b4] ss:$8 sps:$4 sm:$0xff]  }
  0x6a   : > { %1190 = vmatpush1.bf16.msra.mxu1 %v1819_v21  ;;  %v1887_v21 = vld [vmem:[%s2041_s3 + $0x1b0] ss:$8 sps:$4 sm:$0xff]  }
  0x6b   : > { %1296 = vmatpush1.bf16.msra.mxu0 %v1820_v22  ;;  %1212 = vmatprep.subr.bf16.mxu1 %v1823_v23  ;;  %v1890_v22 = vld [vmem:[%s2041_s3 + $0x3b0] ss:$8 sps:$4 sm:$0xff]   ;;  %v1895_v23 = vld [vmem:[%s2041_s3 + $0x1c4] ss:$8 sps:$4 sm:$0xff]  }
  0x6c   : > { %1318 = vmatprep.subr.bf16.mxu0 %v1826_v24  ;;  %v1898_v24 = vld [vmem:[%s2041_s3 + $0x3c4] ss:$8 sps:$4 sm:$0xff]  }
  0x6d   : > { %1192 = vmatmul.mubr.bf16.vlgmr.msra.gmra.mrb[0].mxu1 %v1510_v25  ;;  %v1893_v25 = vld [vmem:[%s2041_s3 + $0x1c0] ss:$8 sps:$4 sm:$0xff]  }
  0x6e   : > { %1298 = vmatmul.mubr.bf16.vlgmr.msra.gmra.mrb[0].mxu0 %v1514_v27  ;;  %1213 = vmatpush1.bf16.msra.mxu1 %v1821_v26  ;;  %v1896_v26 = vld [vmem:[%s2041_s3 + $0x3c0] ss:$8 sps:$4 sm:$0xff]   ;;  %v1901_v27 = vld [vmem:[%s2041_s3 + $0x1d4] ss:$8 sps:$4 sm:$0xff]  }
  0x6f   : > { %1319 = vmatpush1.bf16.msra.mxu0 %v1824_v28  ;;  %1214 = vmatprep.subr.bf16.mxu1 %v1829_v29  ;;  %v1904_v28 = vld [vmem:[%s2041_s3 + $0x3d4] ss:$8 sps:$4 sm:$0xff]   ;;  %v1899_v29 = vld [vmem:[%s2041_s3 + $0x1d0] ss:$8 sps:$4 sm:$0xff]  }
  0x70   : > { %1320 = vmatprep.subr.bf16.mxu0 %v1832_v30  ;;  %1201 = vmatprep.mubr.bf16.mxu1 %v1519_v49  ;;  %v1902_v30 = vld [vmem:[%s2041_s3 + $0x3d0] ss:$8 sps:$4 sm:$0xff]  }
  0x71   : > { %1307 = vmatprep.mubr.bf16.mxu0 %v1523_v54  ;;  %v288_v54 = vld [vmem:[%s2295_s2 + $0x8] sm:$0xff] }
  0x72   : > { %1215 = vmatpush1.bf16.msra.mxu1 %v1827_v31  ;;  %v1907_v31 = vld [vmem:[%s2041_s3 + $0x1e4] ss:$8 sps:$4 sm:$0xff]  }
  0x73   : > { %1321 = vmatpush1.bf16.msra.mxu0 %v1830_v32  ;;  %1216 = vmatprep.subr.bf16.mxu1 %v1835_v33  ;;  %v1910_v32 = vld [vmem:[%s2041_s3 + $0x3e4] ss:$8 sps:$4 sm:$0xff]   ;;  %v1905_v33 = vld [vmem:[%s2041_s3 + $0x1e0] ss:$8 sps:$4 sm:$0xff]  }
  0x74   : > { %1322 = vmatprep.subr.bf16.mxu0 %v1838_v34  ;;  %v1908_v34 = vld [vmem:[%s2041_s3 + $0x3e0] ss:$8 sps:$4 sm:$0xff]  }
  0x75   : > { %1202 = vmatmul.mubr.bf16.gmra.mrb[4].mxu1 %v1518_v55 }
  0x76   : > { %1217 = vmatpush1.bf16.msra.mxu1 %v1833_v35  ;;  %1308 = vmatmul.mubr.bf16.gmra.mrb[4].mxu0 %v1522_v56  ;;  %v1913_v35 = vld [vmem:[%s2041_s3 + $0x1f4] ss:$8 sps:$4 sm:$0xff]  }
  0x77   : > { %1323 = vmatpush1.bf16.msra.mxu0 %v1836_v36  ;;  %1218 = vmatprep.subr.bf16.mxu1 %v1841_v37  ;;  %v1916_v36 = vld [vmem:[%s2041_s3 + $0x3f4] ss:$8 sps:$4 sm:$0xff]   ;;  %v1911_v37 = vld [vmem:[%s2041_s3 + $0x1f0] ss:$8 sps:$4 sm:$0xff]  }
  0x78   : > { %1324 = vmatprep.subr.bf16.mxu0 %v1844_v38  ;;  %1244 = vmatprep.mubr.bf16.mxu1 %v1513_v2  ;;  %v1914_v38 = vld [vmem:[%s2041_s3 + $0x3f0] ss:$8 sps:$4 sm:$0xff]  }
  0x79   : > { %1350 = vmatprep.mubr.bf16.mxu0 %v1517_v4 }
  0x7a   : > { %1219 = vmatpush1.bf16.msra.mxu1 %v1839_v39  ;;  %v304_v39 = vld [vmem:[%s2043_s4 + $0x48] sm:$0xff] }
  0x7b   : > { %1325 = vmatpush1.bf16.msra.mxu0 %v1842_v40  ;;  %1220 = vmatprep.subr.bf16.mxu1 %v1847_v41  ;;  %v308_v40 = vld [vmem:[%s2043_s4 + $0x68] sm:$0xff]  ;;  %v306_v41 = vld [vmem:[%s2043_s4 + $0x58] sm:$0xff] }
  0x7c   : > { %1326 = vmatprep.subr.bf16.mxu0 %v1850_v42  ;;  %v310_v42 = vld [vmem:[%s2043_s4 + $0x78] sm:$0xff]  ;;  %v1520_v47 = vcombine.low %v304_v39, %v308_v40 }
  0x7d   : > { %v1524_v48 = vcombine.low %v306_v41, %v310_v42 }
  0x7e   : > { %1221 = vmatpush1.bf16.msra.mxu1 %v1845_v43  ;;  %v1512_v43 = vcombine.low %v2171_v61, %v2174_v62 }
  0x7f   : > { %1327 = vmatpush1.bf16.msra.mxu0 %v1848_v44  ;;  %1222 = vmatprep.subr.bf16.mxu1 %v1853_v45  ;;  %v1516_v44 = vcombine.low %v2177_v63, %v2184_v3  ;;  %v1521_v45 = vcombine.high %v304_v39, %v308_v40  ;;  %v290_v63 = vld [vmem:[%s2295_s2 + $0x18] sm:$0xff] }
  0x80   : > { %1328 = vmatprep.subr.bf16.mxu0 %v1856_v46  ;;  %v1525_v46 = vcombine.high %v306_v41, %v310_v42 }
  0x82   : > { %1223 = vmatpush1.bf16.msra.mxu1 %v1851_v52 }
  0x83   : > { %1329 = vmatpush1.bf16.msra.mxu0 %v1854_v53  ;;  %1224 = vmatprep.subr.bf16.mxu1 %v1859_v57 }
  0x84   : > { %1330 = vmatprep.subr.bf16.mxu0 %v1862_v58  ;;  %v289_v58 = vld [vmem:[%s2295_s2 + $0x10] sm:$0xff] }
  0x86   : > { %1225 = vmatpush1.bf16.msra.mxu1 %v1857_v59 }
  0x87   : > { %1331 = vmatpush1.bf16.msra.mxu0 %v1860_v60  ;;  %1226 = vmatprep.subr.bf16.mxu1 %v1865_v0 }
  0x88   : > { %1332 = vmatprep.subr.bf16.mxu0 %v1868_v1 }
  0x8a   : > { %1227 = vmatpush1.bf16.msra.mxu1 %v1863_v5 }
  0x8b   : > { %1333 = vmatpush1.bf16.msra.mxu0 %v1866_v6  ;;  %1228 = vmatprep.subr.bf16.mxu1 %v1871_v7  ;;  %v291_v6 = vld [vmem:[%s2295_s2 + $0x20] sm:$0xff] }
  0x8c   : > { %1334 = vmatprep.subr.bf16.mxu0 %v1874_v8 }
  0x8e   : > { %1229 = vmatpush1.bf16.msra.mxu1 %v1869_v9 }
  0x8f   : > { %1335 = vmatpush1.bf16.msra.mxu0 %v1872_v10  ;;  %1230 = vmatprep.subr.bf16.mxu1 %v1877_v11  ;;  %v292_v10 = vld [vmem:[%s2295_s2 + $0x28] sm:$0xff] }
  0x90   : > { %1336 = vmatprep.subr.bf16.mxu0 %v1880_v12 }
  0x92   : > { %1231 = vmatpush1.bf16.msra.mxu1 %v1875_v13 }
  0x93   : > { %1337 = vmatpush1.bf16.msra.mxu0 %v1878_v14  ;;  %1232 = vmatprep.subr.bf16.mxu1 %v1883_v15  ;;  %v293_v14 = vld [vmem:[%s2295_s2 + $0x30] sm:$0xff] }
  0x94   : > { %1338 = vmatprep.subr.bf16.mxu0 %v1886_v16 }
  0x96   : > { %1233 = vmatpush1.bf16.msra.mxu1 %v1881_v17 }
  0x97   : > { %1339 = vmatpush1.bf16.msra.mxu0 %v1884_v18  ;;  %1234 = vmatprep.subr.bf16.mxu1 %v1889_v19  ;;  %v294_v19 = vld [vmem:[%s2295_s2 + $0x38] sm:$0xff] }
  0x98   : > { %1340 = vmatprep.subr.bf16.mxu0 %v1892_v20 }
  0x9a   : > { %1235 = vmatpush1.bf16.msra.mxu1 %v1887_v21 }
  0x9b   : > { %1341 = vmatpush1.bf16.msra.mxu0 %v1890_v22  ;;  %1236 = vmatprep.subr.bf16.mxu1 %v1895_v23 }
  0x9c   : > { %1342 = vmatprep.subr.bf16.mxu0 %v1898_v24 }
  0x9e   : > { %1237 = vmatpush1.bf16.msra.mxu1 %v1893_v25 }
  0x9f   : > { %1343 = vmatpush1.bf16.msra.mxu0 %v1896_v26  ;;  %1238 = vmatprep.subr.bf16.mxu1 %v1901_v27 }
  0xa0   : > { %1344 = vmatprep.subr.bf16.mxu0 %v1904_v28 }
  0xa2   : > { %1239 = vmatpush1.bf16.msra.mxu1 %v1899_v29 }
  0xa3   : > { %1345 = vmatpush1.bf16.msra.mxu0 %v1902_v30  ;;  %1240 = vmatprep.subr.bf16.mxu1 %v1907_v31 }
  0xa4   : > { %1346 = vmatprep.subr.bf16.mxu0 %v1910_v32 }
  0xa6   : > { %1241 = vmatpush1.bf16.msra.mxu1 %v1905_v33 }
  0xa7   : > { %1347 = vmatpush1.bf16.msra.mxu0 %v1908_v34  ;;  %1242 = vmatprep.subr.bf16.mxu1 %v1913_v35 }
  0xa8   : > { %1348 = vmatprep.subr.bf16.mxu0 %v1916_v36 }
  0xaa   : > { %1243 = vmatpush1.bf16.msra.mxu1 %v1911_v37 }
  0xab   : > { %1349 = vmatpush1.bf16.msra.mxu0 %v1914_v38 }
  0xad   : > { %1245 = vmatmul.mubr.bf16.vlgmr.msra.gmra.mrb[0].mxu1 %v1512_v43 }
  0xae   : > { %1351 = vmatmul.mubr.bf16.vlgmr.msra.gmra.mrb[0].mxu0 %v1516_v44  ;;  %1254 = vmatprep.mubr.bf16.mxu1 %v1521_v45 }
  0xaf   : > { %1360 = vmatprep.mubr.bf16.mxu0 %v1525_v46 }
  0xb5   : > { %1255 = vmatmul.mubr.bf16.gmra.mrb[4].mxu1 %v1520_v47 }
  0xb6   : > { %1361 = vmatmul.mubr.bf16.gmra.mrb[4].mxu0 %v1524_v48 }
 0x180   : > { %v1246_v49 = vpop.f32.mrb[0].mxu1 }
 0x181   : > { %v1352_v51 = vpop.f32.mrb[0].mxu0  ;;  %v1248_v53 = vpop.f32.mrb[1].mxu1 }
 0x182   : > { %v1660_v52 = vadd.f32 %v1352_v51, %v1246_v49  ;;  %v1354_v55 = vpop.f32.mrb[1].mxu0  ;;  %v1250_v57 = vpop.f32.mrb[2].mxu1 }
 0x183   : > { %v1661_v56 = vadd.f32 %v1354_v55, %v1248_v53  ;;  %v1356_v59 = vpop.f32.mrb[2].mxu0  ;;  %v1252_v62 = vpop.f32.mrb[3].mxu1 }
 0x184   : > { %v1371_v60 = vadd.f32 %v1660_v52, %v287_v50  ;;  %v1662_v61 = vadd.f32 %v1356_v59, %v1250_v57  ;;  %v1358_v0 = vpop.f32.mrb[3].mxu0 }
 0x185   : > { %v1372_v1 = vadd.f32 %v1661_v56, %v288_v54  ;;  %v1663_v2 = vadd.f32 %v1358_v0, %v1252_v62 }
 0x186   : > { %1379 = vst [vmem:[%s2295_s2] sm:$0xff] %v1371_v60  ;;  %v1373_v3 = vadd.f32 %v1662_v61, %v289_v58 }
 0x187   : > { %1380 = vst [vmem:[%s2295_s2 + $0x8] sm:$0xff] %v1372_v1  ;;  %v1374_v4 = vadd.f32 %v1663_v2, %v290_v63 }
 0x188   : > { %1381 = vst [vmem:[%s2295_s2 + $0x10] sm:$0xff] %v1373_v3  ;;  %v1256_v5 = vpop.f32.mrb[4].mxu1 }
 0x189   : > { %1382 = vst [vmem:[%s2295_s2 + $0x18] sm:$0xff] %v1374_v4  ;;  %v1362_v7 = vpop.f32.mrb[4].mxu0  ;;  %v1258_v9 = vpop.f32.mrb[5].mxu1 }
 0x18a   : > { %v1664_v8 = vadd.f32 %v1362_v7, %v1256_v5  ;;  %v1364_v11 = vpop.f32.mrb[5].mxu0  ;;  %v1260_v13 = vpop.f32.mrb[6].mxu1 }
 0x18b   : > { %v1665_v12 = vadd.f32 %v1364_v11, %v1258_v9  ;;  %v1366_v15 = vpop.f32.mrb[6].mxu0  ;;  %v1262_v18 = vpop.f32.mrb[7].mxu1 }
 0x18c   : > { %v1375_v16 = vadd.f32 %v1664_v8, %v291_v6  ;;  %v1666_v17 = vadd.f32 %v1366_v15, %v1260_v13  ;;  %v1368_v20 = vpop.f32.mrb[7].mxu0 }
 0x18d   : > { %v1376_v21 = vadd.f32 %v1665_v12, %v292_v10  ;;  %v1667_v22 = vadd.f32 %v1368_v20, %v1262_v18 }
 0x18e   : > { %1383 = vst [vmem:[%s2295_s2 + $0x20] sm:$0xff] %v1375_v16  ;;  %v1377_v23 = vadd.f32 %v1666_v17, %v293_v14 }
 0x18f   : > { %1384 = vst [vmem:[%s2295_s2 + $0x28] sm:$0xff] %v1376_v21  ;;  %v1378_v24 = vadd.f32 %v1667_v22, %v294_v19 }
 0x190   : > { %1385 = vst [vmem:[%s2295_s2 + $0x30] sm:$0xff] %v1377_v23 }
 0x191   : > { %1386 = vst [vmem:[%s2295_s2 + $0x38] sm:$0xff] %v1378_v24 }
 0x192 PF: > { %s12_s13 = sadd.s32 1, %s1955_s13   ;;  %s2296_s9 = smov %s1943_s10 }
 0x193   : > { %p9_p11 = scmp.ge.s32.totalorder %s12_s13, 4   ;;  %s2297_s10 = smov %s2008_s17 }
 0x194   : > { %s2298_s11 = smov %s1951_s12  ;;  %s2299_s12 = smov %s2301_s14 }
 0x195   :  { %11 = sbr.rel (!%p9_p11) target bundleno = 3 (0x3), region = 93 }

// kernel: forward.65
= control target key start
LH: loop header
LB: loop body
LE: loop exit
PB: predicated region body
PF: predicated region fallthrough
CT: control target
= control target key end

     0   :  { %s1652_s9 = smov 0   ;;  %s1654_s10 = smov 0   ;;  %s1902_s0 = inlined_call_operand.vmem [shape: bf16[32,2304], index: 0, kind: input, shape index: {}]   ;;  %s1903_s1 = inlined_call_operand.vmem [shape: bf16[2304,256], index: 1, kind: input, shape index: {}]   ;;  %s1904_s2 = inlined_call_operand.vmem [shape: f32[32,256], index: 2, kind: output, shape index: {}]  }
   0x1   :  { %s1656_s11 = smov 0   ;;  %s1658_s12 = smov 0  }
   0x2   :  { %s1660_s13 = smov 0  }
   0x3 LB: > { %s24_s14 = sadd.s32 1, %s1630_s12  ;;  %p47_p1 = scmp.ne.s32.totalorder %s1622_s10, %s1618_s9  ;;  %s1634_s13 = sphi %s1660_s13, %s12_s13   ;;  %s1630_s12 = sphi %s1658_s12, %s1908_s12   ;;  %s1626_s11 = sphi %s1656_s11, %s1907_s11   ;;  %s1622_s10 = sphi %s1654_s10, %s1906_s10   ;;  %s1618_s9 = sphi %s1652_s9, %s1905_s9  }
   0x4   : > { %p25_p0 = scmp.ge.s32.totalorder %s24_s14, 3  ;;  %p48_p2 = scmp.eq.s32.totalorder %s1634_s13, 0 }
   0x5   : > { %s40_s16 = sadd.s32 1, %s1622_s10  ;;  %p1223_p5 = scmp.ge.s32.totalorder %s1634_s13, 3 }
   0x6   : > { %s1910_s14 = smov (%p25_p0, %s24_s14), 0  ;;  %p49_p3 = por %p48_p2, %p47_p1 }
   0x7   : > { %s36_s15 = ssub.s32 %s1630_s12, %s1910_s14  ;;  %129 = sbr.rel (%p1223_p5) target bundleno = 25 (0x19), region = 16 }
   0x8   : > { %p38_p4 = scmp.eq.s32.totalorder %s36_s15, 0 }
   0xa   : > { %s1687_s17 = scalar_select %p38_p4, %s1622_s10, %s40_s16  }
   0xe   : > { %132 = sbr.rel (!%p49_p3) target bundleno = 25 (0x19), region = 20  ;;  %s134_s18 = sand.u32 (%p49_p3), 1, %s1622_s10  }
   0xf   : > { %s1341_s19 = smul.u32 (%p49_p3), 24, %s1630_s12 }
  0x10   : > { %s1391_s20 = smul.u32 (%p49_p3), 96, %s134_s18 }
  0x11   : > { %s142_s23 = scalar_lea.vmem (%p49_p3), %s1902_s0, %s1341_s19 }
  0x12   : > { %v155_v0 = vld [vmem:[%s142_s23] sm:$0xff] (%p49_p3)  ;;  %v157_v1 = vld [vmem:[%s142_s23 + $0x8] sm:$0xff] (%p49_p3)  ;;  %v159_v2 = vld [vmem:[%s142_s23 + $0x10] sm:$0xff] (%p49_p3)  ;;  %s136_s24 = scalar_lea.vmem (%p49_p3), [#allocation2], %s1391_s20 }
  0x13   : > { %156 = vst [vmem:[%s136_s24] sm:$0xff] (%p49_p3), %v155_v0  ;;  %158 = vst [vmem:[%s136_s24 + $0x8] sm:$0xff] (%p49_p3), %v157_v1  ;;  %v161_v3 = vld [vmem:[%s142_s23 + $0x48] sm:$0xff] (%p49_p3)  ;;  %v163_v4 = vld [vmem:[%s142_s23 + $0x50] sm:$0xff] (%p49_p3) }
  0x14   : > { %160 = vst [vmem:[%s136_s24 + $0x10] sm:$0xff] (%p49_p3), %v159_v2  ;;  %v165_v5 = vld [vmem:[%s142_s23 + $0x58] sm:$0xff] (%p49_p3)  ;;  %162 = vst [vmem:[%s136_s24 + $0x18] sm:$0xff] (%p49_p3), %v161_v3  ;;  %v167_v6 = vld [vmem:[%s142_s23 + $0x90] sm:$0xff] (%p49_p3) }
  0x15   : > { %164 = vst [vmem:[%s136_s24 + $0x20] sm:$0xff] %v163_v4  ;;  %166 = vst [vmem:[%s136_s24 + $0x28] sm:$0xff] %v165_v5  ;;  %v169_v7 = vld [vmem:[%s142_s23 + $0x98] sm:$0xff]  ;;  %v171_v8 = vld [vmem:[%s142_s23 + $0xa0] sm:$0xff] }
  0x16   : > { %168 = vst [vmem:[%s136_s24 + $0x30] sm:$0xff] %v167_v6  ;;  %170 = vst [vmem:[%s136_s24 + $0x38] sm:$0xff] %v169_v7  ;;  %v173_v9 = vld [vmem:[%s142_s23 + $0xd8] sm:$0xff]  ;;  %v175_v10 = vld [vmem:[%s142_s23 + $0xe0] sm:$0xff] }
  0x17   : > { %172 = vst [vmem:[%s136_s24 + $0x40] sm:$0xff] %v171_v8  ;;  %v177_v11 = vld [vmem:[%s142_s23 + $0xe8] sm:$0xff]  ;;  %174 = vst [vmem:[%s136_s24 + $0x48] sm:$0xff] %v173_v9 }
  0x18   : > { %176 = vst [vmem:[%s136_s24 + $0x50] sm:$0xff] %v175_v10  ;;  %178 = vst [vmem:[%s136_s24 + $0x58] sm:$0xff] %v177_v11 }
  0x19 PF: > { %p1225_p6 = scmp.ge.s32.totalorder %s1634_s13, 1  ;;  %p198_p7 = scmp.lt.s32.totalorder %s1634_s13, 4 }
  0x1b   : > { %p199_p8 = pnand %p1225_p6, %p198_p7 }
  0x1c   : > { %s205_s25 = sand.u32 (!%p199_p8), 1, %s1618_s9   ;;  %s243_s26 = smul.u32 (!%p199_p8), 96, %s1626_s11 }
  0x1d   : > { %202 = sbr.rel (%p199_p8) target bundleno = 393 (0x189), region = 47  ;;  %p1228_p10 = scmp.ne.s32.totalorder (!%p199_p8), %s1626_s11, 0 }
  0x1e   : > { %s1392_s27 = smul.u32 (!%p199_p8), 96, %s205_s25  ;;  %p245_p9 = scmp.lt.s32.totalorder (!%p199_p8), %s243_s26, 287 }
  0x20   : > { %s1704_s4 = scalar_lea.vmem (!%p199_p8), [#allocation2], %s1392_s27 }
  0x24   : > { %s1912_s26 = smov (!%p245_p9, %s243_s26), 287  ;;  %270 = sbr.rel (%p1228_p10) target bundleno = 43 (0x2b), region = 55 }
  0x25   : > { %s1342_s28 = sshll.u32 %s1912_s26, 3  ;;  %v1636_v12 = vmov (!%p1228_p10), 0.0  }
  0x26   : > { %s1702_s3 = scalar_lea.vmem %s1903_s1, %s1342_s28  ;;  %271 = vst [vmem:[%s1904_s2] sm:$0xff] (!%p1228_p10), %v1636_v12  ;;  %272 = vst [vmem:[%s1904_s2 + $0x8] sm:$0xff] (!%p1228_p10), %v1636_v12 }
  0x27   : > { %273 = vst [vmem:[%s1904_s2 + $0x10] sm:$0xff] (!%p1228_p10), %v1636_v12  ;;  %274 = vst [vmem:[%s1904_s2 + $0x18] sm:$0xff] (!%p1228_p10), %v1636_v12 }
  0x28   : > { %275 = vst [vmem:[%s1904_s2 + $0x20] sm:$0xff] (!%p1228_p10), %v1636_v12  ;;  %276 = vst [vmem:[%s1904_s2 + $0x28] sm:$0xff] (!%p1228_p10), %v1636_v12 }
  0x29   : > { %277 = vst [vmem:[%s1904_s2 + $0x30] sm:$0xff] (!%p1228_p10), %v1636_v12  ;;  %278 = vst [vmem:[%s1904_s2 + $0x38] sm:$0xff] (!%p1228_p10), %v1636_v12 }
  0x2b PF: > { %v1434_v13 = vld [vmem:[%s1702_s3 + $0x4] ss:$8 sps:$4 sm:$0xff]   ;;  %v1438_v15 = vld [vmem:[%s1702_s3] ss:$8 sps:$4 sm:$0xff]   ;;  %v1440_v17 = vld [vmem:[%s1702_s3 + $0x14] ss:$8 sps:$4 sm:$0xff]  }
  0x2c   : > { %v1436_v14 = vld [vmem:[%s1702_s3 + $0x104] ss:$8 sps:$4 sm:$0xff]   ;;  %935 = vmatprep.subr.bf16.mxu1 %v1434_v13  ;;  %v1439_v16 = vld [vmem:[%s1702_s3 + $0x100] ss:$8 sps:$4 sm:$0xff]   ;;  %v1442_v18 = vld [vmem:[%s1702_s3 + $0x114] ss:$8 sps:$4 sm:$0xff]  }
  0x2d   : > { %988 = vmatprep.subr.bf16.mxu0 %v1436_v14  ;;  %936 = vmatpush1.bf16.msra.mxu1 %v1438_v15  ;;  %v1444_v19 = vld [vmem:[%s1702_s3 + $0x10] ss:$8 sps:$4 sm:$0xff]   ;;  %v1446_v21 = vld [vmem:[%s1702_s3 + $0x24] ss:$8 sps:$4 sm:$0xff]   ;;  %v1450_v23 = vld [vmem:[%s1702_s3 + $0x20] ss:$8 sps:$4 sm:$0xff]  }
  0x2e   : > { %989 = vmatpush1.bf16.msra.mxu0 %v1439_v16  ;;  %937 = vmatprep.subr.bf16.mxu1 %v1440_v17  ;;  %v1445_v20 = vld [vmem:[%s1702_s3 + $0x110] ss:$8 sps:$4 sm:$0xff]   ;;  %v1448_v22 = vld [vmem:[%s1702_s3 + $0x124] ss:$8 sps:$4 sm:$0xff]   ;;  %v1451_v24 = vld [vmem:[%s1702_s3 + $0x120] ss:$8 sps:$4 sm:$0xff]  }
  0x2f   : > { %990 = vmatprep.subr.bf16.mxu0 %v1442_v18  ;;  %v1452_v25 = vld [vmem:[%s1702_s3 + $0x34] ss:$8 sps:$4 sm:$0xff]   ;;  %v1456_v27 = vld [vmem:[%s1702_s3 + $0x30] ss:$8 sps:$4 sm:$0xff]   ;;  %v1458_v29 = vld [vmem:[%s1702_s3 + $0x44] ss:$8 sps:$4 sm:$0xff]  }
  0x30   : > { %v1454_v26 = vld [vmem:[%s1702_s3 + $0x134] ss:$8 sps:$4 sm:$0xff]   ;;  %v1457_v28 = vld [vmem:[%s1702_s3 + $0x130] ss:$8 sps:$4 sm:$0xff]   ;;  %v1460_v30 = vld [vmem:[%s1702_s3 + $0x144] ss:$8 sps:$4 sm:$0xff]  }
  0x31   : > { %938 = vmatpush1.bf16.msra.mxu1 %v1444_v19  ;;  %v1462_v31 = vld [vmem:[%s1702_s3 + $0x40] ss:$8 sps:$4 sm:$0xff]   ;;  %v1464_v33 = vld [vmem:[%s1702_s3 + $0x54] ss:$8 sps:$4 sm:$0xff]   ;;  %v1468_v35 = vld [vmem:[%s1702_s3 + $0x50] ss:$8 sps:$4 sm:$0xff]  }
  0x32   : > { %991 = vmatpush1.bf16.msra.mxu0 %v1445_v20  ;;  %939 = vmatprep.subr.bf16.mxu1 %v1446_v21  ;;  %v1463_v32 = vld [vmem:[%s1702_s3 + $0x140] ss:$8 sps:$4 sm:$0xff]   ;;  %v1466_v34 = vld [vmem:[%s1702_s3 + $0x154] ss:$8 sps:$4 sm:$0xff]   ;;  %v1469_v36 = vld [vmem:[%s1702_s3 + $0x150] ss:$8 sps:$4 sm:$0xff]  }
  0x33   : > { %992 = vmatprep.subr.bf16.mxu0 %v1448_v22  ;;  %v1470_v37 = vld [vmem:[%s1702_s3 + $0x64] ss:$8 sps:$4 sm:$0xff]   ;;  %v1474_v39 = vld [vmem:[%s1702_s3 + $0x60] ss:$8 sps:$4 sm:$0xff]   ;;  %v1476_v41 = vld [vmem:[%s1702_s3 + $0x74] ss:$8 sps:$4 sm:$0xff]  }
  0x34   : > { %v1472_v38 = vld [vmem:[%s1702_s3 + $0x164] ss:$8 sps:$4 sm:$0xff]   ;;  %v1475_v40 = vld [vmem:[%s1702_s3 + $0x160] ss:$8 sps:$4 sm:$0xff]   ;;  %v1478_v42 = vld [vmem:[%s1702_s3 + $0x174] ss:$8 sps:$4 sm:$0xff]  }
  0x35   : > { %940 = vmatpush1.bf16.msra.mxu1 %v1450_v23  ;;  %v1480_v43 = vld [vmem:[%s1702_s3 + $0x70] ss:$8 sps:$4 sm:$0xff]   ;;  %v1482_v45 = vld [vmem:[%s1702_s3 + $0x84] ss:$8 sps:$4 sm:$0xff]   ;;  %v1486_v47 = vld [vmem:[%s1702_s3 + $0x80] ss:$8 sps:$4 sm:$0xff]  }
  0x36   : > { %993 = vmatpush1.bf16.msra.mxu0 %v1451_v24  ;;  %941 = vmatprep.subr.bf16.mxu1 %v1452_v25  ;;  %v1481_v44 = vld [vmem:[%s1702_s3 + $0x170] ss:$8 sps:$4 sm:$0xff]   ;;  %v1484_v46 = vld [vmem:[%s1702_s3 + $0x184] ss:$8 sps:$4 sm:$0xff]   ;;  %v1487_v48 = vld [vmem:[%s1702_s3 + $0x180] ss:$8 sps:$4 sm:$0xff]  }
  0x37   : > { %994 = vmatprep.subr.bf16.mxu0 %v1454_v26  ;;  %v1488_v49 = vld [vmem:[%s1702_s3 + $0x94] ss:$8 sps:$4 sm:$0xff]   ;;  %v1492_v51 = vld [vmem:[%s1702_s3 + $0x90] ss:$8 sps:$4 sm:$0xff]   ;;  %v1494_v53 = vld [vmem:[%s1702_s3 + $0xa4] ss:$8 sps:$4 sm:$0xff]  }
  0x38   : > { %v1490_v50 = vld [vmem:[%s1702_s3 + $0x194] ss:$8 sps:$4 sm:$0xff]   ;;  %v1493_v52 = vld [vmem:[%s1702_s3 + $0x190] ss:$8 sps:$4 sm:$0xff]   ;;  %v1496_v54 = vld [vmem:[%s1702_s3 + $0x1a4] ss:$8 sps:$4 sm:$0xff]  }
  0x39   : > { %942 = vmatpush1.bf16.msra.mxu1 %v1456_v27  ;;  %v1498_v55 = vld [vmem:[%s1702_s3 + $0xa0] ss:$8 sps:$4 sm:$0xff]   ;;  %v1500_v57 = vld [vmem:[%s1702_s3 + $0xb4] ss:$8 sps:$4 sm:$0xff]   ;;  %v1504_v59 = vld [vmem:[%s1702_s3 + $0xb0] ss:$8 sps:$4 sm:$0xff]  }
  0x3a   : > { %995 = vmatpush1.bf16.msra.mxu0 %v1457_v28  ;;  %943 = vmatprep.subr.bf16.mxu1 %v1458_v29  ;;  %v1499_v56 = vld [vmem:[%s1702_s3 + $0x1a0] ss:$8 sps:$4 sm:$0xff]   ;;  %v1502_v58 = vld [vmem:[%s1702_s3 + $0x1b4] ss:$8 sps:$4 sm:$0xff]   ;;  %v1505_v60 = vld [vmem:[%s1702_s3 + $0x1b0] ss:$8 sps:$4 sm:$0xff]  }
  0x3b   : > { %996 = vmatprep.subr.bf16.mxu0 %v1460_v30  ;;  %v1506_v61 = vld [vmem:[%s1702_s3 + $0xc4] ss:$8 sps:$4 sm:$0xff]   ;;  %v1510_v1 = vld [vmem:[%s1702_s3 + $0xc0] ss:$8 sps:$4 sm:$0xff]   ;;  %v1512_v3 = vld [vmem:[%s1702_s3 + $0xd4] ss:$8 sps:$4 sm:$0xff]  }
  0x3c   : > { %v1532_v62 = vld [vmem:[%s1704_s4 + $0x4] ss:$24 sps:$4 sm:$0xff]   ;;  %v1511_v2 = vld [vmem:[%s1702_s3 + $0x1c0] ss:$8 sps:$4 sm:$0xff]   ;;  %v1516_v5 = vld [vmem:[%s1702_s3 + $0xd0] ss:$8 sps:$4 sm:$0xff]  }
  0x3d   : > { %944 = vmatpush1.bf16.msra.mxu1 %v1462_v31  ;;  %v1508_v63 = vld [vmem:[%s1702_s3 + $0x1c4] ss:$8 sps:$4 sm:$0xff]   ;;  %967 = vmatprep.mubr.bf16.mxu1 %v1532_v62  ;;  %v1514_v4 = vld [vmem:[%s1702_s3 + $0x1d4] ss:$8 sps:$4 sm:$0xff]   ;;  %v1517_v6 = vld [vmem:[%s1702_s3 + $0x1d0] ss:$8 sps:$4 sm:$0xff]  }
  0x3e   : > { %997 = vmatpush1.bf16.msra.mxu0 %v1463_v32  ;;  %945 = vmatprep.subr.bf16.mxu1 %v1464_v33  ;;  %v1535_v0 = vld [vmem:[%s1704_s4 + $0xc] ss:$24 sps:$4 sm:$0xff]   ;;  %v1522_v9 = vld [vmem:[%s1702_s3 + $0xe0] ss:$8 sps:$4 sm:$0xff]   ;;  %v1524_v11 = vld [vmem:[%s1702_s3 + $0xf4] ss:$8 sps:$4 sm:$0xff]  }
  0x3f   : > { %998 = vmatprep.subr.bf16.mxu0 %v1466_v34  ;;  %1020 = vmatprep.mubr.bf16.mxu0 %v1535_v0  ;;  %v1518_v7 = vld [vmem:[%s1702_s3 + $0xe4] ss:$8 sps:$4 sm:$0xff]   ;;  %v1523_v10 = vld [vmem:[%s1702_s3 + $0x1e0] ss:$8 sps:$4 sm:$0xff]   ;;  %v1526_v12 = vld [vmem:[%s1702_s3 + $0x1f4] ss:$8 sps:$4 sm:$0xff]  }
  0x40   : > { %v1520_v8 = vld [vmem:[%s1702_s3 + $0x1e4] ss:$8 sps:$4 sm:$0xff]   ;;  %v1528_v13 = vld [vmem:[%s1702_s3 + $0xf0] ss:$8 sps:$4 sm:$0xff]   ;;  %v1533_v17 = vld [vmem:[%s1704_s4 + $0x8] ss:$24 sps:$4 sm:$0xff]  }
  0x41   : > { %946 = vmatpush1.bf16.msra.mxu1 %v1468_v35  ;;  %v1529_v14 = vld [vmem:[%s1702_s3 + $0x1f0] ss:$8 sps:$4 sm:$0xff]   ;;  %v1538_v15 = vld [vmem:[%s1702_s3 + $0x204] ss:$8 sps:$4 sm:$0xff]   ;;  %v1536_v18 = vld [vmem:[%s1702_s3 + $0x200] ss:$8 sps:$4 sm:$0xff]  }
  0x42   : > { %999 = vmatpush1.bf16.msra.mxu0 %v1469_v36  ;;  %947 = vmatprep.subr.bf16.mxu1 %v1470_v37  ;;  %v1530_v16 = vld [vmem:[%s1704_s4] ss:$24 sps:$4 sm:$0xff]   ;;  %v1541_v19 = vld [vmem:[%s1702_s3 + $0x214] ss:$8 sps:$4 sm:$0xff]   ;;  %v1544_v23 = vld [vmem:[%s1702_s3 + $0x224] ss:$8 sps:$4 sm:$0xff]  }
  0x43   : > { %1000 = vmatprep.subr.bf16.mxu0 %v1472_v38  ;;  %v1575_v20 = vld [vmem:[%s1704_s4 + $0x34] ss:$24 sps:$4 sm:$0xff]   ;;  %v1539_v22 = vld [vmem:[%s1702_s3 + $0x210] ss:$8 sps:$4 sm:$0xff]   ;;  %v1542_v26 = vld [vmem:[%s1702_s3 + $0x220] ss:$8 sps:$4 sm:$0xff]  }
  0x44   : > { %v1577_v21 = vld [vmem:[%s1704_s4 + $0x3c] ss:$24 sps:$4 sm:$0xff]   ;;  %v1582_v24 = vld [vmem:[%s1704_s4 + $0x30] ss:$24 sps:$4 sm:$0xff]   ;;  %v1550_v31 = vld [vmem:[%s1702_s3 + $0x244] ss:$8 sps:$4 sm:$0xff]  }
  0x45   : > { %948 = vmatpush1.bf16.msra.mxu1 %v1474_v39  ;;  %v1583_v25 = vld [vmem:[%s1704_s4 + $0x38] ss:$24 sps:$4 sm:$0xff]   ;;  %v1547_v27 = vld [vmem:[%s1702_s3 + $0x234] ss:$8 sps:$4 sm:$0xff]   ;;  %v1548_v32 = vld [vmem:[%s1702_s3 + $0x240] ss:$8 sps:$4 sm:$0xff]  }
  0x46   : > { %1001 = vmatpush1.bf16.msra.mxu0 %v1475_v40  ;;  %949 = vmatprep.subr.bf16.mxu1 %v1476_v41  ;;  %v1592_v28 = vld [vmem:[%s1704_s4 + $0x14] ss:$24 sps:$4 sm:$0xff]   ;;  %v1595_v29 = vld [vmem:[%s1704_s4 + $0x44] ss:$24 sps:$4 sm:$0xff]   ;;  %v1545_v30 = vld [vmem:[%s1702_s3 + $0x230] ss:$8 sps:$4 sm:$0xff]  }
  0x47   : > { %1002 = vmatprep.subr.bf16.mxu0 %v1478_v42  ;;  %v1553_v33 = vld [vmem:[%s1702_s3 + $0x254] ss:$8 sps:$4 sm:$0xff]   ;;  %v1551_v34 = vld [vmem:[%s1702_s3 + $0x250] ss:$8 sps:$4 sm:$0xff]   ;;  %v1556_v35 = vld [vmem:[%s1702_s3 + $0x264] ss:$8 sps:$4 sm:$0xff]  }
  0x48   : > { %v1554_v36 = vld [vmem:[%s1702_s3 + $0x260] ss:$8 sps:$4 sm:$0xff]   ;;  %v1559_v37 = vld [vmem:[%s1702_s3 + $0x274] ss:$8 sps:$4 sm:$0xff]   ;;  %v1557_v38 = vld [vmem:[%s1702_s3 + $0x270] ss:$8 sps:$4 sm:$0xff]  }
  0x49   : > { %950 = vmatpush1.bf16.msra.mxu1 %v1480_v43  ;;  %v1562_v39 = vld [vmem:[%s1702_s3 + $0x284] ss:$8 sps:$4 sm:$0xff]   ;;  %v1560_v40 = vld [vmem:[%s1702_s3 + $0x280] ss:$8 sps:$4 sm:$0xff]   ;;  %v1565_v41 = vld [vmem:[%s1702_s3 + $0x294] ss:$8 sps:$4 sm:$0xff]  }
  0x4a   : > { %1003 = vmatpush1.bf16.msra.mxu0 %v1481_v44  ;;  %951 = vmatprep.subr.bf16.mxu1 %v1482_v45  ;;  %v1563_v42 = vld [vmem:[%s1702_s3 + $0x290] ss:$8 sps:$4 sm:$0xff]   ;;  %v1568_v43 = vld [vmem:[%s1702_s3 + $0x2a4] ss:$8 sps:$4 sm:$0xff]   ;;  %v1566_v44 = vld [vmem:[%s1702_s3 + $0x2a0] ss:$8 sps:$4 sm:$0xff]  }
  0x4b   : > { %1004 = vmatprep.subr.bf16.mxu0 %v1484_v46  ;;  %v1571_v45 = vld [vmem:[%s1702_s3 + $0x2b4] ss:$8 sps:$4 sm:$0xff]   ;;  %v1569_v46 = vld [vmem:[%s1702_s3 + $0x2b0] ss:$8 sps:$4 sm:$0xff]  }
  0x4d   : > { %952 = vmatpush1.bf16.msra.mxu1 %v1486_v47  ;;  %v1574_v47 = vld [vmem:[%s1702_s3 + $0x2c4] ss:$8 sps:$4 sm:$0xff]  }
  0x4e   : > { %1005 = vmatpush1.bf16.msra.mxu0 %v1487_v48  ;;  %953 = vmatprep.subr.bf16.mxu1 %v1488_v49  ;;  %v1572_v48 = vld [vmem:[%s1702_s3 + $0x2c0] ss:$8 sps:$4 sm:$0xff]   ;;  %v1581_v49 = vld [vmem:[%s1702_s3 + $0x2d4] ss:$8 sps:$4 sm:$0xff]  }
  0x4f   : > { %1006 = vmatprep.subr.bf16.mxu0 %v1490_v50  ;;  %v1579_v50 = vld [vmem:[%s1702_s3 + $0x2d0] ss:$8 sps:$4 sm:$0xff]  }
  0x51   : > { %954 = vmatpush1.bf16.msra.mxu1 %v1492_v51  ;;  %v1586_v51 = vld [vmem:[%s1702_s3 + $0x2e4] ss:$8 sps:$4 sm:$0xff]  }
  0x52   : > { %1007 = vmatpush1.bf16.msra.mxu0 %v1493_v52  ;;  %955 = vmatprep.subr.bf16.mxu1 %v1494_v53  ;;  %v1584_v52 = vld [vmem:[%s1702_s3 + $0x2e0] ss:$8 sps:$4 sm:$0xff]   ;;  %v1589_v53 = vld [vmem:[%s1702_s3 + $0x2f4] ss:$8 sps:$4 sm:$0xff]  }
  0x53   : > { %1008 = vmatprep.subr.bf16.mxu0 %v1496_v54  ;;  %v1587_v54 = vld [vmem:[%s1702_s3 + $0x2f0] ss:$8 sps:$4 sm:$0xff]  }
  0x55   : > { %956 = vmatpush1.bf16.msra.mxu1 %v1498_v55  ;;  %v1590_v55 = vld [vmem:[%s1704_s4 + $0x10] ss:$24 sps:$4 sm:$0xff]  }
  0x56   : > { %1009 = vmatpush1.bf16.msra.mxu0 %v1499_v56  ;;  %957 = vmatprep.subr.bf16.mxu1 %v1500_v57  ;;  %v1593_v56 = vld [vmem:[%s1704_s4 + $0x40] ss:$24 sps:$4 sm:$0xff]  }
  0x57   : > { %1010 = vmatprep.subr.bf16.mxu0 %v1502_v58 }
  0x59   : > { %958 = vmatpush1.bf16.msra.mxu1 %v1504_v59 }
  0x5a   : > { %1011 = vmatpush1.bf16.msra.mxu0 %v1505_v60  ;;  %959 = vmatprep.subr.bf16.mxu1 %v1506_v61 }
  0x5b   : > { %1012 = vmatprep.subr.bf16.mxu0 %v1508_v63 }
  0x5d   : > { %960 = vmatpush1.bf16.msra.mxu1 %v1510_v1 }
  0x5e   : > { %1013 = vmatpush1.bf16.msra.mxu0 %v1511_v2  ;;  %961 = vmatprep.subr.bf16.mxu1 %v1512_v3 }
  0x5f   : > { %1014 = vmatprep.subr.bf16.mxu0 %v1514_v4 }
  0x61   : > { %962 = vmatpush1.bf16.msra.mxu1 %v1516_v5 }
  0x62   : > { %1015 = vmatpush1.bf16.msra.mxu0 %v1517_v6  ;;  %963 = vmatprep.subr.bf16.mxu1 %v1518_v7 }
  0x63   : > { %1016 = vmatprep.subr.bf16.mxu0 %v1520_v8 }
  0x65   : > { %964 = vmatpush1.bf16.msra.mxu1 %v1522_v9  ;;  %v279_v9 = vld [vmem:[%s1904_s2] sm:$0xff] }
  0x66   : > { %1017 = vmatpush1.bf16.msra.mxu0 %v1523_v10  ;;  %965 = vmatprep.subr.bf16.mxu1 %v1524_v11  ;;  %v283_v11 = vld [vmem:[%s1904_s2 + $0x20] sm:$0xff] }
  0x67   : > { %1018 = vmatprep.subr.bf16.mxu0 %v1526_v12 }
  0x69   : > { %966 = vmatpush1.bf16.msra.mxu1 %v1528_v13 }
  0x6a   : > { %1019 = vmatpush1.bf16.msra.mxu0 %v1529_v14  ;;  %1343 = vmatprep.subr.bf16.mxu1 %v1538_v15 }
  0x6b   : > { %1041 = vmatprep.subr.bf16.mxu0 %v1538_v15  ;;  %v280_v15 = vld [vmem:[%s1904_s2 + $0x8] sm:$0xff] }
  0x6c   : > { %968 = vmatmul.mubr.bf16.vlgmr.msra.gmra.mrb[0].mxu1 %v1530_v16 }
  0x6d   : > { %1021 = vmatmul.mubr.bf16.vlgmr.msra.gmra.mrb[0].mxu0 %v1533_v17  ;;  %1359 = vmatpush1.bf16.msra.mxu1 %v1536_v18  ;;  %v284_v17 = vld [vmem:[%s1904_s2 + $0x28] sm:$0xff] }
  0x6e   : > { %1042 = vmatpush1.bf16.msra.mxu0 %v1536_v18  ;;  %1344 = vmatprep.subr.bf16.mxu1 %v1541_v19 }
  0x6f   : > { %1043 = vmatprep.subr.bf16.mxu0 %v1541_v19  ;;  %977 = vmatprep.mubr.bf16.mxu1 %v1575_v20 }
  0x70   : > { %1030 = vmatprep.mubr.bf16.mxu0 %v1577_v21  ;;  %v281_v21 = vld [vmem:[%s1904_s2 + $0x10] sm:$0xff] }
  0x71   : > { %1360 = vmatpush1.bf16.msra.mxu1 %v1539_v22 }
  0x72   : > { %1044 = vmatpush1.bf16.msra.mxu0 %v1539_v22  ;;  %1345 = vmatprep.subr.bf16.mxu1 %v1544_v23 }
  0x73   : > { %1045 = vmatprep.subr.bf16.mxu0 %v1544_v23  ;;  %v285_v23 = vld [vmem:[%s1904_s2 + $0x30] sm:$0xff] }
  0x74   : > { %978 = vmatmul.mubr.bf16.gmra.mrb[4].mxu1 %v1582_v24 }
  0x75   : > { %1031 = vmatmul.mubr.bf16.gmra.mrb[4].mxu0 %v1583_v25  ;;  %1361 = vmatpush1.bf16.msra.mxu1 %v1542_v26 }
  0x76   : > { %1046 = vmatpush1.bf16.msra.mxu0 %v1542_v26  ;;  %1346 = vmatprep.subr.bf16.mxu1 %v1547_v27 }
  0x77   : > { %1047 = vmatprep.subr.bf16.mxu0 %v1547_v27  ;;  %1073 = vmatprep.mubr.bf16.mxu0 %v1592_v28 }
  0x78   : > { %1083 = vmatprep.mubr.bf16.mxu1 %v1595_v29  ;;  %v282_v29 = vld [vmem:[%s1904_s2 + $0x18] sm:$0xff] }
  0x79   : > { %1362 = vmatpush1.bf16.msra.mxu1 %v1545_v30 }
  0x7a   : > { %1048 = vmatpush1.bf16.msra.mxu0 %v1545_v30  ;;  %1347 = vmatprep.subr.bf16.mxu1 %v1550_v31 }
  0x7b   : > { %1049 = vmatprep.subr.bf16.mxu0 %v1550_v31  ;;  %v286_v31 = vld [vmem:[%s1904_s2 + $0x38] sm:$0xff] }
  0x7d   : > { %1363 = vmatpush1.bf16.msra.mxu1 %v1548_v32 }
  0x7e   : > { %1050 = vmatpush1.bf16.msra.mxu0 %v1548_v32  ;;  %1348 = vmatprep.subr.bf16.mxu1 %v1553_v33 }
  0x7f   : > { %1051 = vmatprep.subr.bf16.mxu0 %v1553_v33 }
  0x81   : > { %1364 = vmatpush1.bf16.msra.mxu1 %v1551_v34 }
  0x82   : > { %1052 = vmatpush1.bf16.msra.mxu0 %v1551_v34  ;;  %1349 = vmatprep.subr.bf16.mxu1 %v1556_v35 }
  0x83   : > { %1053 = vmatprep.subr.bf16.mxu0 %v1556_v35 }
  0x85   : > { %1365 = vmatpush1.bf16.msra.mxu1 %v1554_v36 }
  0x86   : > { %1054 = vmatpush1.bf16.msra.mxu0 %v1554_v36  ;;  %1350 = vmatprep.subr.bf16.mxu1 %v1559_v37 }
  0x87   : > { %1055 = vmatprep.subr.bf16.mxu0 %v1559_v37 }
  0x89   : > { %1366 = vmatpush1.bf16.msra.mxu1 %v1557_v38 }
  0x8a   : > { %1056 = vmatpush1.bf16.msra.mxu0 %v1557_v38  ;;  %1351 = vmatprep.subr.bf16.mxu1 %v1562_v39 }
  0x8b   : > { %1057 = vmatprep.subr.bf16.mxu0 %v1562_v39 }
  0x8d   : > { %1367 = vmatpush1.bf16.msra.mxu1 %v1560_v40 }
  0x8e   : > { %1058 = vmatpush1.bf16.msra.mxu0 %v1560_v40  ;;  %1352 = vmatprep.subr.bf16.mxu1 %v1565_v41 }
  0x8f   : > { %1059 = vmatprep.subr.bf16.mxu0 %v1565_v41 }
  0x91   : > { %1368 = vmatpush1.bf16.msra.mxu1 %v1563_v42 }
  0x92   : > { %1060 = vmatpush1.bf16.msra.mxu0 %v1563_v42  ;;  %1353 = vmatprep.subr.bf16.mxu1 %v1568_v43 }
  0x93   : > { %1061 = vmatprep.subr.bf16.mxu0 %v1568_v43 }
  0x95   : > { %1369 = vmatpush1.bf16.msra.mxu1 %v1566_v44 }
  0x96   : > { %1062 = vmatpush1.bf16.msra.mxu0 %v1566_v44  ;;  %1354 = vmatprep.subr.bf16.mxu1 %v1571_v45 }
  0x97   : > { %1063 = vmatprep.subr.bf16.mxu0 %v1571_v45 }
  0x99   : > { %1370 = vmatpush1.bf16.msra.mxu1 %v1569_v46 }
  0x9a   : > { %1064 = vmatpush1.bf16.msra.mxu0 %v1569_v46  ;;  %1355 = vmatprep.subr.bf16.mxu1 %v1574_v47 }
  0x9b   : > { %1065 = vmatprep.subr.bf16.mxu0 %v1574_v47 }
  0x9d   : > { %1371 = vmatpush1.bf16.msra.mxu1 %v1572_v48 }
  0x9e   : > { %1066 = vmatpush1.bf16.msra.mxu0 %v1572_v48  ;;  %1356 = vmatprep.subr.bf16.mxu1 %v1581_v49 }
  0x9f   : > { %1067 = vmatprep.subr.bf16.mxu0 %v1581_v49 }
  0xa1   : > { %1372 = vmatpush1.bf16.msra.mxu1 %v1579_v50 }
  0xa2   : > { %1068 = vmatpush1.bf16.msra.mxu0 %v1579_v50  ;;  %1357 = vmatprep.subr.bf16.mxu1 %v1586_v51 }
  0xa3   : > { %1069 = vmatprep.subr.bf16.mxu0 %v1586_v51 }
  0xa5   : > { %1373 = vmatpush1.bf16.msra.mxu1 %v1584_v52 }
  0xa6   : > { %1070 = vmatpush1.bf16.msra.mxu0 %v1584_v52  ;;  %1358 = vmatprep.subr.bf16.mxu1 %v1589_v53 }
  0xa7   : > { %1071 = vmatprep.subr.bf16.mxu0 %v1589_v53 }
  0xa9   : > { %1374 = vmatpush1.bf16.msra.mxu1 %v1587_v54 }
  0xaa   : > { %1072 = vmatpush1.bf16.msra.mxu0 %v1587_v54 }
  0xac   : > { %1084 = vmatmul.mubr.bf16.vlgmr.msra.gmra.mrb[8].mxu1 %v1593_v56 }
  0xad   : > { %1074 = vmatmul.mubr.bf16.vlgmr.msra.gmra.mrb[0].mxu0 %v1590_v55 }
 0x13f   : > { %v969_v57 = vpop.f32.mrb[0].mxu1 }
 0x140   : > { %v971_v58 = vpop.f32.mrb[1].mxu1 }
 0x141   : > { %v973_v59 = vpop.f32.mrb[2].mxu1 }
 0x142   : > { %v975_v60 = vpop.f32.mrb[3].mxu1 }
 0x147   : > { %v979_v61 = vpop.f32.mrb[4].mxu1 }
 0x148   : > { %v1032_v62 = vpop.f32.mrb[4].mxu0  ;;  %v981_v0 = vpop.f32.mrb[5].mxu1 }
 0x149   : > { %v1033_v63 = vadd.f32 %v1032_v62, %v979_v61  ;;  %v1034_v1 = vpop.f32.mrb[5].mxu0  ;;  %v983_v3 = vpop.f32.mrb[6].mxu1 }
 0x14a   : > { %v1035_v2 = vadd.f32 %v1034_v1, %v981_v0  ;;  %v1036_v4 = vpop.f32.mrb[6].mxu0  ;;  %v985_v6 = vpop.f32.mrb[7].mxu1 }
 0x14b   : > { %v1037_v5 = vadd.f32 %v1036_v4, %v983_v3  ;;  %v1038_v7 = vpop.f32.mrb[7].mxu0 }
 0x14c   : > { %v1039_v8 = vadd.f32 %v1038_v7, %v985_v6 }
 0x17f   : > { %v1085_v12 = vpop.f32.mrb[8].mxu1 }
 0x180   : > { %v1075_v10 = vpop.f32.mrb[0].mxu0  ;;  %v1086_v14 = vadd.f32 %v1085_v12, %v1033_v63  ;;  %v1087_v18 = vpop.f32.mrb[9].mxu1 }
 0x181   : > { %v1375_v13 = vadd.f32 %v1075_v10, %v969_v57  ;;  %v1077_v16 = vpop.f32.mrb[1].mxu0  ;;  %v1088_v20 = vadd.f32 %v1087_v18, %v1035_v2  ;;  %v1089_v24 = vpop.f32.mrb[10].mxu1 }
 0x182   : > { %v1376_v19 = vadd.f32 %v1077_v16, %v971_v58  ;;  %v1079_v22 = vpop.f32.mrb[2].mxu0  ;;  %v1098_v26 = vadd.f32 %v1086_v14, %v283_v11  ;;  %v1090_v28 = vadd.f32 %v1089_v24, %v1037_v5  ;;  %v1091_v32 = vpop.f32.mrb[11].mxu1 }
 0x183   : > { %v1094_v25 = vadd.f32 %v1375_v13, %v279_v9  ;;  %v1377_v27 = vadd.f32 %v1079_v22, %v973_v59  ;;  %v1081_v30 = vpop.f32.mrb[3].mxu0  ;;  %v1099_v34 = vadd.f32 %v1088_v20, %v284_v17  ;;  %v1092_v36 = vadd.f32 %v1091_v32, %v1039_v8 }
 0x184   : > { %v1095_v33 = vadd.f32 %v1376_v19, %v280_v15  ;;  %v1378_v35 = vadd.f32 %v1081_v30, %v975_v60  ;;  %1106 = vst [vmem:[%s1904_s2 + $0x20] sm:$0xff] %v1098_v26  ;;  %v1100_v38 = vadd.f32 %v1090_v28, %v285_v23 }
 0x185   : > { %1102 = vst [vmem:[%s1904_s2] sm:$0xff] %v1094_v25  ;;  %v1096_v37 = vadd.f32 %v1377_v27, %v281_v21  ;;  %1107 = vst [vmem:[%s1904_s2 + $0x28] sm:$0xff] %v1099_v34  ;;  %v1101_v40 = vadd.f32 %v1092_v36, %v286_v31 }
 0x186   : > { %1103 = vst [vmem:[%s1904_s2 + $0x8] sm:$0xff] %v1095_v33  ;;  %v1097_v39 = vadd.f32 %v1378_v35, %v282_v29  ;;  %1108 = vst [vmem:[%s1904_s2 + $0x30] sm:$0xff] %v1100_v38 }
 0x187   : > { %1104 = vst [vmem:[%s1904_s2 + $0x10] sm:$0xff] %v1096_v37  ;;  %1109 = vst [vmem:[%s1904_s2 + $0x38] sm:$0xff] %v1101_v40 }
 0x188   : > { %1105 = vst [vmem:[%s1904_s2 + $0x18] sm:$0xff] %v1097_v39 }
 0x189 PF: > { %s12_s13 = sadd.s32 1, %s1634_s13   ;;  %s1905_s9 = smov %s1622_s10 }
 0x18a   : > { %p9_p11 = scmp.ge.s32.totalorder %s12_s13, 5   ;;  %s1906_s10 = smov %s1687_s17 }
 0x18b   : > { %s1907_s11 = smov %s1630_s12  ;;  %s1908_s12 = smov %s1910_s14 }
 0x18c   :  { %11 = sbr.rel (!%p9_p11) target bundleno = 3 (0x3), region = 93 }

// kernel: forward.68
= control target key start
LH: loop header
LB: loop body
LE: loop exit
PB: predicated region body
PF: predicated region fallthrough
CT: control target
= control target key end

     0   :  { %s576_s9 = smov 0   ;;  %s578_s10 = smov 0   ;;  %s691_s0 = inlined_call_operand.vmem [shape: f32[2,16,256], index: 0, kind: input, shape index: {}]   ;;  %s692_s1 = inlined_call_operand.vmem [shape: f32[2,16,256], index: 1, kind: input, shape index: {}]   ;;  %s693_s2 = inlined_call_operand.vmem [shape: f32[2,16,256], index: 2, kind: output, shape index: {}]  }
   0x1   :  { %s580_s11 = smov 0   ;;  %s582_s12 = smov 0  }
   0x2   :  { %s584_s13 = smov 0   ;;  %s586_s14 = smov 0  }
   0x3   :  { %s588_s15 = smov 0  }
   0x4 LB: > { %s21_s16 = sadd.s32 1, %s551_s13  ;;  %s24_s17 = sadd.s32 1, %s555_s14  ;;  %s559_s15 = sphi %s588_s15, %s12_s15   ;;  %s555_s14 = sphi %s586_s14, %s701_s14   ;;  %s551_s13 = sphi %s584_s13, %s700_s13   ;;  %s547_s12 = sphi %s582_s12, %s699_s12   ;;  %s543_s11 = sphi %s580_s11, %s698_s11   ;;  %s539_s10 = sphi %s578_s10, %s697_s10   ;;  %s535_s9 = sphi %s576_s9, %s696_s9  }
   0x5   : > { %p22_p0 = scmp.ge.s32.totalorder %s21_s16, 2  ;;  %s428_s18 = sadd.s32 4294967295, %s559_s15  }
   0x6   : > { %p40_p1 = scmp.ne.s32.totalorder %s539_s10, %s535_s9  ;;  %p41_p2 = scmp.eq.s32.totalorder %s559_s15, 0 }
   0x7   : > { %s703_s16 = smov (%p22_p0, %s21_s16), 0  ;;  %s705_s17 = smov (!%p22_p0, %s24_s17), %s555_s14 }
   0x8   : > { %p26_p3 = scmp.ge.s32.totalorder %s705_s17, 2  ;;  %p100_p4 = scmp.eq.s32.totalorder %s428_s18, 3 }
   0x9   : > { %s29_s19 = ssub.s32 %s551_s13, %s703_s16  ;;  %p622_p5 = por %p41_p2, %p40_p1 }
   0xa   : > { %s707_s17 = smov (%p26_p3, %s705_s17), 0  ;;  %p628_p6 = por %p100_p4, %p40_p1 }
   0xb   : > { %s28_s22 = ssub.s32 %s555_s14, %s707_s17  ;;  %s33_s24 = sadd.s32 1, %s539_s10 }
   0xc   : > { %s30_s23 = sor.u32 %s29_s19, %s28_s22  ;;  %p431_p8 = scmp.ge.s32.totalorder %s559_s15, 4 }
   0xd   : > { %p31_p7 = scmp.eq.s32.totalorder %s30_s23, 0 }
   0xe   : > { %122 = sbr.rel (%p431_p8) target bundleno = 35 (0x23), region = 16 }
   0xf   : > { %s636_s25 = scalar_select %p31_p7, %s539_s10, %s33_s24  }
  0x15   : > { %125 = sbr.rel (!%p622_p5) target bundleno = 28 (0x1c), region = 20  ;;  %s127_s26 = sand.u32 (%p622_p5), 1, %s539_s10  }
  0x16   : > { %s433_s27 = sshll.u32 (%p622_p5), %s555_s14, 2  ;;  %s432_s28 = sshll.u32 (%p622_p5), %s127_s26, 4 }
  0x17   : > { %s131_s29 = sadd.s32 (%p622_p5), %s551_s13, %s433_s27  ;;  %s129_s6 = scalar_lea.vmem (%p622_p5), [#allocation2], %s432_s28 }
  0x18   : > { %s434_s30 = sshll.u32 (%p622_p5), %s131_s29, 3 }
  0x19   : > { %s133_s5 = scalar_lea.vmem (%p622_p5), %s691_s0, %s434_s30 }
  0x1a   : > { %v163_v0 = vld [vmem:[%s133_s5] sm:$0xff] (%p622_p5)  ;;  %v165_v1 = vld [vmem:[%s133_s5 + $0x10] sm:$0xff] (%p622_p5) }
  0x1b   : > { %164 = vst [vmem:[%s129_s6] sm:$0xff] (%p622_p5), %v163_v0  ;;  %166 = vst [vmem:[%s129_s6 + $0x8] sm:$0xff] (%p622_p5), %v165_v1 }
  0x1c PF: > { %172 = sbr.rel (!%p622_p5) target bundleno = 35 (0x23), region = 58  ;;  %s174_s7 = sand.u32 (%p622_p5), 1, %s539_s10  }
  0x1d   : > { %s436_s8 = sshll.u32 (%p622_p5), %s555_s14, 2  ;;  %s435_s18 = sshll.u32 (%p622_p5), %s174_s7, 4 }
  0x1e   : > { %s178_s19 = sadd.s32 (%p622_p5), %s551_s13, %s436_s8  ;;  %s176_s27 = scalar_lea.vmem (%p622_p5), [#allocation3], %s435_s18 }
  0x1f   : > { %s437_s22 = sshll.u32 (%p622_p5), %s178_s19, 3 }
  0x20   : > { %s180_s26 = scalar_lea.vmem (%p622_p5), %s692_s1, %s437_s22 }
  0x21   : > { %v210_v2 = vld [vmem:[%s180_s26] sm:$0xff] (%p622_p5)  ;;  %v212_v3 = vld [vmem:[%s180_s26 + $0x10] sm:$0xff] (%p622_p5) }
  0x22   : > { %211 = vst [vmem:[%s176_s27] sm:$0xff] (%p622_p5), %v210_v2  ;;  %213 = vst [vmem:[%s176_s27 + $0x8] sm:$0xff] (%p622_p5), %v212_v3 }
  0x23 PF: > { %p438_p9 = scmp.ge.s32.totalorder %s559_s15, 1  ;;  %p218_p10 = scmp.lt.s32.totalorder %s559_s15, 5 }
  0x25   : > { %p219_p11 = pnand %p438_p9, %p218_p10 }
  0x26   : > { %s225_s20 = sand.u32 (!%p219_p11), 1, %s535_s9  }
  0x27   : > { %222 = sbr.rel (%p219_p11) target bundleno = 104 (0x68), region = 96  ;;  %s658_s28 = sshll.u32 (!%p219_p11), %s225_s20, 4 }
  0x28   : > { %s227_s29 = scalar_lea.vmem (!%p219_p11), [#allocation2], %s658_s28  ;;  %s234_s9 = scalar_lea.vmem (!%p219_p11), [#allocation3], %s658_s28 }
  0x29   : > { %v256_v4 = vld [vmem:[%s227_s29] sm:$0xff] (!%p219_p11)  ;;  %v257_v5 = vld [vmem:[%s227_s29 + $0x8] sm:$0xff] (!%p219_p11)  ;;  %s255_s30 = scalar_lea.vmem (!%p219_p11), [#allocation4], %s658_s28 }
  0x2a   : > { %v258_v6 = vadd.f32 (!%p219_p11), %v257_v5, %v256_v4  ;;  %v283_v28 = vld [vmem:[%s234_s9] sm:$0xff] (!%p219_p11)  ;;  %v284_v29 = vld [vmem:[%s234_s9 + $0x8] sm:$0xff] (!%p219_p11) }
  0x2c   : > { %v259_v7 = vrot.slane (!%p219_p11), %v258_v6, 4 }
  0x2e   : > { %v260_v8 = vadd.f32 %v259_v7, %v258_v6  ;;  %s443_s3 = sshll.u32 (%p628_p6), %s547_s12, 2 }
  0x2f   : > { %s297_s4 = sadd.s32 (%p628_p6), %s543_s11, %s443_s3 }
  0x30   : > { %v261_v9 = vrot.slane %v260_v8, 2  ;;  %s444_s5 = sshll.u32 (%p628_p6), %s297_s4, 3 }
  0x31   : > { %s299_s8 = scalar_lea.vmem (%p628_p6), %s693_s2, %s444_s5 }
  0x32   : > { %v262_v10 = vadd.f32 %v261_v9, %v260_v8 }
  0x34   : > { %v263_v11 = vrot.slane %v262_v10, 1 }
  0x36   : > { %v264_v12 = vadd.f32 %v263_v11, %v262_v10 }
  0x38   : > { %v266_v13 = vmul.f32 0.0625, %v264_v12 }
  0x3a   : > { %v267_v14 = vsub.f32 %v256_v4, %v266_v13  ;;  %v268_v15 = vsub.f32 %v257_v5, %v266_v13 }
  0x3c   : > { %v269_v16 = vmul.f32 %v267_v14, %v267_v14  ;;  %v270_v17 = vmul.f32 %v268_v15, %v268_v15 }
  0x3e   : > { %v271_v18 = vadd.f32 %v270_v17, %v269_v16 }
  0x40   : > { %v272_v19 = vrot.slane %v271_v18, 4 }
  0x42   : > { %v273_v20 = vadd.f32 %v272_v19, %v271_v18 }
  0x44   : > { %v274_v21 = vrot.slane %v273_v20, 2 }
  0x46   : > { %v275_v22 = vadd.f32 %v274_v21, %v273_v20 }
  0x48   : > { %v276_v23 = vrot.slane %v275_v22, 1 }
  0x4a   : > { %v277_v24 = vadd.f32 %v276_v23, %v275_v22 }
  0x4c   : > { %v278_v25 = vmul.f32 0.0625, %v277_v24 }
  0x4e   : > { %v279_v26 = vadd.f32 1e-05, %v278_v25 }
  0x50   : > { %503 = vrsqrt.f32 %v279_v26 }
  0x59   : > { %295 = sbr.rel (!%p628_p6) target bundleno = 104 (0x68), region = 108 }
  0x5a   : > { %v504_v27 = vpop.eup %503 }
  0x5b   : > { %v281_v30 = vmul.f32 %v504_v27, %v267_v14  ;;  %v282_v31 = vmul.f32 %v504_v27, %v268_v15 }
  0x5d   : > { %v285_v32 = vadd.f32 %v283_v28, %v281_v30  ;;  %v286_v33 = vadd.f32 %v284_v29, %v282_v31 }
  0x5f   : > { %287 = vst [vmem:[%s255_s30] sm:$0xff] %v285_v32  ;;  %288 = vst [vmem:[%s255_s30 + $0x8] sm:$0xff] %v286_v33 }
  0x66   : > { %v329_v34 = vld [vmem:[%s255_s30] sm:$0xff]  ;;  %v331_v35 = vld [vmem:[%s255_s30 + $0x8] sm:$0xff] }
  0x67   : > { %330 = vst [vmem:[%s299_s8] sm:$0xff] %v329_v34  ;;  %332 = vst [vmem:[%s299_s8 + $0x10] sm:$0xff] %v331_v35 }
  0x68 PF: > { %s12_s15 = sadd.s32 1, %s559_s15   ;;  %s696_s9 = smov %s539_s10 }
  0x69   : > { %p9_p12 = scmp.ge.s32.totalorder %s12_s15, 6   ;;  %s697_s10 = smov %s636_s25 }
  0x6a   : > { %s698_s11 = smov %s551_s13  ;;  %s699_s12 = smov %s555_s14 }
  0x6b   : > { %s700_s13 = smov %s703_s16  ;;  %s701_s14 = smov %s707_s17 }
  0x6c   :  { %11 = sbr.rel (!%p9_p12) target bundleno = 4 (0x4), region = 185 }

// kernel: forward.69
= control target key start
LH: loop header
LB: loop body
LE: loop exit
PB: predicated region body
PF: predicated region fallthrough
CT: control target
= control target key end

     0   :  { %7 = vsyncpa [#allocation3], 0  ;;  %s2003_s0 = inlined_call_operand.hbm [shape: bf16[32,2304], index: 0, kind: input, shape index: {}]   ;;  %s2004_s1 = inlined_call_operand.vmem [shape: bf16[2304,256], index: 1, kind: input, shape index: {}]   ;;  %s2005_s2 = inlined_call_operand.vmem [shape: f32[32,256], index: 2, kind: output, shape index: {}]  }
   0x1   :  { %9 = vsyncpa [#allocation3 + $0x1], 0  ;;  %s1699_s9 = smov 0   ;;  %s1701_s10 = smov 0  }
   0x2   :  { %s1703_s11 = smov 0   ;;  %s1705_s12 = smov 0  }
   0x3   :  { %s1707_s13 = smov 0   ;;  %s1709_s14 = smov 0  }
   0x4 LB: > { %s1204_s15 = sadd.s32 4294967295, %s1677_s14   ;;  %s27_s16 = sadd.s32 1, %s1673_s13  ;;  %s1677_s14 = sphi %s1709_s14, %s15_s14   ;;  %s1673_s13 = sphi %s1707_s13, %s2013_s13   ;;  %s1669_s12 = sphi %s1705_s12, %s2012_s12   ;;  %s1665_s11 = sphi %s1703_s11, %s2011_s11   ;;  %s1661_s10 = sphi %s1701_s10, %s2010_s10   ;;  %s1657_s9 = sphi %s1699_s9, %s2009_s9  }
   0x5   : > { %p28_p0 = scmp.ge.s32.totalorder %s27_s16, 3  ;;  %s43_s17 = sadd.s32 1, %s1665_s11 }
   0x6   : > { %p50_p1 = scmp.ne.s32.totalorder %s1665_s11, %s1661_s10  ;;  %p51_p2 = scmp.eq.s32.totalorder %s1677_s14, 0 }
   0x7   : > { %s2015_s16 = smov (%p28_p0, %s27_s16), 0  ;;  %p56_p4 = scmp.ne.s32.totalorder %s1661_s10, %s1657_s9 }
   0x8   : > { %p52_p3 = por %p51_p2, %p50_p1  ;;  %s39_s18 = ssub.s32 %s1673_s13, %s2015_s16 }
   0x9   : > { %p57_p5 = scmp.eq.s32.totalorder %s1204_s15, 0  ;;  %p41_p6 = scmp.eq.s32.totalorder %s39_s18, 0 }
   0xa   : > { %p1382_p8 = scmp.lt.s32.totalorder %s1677_s14, 3  ;;  %s136_s21 = sand.u32 1, %s1665_s11  }
   0xb   : > { %p1738_p7 = por %p57_p5, %p56_p4  ;;  %s1324_s22 = smul.u32 384, %s1673_s13 }
   0xc   : > { %s1744_s20 = scalar_select %p41_p6, %s1665_s11, %s43_s17  }
   0xd   : > { %s1374_s23 = smul.u32 96, %s136_s21  ;;  %s1751_s26 = scalar_lea.hbm %s2003_s0, %s1324_s22 }
   0xe   : > { %p1753_p9 = pnand %p1382_p8, %p52_p3  ;;  %s1760_s30 = scalar_lea.sflag [#allocation3], %s136_s21 }
   0xf   : > { %s140_s28 = scalar_lea.vmem [#allocation2], %s1374_s23  ;;  %s1597_s3 = scalar_lea.hbm %s1751_s26, 1536 }
  0x10   : > { %s150_s29 = sshll.u32 %s140_s28, 4  ;;  %p1598_p11 = scmp.ne.s32.totalorder %s1751_s26, %s1597_s3  ;;  %s1757_s29 = int_to_ptr.vmem [resolvable:$true] %s150_s29 }
  0x11   : > { %p1599_p12 = pneg %p1753_p9  ;;  %s1602_s6 = scalar_lea.hbm %s2003_s0, 4608 }
  0x12   : > { %p1603_p1 = scmp.lt.u32.totalorder %s1751_s26, %s2003_s0  ;;  %p1604_p2 = scmp.lt.u32.totalorder %s1602_s6, %s1597_s3 }
  0x13   : > { %p1600_p13 = pnand %p1599_p12, %p1598_p11  ;;  %p1606_p4 = scmp.lt.u32.totalorder %s1597_s3, %s1751_s26 }
  0x14   : > { %p1605_p3 = por %p1604_p2, %p1603_p1 }
  0x15   : > { %p1601_p0 = pneg %p1600_p13 }
  0x16   : > { %p1607_p5 = por %p1606_p4, %p1605_p3 }
  0x18   : > { %p1608_p6 = pnand %p1607_p5, %p1601_p0 }
  0x1a   : > { %1611 = shalt.err (!%p1608_p6)
}
  0x1b   : > { %s1612_s9 = scalar_lea.vmem %s1757_s29, 1536  ;;  %s1679_s15 = smov [#allocation2]  }
  0x1c   : > { %p1613_p8 = scmp.ne.s32.totalorder %s1757_s29, %s1612_s9  ;;  %s1617_s17 = sshll.u32 %s1679_s15, 4  ;;  %s1618_s17 = int_to_ptr.vmem [resolvable:$false] %s1617_s17 }
  0x1d   : > { %s1619_s18 = scalar_lea.vmem %s1618_s17, 3072  ;;  %p1620_p10 = scmp.lt.s32.totalorder %s1757_s29, %s1618_s17 }
  0x1e   : > { %p1615_p11 = pnand %p1613_p8, %p1599_p12  ;;  %p1621_p1 = scmp.lt.s32.totalorder %s1619_s18, %s1612_s9 }
  0x20   : > { %p1616_p13 = pneg %p1615_p11  ;;  %p1622_p2 = por %p1621_p1, %p1620_p10 }
  0x22   : > { %p1623_p3 = pnand %p1622_p2, %p1616_p13 }
  0x24   : > { %1626 = shalt.err (!%p1623_p3)
}
  0x25   : > { %s1680_s21 = smov 1152   ;;  %s1681_s22 = smov 384  }
  0x26   : > { %s1682_s23 = smov 24   ;;  %p173_p12 = scmp.lt.s32.totalorder %s1677_s14, 4 }
  0x27   : > { %1381 = dma.hbm_to_vmem [thread:$0]  (!%p1753_p9), %s1751_s26, 1536, %s1757_s29, %s1760_s30, %s1680_s21, %s1681_s22, %s1682_s23  }
  0x28   : > { %p2008_p0 = scmp.ge.s32.totalorder %s1677_s14, 1 }
  0x2a   : > { %p174_p4 = pnand %p2008_p0, %p173_p12 }
  0x2b   : > { %s179_s24 = sand.u32 (!%p174_p4), 1, %s1661_s10  }
  0x2c   : > { %177 = sbr.rel (%p174_p4) target bundleno = 411 (0x19b), region = 28  ;;  %s180_s28 = scalar_lea.sflag (!%p174_p4), [#allocation3], %s179_s24 }
  0x2d   : > { %s1375_s25 = smul.u32 (!%p174_p4), 96, %s179_s24 }
  0x2f   : > { %s1792_s3 = scalar_lea.vmem (!%p174_p4), [#allocation2], %s1375_s25 }
  0x33   : > { %1652 = dma.done.wait (%p1738_p7), %s180_s28, 1536  }
  0x34   : > { %1654 = vsyncadd (%p1738_p7), %s180_s28, 4294965760  ;;  %s221_s4 = smul.u32 96, %s1669_s12  ;;  %p1211_p9 = scmp.ne.s32.totalorder %s1669_s12, 0 }
  0x35   : > { %v1683_v0 = vmov (!%p1211_p9), 0.0  }
  0x36   : > { %p223_p10 = scmp.lt.s32.totalorder %s221_s4, 287  ;;  %248 = sbr.rel (%p1211_p9) target bundleno = 61 (0x3d), region = 36  ;;  %249 = vst [vmem:[%s2005_s2] sm:$0xff] (!%p1211_p9), %v1683_v0  ;;  %250 = vst [vmem:[%s2005_s2 + $0x8] sm:$0xff] (!%p1211_p9), %v1683_v0 }
  0x37   : > { %251 = vst [vmem:[%s2005_s2 + $0x10] sm:$0xff] (!%p1211_p9), %v1683_v0  ;;  %252 = vst [vmem:[%s2005_s2 + $0x18] sm:$0xff] (!%p1211_p9), %v1683_v0 }
  0x38   : > { %s2017_s4 = smov (!%p223_p10, %s221_s4), 287  ;;  %253 = vst [vmem:[%s2005_s2 + $0x20] sm:$0xff] (!%p1211_p9), %v1683_v0  ;;  %254 = vst [vmem:[%s2005_s2 + $0x28] sm:$0xff] (!%p1211_p9), %v1683_v0 }
  0x39   : > { %s1325_s26 = sshll.u32 %s2017_s4, 3  ;;  %255 = vst [vmem:[%s2005_s2 + $0x30] sm:$0xff] (!%p1211_p9), %v1683_v0  ;;  %256 = vst [vmem:[%s2005_s2 + $0x38] sm:$0xff] (!%p1211_p9), %v1683_v0 }
  0x3a   : > { %s1802_s30 = scalar_lea.vmem %s2004_s1, %s1325_s26 }
  0x3d PF: > { %v1435_v1 = vld [vmem:[%s1802_s30 + $0x4] ss:$8 sps:$4 sm:$0xff]   ;;  %v1439_v3 = vld [vmem:[%s1802_s30] ss:$8 sps:$4 sm:$0xff]   ;;  %v1441_v5 = vld [vmem:[%s1802_s30 + $0x14] ss:$8 sps:$4 sm:$0xff]  }
  0x3e   : > { %v1437_v2 = vld [vmem:[%s1802_s30 + $0x104] ss:$8 sps:$4 sm:$0xff]   ;;  %913 = vmatprep.subr.bf16.mxu1 %v1435_v1  ;;  %v1440_v4 = vld [vmem:[%s1802_s30 + $0x100] ss:$8 sps:$4 sm:$0xff]   ;;  %v1443_v6 = vld [vmem:[%s1802_s30 + $0x114] ss:$8 sps:$4 sm:$0xff]  }
  0x3f   : > { %966 = vmatprep.subr.bf16.mxu0 %v1437_v2  ;;  %914 = vmatpush1.bf16.msra.mxu1 %v1439_v3  ;;  %v1445_v7 = vld [vmem:[%s1802_s30 + $0x10] ss:$8 sps:$4 sm:$0xff]   ;;  %v1447_v9 = vld [vmem:[%s1802_s30 + $0x24] ss:$8 sps:$4 sm:$0xff]   ;;  %v1451_v11 = vld [vmem:[%s1802_s30 + $0x20] ss:$8 sps:$4 sm:$0xff]  }
  0x40   : > { %967 = vmatpush1.bf16.msra.mxu0 %v1440_v4  ;;  %915 = vmatprep.subr.bf16.mxu1 %v1441_v5  ;;  %v1446_v8 = vld [vmem:[%s1802_s30 + $0x110] ss:$8 sps:$4 sm:$0xff]   ;;  %v1449_v10 = vld [vmem:[%s1802_s30 + $0x124] ss:$8 sps:$4 sm:$0xff]   ;;  %v1452_v12 = vld [vmem:[%s1802_s30 + $0x120] ss:$8 sps:$4 sm:$0xff]  }
  0x41   : > { %968 = vmatprep.subr.bf16.mxu0 %v1443_v6  ;;  %v1453_v13 = vld [vmem:[%s1802_s30 + $0x34] ss:$8 sps:$4 sm:$0xff]   ;;  %v1457_v15 = vld [vmem:[%s1802_s30 + $0x30] ss:$8 sps:$4 sm:$0xff]   ;;  %v1459_v17 = vld [vmem:[%s1802_s30 + $0x44] ss:$8 sps:$4 sm:$0xff]  }
  0x42   : > { %v1455_v14 = vld [vmem:[%s1802_s30 + $0x134] ss:$8 sps:$4 sm:$0xff]   ;;  %v1458_v16 = vld [vmem:[%s1802_s30 + $0x130] ss:$8 sps:$4 sm:$0xff]   ;;  %v1461_v18 = vld [vmem:[%s1802_s30 + $0x144] ss:$8 sps:$4 sm:$0xff]  }
  0x43   : > { %916 = vmatpush1.bf16.msra.mxu1 %v1445_v7  ;;  %v1463_v19 = vld [vmem:[%s1802_s30 + $0x40] ss:$8 sps:$4 sm:$0xff]   ;;  %v1465_v21 = vld [vmem:[%s1802_s30 + $0x54] ss:$8 sps:$4 sm:$0xff]   ;;  %v1469_v23 = vld [vmem:[%s1802_s30 + $0x50] ss:$8 sps:$4 sm:$0xff]  }
  0x44   : > { %969 = vmatpush1.bf16.msra.mxu0 %v1446_v8  ;;  %917 = vmatprep.subr.bf16.mxu1 %v1447_v9  ;;  %v1464_v20 = vld [vmem:[%s1802_s30 + $0x140] ss:$8 sps:$4 sm:$0xff]   ;;  %v1467_v22 = vld [vmem:[%s1802_s30 + $0x154] ss:$8 sps:$4 sm:$0xff]   ;;  %v1470_v24 = vld [vmem:[%s1802_s30 + $0x150] ss:$8 sps:$4 sm:$0xff]  }
  0x45   : > { %970 = vmatprep.subr.bf16.mxu0 %v1449_v10  ;;  %v1471_v25 = vld [vmem:[%s1802_s30 + $0x64] ss:$8 sps:$4 sm:$0xff]   ;;  %v1475_v27 = vld [vmem:[%s1802_s30 + $0x60] ss:$8 sps:$4 sm:$0xff]   ;;  %v1477_v29 = vld [vmem:[%s1802_s30 + $0x74] ss:$8 sps:$4 sm:$0xff]  }
  0x46   : > { %v1473_v26 = vld [vmem:[%s1802_s30 + $0x164] ss:$8 sps:$4 sm:$0xff]   ;;  %v1476_v28 = vld [vmem:[%s1802_s30 + $0x160] ss:$8 sps:$4 sm:$0xff]   ;;  %v1479_v30 = vld [vmem:[%s1802_s30 + $0x174] ss:$8 sps:$4 sm:$0xff]  }
  0x47   : > { %918 = vmatpush1.bf16.msra.mxu1 %v1451_v11  ;;  %v1481_v31 = vld [vmem:[%s1802_s30 + $0x70] ss:$8 sps:$4 sm:$0xff]   ;;  %v1483_v33 = vld [vmem:[%s1802_s30 + $0x84] ss:$8 sps:$4 sm:$0xff]   ;;  %v1487_v35 = vld [vmem:[%s1802_s30 + $0x80] ss:$8 sps:$4 sm:$0xff]  }
  0x48   : > { %971 = vmatpush1.bf16.msra.mxu0 %v1452_v12  ;;  %919 = vmatprep.subr.bf16.mxu1 %v1453_v13  ;;  %v1482_v32 = vld [vmem:[%s1802_s30 + $0x170] ss:$8 sps:$4 sm:$0xff]   ;;  %v1485_v34 = vld [vmem:[%s1802_s30 + $0x184] ss:$8 sps:$4 sm:$0xff]   ;;  %v1488_v36 = vld [vmem:[%s1802_s30 + $0x180] ss:$8 sps:$4 sm:$0xff]  }
  0x49   : > { %972 = vmatprep.subr.bf16.mxu0 %v1455_v14  ;;  %v1489_v37 = vld [vmem:[%s1802_s30 + $0x94] ss:$8 sps:$4 sm:$0xff]   ;;  %v1493_v39 = vld [vmem:[%s1802_s30 + $0x90] ss:$8 sps:$4 sm:$0xff]   ;;  %v1495_v41 = vld [vmem:[%s1802_s30 + $0xa4] ss:$8 sps:$4 sm:$0xff]  }
  0x4a   : > { %v1491_v38 = vld [vmem:[%s1802_s30 + $0x194] ss:$8 sps:$4 sm:$0xff]   ;;  %v1494_v40 = vld [vmem:[%s1802_s30 + $0x190] ss:$8 sps:$4 sm:$0xff]   ;;  %v1497_v42 = vld [vmem:[%s1802_s30 + $0x1a4] ss:$8 sps:$4 sm:$0xff]  }
  0x4b   : > { %920 = vmatpush1.bf16.msra.mxu1 %v1457_v15  ;;  %v1499_v43 = vld [vmem:[%s1802_s30 + $0xa0] ss:$8 sps:$4 sm:$0xff]   ;;  %v1501_v45 = vld [vmem:[%s1802_s30 + $0xb4] ss:$8 sps:$4 sm:$0xff]   ;;  %v1505_v47 = vld [vmem:[%s1802_s30 + $0xb0] ss:$8 sps:$4 sm:$0xff]  }
  0x4c   : > { %973 = vmatpush1.bf16.msra.mxu0 %v1458_v16  ;;  %921 = vmatprep.subr.bf16.mxu1 %v1459_v17  ;;  %v1500_v44 = vld [vmem:[%s1802_s30 + $0x1a0] ss:$8 sps:$4 sm:$0xff]   ;;  %v1503_v46 = vld [vmem:[%s1802_s30 + $0x1b4] ss:$8 sps:$4 sm:$0xff]   ;;  %v1506_v48 = vld [vmem:[%s1802_s30 + $0x1b0] ss:$8 sps:$4 sm:$0xff]  }
  0x4d   : > { %974 = vmatprep.subr.bf16.mxu0 %v1461_v18  ;;  %v1507_v49 = vld [vmem:[%s1802_s30 + $0xc4] ss:$8 sps:$4 sm:$0xff]   ;;  %v1511_v53 = vld [vmem:[%s1802_s30 + $0xc0] ss:$8 sps:$4 sm:$0xff]   ;;  %v1513_v55 = vld [vmem:[%s1802_s30 + $0xd4] ss:$8 sps:$4 sm:$0xff]  }
  0x4e   : > { %v1533_v50 = vld [vmem:[%s1792_s3 + $0x4] ss:$24 sps:$4 sm:$0xff]   ;;  %v1512_v54 = vld [vmem:[%s1802_s30 + $0x1c0] ss:$8 sps:$4 sm:$0xff]   ;;  %v1517_v57 = vld [vmem:[%s1802_s30 + $0xd0] ss:$8 sps:$4 sm:$0xff]  }
  0x4f   : > { %922 = vmatpush1.bf16.msra.mxu1 %v1463_v19  ;;  %v1509_v51 = vld [vmem:[%s1802_s30 + $0x1c4] ss:$8 sps:$4 sm:$0xff]   ;;  %945 = vmatprep.mubr.bf16.mxu1 %v1533_v50  ;;  %v1515_v56 = vld [vmem:[%s1802_s30 + $0x1d4] ss:$8 sps:$4 sm:$0xff]   ;;  %v1518_v58 = vld [vmem:[%s1802_s30 + $0x1d0] ss:$8 sps:$4 sm:$0xff]  }
  0x50   : > { %975 = vmatpush1.bf16.msra.mxu0 %v1464_v20  ;;  %923 = vmatprep.subr.bf16.mxu1 %v1465_v21  ;;  %v1536_v52 = vld [vmem:[%s1792_s3 + $0xc] ss:$24 sps:$4 sm:$0xff]   ;;  %v1523_v61 = vld [vmem:[%s1802_s30 + $0xe0] ss:$8 sps:$4 sm:$0xff]   ;;  %v1525_v63 = vld [vmem:[%s1802_s30 + $0xf4] ss:$8 sps:$4 sm:$0xff]  }
  0x51   : > { %976 = vmatprep.subr.bf16.mxu0 %v1467_v22  ;;  %998 = vmatprep.mubr.bf16.mxu0 %v1536_v52  ;;  %v1519_v59 = vld [vmem:[%s1802_s30 + $0xe4] ss:$8 sps:$4 sm:$0xff]   ;;  %v1524_v62 = vld [vmem:[%s1802_s30 + $0x1e0] ss:$8 sps:$4 sm:$0xff]   ;;  %v1527_v0 = vld [vmem:[%s1802_s30 + $0x1f4] ss:$8 sps:$4 sm:$0xff]  }
  0x52   : > { %v1521_v60 = vld [vmem:[%s1802_s30 + $0x1e4] ss:$8 sps:$4 sm:$0xff]   ;;  %v1529_v1 = vld [vmem:[%s1802_s30 + $0xf0] ss:$8 sps:$4 sm:$0xff]   ;;  %v1534_v5 = vld [vmem:[%s1792_s3 + $0x8] ss:$24 sps:$4 sm:$0xff]  }
  0x53   : > { %924 = vmatpush1.bf16.msra.mxu1 %v1469_v23  ;;  %v1530_v2 = vld [vmem:[%s1802_s30 + $0x1f0] ss:$8 sps:$4 sm:$0xff]   ;;  %v1539_v3 = vld [vmem:[%s1802_s30 + $0x204] ss:$8 sps:$4 sm:$0xff]   ;;  %v1537_v6 = vld [vmem:[%s1802_s30 + $0x200] ss:$8 sps:$4 sm:$0xff]  }
  0x54   : > { %977 = vmatpush1.bf16.msra.mxu0 %v1470_v24  ;;  %925 = vmatprep.subr.bf16.mxu1 %v1471_v25  ;;  %v1531_v4 = vld [vmem:[%s1792_s3] ss:$24 sps:$4 sm:$0xff]   ;;  %v1542_v7 = vld [vmem:[%s1802_s30 + $0x214] ss:$8 sps:$4 sm:$0xff]   ;;  %v1545_v11 = vld [vmem:[%s1802_s30 + $0x224] ss:$8 sps:$4 sm:$0xff]  }
  0x55   : > { %978 = vmatprep.subr.bf16.mxu0 %v1473_v26  ;;  %v1576_v8 = vld [vmem:[%s1792_s3 + $0x34] ss:$24 sps:$4 sm:$0xff]   ;;  %v1540_v10 = vld [vmem:[%s1802_s30 + $0x210] ss:$8 sps:$4 sm:$0xff]   ;;  %v1543_v14 = vld [vmem:[%s1802_s30 + $0x220] ss:$8 sps:$4 sm:$0xff]  }
  0x56   : > { %v1578_v9 = vld [vmem:[%s1792_s3 + $0x3c] ss:$24 sps:$4 sm:$0xff]   ;;  %v1583_v12 = vld [vmem:[%s1792_s3 + $0x30] ss:$24 sps:$4 sm:$0xff]   ;;  %v1551_v19 = vld [vmem:[%s1802_s30 + $0x244] ss:$8 sps:$4 sm:$0xff]  }
  0x57   : > { %926 = vmatpush1.bf16.msra.mxu1 %v1475_v27  ;;  %v1584_v13 = vld [vmem:[%s1792_s3 + $0x38] ss:$24 sps:$4 sm:$0xff]   ;;  %v1548_v15 = vld [vmem:[%s1802_s30 + $0x234] ss:$8 sps:$4 sm:$0xff]   ;;  %v1549_v20 = vld [vmem:[%s1802_s30 + $0x240] ss:$8 sps:$4 sm:$0xff]  }
  0x58   : > { %979 = vmatpush1.bf16.msra.mxu0 %v1476_v28  ;;  %927 = vmatprep.subr.bf16.mxu1 %v1477_v29  ;;  %v1593_v16 = vld [vmem:[%s1792_s3 + $0x14] ss:$24 sps:$4 sm:$0xff]   ;;  %v1596_v17 = vld [vmem:[%s1792_s3 + $0x44] ss:$24 sps:$4 sm:$0xff]   ;;  %v1546_v18 = vld [vmem:[%s1802_s30 + $0x230] ss:$8 sps:$4 sm:$0xff]  }
  0x59   : > { %980 = vmatprep.subr.bf16.mxu0 %v1479_v30  ;;  %v1554_v21 = vld [vmem:[%s1802_s30 + $0x254] ss:$8 sps:$4 sm:$0xff]   ;;  %v1552_v22 = vld [vmem:[%s1802_s30 + $0x250] ss:$8 sps:$4 sm:$0xff]   ;;  %v1557_v23 = vld [vmem:[%s1802_s30 + $0x264] ss:$8 sps:$4 sm:$0xff]  }
  0x5a   : > { %v1555_v24 = vld [vmem:[%s1802_s30 + $0x260] ss:$8 sps:$4 sm:$0xff]   ;;  %v1560_v25 = vld [vmem:[%s1802_s30 + $0x274] ss:$8 sps:$4 sm:$0xff]   ;;  %v1558_v26 = vld [vmem:[%s1802_s30 + $0x270] ss:$8 sps:$4 sm:$0xff]  }
  0x5b   : > { %928 = vmatpush1.bf16.msra.mxu1 %v1481_v31  ;;  %v1563_v27 = vld [vmem:[%s1802_s30 + $0x284] ss:$8 sps:$4 sm:$0xff]   ;;  %v1561_v28 = vld [vmem:[%s1802_s30 + $0x280] ss:$8 sps:$4 sm:$0xff]   ;;  %v1566_v29 = vld [vmem:[%s1802_s30 + $0x294] ss:$8 sps:$4 sm:$0xff]  }
  0x5c   : > { %981 = vmatpush1.bf16.msra.mxu0 %v1482_v32  ;;  %929 = vmatprep.subr.bf16.mxu1 %v1483_v33  ;;  %v1564_v30 = vld [vmem:[%s1802_s30 + $0x290] ss:$8 sps:$4 sm:$0xff]   ;;  %v1569_v31 = vld [vmem:[%s1802_s30 + $0x2a4] ss:$8 sps:$4 sm:$0xff]   ;;  %v1567_v32 = vld [vmem:[%s1802_s30 + $0x2a0] ss:$8 sps:$4 sm:$0xff]  }
  0x5d   : > { %982 = vmatprep.subr.bf16.mxu0 %v1485_v34  ;;  %v1572_v33 = vld [vmem:[%s1802_s30 + $0x2b4] ss:$8 sps:$4 sm:$0xff]   ;;  %v1570_v34 = vld [vmem:[%s1802_s30 + $0x2b0] ss:$8 sps:$4 sm:$0xff]  }
  0x5f   : > { %930 = vmatpush1.bf16.msra.mxu1 %v1487_v35  ;;  %v1575_v35 = vld [vmem:[%s1802_s30 + $0x2c4] ss:$8 sps:$4 sm:$0xff]  }
  0x60   : > { %983 = vmatpush1.bf16.msra.mxu0 %v1488_v36  ;;  %931 = vmatprep.subr.bf16.mxu1 %v1489_v37  ;;  %v1573_v36 = vld [vmem:[%s1802_s30 + $0x2c0] ss:$8 sps:$4 sm:$0xff]   ;;  %v1582_v37 = vld [vmem:[%s1802_s30 + $0x2d4] ss:$8 sps:$4 sm:$0xff]  }
  0x61   : > { %984 = vmatprep.subr.bf16.mxu0 %v1491_v38  ;;  %v1580_v38 = vld [vmem:[%s1802_s30 + $0x2d0] ss:$8 sps:$4 sm:$0xff]  }
  0x63   : > { %932 = vmatpush1.bf16.msra.mxu1 %v1493_v39  ;;  %v1587_v39 = vld [vmem:[%s1802_s30 + $0x2e4] ss:$8 sps:$4 sm:$0xff]  }
  0x64   : > { %985 = vmatpush1.bf16.msra.mxu0 %v1494_v40  ;;  %933 = vmatprep.subr.bf16.mxu1 %v1495_v41  ;;  %v1585_v40 = vld [vmem:[%s1802_s30 + $0x2e0] ss:$8 sps:$4 sm:$0xff]   ;;  %v1590_v41 = vld [vmem:[%s1802_s30 + $0x2f4] ss:$8 sps:$4 sm:$0xff]  }
  0x65   : > { %986 = vmatprep.subr.bf16.mxu0 %v1497_v42  ;;  %v1588_v42 = vld [vmem:[%s1802_s30 + $0x2f0] ss:$8 sps:$4 sm:$0xff]  }
  0x67   : > { %934 = vmatpush1.bf16.msra.mxu1 %v1499_v43  ;;  %v1591_v43 = vld [vmem:[%s1792_s3 + $0x10] ss:$24 sps:$4 sm:$0xff]  }
  0x68   : > { %987 = vmatpush1.bf16.msra.mxu0 %v1500_v44  ;;  %935 = vmatprep.subr.bf16.mxu1 %v1501_v45  ;;  %v1594_v44 = vld [vmem:[%s1792_s3 + $0x40] ss:$24 sps:$4 sm:$0xff]  }
  0x69   : > { %988 = vmatprep.subr.bf16.mxu0 %v1503_v46 }
  0x6b   : > { %936 = vmatpush1.bf16.msra.mxu1 %v1505_v47 }
  0x6c   : > { %989 = vmatpush1.bf16.msra.mxu0 %v1506_v48  ;;  %937 = vmatprep.subr.bf16.mxu1 %v1507_v49 }
  0x6d   : > { %990 = vmatprep.subr.bf16.mxu0 %v1509_v51 }
  0x6f   : > { %938 = vmatpush1.bf16.msra.mxu1 %v1511_v53 }
  0x70   : > { %991 = vmatpush1.bf16.msra.mxu0 %v1512_v54  ;;  %939 = vmatprep.subr.bf16.mxu1 %v1513_v55 }
  0x71   : > { %992 = vmatprep.subr.bf16.mxu0 %v1515_v56 }
  0x73   : > { %940 = vmatpush1.bf16.msra.mxu1 %v1517_v57 }
  0x74   : > { %993 = vmatpush1.bf16.msra.mxu0 %v1518_v58  ;;  %941 = vmatprep.subr.bf16.mxu1 %v1519_v59 }
  0x75   : > { %994 = vmatprep.subr.bf16.mxu0 %v1521_v60 }
  0x77   : > { %942 = vmatpush1.bf16.msra.mxu1 %v1523_v61  ;;  %v257_v61 = vld [vmem:[%s2005_s2] sm:$0xff] }
  0x78   : > { %995 = vmatpush1.bf16.msra.mxu0 %v1524_v62  ;;  %943 = vmatprep.subr.bf16.mxu1 %v1525_v63  ;;  %v261_v63 = vld [vmem:[%s2005_s2 + $0x20] sm:$0xff] }
  0x79   : > { %996 = vmatprep.subr.bf16.mxu0 %v1527_v0 }
  0x7b   : > { %944 = vmatpush1.bf16.msra.mxu1 %v1529_v1 }
  0x7c   : > { %997 = vmatpush1.bf16.msra.mxu0 %v1530_v2  ;;  %1326 = vmatprep.subr.bf16.mxu1 %v1539_v3 }
  0x7d   : > { %1019 = vmatprep.subr.bf16.mxu0 %v1539_v3  ;;  %v258_v3 = vld [vmem:[%s2005_s2 + $0x8] sm:$0xff] }
  0x7e   : > { %946 = vmatmul.mubr.bf16.vlgmr.msra.gmra.mrb[0].mxu1 %v1531_v4 }
  0x7f   : > { %999 = vmatmul.mubr.bf16.vlgmr.msra.gmra.mrb[0].mxu0 %v1534_v5  ;;  %1342 = vmatpush1.bf16.msra.mxu1 %v1537_v6  ;;  %v262_v5 = vld [vmem:[%s2005_s2 + $0x28] sm:$0xff] }
  0x80   : > { %1020 = vmatpush1.bf16.msra.mxu0 %v1537_v6  ;;  %1327 = vmatprep.subr.bf16.mxu1 %v1542_v7 }
  0x81   : > { %1021 = vmatprep.subr.bf16.mxu0 %v1542_v7  ;;  %955 = vmatprep.mubr.bf16.mxu1 %v1576_v8 }
  0x82   : > { %1008 = vmatprep.mubr.bf16.mxu0 %v1578_v9  ;;  %v259_v9 = vld [vmem:[%s2005_s2 + $0x10] sm:$0xff] }
  0x83   : > { %1343 = vmatpush1.bf16.msra.mxu1 %v1540_v10 }
  0x84   : > { %1022 = vmatpush1.bf16.msra.mxu0 %v1540_v10  ;;  %1328 = vmatprep.subr.bf16.mxu1 %v1545_v11 }
  0x85   : > { %1023 = vmatprep.subr.bf16.mxu0 %v1545_v11  ;;  %v263_v11 = vld [vmem:[%s2005_s2 + $0x30] sm:$0xff] }
  0x86   : > { %956 = vmatmul.mubr.bf16.gmra.mrb[4].mxu1 %v1583_v12 }
  0x87   : > { %1009 = vmatmul.mubr.bf16.gmra.mrb[4].mxu0 %v1584_v13  ;;  %1344 = vmatpush1.bf16.msra.mxu1 %v1543_v14 }
  0x88   : > { %1024 = vmatpush1.bf16.msra.mxu0 %v1543_v14  ;;  %1329 = vmatprep.subr.bf16.mxu1 %v1548_v15 }
  0x89   : > { %1025 = vmatprep.subr.bf16.mxu0 %v1548_v15  ;;  %1051 = vmatprep.mubr.bf16.mxu0 %v1593_v16 }
  0x8a   : > { %1061 = vmatprep.mubr.bf16.mxu1 %v1596_v17  ;;  %v260_v17 = vld [vmem:[%s2005_s2 + $0x18] sm:$0xff] }
  0x8b   : > { %1345 = vmatpush1.bf16.msra.mxu1 %v1546_v18 }
  0x8c   : > { %1026 = vmatpush1.bf16.msra.mxu0 %v1546_v18  ;;  %1330 = vmatprep.subr.bf16.mxu1 %v1551_v19 }
  0x8d   : > { %1027 = vmatprep.subr.bf16.mxu0 %v1551_v19  ;;  %v264_v19 = vld [vmem:[%s2005_s2 + $0x38] sm:$0xff] }
  0x8f   : > { %1346 = vmatpush1.bf16.msra.mxu1 %v1549_v20 }
  0x90   : > { %1028 = vmatpush1.bf16.msra.mxu0 %v1549_v20  ;;  %1331 = vmatprep.subr.bf16.mxu1 %v1554_v21 }
  0x91   : > { %1029 = vmatprep.subr.bf16.mxu0 %v1554_v21 }
  0x93   : > { %1347 = vmatpush1.bf16.msra.mxu1 %v1552_v22 }
  0x94   : > { %1030 = vmatpush1.bf16.msra.mxu0 %v1552_v22  ;;  %1332 = vmatprep.subr.bf16.mxu1 %v1557_v23 }
  0x95   : > { %1031 = vmatprep.subr.bf16.mxu0 %v1557_v23 }
  0x97   : > { %1348 = vmatpush1.bf16.msra.mxu1 %v1555_v24 }
  0x98   : > { %1032 = vmatpush1.bf16.msra.mxu0 %v1555_v24  ;;  %1333 = vmatprep.subr.bf16.mxu1 %v1560_v25 }
  0x99   : > { %1033 = vmatprep.subr.bf16.mxu0 %v1560_v25 }
  0x9b   : > { %1349 = vmatpush1.bf16.msra.mxu1 %v1558_v26 }
  0x9c   : > { %1034 = vmatpush1.bf16.msra.mxu0 %v1558_v26  ;;  %1334 = vmatprep.subr.bf16.mxu1 %v1563_v27 }
  0x9d   : > { %1035 = vmatprep.subr.bf16.mxu0 %v1563_v27 }
  0x9f   : > { %1350 = vmatpush1.bf16.msra.mxu1 %v1561_v28 }
  0xa0   : > { %1036 = vmatpush1.bf16.msra.mxu0 %v1561_v28  ;;  %1335 = vmatprep.subr.bf16.mxu1 %v1566_v29 }
  0xa1   : > { %1037 = vmatprep.subr.bf16.mxu0 %v1566_v29 }
  0xa3   : > { %1351 = vmatpush1.bf16.msra.mxu1 %v1564_v30 }
  0xa4   : > { %1038 = vmatpush1.bf16.msra.mxu0 %v1564_v30  ;;  %1336 = vmatprep.subr.bf16.mxu1 %v1569_v31 }
  0xa5   : > { %1039 = vmatprep.subr.bf16.mxu0 %v1569_v31 }
  0xa7   : > { %1352 = vmatpush1.bf16.msra.mxu1 %v1567_v32 }
  0xa8   : > { %1040 = vmatpush1.bf16.msra.mxu0 %v1567_v32  ;;  %1337 = vmatprep.subr.bf16.mxu1 %v1572_v33 }
  0xa9   : > { %1041 = vmatprep.subr.bf16.mxu0 %v1572_v33 }
  0xab   : > { %1353 = vmatpush1.bf16.msra.mxu1 %v1570_v34 }
  0xac   : > { %1042 = vmatpush1.bf16.msra.mxu0 %v1570_v34  ;;  %1338 = vmatprep.subr.bf16.mxu1 %v1575_v35 }
  0xad   : > { %1043 = vmatprep.subr.bf16.mxu0 %v1575_v35 }
  0xaf   : > { %1354 = vmatpush1.bf16.msra.mxu1 %v1573_v36 }
  0xb0   : > { %1044 = vmatpush1.bf16.msra.mxu0 %v1573_v36  ;;  %1339 = vmatprep.subr.bf16.mxu1 %v1582_v37 }
  0xb1   : > { %1045 = vmatprep.subr.bf16.mxu0 %v1582_v37 }
  0xb3   : > { %1355 = vmatpush1.bf16.msra.mxu1 %v1580_v38 }
  0xb4   : > { %1046 = vmatpush1.bf16.msra.mxu0 %v1580_v38  ;;  %1340 = vmatprep.subr.bf16.mxu1 %v1587_v39 }
  0xb5   : > { %1047 = vmatprep.subr.bf16.mxu0 %v1587_v39 }
  0xb7   : > { %1356 = vmatpush1.bf16.msra.mxu1 %v1585_v40 }
  0xb8   : > { %1048 = vmatpush1.bf16.msra.mxu0 %v1585_v40  ;;  %1341 = vmatprep.subr.bf16.mxu1 %v1590_v41 }
  0xb9   : > { %1049 = vmatprep.subr.bf16.mxu0 %v1590_v41 }
  0xbb   : > { %1357 = vmatpush1.bf16.msra.mxu1 %v1588_v42 }
  0xbc   : > { %1050 = vmatpush1.bf16.msra.mxu0 %v1588_v42 }
  0xbe   : > { %1062 = vmatmul.mubr.bf16.vlgmr.msra.gmra.mrb[8].mxu1 %v1594_v44 }
  0xbf   : > { %1052 = vmatmul.mubr.bf16.vlgmr.msra.gmra.mrb[0].mxu0 %v1591_v43 }
 0x151   : > { %v947_v45 = vpop.f32.mrb[0].mxu1 }
 0x152   : > { %v949_v46 = vpop.f32.mrb[1].mxu1 }
 0x153   : > { %v951_v47 = vpop.f32.mrb[2].mxu1 }
 0x154   : > { %v953_v48 = vpop.f32.mrb[3].mxu1 }
 0x159   : > { %v957_v49 = vpop.f32.mrb[4].mxu1 }
 0x15a   : > { %v1010_v50 = vpop.f32.mrb[4].mxu0  ;;  %v959_v52 = vpop.f32.mrb[5].mxu1 }
 0x15b   : > { %v1011_v51 = vadd.f32 %v1010_v50, %v957_v49  ;;  %v1012_v53 = vpop.f32.mrb[5].mxu0  ;;  %v961_v55 = vpop.f32.mrb[6].mxu1 }
 0x15c   : > { %v1013_v54 = vadd.f32 %v1012_v53, %v959_v52  ;;  %v1014_v56 = vpop.f32.mrb[6].mxu0  ;;  %v963_v58 = vpop.f32.mrb[7].mxu1 }
 0x15d   : > { %v1015_v57 = vadd.f32 %v1014_v56, %v961_v55  ;;  %v1016_v59 = vpop.f32.mrb[7].mxu0 }
 0x15e   : > { %v1017_v60 = vadd.f32 %v1016_v59, %v963_v58 }
 0x191   : > { %v1063_v0 = vpop.f32.mrb[8].mxu1 }
 0x192   : > { %v1053_v62 = vpop.f32.mrb[0].mxu0  ;;  %v1064_v2 = vadd.f32 %v1063_v0, %v1011_v51  ;;  %v1065_v6 = vpop.f32.mrb[9].mxu1 }
 0x193   : > { %v1358_v1 = vadd.f32 %v1053_v62, %v947_v45  ;;  %v1055_v4 = vpop.f32.mrb[1].mxu0  ;;  %v1066_v8 = vadd.f32 %v1065_v6, %v1013_v54  ;;  %v1067_v12 = vpop.f32.mrb[10].mxu1 }
 0x194   : > { %v1359_v7 = vadd.f32 %v1055_v4, %v949_v46  ;;  %v1057_v10 = vpop.f32.mrb[2].mxu0  ;;  %v1076_v14 = vadd.f32 %v1064_v2, %v261_v63  ;;  %v1068_v16 = vadd.f32 %v1067_v12, %v1015_v57  ;;  %v1069_v20 = vpop.f32.mrb[11].mxu1 }
 0x195   : > { %v1072_v13 = vadd.f32 %v1358_v1, %v257_v61  ;;  %v1360_v15 = vadd.f32 %v1057_v10, %v951_v47  ;;  %v1059_v18 = vpop.f32.mrb[3].mxu0  ;;  %v1077_v22 = vadd.f32 %v1066_v8, %v262_v5  ;;  %v1070_v24 = vadd.f32 %v1069_v20, %v1017_v60 }
 0x196   : > { %v1073_v21 = vadd.f32 %v1359_v7, %v258_v3  ;;  %v1361_v23 = vadd.f32 %v1059_v18, %v953_v48  ;;  %1084 = vst [vmem:[%s2005_s2 + $0x20] sm:$0xff] %v1076_v14  ;;  %v1078_v26 = vadd.f32 %v1068_v16, %v263_v11 }
 0x197   : > { %1080 = vst [vmem:[%s2005_s2] sm:$0xff] %v1072_v13  ;;  %v1074_v25 = vadd.f32 %v1360_v15, %v259_v9  ;;  %1085 = vst [vmem:[%s2005_s2 + $0x28] sm:$0xff] %v1077_v22  ;;  %v1079_v28 = vadd.f32 %v1070_v24, %v264_v19 }
 0x198   : > { %1081 = vst [vmem:[%s2005_s2 + $0x8] sm:$0xff] %v1073_v21  ;;  %v1075_v27 = vadd.f32 %v1361_v23, %v260_v17  ;;  %1086 = vst [vmem:[%s2005_s2 + $0x30] sm:$0xff] %v1078_v26 }
 0x199   : > { %1082 = vst [vmem:[%s2005_s2 + $0x10] sm:$0xff] %v1074_v25  ;;  %1087 = vst [vmem:[%s2005_s2 + $0x38] sm:$0xff] %v1079_v28 }
 0x19a   : > { %1083 = vst [vmem:[%s2005_s2 + $0x18] sm:$0xff] %v1075_v27 }
 0x19b PF: > { %s15_s14 = sadd.s32 1, %s1677_s14   ;;  %s2009_s9 = smov %s1661_s10 }
 0x19c   : > { %p12_p7 = scmp.ge.s32.totalorder %s15_s14, 5   ;;  %s2010_s10 = smov %s1665_s11 }
 0x19d   : > { %s2011_s11 = smov %s1744_s20  ;;  %s2012_s12 = smov %s1673_s13 }
 0x19e   : > { %s2013_s13 = smov %s2015_s16  ;;  %14 = sbr.rel (!%p12_p7) target bundleno = 4 (0x4), region = 75 }
 0x1a5   :  { %1121 = vsyncpa [#allocation3], 1 }
 0x1a6   :  { %1123 = vsyncpa [#allocation3 + $0x1], 1 }

// kernel: forward.97
= control target key start
LH: loop header
LB: loop body
LE: loop exit
PB: predicated region body
PF: predicated region fallthrough
CT: control target
= control target key end

     0   :  { %s1364_s1 = inlined_call_operand.vmem [shape: bf16[1024,128], index: 1, kind: input, shape index: {}]   ;;  %s1365_s0 = inlined_call_operand.vmem [shape: bf16[32,1024], index: 0, kind: input, shape index: {}]   ;;  %s1366_s2 = inlined_call_operand.vmem [shape: f32[32,128], index: 2, kind: output, shape index: {}]  }
   0x1   :  { %v1033_v0 = vld [vmem:[%s1364_s1 + $0x40] sm:$0xff]   ;;  %v1037_v4 = vld [vmem:[%s1364_s1 + $0x48] sm:$0xff]   ;;  %v1041_v8 = vld [vmem:[%s1364_s1 + $0x50] sm:$0xff]  }
   0x2   :  { %v1034_v1 = vld [vmem:[%s1364_s1 + $0xc0] sm:$0xff]   ;;  %920 = vmatprep.subr.bf16.mxu0 %v1033_v0  ;;  %v1038_v5 = vld [vmem:[%s1364_s1 + $0xc8] sm:$0xff]   ;;  %v1042_v9 = vld [vmem:[%s1364_s1 + $0xd0] sm:$0xff]  }
   0x3   :  { %v1035_v2 = vld [vmem:[%s1364_s1] sm:$0xff]   ;;  %948 = vmatprep.subr.bf16.mxu1 %v1034_v1  ;;  %v1039_v6 = vld [vmem:[%s1364_s1 + $0x8] sm:$0xff]   ;;  %v1043_v10 = vld [vmem:[%s1364_s1 + $0x10] sm:$0xff]  }
   0x4   :  { %v1036_v3 = vld [vmem:[%s1364_s1 + $0x80] sm:$0xff]   ;;  %921 = vmatpush3.bf16.msra.mxu0 %v1035_v2  ;;  %v1040_v7 = vld [vmem:[%s1364_s1 + $0x88] sm:$0xff]   ;;  %v1044_v11 = vld [vmem:[%s1364_s1 + $0x90] sm:$0xff]  }
   0x5   :  { %949 = vmatpush3.bf16.msra.mxu1 %v1036_v3  ;;  %922 = vmatprep.subr.bf16.mxu0 %v1037_v4  ;;  %v1045_v12 = vld [vmem:[%s1364_s1 + $0x58] sm:$0xff]   ;;  %v1049_v16 = vld [vmem:[%s1364_s1 + $0x60] sm:$0xff]   ;;  %v1053_v20 = vld [vmem:[%s1364_s1 + $0x68] sm:$0xff]  }
   0x6   :  { %950 = vmatprep.subr.bf16.mxu1 %v1038_v5  ;;  %v1046_v13 = vld [vmem:[%s1364_s1 + $0xd8] sm:$0xff]   ;;  %v1050_v17 = vld [vmem:[%s1364_s1 + $0xe0] sm:$0xff]   ;;  %v1054_v21 = vld [vmem:[%s1364_s1 + $0xe8] sm:$0xff]  }
   0x7   :  { %v1047_v14 = vld [vmem:[%s1364_s1 + $0x18] sm:$0xff]   ;;  %v1051_v18 = vld [vmem:[%s1364_s1 + $0x20] sm:$0xff]   ;;  %v1055_v22 = vld [vmem:[%s1364_s1 + $0x28] sm:$0xff]  }
   0x8   :  { %923 = vmatpush3.bf16.msra.mxu0 %v1039_v6  ;;  %v1048_v15 = vld [vmem:[%s1364_s1 + $0x98] sm:$0xff]   ;;  %v1052_v19 = vld [vmem:[%s1364_s1 + $0xa0] sm:$0xff]   ;;  %v1056_v23 = vld [vmem:[%s1364_s1 + $0xa8] sm:$0xff]  }
   0x9   :  { %951 = vmatpush3.bf16.msra.mxu1 %v1040_v7  ;;  %924 = vmatprep.subr.bf16.mxu0 %v1041_v8  ;;  %v1057_v24 = vld [vmem:[%s1364_s1 + $0x70] sm:$0xff]   ;;  %v1061_v28 = vld [vmem:[%s1364_s1 + $0x78] sm:$0xff]   ;;  %v24_v32 = vld [vmem:[%s1365_s0] sm:$0xff] }
   0xa   :  { %952 = vmatprep.subr.bf16.mxu1 %v1042_v9  ;;  %v1058_v25 = vld [vmem:[%s1364_s1 + $0xf0] sm:$0xff]   ;;  %v1062_v29 = vld [vmem:[%s1364_s1 + $0xf8] sm:$0xff]   ;;  %v28_v33 = vld [vmem:[%s1365_s0 + $0x20] sm:$0xff] }
   0xb   :  { %v1059_v26 = vld [vmem:[%s1364_s1 + $0x30] sm:$0xff]   ;;  %v1063_v30 = vld [vmem:[%s1364_s1 + $0x38] sm:$0xff]   ;;  %v25_v34 = vld [vmem:[%s1365_s0 + $0x8] sm:$0xff]  ;;  %v840_v35 = vcombine.low %v24_v32, %v28_v33  ;;  %v841_v36 = vcombine.high %v24_v32, %v28_v33 }
   0xc   :  { %925 = vmatpush3.bf16.msra.mxu0 %v1043_v10  ;;  %v1060_v27 = vld [vmem:[%s1364_s1 + $0xb0] sm:$0xff]   ;;  %v1064_v31 = vld [vmem:[%s1364_s1 + $0xb8] sm:$0xff]   ;;  %v29_v37 = vld [vmem:[%s1365_s0 + $0x28] sm:$0xff] }
   0xd   :  { %953 = vmatpush3.bf16.msra.mxu1 %v1044_v11  ;;  %926 = vmatprep.subr.bf16.mxu0 %v1045_v12  ;;  %v842_v38 = vcombine.low %v25_v34, %v29_v37  ;;  %v843_v39 = vcombine.high %v25_v34, %v29_v37  ;;  %v1065_v40 = vld [vmem:[%s1364_s1 + $0x140] sm:$0xff]   ;;  %v1069_v44 = vld [vmem:[%s1364_s1 + $0x148] sm:$0xff]   ;;  %v1073_v48 = vld [vmem:[%s1364_s1 + $0x150] sm:$0xff]  }
   0xe   :  { %954 = vmatprep.subr.bf16.mxu1 %v1046_v13  ;;  %664 = vmatprep.mubr.bf16.mxu0 %v841_v36  ;;  %v1066_v41 = vld [vmem:[%s1364_s1 + $0x1c0] sm:$0xff]   ;;  %v1070_v45 = vld [vmem:[%s1364_s1 + $0x1c8] sm:$0xff]   ;;  %v1074_v49 = vld [vmem:[%s1364_s1 + $0x1d0] sm:$0xff]  }
   0xf   :  { %713 = vmatprep.mubr.bf16.mxu1 %v843_v39  ;;  %v1067_v42 = vld [vmem:[%s1364_s1 + $0x100] sm:$0xff]   ;;  %v1071_v46 = vld [vmem:[%s1364_s1 + $0x108] sm:$0xff]   ;;  %v1075_v50 = vld [vmem:[%s1364_s1 + $0x110] sm:$0xff]  }
  0x10   :  { %927 = vmatpush3.bf16.msra.mxu0 %v1047_v14  ;;  %v1068_v43 = vld [vmem:[%s1364_s1 + $0x180] sm:$0xff]   ;;  %v1072_v47 = vld [vmem:[%s1364_s1 + $0x188] sm:$0xff]   ;;  %v1076_v51 = vld [vmem:[%s1364_s1 + $0x190] sm:$0xff]  }
  0x11   :  { %955 = vmatpush3.bf16.msra.mxu1 %v1048_v15  ;;  %928 = vmatprep.subr.bf16.mxu0 %v1049_v16  ;;  %v1077_v52 = vld [vmem:[%s1364_s1 + $0x158] sm:$0xff]   ;;  %v1081_v56 = vld [vmem:[%s1364_s1 + $0x160] sm:$0xff]   ;;  %v33_v63 = vld [vmem:[%s1365_s0 + $0x48] sm:$0xff] }
  0x12   :  { %956 = vmatprep.subr.bf16.mxu1 %v1050_v17  ;;  %v1078_v53 = vld [vmem:[%s1364_s1 + $0x1d8] sm:$0xff]   ;;  %v1082_v57 = vld [vmem:[%s1364_s1 + $0x1e0] sm:$0xff]   ;;  %v37_v0 = vld [vmem:[%s1365_s0 + $0x68] sm:$0xff] }
  0x13   :  { %v1079_v54 = vld [vmem:[%s1364_s1 + $0x118] sm:$0xff]   ;;  %v1083_v58 = vld [vmem:[%s1364_s1 + $0x120] sm:$0xff]   ;;  %v851_v2 = vcombine.high %v33_v63, %v37_v0  ;;  %v1085_v3 = vld [vmem:[%s1364_s1 + $0x168] sm:$0xff]   ;;  %v850_v4 = vcombine.low %v33_v63, %v37_v0 }
  0x14   :  { %929 = vmatpush3.bf16.msra.mxu0 %v1051_v18  ;;  %v1080_v55 = vld [vmem:[%s1364_s1 + $0x198] sm:$0xff]   ;;  %v1084_v59 = vld [vmem:[%s1364_s1 + $0x1a0] sm:$0xff]   ;;  %v1086_v5 = vld [vmem:[%s1364_s1 + $0x1e8] sm:$0xff]  }
  0x15   :  { %957 = vmatpush3.bf16.msra.mxu1 %v1052_v19  ;;  %930 = vmatprep.subr.bf16.mxu0 %v1053_v20  ;;  %v32_v60 = vld [vmem:[%s1365_s0 + $0x40] sm:$0xff]  ;;  %v1087_v6 = vld [vmem:[%s1364_s1 + $0x128] sm:$0xff]   ;;  %v1089_v8 = vld [vmem:[%s1364_s1 + $0x170] sm:$0xff]  }
  0x16   :  { %958 = vmatprep.subr.bf16.mxu1 %v1054_v21  ;;  %v36_v61 = vld [vmem:[%s1365_s0 + $0x60] sm:$0xff]  ;;  %v1088_v7 = vld [vmem:[%s1364_s1 + $0x1a8] sm:$0xff]   ;;  %v1090_v9 = vld [vmem:[%s1364_s1 + $0x1f0] sm:$0xff]  }
  0x17   :  { %v849_v62 = vcombine.high %v32_v60, %v36_v61  ;;  %v848_v1 = vcombine.low %v32_v60, %v36_v61  ;;  %v1091_v10 = vld [vmem:[%s1364_s1 + $0x130] sm:$0xff]   ;;  %v1093_v12 = vld [vmem:[%s1364_s1 + $0x178] sm:$0xff]  }
  0x18   :  { %931 = vmatpush3.bf16.msra.mxu0 %v1055_v22  ;;  %v1092_v11 = vld [vmem:[%s1364_s1 + $0x1b0] sm:$0xff]   ;;  %v1094_v13 = vld [vmem:[%s1364_s1 + $0x1f8] sm:$0xff]  }
  0x19   :  { %959 = vmatpush3.bf16.msra.mxu1 %v1056_v23  ;;  %932 = vmatprep.subr.bf16.mxu0 %v1057_v24  ;;  %v1095_v14 = vld [vmem:[%s1364_s1 + $0x138] sm:$0xff]   ;;  %v26_v16 = vld [vmem:[%s1365_s0 + $0x10] sm:$0xff] }
  0x1a   :  { %960 = vmatprep.subr.bf16.mxu1 %v1058_v25  ;;  %v1096_v15 = vld [vmem:[%s1364_s1 + $0x1b8] sm:$0xff]   ;;  %v30_v17 = vld [vmem:[%s1365_s0 + $0x30] sm:$0xff] }
  0x1b   :  { %v27_v18 = vld [vmem:[%s1365_s0 + $0x18] sm:$0xff]  ;;  %v844_v20 = vcombine.low %v26_v16, %v30_v17  ;;  %v845_v21 = vcombine.high %v26_v16, %v30_v17  ;;  %v34_v24 = vld [vmem:[%s1365_s0 + $0x50] sm:$0xff] }
  0x1c   :  { %933 = vmatpush3.bf16.msra.mxu0 %v1059_v26  ;;  %v31_v19 = vld [vmem:[%s1365_s0 + $0x38] sm:$0xff]  ;;  %v38_v25 = vld [vmem:[%s1365_s0 + $0x70] sm:$0xff] }
  0x1d   :  { %961 = vmatpush3.bf16.msra.mxu1 %v1060_v27  ;;  %934 = vmatprep.subr.bf16.mxu0 %v1061_v28  ;;  %v846_v22 = vcombine.low %v27_v18, %v31_v19  ;;  %v847_v23 = vcombine.high %v27_v18, %v31_v19  ;;  %v35_v26 = vld [vmem:[%s1365_s0 + $0x58] sm:$0xff]  ;;  %v853_v27 = vcombine.high %v34_v24, %v38_v25 }
  0x1e   :  { %962 = vmatprep.subr.bf16.mxu1 %v1062_v29  ;;  %v39_v28 = vld [vmem:[%s1365_s0 + $0x78] sm:$0xff] }
  0x1f   :  { %v855_v29 = vcombine.high %v35_v26, %v39_v28 }
  0x20   :  { %935 = vmatpush3.bf16.msra.mxu0 %v1063_v30  ;;  %v852_v30 = vcombine.low %v34_v24, %v38_v25 }
  0x21   :  { %963 = vmatpush3.bf16.msra.mxu1 %v1064_v31  ;;  %976 = vmatprep.subr.bf16.mxu0 %v1065_v40  ;;  %v854_v31 = vcombine.low %v35_v26, %v39_v28 }
  0x22   :  { %1004 = vmatprep.subr.bf16.mxu1 %v1066_v41 }
  0x23   :  { %665 = vmatmul.mubr.bf16.vlgmr.msra.gmra.mrb[0].mxu0 %v840_v35 }
  0x24   :  { %714 = vmatmul.mubr.bf16.vlgmr.msra.gmra.mrb[0].mxu1 %v842_v38  ;;  %977 = vmatpush3.bf16.msra.mxu0 %v1067_v42 }
  0x25   :  { %1005 = vmatpush3.bf16.msra.mxu1 %v1068_v43  ;;  %978 = vmatprep.subr.bf16.mxu0 %v1069_v44 }
  0x26   :  { %1006 = vmatprep.subr.bf16.mxu1 %v1070_v45  ;;  %672 = vmatprep.mubr.bf16.mxu0 %v849_v62 }
  0x27   :  { %721 = vmatprep.mubr.bf16.mxu1 %v851_v2 }
  0x28   :  { %979 = vmatpush3.bf16.msra.mxu0 %v1071_v46 }
  0x29   :  { %1007 = vmatpush3.bf16.msra.mxu1 %v1072_v47  ;;  %980 = vmatprep.subr.bf16.mxu0 %v1073_v48 }
  0x2a   :  { %1008 = vmatprep.subr.bf16.mxu1 %v1074_v49 }
  0x2b   :  { %673 = vmatmul.mubr.bf16.gmra.mrb[4].mxu0 %v848_v1 }
  0x2c   :  { %981 = vmatpush3.bf16.msra.mxu0 %v1075_v50  ;;  %722 = vmatmul.mubr.bf16.gmra.mrb[4].mxu1 %v850_v4 }
  0x2d   :  { %1009 = vmatpush3.bf16.msra.mxu1 %v1076_v51  ;;  %982 = vmatprep.subr.bf16.mxu0 %v1077_v52 }
  0x2e   :  { %1010 = vmatprep.subr.bf16.mxu1 %v1078_v53  ;;  %762 = vmatprep.mubr.bf16.mxu0 %v845_v21 }
  0x2f   :  { %811 = vmatprep.mubr.bf16.mxu1 %v847_v23 }
  0x30   :  { %983 = vmatpush3.bf16.msra.mxu0 %v1079_v54 }
  0x31   :  { %1011 = vmatpush3.bf16.msra.mxu1 %v1080_v55  ;;  %984 = vmatprep.subr.bf16.mxu0 %v1081_v56 }
  0x32   :  { %1012 = vmatprep.subr.bf16.mxu1 %v1082_v57 }
  0x34   :  { %985 = vmatpush3.bf16.msra.mxu0 %v1083_v58 }
  0x35   :  { %1013 = vmatpush3.bf16.msra.mxu1 %v1084_v59  ;;  %986 = vmatprep.subr.bf16.mxu0 %v1085_v3 }
  0x36   :  { %1014 = vmatprep.subr.bf16.mxu1 %v1086_v5 }
  0x38   :  { %987 = vmatpush3.bf16.msra.mxu0 %v1087_v6 }
  0x39   :  { %1015 = vmatpush3.bf16.msra.mxu1 %v1088_v7  ;;  %988 = vmatprep.subr.bf16.mxu0 %v1089_v8 }
  0x3a   :  { %1016 = vmatprep.subr.bf16.mxu1 %v1090_v9 }
  0x3c   :  { %989 = vmatpush3.bf16.msra.mxu0 %v1091_v10 }
  0x3d   :  { %1017 = vmatpush3.bf16.msra.mxu1 %v1092_v11  ;;  %990 = vmatprep.subr.bf16.mxu0 %v1093_v12 }
  0x3e   :  { %1018 = vmatprep.subr.bf16.mxu1 %v1094_v13 }
  0x40   :  { %991 = vmatpush3.bf16.msra.mxu0 %v1095_v14 }
  0x41   :  { %1019 = vmatpush3.bf16.msra.mxu1 %v1096_v15 }
  0x43   :  { %763 = vmatmul.mubr.bf16.vlgmr.msra.gmra.mrb[8].mxu0 %v844_v20 }
  0x44   :  { %812 = vmatmul.mubr.bf16.vlgmr.msra.gmra.mrb[8].mxu1 %v846_v22  ;;  %770 = vmatprep.mubr.bf16.mxu0 %v853_v27 }
  0x45   :  { %819 = vmatprep.mubr.bf16.mxu1 %v855_v29 }
  0x4b   :  { %771 = vmatmul.mubr.bf16.gmra.mrb[12].mxu0 %v852_v30 }
  0x4c   :  { %820 = vmatmul.mubr.bf16.gmra.mrb[12].mxu1 %v854_v31 }
  0xf6   :  { %v936_v32 = vpop.f32.mrb[0].mxu0 }
  0xf7   :  { %v964_v33 = vpop.f32.mrb[0].mxu1  ;;  %v937_v34 = vpop.f32.mrb[1].mxu0 }
  0xf8   :  { %v938_v35 = vadd.f32 %v937_v34, %v936_v32  ;;  %v965_v36 = vpop.f32.mrb[1].mxu1  ;;  %v939_v37 = vpop.f32.mrb[2].mxu0 }
  0xf9   :  { %v966_v38 = vadd.f32 %v965_v36, %v964_v33  ;;  %v967_v39 = vpop.f32.mrb[2].mxu1  ;;  %v940_v40 = vpop.f32.mrb[3].mxu0 }
  0xfa   :  { %v941_v41 = vadd.f32 %v940_v40, %v939_v37  ;;  %v968_v42 = vpop.f32.mrb[3].mxu1 }
  0xfb   :  { %v716_v43 = vadd.f32 %v966_v38, %v938_v35  ;;  %v969_v44 = vadd.f32 %v968_v42, %v967_v39 }
  0xfd   :  { %v719_v45 = vadd.f32 %v969_v44, %v941_v41 }
  0xfe   :  { %v942_v46 = vpop.f32.mrb[4].mxu0 }
  0xff   :  { %v970_v47 = vpop.f32.mrb[4].mxu1  ;;  %v943_v48 = vpop.f32.mrb[5].mxu0 }
 0x100   :  { %v944_v49 = vadd.f32 %v943_v48, %v942_v46  ;;  %v971_v50 = vpop.f32.mrb[5].mxu1  ;;  %v945_v51 = vpop.f32.mrb[6].mxu0 }
 0x101   :  { %v972_v52 = vadd.f32 %v971_v50, %v970_v47  ;;  %v973_v53 = vpop.f32.mrb[6].mxu1  ;;  %v946_v54 = vpop.f32.mrb[7].mxu0 }
 0x102   :  { %v947_v55 = vadd.f32 %v946_v54, %v945_v51  ;;  %v974_v56 = vpop.f32.mrb[7].mxu1 }
 0x103   :  { %v724_v57 = vadd.f32 %v972_v52, %v944_v49  ;;  %v975_v58 = vadd.f32 %v974_v56, %v973_v53 }
 0x105   :  { %v727_v59 = vadd.f32 %v975_v58, %v947_v55 }
 0x116   :  { %v992_v60 = vpop.f32.mrb[8].mxu0 }
 0x117   :  { %v1020_v61 = vpop.f32.mrb[8].mxu1  ;;  %v993_v62 = vpop.f32.mrb[9].mxu0 }
 0x118   :  { %v1021_v63 = vpop.f32.mrb[9].mxu1  ;;  %v994_v0 = vadd.f32 %v993_v62, %v992_v60  ;;  %v995_v2 = vpop.f32.mrb[10].mxu0 }
 0x119   :  { %v1022_v1 = vadd.f32 %v1021_v63, %v1020_v61  ;;  %v1023_v3 = vpop.f32.mrb[10].mxu1  ;;  %v996_v4 = vpop.f32.mrb[11].mxu0 }
 0x11a   :  { %v1024_v5 = vpop.f32.mrb[11].mxu1  ;;  %v765_v6 = vadd.f32 %v994_v0, %v716_v43  ;;  %v997_v7 = vadd.f32 %v996_v4, %v995_v2 }
 0x11b   :  { %v1025_v8 = vadd.f32 %v1024_v5, %v1023_v3 }
 0x11c   :  { %v814_v9 = vadd.f32 %v1022_v1, %v765_v6  ;;  %v768_v10 = vadd.f32 %v997_v7, %v719_v45 }
 0x11e   :  { %v817_v11 = vadd.f32 %v1025_v8, %v768_v10  ;;  %v998_v12 = vpop.f32.mrb[12].mxu0  ;;  %832 = vst [vmem:[%s1366_s2] sm:$0xff] %v814_v9 }
 0x11f   :  { %v1026_v13 = vpop.f32.mrb[12].mxu1  ;;  %v999_v14 = vpop.f32.mrb[13].mxu0 }
 0x120   :  { %v1027_v15 = vpop.f32.mrb[13].mxu1  ;;  %v1000_v16 = vadd.f32 %v999_v14, %v998_v12  ;;  %v1001_v18 = vpop.f32.mrb[14].mxu0  ;;  %833 = vst [vmem:[%s1366_s2 + $0x8] sm:$0xff] %v817_v11 }
 0x121   :  { %v1028_v17 = vadd.f32 %v1027_v15, %v1026_v13  ;;  %v1029_v19 = vpop.f32.mrb[14].mxu1  ;;  %v1002_v20 = vpop.f32.mrb[15].mxu0 }
 0x122   :  { %v1030_v21 = vpop.f32.mrb[15].mxu1  ;;  %v773_v22 = vadd.f32 %v1000_v16, %v724_v57  ;;  %v1003_v23 = vadd.f32 %v1002_v20, %v1001_v18 }
 0x123   :  { %v1031_v24 = vadd.f32 %v1030_v21, %v1029_v19 }
 0x124   :  { %v822_v25 = vadd.f32 %v1028_v17, %v773_v22  ;;  %v776_v26 = vadd.f32 %v1003_v23, %v727_v59 }
 0x126   :  { %v825_v27 = vadd.f32 %v1031_v24, %v776_v26  ;;  %834 = vst [vmem:[%s1366_s2 + $0x10] sm:$0xff] %v822_v25 }
 0x128   :  { %835 = vst [vmem:[%s1366_s2 + $0x18] sm:$0xff] %v825_v27 }

// kernel: forward.102
= control target key start
LH: loop header
LB: loop body
LE: loop exit
PB: predicated region body
PF: predicated region fallthrough
CT: control target
= control target key end

     0   :  { %s1254_s1 = inlined_call_operand.vmem [shape: bf16[512,128], index: 1, kind: input, shape index: {}]   ;;  %s1255_s0 = inlined_call_operand.vmem [shape: bf16[128,512], index: 0, kind: input, shape index: {}]   ;;  %s1256_s2 = inlined_call_operand.vmem [shape: f32[128,128], index: 2, kind: output, shape index: {}]  }
   0x1   :  { %v919_v0 = vld [vmem:[%s1254_s1 + $0x40] sm:$0xff]   ;;  %v923_v4 = vld [vmem:[%s1254_s1 + $0x48] sm:$0xff]   ;;  %v927_v8 = vld [vmem:[%s1254_s1 + $0x50] sm:$0xff]  }
   0x2   :  { %v920_v1 = vld [vmem:[%s1254_s1 + $0xc0] sm:$0xff]   ;;  %790 = vmatprep.subr.bf16.mxu0 %v919_v0  ;;  %v924_v5 = vld [vmem:[%s1254_s1 + $0xc8] sm:$0xff]   ;;  %v928_v9 = vld [vmem:[%s1254_s1 + $0xd0] sm:$0xff]  }
   0x3   :  { %v921_v2 = vld [vmem:[%s1254_s1] sm:$0xff]   ;;  %854 = vmatprep.subr.bf16.mxu1 %v920_v1  ;;  %v925_v6 = vld [vmem:[%s1254_s1 + $0x8] sm:$0xff]   ;;  %v929_v10 = vld [vmem:[%s1254_s1 + $0x10] sm:$0xff]  }
   0x4   :  { %v922_v3 = vld [vmem:[%s1254_s1 + $0x80] sm:$0xff]   ;;  %791 = vmatpush3.bf16.msra.mxu0 %v921_v2  ;;  %v926_v7 = vld [vmem:[%s1254_s1 + $0x88] sm:$0xff]   ;;  %v930_v11 = vld [vmem:[%s1254_s1 + $0x90] sm:$0xff]  }
   0x5   :  { %855 = vmatpush3.bf16.msra.mxu1 %v922_v3  ;;  %792 = vmatprep.subr.bf16.mxu0 %v923_v4  ;;  %v931_v12 = vld [vmem:[%s1254_s1 + $0x58] sm:$0xff]   ;;  %v935_v16 = vld [vmem:[%s1254_s1 + $0x60] sm:$0xff]   ;;  %v939_v20 = vld [vmem:[%s1254_s1 + $0x68] sm:$0xff]  }
   0x6   :  { %856 = vmatprep.subr.bf16.mxu1 %v924_v5  ;;  %v932_v13 = vld [vmem:[%s1254_s1 + $0xd8] sm:$0xff]   ;;  %v936_v17 = vld [vmem:[%s1254_s1 + $0xe0] sm:$0xff]   ;;  %v940_v21 = vld [vmem:[%s1254_s1 + $0xe8] sm:$0xff]  }
   0x7   :  { %v933_v14 = vld [vmem:[%s1254_s1 + $0x18] sm:$0xff]   ;;  %v937_v18 = vld [vmem:[%s1254_s1 + $0x20] sm:$0xff]   ;;  %v941_v22 = vld [vmem:[%s1254_s1 + $0x28] sm:$0xff]  }
   0x8   :  { %793 = vmatpush3.bf16.msra.mxu0 %v925_v6  ;;  %v934_v15 = vld [vmem:[%s1254_s1 + $0x98] sm:$0xff]   ;;  %v938_v19 = vld [vmem:[%s1254_s1 + $0xa0] sm:$0xff]   ;;  %v942_v23 = vld [vmem:[%s1254_s1 + $0xa8] sm:$0xff]  }
   0x9   :  { %857 = vmatpush3.bf16.msra.mxu1 %v926_v7  ;;  %794 = vmatprep.subr.bf16.mxu0 %v927_v8  ;;  %v943_v24 = vld [vmem:[%s1254_s1 + $0x70] sm:$0xff]   ;;  %v947_v28 = vld [vmem:[%s1254_s1 + $0x78] sm:$0xff]  }
   0xa   :  { %858 = vmatprep.subr.bf16.mxu1 %v928_v9  ;;  %v944_v25 = vld [vmem:[%s1254_s1 + $0xf0] sm:$0xff]   ;;  %v948_v29 = vld [vmem:[%s1254_s1 + $0xf8] sm:$0xff]  }
   0xb   :  { %v945_v26 = vld [vmem:[%s1254_s1 + $0x30] sm:$0xff]   ;;  %v949_v30 = vld [vmem:[%s1254_s1 + $0x38] sm:$0xff]  }
   0xc   :  { %795 = vmatpush3.bf16.msra.mxu0 %v929_v10  ;;  %v946_v27 = vld [vmem:[%s1254_s1 + $0xb0] sm:$0xff]   ;;  %v950_v31 = vld [vmem:[%s1254_s1 + $0xb8] sm:$0xff]  }
   0xd   :  { %859 = vmatpush3.bf16.msra.mxu1 %v930_v11  ;;  %796 = vmatprep.subr.bf16.mxu0 %v931_v12  ;;  %v951_v32 = vld [vmem:[%s1255_s0] ss:$16 sps:$4 sm:$0xff]   ;;  %v953_v33 = vld [vmem:[%s1255_s0 + $0x4] ss:$16 sps:$4 sm:$0xff]   ;;  %v954_v34 = vld [vmem:[%s1255_s0 + $0x8] ss:$16 sps:$4 sm:$0xff]  }
   0xe   :  { %860 = vmatprep.subr.bf16.mxu1 %v932_v13  ;;  %v956_v35 = vld [vmem:[%s1255_s0 + $0xc] ss:$16 sps:$4 sm:$0xff]   ;;  %528 = vmatprep.mubr.bf16.mxu0 %v953_v33  ;;  %v957_v36 = vld [vmem:[%s1255_s0 + $0x24] ss:$16 sps:$4 sm:$0xff]   ;;  %v961_v38 = vld [vmem:[%s1255_s0 + $0x20] ss:$16 sps:$4 sm:$0xff]  }
   0xf   :  { %625 = vmatprep.mubr.bf16.mxu1 %v956_v35  ;;  %v959_v37 = vld [vmem:[%s1255_s0 + $0x2c] ss:$16 sps:$4 sm:$0xff]   ;;  %v962_v39 = vld [vmem:[%s1255_s0 + $0x28] ss:$16 sps:$4 sm:$0xff]   ;;  %v963_v40 = vld [vmem:[%s1255_s0 + $0x44] ss:$16 sps:$4 sm:$0xff]  }
  0x10   :  { %797 = vmatpush3.bf16.msra.mxu0 %v933_v14  ;;  %v965_v41 = vld [vmem:[%s1255_s0 + $0x4c] ss:$16 sps:$4 sm:$0xff]   ;;  %v967_v42 = vld [vmem:[%s1255_s0 + $0x40] ss:$16 sps:$4 sm:$0xff]   ;;  %v968_v43 = vld [vmem:[%s1255_s0 + $0x48] ss:$16 sps:$4 sm:$0xff]  }
  0x11   :  { %861 = vmatpush3.bf16.msra.mxu1 %v934_v15  ;;  %798 = vmatprep.subr.bf16.mxu0 %v935_v16  ;;  %v969_v44 = vld [vmem:[%s1255_s0 + $0x64] ss:$16 sps:$4 sm:$0xff]   ;;  %v971_v45 = vld [vmem:[%s1255_s0 + $0x6c] ss:$16 sps:$4 sm:$0xff]   ;;  %v973_v46 = vld [vmem:[%s1255_s0 + $0x60] ss:$16 sps:$4 sm:$0xff]  }
  0x12   :  { %862 = vmatprep.subr.bf16.mxu1 %v936_v17  ;;  %v974_v47 = vld [vmem:[%s1255_s0 + $0x68] ss:$16 sps:$4 sm:$0xff]   ;;  %v975_v48 = vld [vmem:[%s1255_s0 + $0x84] ss:$16 sps:$4 sm:$0xff]   ;;  %v977_v49 = vld [vmem:[%s1255_s0 + $0x8c] ss:$16 sps:$4 sm:$0xff]  }
  0x13   :  { %v979_v50 = vld [vmem:[%s1255_s0 + $0x80] ss:$16 sps:$4 sm:$0xff]   ;;  %v980_v51 = vld [vmem:[%s1255_s0 + $0x88] ss:$16 sps:$4 sm:$0xff]   ;;  %v981_v52 = vld [vmem:[%s1255_s0 + $0xa4] ss:$16 sps:$4 sm:$0xff]  }
  0x14   :  { %799 = vmatpush3.bf16.msra.mxu0 %v937_v18  ;;  %v983_v53 = vld [vmem:[%s1255_s0 + $0xac] ss:$16 sps:$4 sm:$0xff]   ;;  %v985_v54 = vld [vmem:[%s1255_s0 + $0xa0] ss:$16 sps:$4 sm:$0xff]   ;;  %v986_v55 = vld [vmem:[%s1255_s0 + $0xa8] ss:$16 sps:$4 sm:$0xff]  }
  0x15   :  { %863 = vmatpush3.bf16.msra.mxu1 %v938_v19  ;;  %800 = vmatprep.subr.bf16.mxu0 %v939_v20  ;;  %v987_v56 = vld [vmem:[%s1255_s0 + $0xc4] ss:$16 sps:$4 sm:$0xff]   ;;  %v989_v57 = vld [vmem:[%s1255_s0 + $0xcc] ss:$16 sps:$4 sm:$0xff]   ;;  %v991_v58 = vld [vmem:[%s1255_s0 + $0xc0] ss:$16 sps:$4 sm:$0xff]  }
  0x16   :  { %864 = vmatprep.subr.bf16.mxu1 %v940_v21  ;;  %v992_v59 = vld [vmem:[%s1255_s0 + $0xc8] ss:$16 sps:$4 sm:$0xff]   ;;  %v993_v60 = vld [vmem:[%s1255_s0 + $0xe4] ss:$16 sps:$4 sm:$0xff]   ;;  %v995_v61 = vld [vmem:[%s1255_s0 + $0xec] ss:$16 sps:$4 sm:$0xff]  }
  0x17   :  { %v997_v62 = vld [vmem:[%s1255_s0 + $0xe0] ss:$16 sps:$4 sm:$0xff]   ;;  %v998_v63 = vld [vmem:[%s1255_s0 + $0xe8] ss:$16 sps:$4 sm:$0xff]  }
  0x18   :  { %801 = vmatpush3.bf16.msra.mxu0 %v941_v22 }
  0x19   :  { %865 = vmatpush3.bf16.msra.mxu1 %v942_v23  ;;  %802 = vmatprep.subr.bf16.mxu0 %v943_v24 }
  0x1a   :  { %866 = vmatprep.subr.bf16.mxu1 %v944_v25 }
  0x1c   :  { %803 = vmatpush3.bf16.msra.mxu0 %v945_v26 }
  0x1d   :  { %867 = vmatpush3.bf16.msra.mxu1 %v946_v27  ;;  %804 = vmatprep.subr.bf16.mxu0 %v947_v28 }
  0x1e   :  { %868 = vmatprep.subr.bf16.mxu1 %v948_v29 }
  0x20   :  { %805 = vmatpush3.bf16.msra.mxu0 %v949_v30 }
  0x21   :  { %869 = vmatpush3.bf16.msra.mxu1 %v950_v31 }
  0x23   :  { %529 = vmatmul.mubr.bf16.vlgmr.msra.gmra.mrb[0].mxu0 %v951_v32 }
  0x24   :  { %626 = vmatmul.mubr.bf16.vlgmr.msra.gmra.mrb[0].mxu1 %v954_v34  ;;  %536 = vmatprep.mubr.bf16.mxu0 %v957_v36 }
  0x25   :  { %633 = vmatprep.mubr.bf16.mxu1 %v959_v37 }
  0x2b   :  { %537 = vmatmul.mubr.bf16.gmra.mrb[4].mxu0 %v961_v38 }
  0x2c   :  { %634 = vmatmul.mubr.bf16.gmra.mrb[4].mxu1 %v962_v39  ;;  %544 = vmatprep.mubr.bf16.mxu0 %v963_v40 }
  0x2d   :  { %641 = vmatprep.mubr.bf16.mxu1 %v965_v41 }
  0x33   :  { %545 = vmatmul.mubr.bf16.gmra.mrb[8].mxu0 %v967_v42 }
  0x34   :  { %642 = vmatmul.mubr.bf16.gmra.mrb[8].mxu1 %v968_v43  ;;  %552 = vmatprep.mubr.bf16.mxu0 %v969_v44 }
  0x35   :  { %649 = vmatprep.mubr.bf16.mxu1 %v971_v45 }
  0x3b   :  { %553 = vmatmul.mubr.bf16.gmra.mrb[12].mxu0 %v973_v46 }
  0x3c   :  { %650 = vmatmul.mubr.bf16.gmra.mrb[12].mxu1 %v974_v47  ;;  %560 = vmatprep.mubr.bf16.mxu0 %v975_v48 }
  0x3d   :  { %657 = vmatprep.mubr.bf16.mxu1 %v977_v49 }
  0x43   :  { %561 = vmatmul.mubr.bf16.gmra.mrb[16].mxu0 %v979_v50 }
  0x44   :  { %658 = vmatmul.mubr.bf16.gmra.mrb[16].mxu1 %v980_v51  ;;  %568 = vmatprep.mubr.bf16.mxu0 %v981_v52 }
  0x45   :  { %665 = vmatprep.mubr.bf16.mxu1 %v983_v53 }
  0x4b   :  { %569 = vmatmul.mubr.bf16.gmra.mrb[20].mxu0 %v985_v54 }
  0x4c   :  { %666 = vmatmul.mubr.bf16.gmra.mrb[20].mxu1 %v986_v55  ;;  %576 = vmatprep.mubr.bf16.mxu0 %v987_v56 }
  0x4d   :  { %673 = vmatprep.mubr.bf16.mxu1 %v989_v57 }
  0x53   :  { %577 = vmatmul.mubr.bf16.gmra.mrb[24].mxu0 %v991_v58 }
  0x54   :  { %674 = vmatmul.mubr.bf16.gmra.mrb[24].mxu1 %v992_v59  ;;  %584 = vmatprep.mubr.bf16.mxu0 %v993_v60 }
  0x55   :  { %681 = vmatprep.mubr.bf16.mxu1 %v995_v61 }
  0x5b   :  { %585 = vmatmul.mubr.bf16.gmra.mrb[28].mxu0 %v997_v62 }
  0x5c   :  { %682 = vmatmul.mubr.bf16.gmra.mrb[28].mxu1 %v998_v63 }
  0xf6   :  { %v806_v0 = vpop.f32.mrb[0].mxu0 }
  0xf7   :  { %v870_v1 = vpop.f32.mrb[0].mxu1  ;;  %v807_v2 = vpop.f32.mrb[1].mxu0 }
  0xf8   :  { %v808_v3 = vadd.f32 %v807_v2, %v806_v0  ;;  %v871_v4 = vpop.f32.mrb[1].mxu1  ;;  %v809_v5 = vpop.f32.mrb[2].mxu0 }
  0xf9   :  { %v872_v6 = vadd.f32 %v871_v4, %v870_v1  ;;  %v873_v7 = vpop.f32.mrb[2].mxu1  ;;  %v810_v8 = vpop.f32.mrb[3].mxu0 }
  0xfa   :  { %v811_v9 = vadd.f32 %v810_v8, %v809_v5  ;;  %v874_v10 = vpop.f32.mrb[3].mxu1 }
  0xfb   :  { %v628_v11 = vadd.f32 %v872_v6, %v808_v3  ;;  %v875_v12 = vadd.f32 %v874_v10, %v873_v7 }
  0xfd   :  { %v631_v13 = vadd.f32 %v875_v12, %v811_v9  ;;  %706 = vst [vmem:[%s1256_s2] sm:$0xff] %v628_v11 }
  0xfe   :  { %v812_v14 = vpop.f32.mrb[4].mxu0 }
  0xff   :  { %v876_v15 = vpop.f32.mrb[4].mxu1  ;;  %v813_v16 = vpop.f32.mrb[5].mxu0  ;;  %707 = vst [vmem:[%s1256_s2 + $0x8] sm:$0xff] %v631_v13 }
 0x100   :  { %v814_v17 = vadd.f32 %v813_v16, %v812_v14  ;;  %v877_v18 = vpop.f32.mrb[5].mxu1  ;;  %v815_v19 = vpop.f32.mrb[6].mxu0 }
 0x101   :  { %v878_v20 = vadd.f32 %v877_v18, %v876_v15  ;;  %v879_v21 = vpop.f32.mrb[6].mxu1  ;;  %v816_v22 = vpop.f32.mrb[7].mxu0 }
 0x102   :  { %v817_v23 = vadd.f32 %v816_v22, %v815_v19  ;;  %v880_v24 = vpop.f32.mrb[7].mxu1 }
 0x103   :  { %v636_v25 = vadd.f32 %v878_v20, %v814_v17  ;;  %v881_v26 = vadd.f32 %v880_v24, %v879_v21 }
 0x105   :  { %v639_v27 = vadd.f32 %v881_v26, %v817_v23  ;;  %708 = vst [vmem:[%s1256_s2 + $0x10] sm:$0xff] %v636_v25 }
 0x106   :  { %v818_v28 = vpop.f32.mrb[8].mxu0 }
 0x107   :  { %v882_v29 = vpop.f32.mrb[8].mxu1  ;;  %v819_v30 = vpop.f32.mrb[9].mxu0  ;;  %709 = vst [vmem:[%s1256_s2 + $0x18] sm:$0xff] %v639_v27 }
 0x108   :  { %v820_v31 = vadd.f32 %v819_v30, %v818_v28  ;;  %v883_v32 = vpop.f32.mrb[9].mxu1  ;;  %v821_v33 = vpop.f32.mrb[10].mxu0 }
 0x109   :  { %v884_v34 = vadd.f32 %v883_v32, %v882_v29  ;;  %v885_v35 = vpop.f32.mrb[10].mxu1  ;;  %v822_v36 = vpop.f32.mrb[11].mxu0 }
 0x10a   :  { %v823_v37 = vadd.f32 %v822_v36, %v821_v33  ;;  %v886_v38 = vpop.f32.mrb[11].mxu1 }
 0x10b   :  { %v644_v39 = vadd.f32 %v884_v34, %v820_v31  ;;  %v887_v40 = vadd.f32 %v886_v38, %v885_v35 }
 0x10d   :  { %v647_v41 = vadd.f32 %v887_v40, %v823_v37  ;;  %710 = vst [vmem:[%s1256_s2 + $0x20] sm:$0xff] %v644_v39 }
 0x10e   :  { %v824_v42 = vpop.f32.mrb[12].mxu0 }
 0x10f   :  { %v888_v43 = vpop.f32.mrb[12].mxu1  ;;  %v825_v44 = vpop.f32.mrb[13].mxu0  ;;  %711 = vst [vmem:[%s1256_s2 + $0x28] sm:$0xff] %v647_v41 }
 0x110   :  { %v826_v45 = vadd.f32 %v825_v44, %v824_v42  ;;  %v889_v46 = vpop.f32.mrb[13].mxu1  ;;  %v827_v47 = vpop.f32.mrb[14].mxu0 }
 0x111   :  { %v890_v48 = vadd.f32 %v889_v46, %v888_v43  ;;  %v891_v49 = vpop.f32.mrb[14].mxu1  ;;  %v828_v50 = vpop.f32.mrb[15].mxu0 }
 0x112   :  { %v829_v51 = vadd.f32 %v828_v50, %v827_v47  ;;  %v892_v52 = vpop.f32.mrb[15].mxu1 }
 0x113   :  { %v652_v53 = vadd.f32 %v890_v48, %v826_v45  ;;  %v893_v54 = vadd.f32 %v892_v52, %v891_v49 }
 0x115   :  { %v655_v55 = vadd.f32 %v893_v54, %v829_v51  ;;  %712 = vst [vmem:[%s1256_s2 + $0x30] sm:$0xff] %v652_v53 }
 0x116   :  { %v830_v56 = vpop.f32.mrb[16].mxu0 }
 0x117   :  { %v894_v57 = vpop.f32.mrb[16].mxu1  ;;  %v831_v58 = vpop.f32.mrb[17].mxu0  ;;  %713 = vst [vmem:[%s1256_s2 + $0x38] sm:$0xff] %v655_v55 }
 0x118   :  { %v832_v59 = vadd.f32 %v831_v58, %v830_v56  ;;  %v895_v60 = vpop.f32.mrb[17].mxu1  ;;  %v833_v61 = vpop.f32.mrb[18].mxu0 }
 0x119   :  { %v896_v62 = vadd.f32 %v895_v60, %v894_v57  ;;  %v897_v63 = vpop.f32.mrb[18].mxu1  ;;  %v834_v0 = vpop.f32.mrb[19].mxu0 }
 0x11a   :  { %v835_v1 = vadd.f32 %v834_v0, %v833_v61  ;;  %v898_v2 = vpop.f32.mrb[19].mxu1 }
 0x11b   :  { %v660_v3 = vadd.f32 %v896_v62, %v832_v59  ;;  %v899_v4 = vadd.f32 %v898_v2, %v897_v63 }
 0x11d   :  { %v663_v5 = vadd.f32 %v899_v4, %v835_v1  ;;  %714 = vst [vmem:[%s1256_s2 + $0x40] sm:$0xff] %v660_v3 }
 0x11e   :  { %v836_v6 = vpop.f32.mrb[20].mxu0 }
 0x11f   :  { %v900_v7 = vpop.f32.mrb[20].mxu1  ;;  %v837_v8 = vpop.f32.mrb[21].mxu0  ;;  %715 = vst [vmem:[%s1256_s2 + $0x48] sm:$0xff] %v663_v5 }
 0x120   :  { %v838_v9 = vadd.f32 %v837_v8, %v836_v6  ;;  %v901_v10 = vpop.f32.mrb[21].mxu1  ;;  %v839_v11 = vpop.f32.mrb[22].mxu0 }
 0x121   :  { %v902_v12 = vadd.f32 %v901_v10, %v900_v7  ;;  %v903_v13 = vpop.f32.mrb[22].mxu1  ;;  %v840_v14 = vpop.f32.mrb[23].mxu0 }
 0x122   :  { %v841_v15 = vadd.f32 %v840_v14, %v839_v11  ;;  %v904_v16 = vpop.f32.mrb[23].mxu1 }
 0x123   :  { %v668_v17 = vadd.f32 %v902_v12, %v838_v9  ;;  %v905_v18 = vadd.f32 %v904_v16, %v903_v13 }
 0x125   :  { %v671_v19 = vadd.f32 %v905_v18, %v841_v15  ;;  %716 = vst [vmem:[%s1256_s2 + $0x50] sm:$0xff] %v668_v17 }
 0x126   :  { %v842_v20 = vpop.f32.mrb[24].mxu0 }
 0x127   :  { %v906_v21 = vpop.f32.mrb[24].mxu1  ;;  %v843_v22 = vpop.f32.mrb[25].mxu0  ;;  %717 = vst [vmem:[%s1256_s2 + $0x58] sm:$0xff] %v671_v19 }
 0x128   :  { %v844_v23 = vadd.f32 %v843_v22, %v842_v20  ;;  %v907_v24 = vpop.f32.mrb[25].mxu1  ;;  %v845_v25 = vpop.f32.mrb[26].mxu0 }
 0x129   :  { %v908_v26 = vadd.f32 %v907_v24, %v906_v21  ;;  %v909_v27 = vpop.f32.mrb[26].mxu1  ;;  %v846_v28 = vpop.f32.mrb[27].mxu0 }
 0x12a   :  { %v847_v29 = vadd.f32 %v846_v28, %v845_v25  ;;  %v910_v30 = vpop.f32.mrb[27].mxu1 }
 0x12b   :  { %v676_v31 = vadd.f32 %v908_v26, %v844_v23  ;;  %v911_v32 = vadd.f32 %v910_v30, %v909_v27 }
 0x12d   :  { %v679_v33 = vadd.f32 %v911_v32, %v847_v29  ;;  %718 = vst [vmem:[%s1256_s2 + $0x60] sm:$0xff] %v676_v31 }
 0x12e   :  { %v848_v34 = vpop.f32.mrb[28].mxu0 }
 0x12f   :  { %v912_v35 = vpop.f32.mrb[28].mxu1  ;;  %v849_v36 = vpop.f32.mrb[29].mxu0  ;;  %719 = vst [vmem:[%s1256_s2 + $0x68] sm:$0xff] %v679_v33 }
 0x130   :  { %v850_v37 = vadd.f32 %v849_v36, %v848_v34  ;;  %v913_v38 = vpop.f32.mrb[29].mxu1  ;;  %v851_v39 = vpop.f32.mrb[30].mxu0 }
 0x131   :  { %v914_v40 = vadd.f32 %v913_v38, %v912_v35  ;;  %v915_v41 = vpop.f32.mrb[30].mxu1  ;;  %v852_v42 = vpop.f32.mrb[31].mxu0 }
 0x132   :  { %v853_v43 = vadd.f32 %v852_v42, %v851_v39  ;;  %v916_v44 = vpop.f32.mrb[31].mxu1 }
 0x133   :  { %v684_v45 = vadd.f32 %v914_v40, %v850_v37  ;;  %v917_v46 = vadd.f32 %v916_v44, %v915_v41 }
 0x135   :  { %v687_v47 = vadd.f32 %v917_v46, %v853_v43  ;;  %720 = vst [vmem:[%s1256_s2 + $0x70] sm:$0xff] %v684_v45 }
 0x137   :  { %721 = vst [vmem:[%s1256_s2 + $0x78] sm:$0xff] %v687_v47 }

// kernel: forward.107
= control target key start
LH: loop header
LB: loop body
LE: loop exit
PB: predicated region body
PF: predicated region fallthrough
CT: control target
= control target key end

     0   :  { %s3011_s9 = smov 0   ;;  %s3013_s10 = smov 0   ;;  %s3701_s0 = inlined_call_operand.vmem [shape: bf16[512,3200], index: 0, kind: input, shape index: {}]   ;;  %s3702_s1 = inlined_call_operand.vmem [shape: bf16[3200,128], index: 1, kind: input, shape index: {}]   ;;  %s3703_s2 = inlined_call_operand.vmem [shape: f32[512,128], index: 2, kind: output, shape index: {}]  }
   0x1   :  { %s3015_s11 = smov 0   ;;  %s3017_s12 = smov 0  }
   0x2   :  { %s3019_s13 = smov 0   ;;  %s3021_s14 = smov 0  }
   0x3   :  { %s3023_s15 = smov 0  }
   0x4 LB: > { %s24_s16 = sadd.s32 1, %s2985_s13  ;;  %s31_s17 = sadd.s32 1, %s2989_s14  ;;  %s2993_s15 = sphi %s3023_s15, %s12_s15   ;;  %s2989_s14 = sphi %s3021_s14, %s3709_s14   ;;  %s2985_s13 = sphi %s3019_s13, %s3708_s13   ;;  %s2981_s12 = sphi %s3017_s12, %s3707_s12   ;;  %s2977_s11 = sphi %s3015_s11, %s3706_s11   ;;  %s2973_s10 = sphi %s3013_s10, %s3705_s10   ;;  %s2969_s9 = sphi %s3011_s9, %s3704_s9  }
   0x5   : > { %p25_p0 = scmp.ge.s32.totalorder %s24_s16, 5  ;;  %p47_p1 = scmp.ne.s32.totalorder %s2973_s10, %s2969_s9 }
   0x6   : > { %p48_p2 = scmp.eq.s32.totalorder %s2993_s15, 0  ;;  %s40_s21 = sadd.s32 1, %s2973_s10 }
   0x7   : > { %s3711_s16 = smov (%p25_p0, %s24_s16), 0  ;;  %s3713_s17 = smov (!%p25_p0, %s31_s17), %s2989_s14 }
   0x8   : > { %p49_p3 = por %p48_p2, %p47_p1  ;;  %p33_p4 = scmp.ge.s32.totalorder %s3713_s17, 2 }
   0x9   : > { %s36_s18 = ssub.s32 %s2985_s13, %s3711_s16  ;;  %p2155_p6 = scmp.ge.s32.totalorder %s2993_s15, 10 }
   0xa   : > { %s3715_s17 = smov (%p33_p4, %s3713_s17), 0 }
   0xb   : > { %s35_s19 = ssub.s32 %s2989_s14, %s3715_s17  ;;  %129 = sbr.rel (%p2155_p6) target bundleno = 80 (0x50), region = 16 }
   0xc   : > { %s37_s20 = sor.u32 %s36_s18, %s35_s19 }
   0xd   : > { %p38_p5 = scmp.eq.s32.totalorder %s37_s20, 0 }
   0xf   : > { %s3062_s22 = scalar_select %p38_p5, %s2973_s10, %s40_s21  }
  0x12   : > { %132 = sbr.rel (!%p49_p3) target bundleno = 80 (0x50), region = 20  ;;  %s134_s23 = sand.u32 (%p49_p3), 1, %s2973_s10  }
  0x13   : > { %s138_s24 = smul.u32 (%p49_p3), 5, %s2985_s13 }
  0x14   : > { %s2663_s25 = smul.u32 (%p49_p3), 640, %s134_s23 }
  0x15   : > { %s2664_s26 = smul.u32 (%p49_p3), 800, %s2989_s14 }
  0x16   : > { %s3076_s4 = scalar_lea.vmem (%p49_p3), [#allocation2], %s2663_s25 }
  0x17   : > { %s140_s27 = sadd.s32 (%p49_p3), %s2664_s26, %s138_s24 }
  0x18   : > { %s2158_s28 = sshll.u32 (%p49_p3), %s140_s27, 2 }
  0x19   : > { %s3071_s3 = scalar_lea.vmem %s3701_s0, %s2158_s28 }
  0x1a   : > { %v157_v0 = vld [vmem:[%s3071_s3] sm:$0xff]  ;;  %v159_v1 = vld [vmem:[%s3071_s3 + $0x8] sm:$0xff]  ;;  %v167_v5 = vld [vmem:[%s3071_s3 + $0xd0] sm:$0xff] }
  0x1b   : > { %v161_v2 = vld [vmem:[%s3071_s3 + $0x64] sm:$0xff]  ;;  %158 = vst [vmem:[%s3076_s4] sm:$0xff] %v157_v0  ;;  %160 = vst [vmem:[%s3076_s4 + $0x8] sm:$0xff] %v159_v1  ;;  %v163_v3 = vld [vmem:[%s3071_s3 + $0x6c] sm:$0xff] }
  0x1c   : > { %162 = vst [vmem:[%s3076_s4 + $0x14] sm:$0xff] %v161_v2  ;;  %v165_v4 = vld [vmem:[%s3071_s3 + $0xc8] sm:$0xff]  ;;  %164 = vst [vmem:[%s3076_s4 + $0x1c] sm:$0xff] %v163_v3  ;;  %v171_v7 = vld [vmem:[%s3071_s3 + $0x134] sm:$0xff] }
  0x1d   : > { %166 = vst [vmem:[%s3076_s4 + $0x28] sm:$0xff] %v165_v4  ;;  %168 = vst [vmem:[%s3076_s4 + $0x30] sm:$0xff] %v167_v5  ;;  %v169_v6 = vld [vmem:[%s3071_s3 + $0x12c] sm:$0xff]  ;;  %v175_v9 = vld [vmem:[%s3071_s3 + $0x198] sm:$0xff] }
  0x1e   : > { %v173_v8 = vld [vmem:[%s3071_s3 + $0x190] sm:$0xff]  ;;  %170 = vst [vmem:[%s3076_s4 + $0x3c] sm:$0xff] %v169_v6  ;;  %172 = vst [vmem:[%s3076_s4 + $0x44] sm:$0xff] %v171_v7  ;;  %v179_v11 = vld [vmem:[%s3071_s3 + $0x1fc] sm:$0xff] }
  0x1f   : > { %174 = vst [vmem:[%s3076_s4 + $0x50] sm:$0xff] %v173_v8  ;;  %v177_v10 = vld [vmem:[%s3071_s3 + $0x1f4] sm:$0xff]  ;;  %176 = vst [vmem:[%s3076_s4 + $0x58] sm:$0xff] %v175_v9  ;;  %v183_v13 = vld [vmem:[%s3071_s3 + $0x260] sm:$0xff] }
  0x20   : > { %178 = vst [vmem:[%s3076_s4 + $0x64] sm:$0xff] %v177_v10  ;;  %180 = vst [vmem:[%s3076_s4 + $0x6c] sm:$0xff] %v179_v11  ;;  %v181_v12 = vld [vmem:[%s3071_s3 + $0x258] sm:$0xff]  ;;  %v187_v15 = vld [vmem:[%s3071_s3 + $0x2c4] sm:$0xff] }
  0x21   : > { %v185_v14 = vld [vmem:[%s3071_s3 + $0x2bc] sm:$0xff]  ;;  %182 = vst [vmem:[%s3076_s4 + $0x78] sm:$0xff] %v181_v12  ;;  %184 = vst [vmem:[%s3076_s4 + $0x80] sm:$0xff] %v183_v13  ;;  %v191_v17 = vld [vmem:[%s3071_s3 + $0x328] sm:$0xff] }
  0x22   : > { %186 = vst [vmem:[%s3076_s4 + $0x8c] sm:$0xff] %v185_v14  ;;  %v189_v16 = vld [vmem:[%s3071_s3 + $0x320] sm:$0xff]  ;;  %188 = vst [vmem:[%s3076_s4 + $0x94] sm:$0xff] %v187_v15  ;;  %v195_v19 = vld [vmem:[%s3071_s3 + $0x38c] sm:$0xff] }
  0x23   : > { %190 = vst [vmem:[%s3076_s4 + $0xa0] sm:$0xff] %v189_v16  ;;  %192 = vst [vmem:[%s3076_s4 + $0xa8] sm:$0xff] %v191_v17  ;;  %v193_v18 = vld [vmem:[%s3071_s3 + $0x384] sm:$0xff]  ;;  %v199_v21 = vld [vmem:[%s3071_s3 + $0x3f0] sm:$0xff] }
  0x24   : > { %v197_v20 = vld [vmem:[%s3071_s3 + $0x3e8] sm:$0xff]  ;;  %194 = vst [vmem:[%s3076_s4 + $0xb4] sm:$0xff] %v193_v18  ;;  %196 = vst [vmem:[%s3076_s4 + $0xbc] sm:$0xff] %v195_v19  ;;  %v203_v23 = vld [vmem:[%s3071_s3 + $0x454] sm:$0xff] }
  0x25   : > { %198 = vst [vmem:[%s3076_s4 + $0xc8] sm:$0xff] %v197_v20  ;;  %v201_v22 = vld [vmem:[%s3071_s3 + $0x44c] sm:$0xff]  ;;  %200 = vst [vmem:[%s3076_s4 + $0xd0] sm:$0xff] %v199_v21  ;;  %v207_v25 = vld [vmem:[%s3071_s3 + $0x4b8] sm:$0xff] }
  0x26   : > { %202 = vst [vmem:[%s3076_s4 + $0xdc] sm:$0xff] %v201_v22  ;;  %204 = vst [vmem:[%s3076_s4 + $0xe4] sm:$0xff] %v203_v23  ;;  %v205_v24 = vld [vmem:[%s3071_s3 + $0x4b0] sm:$0xff]  ;;  %v211_v27 = vld [vmem:[%s3071_s3 + $0x51c] sm:$0xff] }
  0x27   : > { %v209_v26 = vld [vmem:[%s3071_s3 + $0x514] sm:$0xff]  ;;  %206 = vst [vmem:[%s3076_s4 + $0xf0] sm:$0xff] %v205_v24  ;;  %208 = vst [vmem:[%s3076_s4 + $0xf8] sm:$0xff] %v207_v25  ;;  %v215_v29 = vld [vmem:[%s3071_s3 + $0x580] sm:$0xff] }
  0x28   : > { %210 = vst [vmem:[%s3076_s4 + $0x104] sm:$0xff] %v209_v26  ;;  %v213_v28 = vld [vmem:[%s3071_s3 + $0x578] sm:$0xff]  ;;  %212 = vst [vmem:[%s3076_s4 + $0x10c] sm:$0xff] %v211_v27  ;;  %v219_v31 = vld [vmem:[%s3071_s3 + $0x5e4] sm:$0xff] }
  0x29   : > { %214 = vst [vmem:[%s3076_s4 + $0x118] sm:$0xff] %v213_v28  ;;  %216 = vst [vmem:[%s3076_s4 + $0x120] sm:$0xff] %v215_v29  ;;  %v217_v30 = vld [vmem:[%s3071_s3 + $0x5dc] sm:$0xff]  ;;  %v223_v33 = vld [vmem:[%s3071_s3 + $0x648] sm:$0xff] }
  0x2a   : > { %v221_v32 = vld [vmem:[%s3071_s3 + $0x640] sm:$0xff]  ;;  %218 = vst [vmem:[%s3076_s4 + $0x12c] sm:$0xff] %v217_v30  ;;  %220 = vst [vmem:[%s3076_s4 + $0x134] sm:$0xff] %v219_v31  ;;  %v227_v35 = vld [vmem:[%s3071_s3 + $0x6ac] sm:$0xff] }
  0x2b   : > { %222 = vst [vmem:[%s3076_s4 + $0x140] sm:$0xff] %v221_v32  ;;  %v225_v34 = vld [vmem:[%s3071_s3 + $0x6a4] sm:$0xff]  ;;  %224 = vst [vmem:[%s3076_s4 + $0x148] sm:$0xff] %v223_v33  ;;  %v231_v37 = vld [vmem:[%s3071_s3 + $0x710] sm:$0xff] }
  0x2c   : > { %226 = vst [vmem:[%s3076_s4 + $0x154] sm:$0xff] %v225_v34  ;;  %228 = vst [vmem:[%s3076_s4 + $0x15c] sm:$0xff] %v227_v35  ;;  %v229_v36 = vld [vmem:[%s3071_s3 + $0x708] sm:$0xff]  ;;  %v235_v39 = vld [vmem:[%s3071_s3 + $0x774] sm:$0xff] }
  0x2d   : > { %v233_v38 = vld [vmem:[%s3071_s3 + $0x76c] sm:$0xff]  ;;  %230 = vst [vmem:[%s3076_s4 + $0x168] sm:$0xff] %v229_v36  ;;  %232 = vst [vmem:[%s3076_s4 + $0x170] sm:$0xff] %v231_v37  ;;  %v239_v41 = vld [vmem:[%s3071_s3 + $0x7d8] sm:$0xff] }
  0x2e   : > { %234 = vst [vmem:[%s3076_s4 + $0x17c] sm:$0xff] %v233_v38  ;;  %v237_v40 = vld [vmem:[%s3071_s3 + $0x7d0] sm:$0xff]  ;;  %236 = vst [vmem:[%s3076_s4 + $0x184] sm:$0xff] %v235_v39  ;;  %v243_v43 = vld [vmem:[%s3071_s3 + $0x83c] sm:$0xff] }
  0x2f   : > { %238 = vst [vmem:[%s3076_s4 + $0x190] sm:$0xff] %v237_v40  ;;  %240 = vst [vmem:[%s3076_s4 + $0x198] sm:$0xff] %v239_v41  ;;  %v241_v42 = vld [vmem:[%s3071_s3 + $0x834] sm:$0xff]  ;;  %v247_v45 = vld [vmem:[%s3071_s3 + $0x8a0] sm:$0xff] }
  0x30   : > { %v245_v44 = vld [vmem:[%s3071_s3 + $0x898] sm:$0xff]  ;;  %242 = vst [vmem:[%s3076_s4 + $0x1a4] sm:$0xff] %v241_v42  ;;  %244 = vst [vmem:[%s3076_s4 + $0x1ac] sm:$0xff] %v243_v43  ;;  %v251_v47 = vld [vmem:[%s3071_s3 + $0x904] sm:$0xff] }
  0x31   : > { %246 = vst [vmem:[%s3076_s4 + $0x1b8] sm:$0xff] %v245_v44  ;;  %v249_v46 = vld [vmem:[%s3071_s3 + $0x8fc] sm:$0xff]  ;;  %248 = vst [vmem:[%s3076_s4 + $0x1c0] sm:$0xff] %v247_v45  ;;  %v255_v49 = vld [vmem:[%s3071_s3 + $0x968] sm:$0xff] }
  0x32   : > { %250 = vst [vmem:[%s3076_s4 + $0x1cc] sm:$0xff] %v249_v46  ;;  %252 = vst [vmem:[%s3076_s4 + $0x1d4] sm:$0xff] %v251_v47  ;;  %v253_v48 = vld [vmem:[%s3071_s3 + $0x960] sm:$0xff]  ;;  %v259_v51 = vld [vmem:[%s3071_s3 + $0x9cc] sm:$0xff] }
  0x33   : > { %v257_v50 = vld [vmem:[%s3071_s3 + $0x9c4] sm:$0xff]  ;;  %254 = vst [vmem:[%s3076_s4 + $0x1e0] sm:$0xff] %v253_v48  ;;  %256 = vst [vmem:[%s3076_s4 + $0x1e8] sm:$0xff] %v255_v49  ;;  %v263_v53 = vld [vmem:[%s3071_s3 + $0xa30] sm:$0xff] }
  0x34   : > { %258 = vst [vmem:[%s3076_s4 + $0x1f4] sm:$0xff] %v257_v50  ;;  %v261_v52 = vld [vmem:[%s3071_s3 + $0xa28] sm:$0xff]  ;;  %260 = vst [vmem:[%s3076_s4 + $0x1fc] sm:$0xff] %v259_v51  ;;  %v267_v55 = vld [vmem:[%s3071_s3 + $0xa94] sm:$0xff] }
  0x35   : > { %262 = vst [vmem:[%s3076_s4 + $0x208] sm:$0xff] %v261_v52  ;;  %264 = vst [vmem:[%s3076_s4 + $0x210] sm:$0xff] %v263_v53  ;;  %v265_v54 = vld [vmem:[%s3071_s3 + $0xa8c] sm:$0xff]  ;;  %v271_v57 = vld [vmem:[%s3071_s3 + $0xaf8] sm:$0xff] }
  0x36   : > { %v269_v56 = vld [vmem:[%s3071_s3 + $0xaf0] sm:$0xff]  ;;  %266 = vst [vmem:[%s3076_s4 + $0x21c] sm:$0xff] %v265_v54  ;;  %268 = vst [vmem:[%s3076_s4 + $0x224] sm:$0xff] %v267_v55  ;;  %v275_v59 = vld [vmem:[%s3071_s3 + $0xb5c] sm:$0xff] }
  0x37   : > { %270 = vst [vmem:[%s3076_s4 + $0x230] sm:$0xff] %v269_v56  ;;  %v273_v58 = vld [vmem:[%s3071_s3 + $0xb54] sm:$0xff]  ;;  %272 = vst [vmem:[%s3076_s4 + $0x238] sm:$0xff] %v271_v57  ;;  %v279_v61 = vld [vmem:[%s3071_s3 + $0xbc0] sm:$0xff] }
  0x38   : > { %274 = vst [vmem:[%s3076_s4 + $0x244] sm:$0xff] %v273_v58  ;;  %276 = vst [vmem:[%s3076_s4 + $0x24c] sm:$0xff] %v275_v59  ;;  %v277_v60 = vld [vmem:[%s3071_s3 + $0xbb8] sm:$0xff]  ;;  %v283_v63 = vld [vmem:[%s3071_s3 + $0xc24] sm:$0xff] }
  0x39   : > { %v281_v62 = vld [vmem:[%s3071_s3 + $0xc1c] sm:$0xff]  ;;  %278 = vst [vmem:[%s3076_s4 + $0x258] sm:$0xff] %v277_v60  ;;  %280 = vst [vmem:[%s3076_s4 + $0x260] sm:$0xff] %v279_v61  ;;  %v2159_v0 = vld [vmem:[%s3071_s3 + $0x10] sm:$0xf] }
  0x3a   : > { %282 = vst [vmem:[%s3076_s4 + $0x26c] sm:$0xff] %v281_v62  ;;  %v2161_v1 = vld [vmem:[%s3071_s3 + $0x74] sm:$0xf]  ;;  %284 = vst [vmem:[%s3076_s4 + $0x274] sm:$0xff] %v283_v63  ;;  %v2163_v2 = vld [vmem:[%s3071_s3 + $0xd8] sm:$0xf] }
  0x3b   : > { %2160 = vst [vmem:[%s3076_s4 + $0x10] sm:$0xf] %v2159_v0  ;;  %2162 = vst [vmem:[%s3076_s4 + $0x24] sm:$0xf] %v2161_v1  ;;  %v2165_v3 = vld [vmem:[%s3071_s3 + $0x13c] sm:$0xf] }
  0x3c   : > { %v2167_v4 = vld [vmem:[%s3071_s3 + $0x1a0] sm:$0xf]  ;;  %2164 = vst [vmem:[%s3076_s4 + $0x38] sm:$0xf] %v2163_v2  ;;  %2166 = vst [vmem:[%s3076_s4 + $0x4c] sm:$0xf] %v2165_v3 }
  0x3d   : > { %2168 = vst [vmem:[%s3076_s4 + $0x60] sm:$0xf] %v2167_v4  ;;  %v2169_v5 = vld [vmem:[%s3071_s3 + $0x204] sm:$0xf]  ;;  %v2171_v6 = vld [vmem:[%s3071_s3 + $0x268] sm:$0xf] }
  0x3e   : > { %v2173_v7 = vld [vmem:[%s3071_s3 + $0x2cc] sm:$0xf]  ;;  %2170 = vst [vmem:[%s3076_s4 + $0x74] sm:$0xf] %v2169_v5  ;;  %2172 = vst [vmem:[%s3076_s4 + $0x88] sm:$0xf] %v2171_v6 }
  0x3f   : > { %2174 = vst [vmem:[%s3076_s4 + $0x9c] sm:$0xf] %v2173_v7  ;;  %v2175_v8 = vld [vmem:[%s3071_s3 + $0x330] sm:$0xf]  ;;  %v2177_v9 = vld [vmem:[%s3071_s3 + $0x394] sm:$0xf] }
  0x40   : > { %v2179_v10 = vld [vmem:[%s3071_s3 + $0x3f8] sm:$0xf]  ;;  %2176 = vst [vmem:[%s3076_s4 + $0xb0] sm:$0xf] %v2175_v8  ;;  %2178 = vst [vmem:[%s3076_s4 + $0xc4] sm:$0xf] %v2177_v9 }
  0x41   : > { %2180 = vst [vmem:[%s3076_s4 + $0xd8] sm:$0xf] %v2179_v10  ;;  %v2181_v11 = vld [vmem:[%s3071_s3 + $0x45c] sm:$0xf]  ;;  %v2183_v12 = vld [vmem:[%s3071_s3 + $0x4c0] sm:$0xf] }
  0x42   : > { %v2185_v13 = vld [vmem:[%s3071_s3 + $0x524] sm:$0xf]  ;;  %2182 = vst [vmem:[%s3076_s4 + $0xec] sm:$0xf] %v2181_v11  ;;  %2184 = vst [vmem:[%s3076_s4 + $0x100] sm:$0xf] %v2183_v12 }
  0x43   : > { %2186 = vst [vmem:[%s3076_s4 + $0x114] sm:$0xf] %v2185_v13  ;;  %v2187_v14 = vld [vmem:[%s3071_s3 + $0x588] sm:$0xf]  ;;  %v2189_v15 = vld [vmem:[%s3071_s3 + $0x5ec] sm:$0xf] }
  0x44   : > { %v2191_v16 = vld [vmem:[%s3071_s3 + $0x650] sm:$0xf]  ;;  %2188 = vst [vmem:[%s3076_s4 + $0x128] sm:$0xf] %v2187_v14  ;;  %2190 = vst [vmem:[%s3076_s4 + $0x13c] sm:$0xf] %v2189_v15 }
  0x45   : > { %2192 = vst [vmem:[%s3076_s4 + $0x150] sm:$0xf] %v2191_v16  ;;  %v2193_v17 = vld [vmem:[%s3071_s3 + $0x6b4] sm:$0xf]  ;;  %v2195_v18 = vld [vmem:[%s3071_s3 + $0x718] sm:$0xf] }
  0x46   : > { %v2197_v19 = vld [vmem:[%s3071_s3 + $0x77c] sm:$0xf]  ;;  %2194 = vst [vmem:[%s3076_s4 + $0x164] sm:$0xf] %v2193_v17  ;;  %2196 = vst [vmem:[%s3076_s4 + $0x178] sm:$0xf] %v2195_v18 }
  0x47   : > { %2198 = vst [vmem:[%s3076_s4 + $0x18c] sm:$0xf] %v2197_v19  ;;  %v2199_v20 = vld [vmem:[%s3071_s3 + $0x7e0] sm:$0xf]  ;;  %v2201_v21 = vld [vmem:[%s3071_s3 + $0x844] sm:$0xf] }
  0x48   : > { %v2203_v22 = vld [vmem:[%s3071_s3 + $0x8a8] sm:$0xf]  ;;  %2200 = vst [vmem:[%s3076_s4 + $0x1a0] sm:$0xf] %v2199_v20  ;;  %2202 = vst [vmem:[%s3076_s4 + $0x1b4] sm:$0xf] %v2201_v21 }
  0x49   : > { %2204 = vst [vmem:[%s3076_s4 + $0x1c8] sm:$0xf] %v2203_v22  ;;  %v2205_v23 = vld [vmem:[%s3071_s3 + $0x90c] sm:$0xf]  ;;  %v2207_v24 = vld [vmem:[%s3071_s3 + $0x970] sm:$0xf] }
  0x4a   : > { %v2209_v25 = vld [vmem:[%s3071_s3 + $0x9d4] sm:$0xf]  ;;  %2206 = vst [vmem:[%s3076_s4 + $0x1dc] sm:$0xf] %v2205_v23  ;;  %2208 = vst [vmem:[%s3076_s4 + $0x1f0] sm:$0xf] %v2207_v24 }
  0x4b   : > { %2210 = vst [vmem:[%s3076_s4 + $0x204] sm:$0xf] %v2209_v25  ;;  %v2211_v26 = vld [vmem:[%s3071_s3 + $0xa38] sm:$0xf]  ;;  %v2213_v27 = vld [vmem:[%s3071_s3 + $0xa9c] sm:$0xf] }
  0x4c   : > { %v2215_v28 = vld [vmem:[%s3071_s3 + $0xb00] sm:$0xf]  ;;  %2212 = vst [vmem:[%s3076_s4 + $0x218] sm:$0xf] %v2211_v26  ;;  %2214 = vst [vmem:[%s3076_s4 + $0x22c] sm:$0xf] %v2213_v27 }
  0x4d   : > { %2216 = vst [vmem:[%s3076_s4 + $0x240] sm:$0xf] %v2215_v28  ;;  %v2217_v29 = vld [vmem:[%s3071_s3 + $0xb64] sm:$0xf]  ;;  %v2219_v30 = vld [vmem:[%s3071_s3 + $0xbc8] sm:$0xf] }
  0x4e   : > { %v2221_v31 = vld [vmem:[%s3071_s3 + $0xc2c] sm:$0xf]  ;;  %2218 = vst [vmem:[%s3076_s4 + $0x254] sm:$0xf] %v2217_v29  ;;  %2220 = vst [vmem:[%s3076_s4 + $0x268] sm:$0xf] %v2219_v30 }
  0x4f   : > { %2222 = vst [vmem:[%s3076_s4 + $0x27c] sm:$0xf] %v2221_v31 }
  0x50 PF: > { %p2223_p7 = scmp.ge.s32.totalorder %s2993_s15, 1  ;;  %p372_p8 = scmp.lt.s32.totalorder %s2993_s15, 11 }
  0x52   : > { %p373_p9 = pnand %p2223_p7, %p372_p8 }
  0x53   : > { %s379_s5 = sand.u32 (!%p373_p9), 1, %s2969_s9   ;;  %s413_s6 = smul.u32 (!%p373_p9), 80, %s2977_s11 }
  0x54   : > { %376 = sbr.rel (%p373_p9) target bundleno = 559 (0x22f), region = 50  ;;  %s2225_s8 = sshll.u32 (!%p373_p9), %s2981_s12, 5 }
  0x55   : > { %s2665_s7 = smul.u32 (!%p373_p9), 640, %s379_s5  ;;  %p414_p10 = scmp.lt.s32.totalorder (!%p373_p9), %s413_s6, 399 }
  0x56   : > { %p423_p11 = scmp.lt.s32.totalorder (!%p373_p9), %s2225_s8, 63  ;;  %p2227_p12 = scmp.ne.s32.totalorder (!%p373_p9), %s2977_s11, 0 }
  0x57   : > { %s3282_s9 = scalar_lea.vmem (!%p373_p9), [#allocation2], %s2665_s7 }
  0x5b   : > { %s3717_s6 = smov (!%p414_p10, %s413_s6), 399  ;;  %s3719_s8 = smov (!%p423_p11, %s2225_s8), 63 }
  0x5c   : > { %s2224_s18 = sshll.u32 %s3717_s6, 2  ;;  %s2226_s23 = sshll.u32 %s3719_s8, 3  ;;  %v2995_v32 = vmov (!%p2227_p12), 0.0  }
  0x5d   : > { %s3275_s21 = scalar_lea.vmem %s3702_s1, %s2224_s18  ;;  %s3280_s26 = scalar_lea.vmem %s3703_s2, %s2226_s23 }
  0x5e   : > { %435 = sbr.rel (%p2227_p12) target bundleno = 110 (0x6e), region = 58  ;;  %436 = vst [vmem:[%s3280_s26] sm:$0xff] (!%p2227_p12), %v2995_v32  ;;  %437 = vst [vmem:[%s3280_s26 + $0x8] sm:$0xff] (!%p2227_p12), %v2995_v32 }
  0x5f   : > { %438 = vst [vmem:[%s3280_s26 + $0x10] sm:$0xff] (!%p2227_p12), %v2995_v32  ;;  %439 = vst [vmem:[%s3280_s26 + $0x18] sm:$0xff] (!%p2227_p12), %v2995_v32 }
  0x60   : > { %440 = vst [vmem:[%s3280_s26 + $0x20] sm:$0xff] (!%p2227_p12), %v2995_v32  ;;  %441 = vst [vmem:[%s3280_s26 + $0x28] sm:$0xff] (!%p2227_p12), %v2995_v32 }
  0x61   : > { %442 = vst [vmem:[%s3280_s26 + $0x30] sm:$0xff] (!%p2227_p12), %v2995_v32  ;;  %443 = vst [vmem:[%s3280_s26 + $0x38] sm:$0xff] (!%p2227_p12), %v2995_v32 }
  0x62   : > { %444 = vst [vmem:[%s3280_s26 + $0x40] sm:$0xff] (!%p2227_p12), %v2995_v32  ;;  %445 = vst [vmem:[%s3280_s26 + $0x48] sm:$0xff] (!%p2227_p12), %v2995_v32 }
  0x63   : > { %446 = vst [vmem:[%s3280_s26 + $0x50] sm:$0xff] (!%p2227_p12), %v2995_v32  ;;  %447 = vst [vmem:[%s3280_s26 + $0x58] sm:$0xff] (!%p2227_p12), %v2995_v32 }
  0x64   : > { %448 = vst [vmem:[%s3280_s26 + $0x60] sm:$0xff] (!%p2227_p12), %v2995_v32  ;;  %449 = vst [vmem:[%s3280_s26 + $0x68] sm:$0xff] (!%p2227_p12), %v2995_v32 }
  0x65   : > { %450 = vst [vmem:[%s3280_s26 + $0x70] sm:$0xff] %v2995_v32  ;;  %451 = vst [vmem:[%s3280_s26 + $0x78] sm:$0xff] %v2995_v32 }
  0x66   : > { %452 = vst [vmem:[%s3280_s26 + $0x80] sm:$0xff] %v2995_v32  ;;  %453 = vst [vmem:[%s3280_s26 + $0x88] sm:$0xff] %v2995_v32 }
  0x67   : > { %454 = vst [vmem:[%s3280_s26 + $0x90] sm:$0xff] %v2995_v32  ;;  %455 = vst [vmem:[%s3280_s26 + $0x98] sm:$0xff] %v2995_v32 }
  0x68   : > { %456 = vst [vmem:[%s3280_s26 + $0xa0] sm:$0xff] %v2995_v32  ;;  %457 = vst [vmem:[%s3280_s26 + $0xa8] sm:$0xff] %v2995_v32 }
  0x69   : > { %458 = vst [vmem:[%s3280_s26 + $0xb0] sm:$0xff] %v2995_v32  ;;  %459 = vst [vmem:[%s3280_s26 + $0xb8] sm:$0xff] %v2995_v32 }
  0x6a   : > { %460 = vst [vmem:[%s3280_s26 + $0xc0] sm:$0xff] %v2995_v32  ;;  %461 = vst [vmem:[%s3280_s26 + $0xc8] sm:$0xff] %v2995_v32 }
  0x6b   : > { %462 = vst [vmem:[%s3280_s26 + $0xd0] sm:$0xff] %v2995_v32  ;;  %463 = vst [vmem:[%s3280_s26 + $0xd8] sm:$0xff] %v2995_v32 }
  0x6c   : > { %464 = vst [vmem:[%s3280_s26 + $0xe0] sm:$0xff] %v2995_v32  ;;  %465 = vst [vmem:[%s3280_s26 + $0xe8] sm:$0xff] %v2995_v32 }
  0x6d   : > { %466 = vst [vmem:[%s3280_s26 + $0xf0] sm:$0xff] %v2995_v32  ;;  %467 = vst [vmem:[%s3280_s26 + $0xf8] sm:$0xff] %v2995_v32 }
  0x6e PF: > { %v2723_v33 = vld [vmem:[%s3275_s21 + $0x40] sm:$0xff]   ;;  %v2725_v35 = vld [vmem:[%s3275_s21 + $0x48] sm:$0xff]   ;;  %v2727_v37 = vld [vmem:[%s3275_s21 + $0x50] sm:$0xff]   ;;  %p2348_p13 = scmp.ne.s32.totalorder %s2977_s11, 4 }
  0x6f   : > { %v2724_v34 = vld [vmem:[%s3275_s21] sm:$0xff]   ;;  %2351 = vmatprep.subr.bf16.mxu0 %v2723_v33  ;;  %2647 = vmatprep.subr.bf16.mxu1 %v2723_v33  ;;  %v2726_v36 = vld [vmem:[%s3275_s21 + $0x8] sm:$0xff]   ;;  %v2728_v38 = vld [vmem:[%s3275_s21 + $0x10] sm:$0xff]  }
  0x70   : > { %2352 = vmatpush3.bf16.msra.mxu0 %v2724_v34  ;;  %2655 = vmatpush3.bf16.msra.mxu1 %v2724_v34  ;;  %v2729_v39 = vld [vmem:[%s3275_s21 + $0x58] sm:$0xff]   ;;  %v2731_v41 = vld [vmem:[%s3275_s21 + $0x60] sm:$0xff]   ;;  %v2733_v43 = vld [vmem:[%s3275_s21 + $0x68] sm:$0xff]  }
  0x71   : > { %2353 = vmatprep.subr.bf16.mxu0 %v2725_v35  ;;  %2648 = vmatprep.subr.bf16.mxu1 %v2725_v35  ;;  %v2730_v40 = vld [vmem:[%s3275_s21 + $0x18] sm:$0xff]   ;;  %v2732_v42 = vld [vmem:[%s3275_s21 + $0x20] sm:$0xff]   ;;  %v2734_v46 = vld [vmem:[%s3275_s21 + $0x28] sm:$0xff]  }
  0x72   : > { %v2741_v44 = vld [vmem:[%s3282_s9 + $0x4] ss:$20 sps:$4 sm:$0xff]   ;;  %v2735_v47 = vld [vmem:[%s3275_s21 + $0x70] sm:$0xff]   ;;  %v2747_v56 = vld [vmem:[%s3275_s21 + $0xc8] sm:$0xff]  }
  0x73   : > { %v2744_v45 = vld [vmem:[%s3282_s9 + $0x1e4] ss:$20 sps:$4 sm:$0xff]   ;;  %1364 = vmatprep.mubr.bf16.mxu0 %v2741_v44  ;;  %v2736_v48 = vld [vmem:[%s3275_s21 + $0x30] sm:$0xff]   ;;  %v2750_v57 = vld [vmem:[%s3282_s9 + $0x2c] ss:$20 sps:$4 sm:$0xff]  }
  0x74   : > { %2354 = vmatpush3.bf16.msra.mxu0 %v2726_v36  ;;  %2656 = vmatpush3.bf16.msra.mxu1 %v2726_v36  ;;  %v2737_v49 = vld [vmem:[%s3275_s21 + $0x78] sm:$0xff]   ;;  %v2745_v51 = vld [vmem:[%s3275_s21 + $0xc0] sm:$0xff]   ;;  %v2767_v59 = vld [vmem:[%s3275_s21 + $0x108] sm:$0xff]  }
  0x75   : > { %2355 = vmatprep.subr.bf16.mxu0 %v2727_v37  ;;  %2649 = vmatprep.subr.bf16.mxu1 %v2727_v37  ;;  %v2738_v50 = vld [vmem:[%s3275_s21 + $0x38] sm:$0xff]   ;;  %v2748_v52 = vld [vmem:[%s3275_s21 + $0x100] sm:$0xff]   ;;  %v2749_v60 = vld [vmem:[%s3275_s21 + $0x88] sm:$0xff]  }
  0x76   : > { %1460 = vmatprep.mubr.bf16.mxu1 %v2744_v45  ;;  %v2739_v53 = vld [vmem:[%s3282_s9] ss:$20 sps:$4 sm:$0xff]   ;;  %v2754_v61 = vld [vmem:[%s3282_s9 + $0x28] ss:$20 sps:$4 sm:$0xff]   ;;  %v2764_v6 = vld [vmem:[%s3282_s9 + $0x50] ss:$20 sps:$4 sm:$0xff]  }
  0x77   : > { %v2742_v54 = vld [vmem:[%s3282_s9 + $0x1e0] ss:$20 sps:$4 sm:$0xff]   ;;  %v2755_v63 = vld [vmem:[%s3282_s9 + $0x208] ss:$20 sps:$4 sm:$0xff]   ;;  %v2765_v8 = vld [vmem:[%s3282_s9 + $0x230] ss:$20 sps:$4 sm:$0xff]  }
  0x78   : > { %2356 = vmatpush3.bf16.msra.mxu0 %v2728_v38  ;;  %2657 = vmatpush3.bf16.msra.mxu1 %v2728_v38  ;;  %v2746_v55 = vld [vmem:[%s3275_s21 + $0x80] sm:$0xff]   ;;  %v2756_v62 = vld [vmem:[%s3275_s21 + $0xd0] sm:$0xff]   ;;  %v2758_v2 = vld [vmem:[%s3275_s21 + $0xd8] sm:$0xff]  }
  0x79   : > { %2357 = vmatprep.subr.bf16.mxu0 %v2729_v39  ;;  %2650 = vmatprep.subr.bf16.mxu1 %v2729_v39  ;;  %v2752_v58 = vld [vmem:[%s3282_s9 + $0x20c] ss:$20 sps:$4 sm:$0xff]   ;;  %v2757_v0 = vld [vmem:[%s3275_s21 + $0x90] sm:$0xff]   ;;  %v2759_v4 = vld [vmem:[%s3275_s21 + $0x98] sm:$0xff]  }
  0x7a   : > { %v2760_v1 = vld [vmem:[%s3282_s9 + $0x54] ss:$20 sps:$4 sm:$0xff]   ;;  %v2766_v5 = vld [vmem:[%s3275_s21 + $0xe0] sm:$0xff]   ;;  %v2771_v11 = vld [vmem:[%s3282_s9 + $0x7c] ss:$20 sps:$4 sm:$0xff]  }
  0x7b   : > { %v2762_v3 = vld [vmem:[%s3282_s9 + $0x234] ss:$20 sps:$4 sm:$0xff]   ;;  %v2768_v9 = vld [vmem:[%s3275_s21 + $0xa0] sm:$0xff]   ;;  %v2773_v12 = vld [vmem:[%s3282_s9 + $0x25c] ss:$20 sps:$4 sm:$0xff]  }
  0x7c   : > { %2358 = vmatpush3.bf16.msra.mxu0 %v2730_v40  ;;  %2658 = vmatpush3.bf16.msra.mxu1 %v2730_v40  ;;  %v2780_v7 = vld [vmem:[%s3275_s21 + $0x110] sm:$0xff]   ;;  %v2769_v10 = vld [vmem:[%s3275_s21 + $0xe8] sm:$0xff]   ;;  %v2794_v14 = vld [vmem:[%s3275_s21 + $0x118] sm:$0xff]  }
  0x7d   : > { %2359 = vmatprep.subr.bf16.mxu0 %v2731_v41  ;;  %2651 = vmatprep.subr.bf16.mxu1 %v2731_v41  ;;  %v2770_v13 = vld [vmem:[%s3275_s21 + $0xa8] sm:$0xff]   ;;  %v2777_v17 = vld [vmem:[%s3275_s21 + $0xf0] sm:$0xff]   ;;  %v2779_v19 = vld [vmem:[%s3275_s21 + $0xf8] sm:$0xff]  }
  0x7e   : > { %v2775_v15 = vld [vmem:[%s3282_s9 + $0x78] ss:$20 sps:$4 sm:$0xff]   ;;  %v2778_v18 = vld [vmem:[%s3275_s21 + $0xb0] sm:$0xff]   ;;  %v2801_v21 = vld [vmem:[%s3275_s21 + $0x120] sm:$0xff]  }
  0x7f   : > { %v2776_v16 = vld [vmem:[%s3282_s9 + $0x258] ss:$20 sps:$4 sm:$0xff]   ;;  %v2784_v24 = vld [vmem:[%s3282_s9 + $0x8] ss:$20 sps:$4 sm:$0xff]   ;;  %v2787_v25 = vld [vmem:[%s3282_s9 + $0xa0] ss:$20 sps:$4 sm:$0xff]  }
  0x80   : > { %2360 = vmatpush3.bf16.msra.mxu0 %v2732_v42  ;;  %2659 = vmatpush3.bf16.msra.mxu1 %v2732_v42  ;;  %v2782_v20 = vld [vmem:[%s3282_s9 + $0xa4] ss:$20 sps:$4 sm:$0xff]   ;;  %v2786_v22 = vld [vmem:[%s3282_s9 + $0xc] ss:$20 sps:$4 sm:$0xff]   ;;  %v2790_v28 = vld [vmem:[%s3282_s9 + $0x34] ss:$20 sps:$4 sm:$0xff]  }
  0x81   : > { %2361 = vmatprep.subr.bf16.mxu0 %v2733_v43  ;;  %2652 = vmatprep.subr.bf16.mxu1 %v2733_v43  ;;  %v2781_v23 = vld [vmem:[%s3275_s21 + $0xb8] sm:$0xff]   ;;  %v2814_v26 = vld [vmem:[%s3275_s21 + $0x128] sm:$0xff]   ;;  %v2821_v29 = vld [vmem:[%s3275_s21 + $0x130] sm:$0xff]  }
  0x82   : > { %v2788_v27 = vld [vmem:[%s3282_s9 + $0xcc] ss:$20 sps:$4 sm:$0xff]   ;;  %v2792_v30 = vld [vmem:[%s3282_s9 + $0xc8] ss:$20 sps:$4 sm:$0xff]   ;;  %v2793_v31 = vld [vmem:[%s3282_s9 + $0x30] ss:$20 sps:$4 sm:$0xff]  }
  0x83   : > { %v2795_v32 = vld [vmem:[%s3282_s9 + $0xf4] ss:$20 sps:$4 sm:$0xff]   ;;  %v2797_v33 = vld [vmem:[%s3282_s9 + $0x5c] ss:$20 sps:$4 sm:$0xff]   ;;  %v2800_v36 = vld [vmem:[%s3282_s9 + $0x58] ss:$20 sps:$4 sm:$0xff]  }
  0x84   : > { %2362 = vmatpush3.bf16.msra.mxu0 %v2734_v46  ;;  %2660 = vmatpush3.bf16.msra.mxu1 %v2734_v46  ;;  %v2834_v34 = vld [vmem:[%s3275_s21 + $0x138] sm:$0xff]   ;;  %v2799_v35 = vld [vmem:[%s3282_s9 + $0xf0] ss:$20 sps:$4 sm:$0xff]   ;;  %v2807_v40 = vld [vmem:[%s3282_s9 + $0x80] ss:$20 sps:$4 sm:$0xff]  }
  0x85   : > { %2363 = vmatprep.subr.bf16.mxu0 %v2735_v47  ;;  %2653 = vmatprep.subr.bf16.mxu1 %v2735_v47  ;;  %v2802_v37 = vld [vmem:[%s3282_s9 + $0x11c] ss:$20 sps:$4 sm:$0xff]   ;;  %v2804_v38 = vld [vmem:[%s3282_s9 + $0x84] ss:$20 sps:$4 sm:$0xff]   ;;  %v2810_v42 = vld [vmem:[%s3282_s9 + $0xac] ss:$20 sps:$4 sm:$0xff]  }
  0x86   : > { %v2806_v39 = vld [vmem:[%s3282_s9 + $0x118] ss:$20 sps:$4 sm:$0xff]   ;;  %v2812_v43 = vld [vmem:[%s3282_s9 + $0x140] ss:$20 sps:$4 sm:$0xff]   ;;  %v2813_v44 = vld [vmem:[%s3282_s9 + $0xa8] ss:$20 sps:$4 sm:$0xff]  }
  0x87   : > { %v2808_v41 = vld [vmem:[%s3282_s9 + $0x144] ss:$20 sps:$4 sm:$0xff]   ;;  %v2815_v45 = vld [vmem:[%s3282_s9 + $0x16c] ss:$20 sps:$4 sm:$0xff]   ;;  %v2817_v46 = vld [vmem:[%s3282_s9 + $0xd4] ss:$20 sps:$4 sm:$0xff]  }
  0x88   : > { %2364 = vmatpush3.bf16.msra.mxu0 %v2736_v48  ;;  %2661 = vmatpush3.bf16.msra.mxu1 %v2736_v48  ;;  %v2819_v47 = vld [vmem:[%s3282_s9 + $0x168] ss:$20 sps:$4 sm:$0xff]   ;;  %v2820_v48 = vld [vmem:[%s3282_s9 + $0xd0] ss:$20 sps:$4 sm:$0xff]  }
  0x89   : > { %2365 = vmatprep.subr.bf16.mxu0 %v2737_v49  ;;  %2654 = vmatprep.subr.bf16.mxu1 %v2737_v49  ;;  %v2822_v49 = vld [vmem:[%s3282_s9 + $0x194] ss:$20 sps:$4 sm:$0xff]  }
  0x8c   : > { %2366 = vmatpush3.bf16.msra.mxu0 %v2738_v50  ;;  %2662 = vmatpush3.bf16.msra.mxu1 %v2738_v50  ;;  %v2824_v50 = vld [vmem:[%s3282_s9 + $0xfc] ss:$20 sps:$4 sm:$0xff]  }
  0x8d   : > { %2463 = vmatprep.subr.bf16.mxu1 %v2745_v51  ;;  %2599 = vmatprep.subr.bf16.mxu0 %v2748_v52  ;;  %v2826_v51 = vld [vmem:[%s3282_s9 + $0x190] ss:$20 sps:$4 sm:$0xff]  }
  0x8f   : > { %1365 = vmatmul.mubr.bf16.vlgmr.msra.gmra.mrb[0].mxu0 %v2739_v53  ;;  %1461 = vmatmul.mubr.bf16.vlgmr.msra.gmra.mrb[0].mxu1 %v2742_v54  ;;  %v2828_v53 = vld [vmem:[%s3282_s9 + $0x1bc] ss:$20 sps:$4 sm:$0xff]   ;;  %v2830_v54 = vld [vmem:[%s3282_s9 + $0x124] ss:$20 sps:$4 sm:$0xff]  }
  0x90   : > { %2464 = vmatpush3.bf16.msra.mxu1 %v2746_v55  ;;  %2600 = vmatpush3.bf16.msra.mxu0 %v2748_v52  ;;  %v2827_v52 = vld [vmem:[%s3282_s9 + $0xf8] ss:$20 sps:$4 sm:$0xff]  }
  0x91   : > { %2465 = vmatprep.subr.bf16.mxu1 %v2747_v56  ;;  %1372 = vmatprep.mubr.bf16.mxu0 %v2750_v57  ;;  %v2832_v55 = vld [vmem:[%s3282_s9 + $0x1b8] ss:$20 sps:$4 sm:$0xff]   ;;  %v2833_v56 = vld [vmem:[%s3282_s9 + $0x120] ss:$20 sps:$4 sm:$0xff]  }
  0x92   : > { %1468 = vmatprep.mubr.bf16.mxu1 %v2752_v58  ;;  %2601 = vmatprep.subr.bf16.mxu0 %v2767_v59  ;;  %v2835_v57 = vld [vmem:[%s3282_s9 + $0x14c] ss:$20 sps:$4 sm:$0xff]   ;;  %v2837_v58 = vld [vmem:[%s3282_s9 + $0x10] ss:$20 sps:$4 sm:$0xff]  }
  0x94   : > { %2466 = vmatpush3.bf16.msra.mxu1 %v2749_v60  ;;  %2602 = vmatpush3.bf16.msra.mxu0 %v2767_v59  ;;  %v2838_v59 = vld [vmem:[%s3282_s9 + $0x148] ss:$20 sps:$4 sm:$0xff]   ;;  %v2839_v60 = vld [vmem:[%s3282_s9 + $0x38] ss:$20 sps:$4 sm:$0xff]  }
  0x95   : > { %2467 = vmatprep.subr.bf16.mxu1 %v2756_v62  ;;  %2603 = vmatprep.subr.bf16.mxu0 %v2780_v7  ;;  %v2842_v62 = vld [vmem:[%s3282_s9 + $0x60] ss:$20 sps:$4 sm:$0xff]  }
  0x97   : > { %1373 = vmatmul.mubr.bf16.gmra.mrb[4].mxu0 %v2754_v61  ;;  %1469 = vmatmul.mubr.bf16.gmra.mrb[4].mxu1 %v2755_v63  ;;  %v2840_v61 = vld [vmem:[%s3282_s9 + $0x174] ss:$20 sps:$4 sm:$0xff]   ;;  %v2843_v63 = vld [vmem:[%s3282_s9 + $0x170] ss:$20 sps:$4 sm:$0xff]  }
  0x98   : > { %2468 = vmatpush3.bf16.msra.mxu1 %v2757_v0  ;;  %1380 = vmatprep.mubr.bf16.mxu0 %v2760_v1  ;;  %v2844_v0 = vld [vmem:[%s3282_s9 + $0x88] ss:$20 sps:$4 sm:$0xff]  }
  0x99   : > { %2469 = vmatprep.subr.bf16.mxu1 %v2758_v2  ;;  %1476 = vmatprep.mubr.bf16.mxu1 %v2762_v3  ;;  %v2845_v1 = vld [vmem:[%s3282_s9 + $0x19c] ss:$20 sps:$4 sm:$0xff]   ;;  %v2848_v3 = vld [vmem:[%s3282_s9 + $0x198] ss:$20 sps:$4 sm:$0xff]  }
  0x9a   : > { %2604 = vmatpush3.bf16.msra.mxu0 %v2780_v7  ;;  %v2847_v2 = vld [vmem:[%s3282_s9 + $0xb0] ss:$20 sps:$4 sm:$0xff]   ;;  %v2853_v7 = vld [vmem:[%s3282_s9 + $0x1c0] ss:$20 sps:$4 sm:$0xff]  }
  0x9b   : > { %2605 = vmatprep.subr.bf16.mxu0 %v2794_v14 }
  0x9c   : > { %2470 = vmatpush3.bf16.msra.mxu1 %v2759_v4  ;;  %v2849_v4 = vld [vmem:[%s3282_s9 + $0xd8] ss:$20 sps:$4 sm:$0xff]  }
  0x9d   : > { %2471 = vmatprep.subr.bf16.mxu1 %v2766_v5  ;;  %v2850_v5 = vld [vmem:[%s3282_s9 + $0x1c4] ss:$20 sps:$4 sm:$0xff]  }
  0x9e   : > { %2606 = vmatpush3.bf16.msra.mxu0 %v2794_v14  ;;  %v2862_v14 = vld [vmem:[%s3282_s9 + $0x1a0] ss:$20 sps:$4 sm:$0xff]  }
  0x9f   : > { %1381 = vmatmul.mubr.bf16.gmra.mrb[8].mxu0 %v2764_v6  ;;  %1477 = vmatmul.mubr.bf16.gmra.mrb[8].mxu1 %v2765_v8  ;;  %v2852_v6 = vld [vmem:[%s3282_s9 + $0x100] ss:$20 sps:$4 sm:$0xff]   ;;  %v2854_v8 = vld [vmem:[%s3282_s9 + $0x128] ss:$20 sps:$4 sm:$0xff]  }
  0xa0   : > { %2472 = vmatpush3.bf16.msra.mxu1 %v2768_v9  ;;  %1388 = vmatprep.mubr.bf16.mxu0 %v2771_v11  ;;  %v2855_v9 = vld [vmem:[%s3282_s9 + $0x1ec] ss:$20 sps:$4 sm:$0xff]   ;;  %v2858_v11 = vld [vmem:[%s3282_s9 + $0x1e8] ss:$20 sps:$4 sm:$0xff]  }
  0xa1   : > { %2473 = vmatprep.subr.bf16.mxu1 %v2769_v10  ;;  %1484 = vmatprep.mubr.bf16.mxu1 %v2773_v12  ;;  %v2857_v10 = vld [vmem:[%s3282_s9 + $0x150] ss:$20 sps:$4 sm:$0xff]   ;;  %v2859_v12 = vld [vmem:[%s3282_s9 + $0x178] ss:$20 sps:$4 sm:$0xff]  }
  0xa2   : > { %2607 = vmatprep.subr.bf16.mxu0 %v2801_v21 }
  0xa3   : > { %2608 = vmatpush3.bf16.msra.mxu0 %v2801_v21  ;;  %v2870_v21 = vld [vmem:[%s3282_s9 + $0x264] ss:$20 sps:$4 sm:$0xff]  }
  0xa4   : > { %2474 = vmatpush3.bf16.msra.mxu1 %v2770_v13  ;;  %2609 = vmatprep.subr.bf16.mxu0 %v2814_v26  ;;  %v2860_v13 = vld [vmem:[%s3282_s9 + $0x214] ss:$20 sps:$4 sm:$0xff]  }
  0xa5   : > { %2475 = vmatprep.subr.bf16.mxu1 %v2777_v17  ;;  %v2865_v17 = vld [vmem:[%s3282_s9 + $0x23c] ss:$20 sps:$4 sm:$0xff]  }
  0xa7   : > { %1389 = vmatmul.mubr.bf16.gmra.mrb[12].mxu0 %v2775_v15  ;;  %1485 = vmatmul.mubr.bf16.gmra.mrb[12].mxu1 %v2776_v16  ;;  %v2863_v15 = vld [vmem:[%s3282_s9 + $0x210] ss:$20 sps:$4 sm:$0xff]   ;;  %v2864_v16 = vld [vmem:[%s3282_s9 + $0x1c8] ss:$20 sps:$4 sm:$0xff]  }
  0xa8   : > { %2476 = vmatpush3.bf16.msra.mxu1 %v2778_v18  ;;  %1396 = vmatprep.mubr.bf16.mxu0 %v2782_v20  ;;  %v2867_v18 = vld [vmem:[%s3282_s9 + $0x1f0] ss:$20 sps:$4 sm:$0xff]   ;;  %v2869_v20 = vld [vmem:[%s3282_s9 + $0x218] ss:$20 sps:$4 sm:$0xff]  }
  0xa9   : > { %2477 = vmatprep.subr.bf16.mxu1 %v2779_v19  ;;  %1525 = vmatprep.mubr.bf16.mxu1 %v2786_v22  ;;  %v2868_v19 = vld [vmem:[%s3282_s9 + $0x238] ss:$20 sps:$4 sm:$0xff]   ;;  %v2872_v22 = vld [vmem:[%s3282_s9 + $0x240] ss:$20 sps:$4 sm:$0xff]  }
  0xaa   : > { %2610 = vmatpush3.bf16.msra.mxu0 %v2814_v26 }
  0xab   : > { %2611 = vmatprep.subr.bf16.mxu0 %v2821_v29 }
  0xac   : > { %2478 = vmatpush3.bf16.msra.mxu1 %v2781_v23  ;;  %v2873_v23 = vld [vmem:[%s3282_s9 + $0x260] ss:$20 sps:$4 sm:$0xff]  }
  0xae   : > { %2612 = vmatpush3.bf16.msra.mxu0 %v2821_v29 }
  0xaf   : > { %1397 = vmatmul.mubr.bf16.gmra.mrb[16].mxu0 %v2787_v25  ;;  %1526 = vmatmul.mubr.bf16.vlgmr.msra.gmra.mrb[16].mxu1 %v2784_v24  ;;  %v2874_v24 = vld [vmem:[%s3282_s9 + $0x268] ss:$20 sps:$4 sm:$0xff]  }
  0xb0   : > { %1404 = vmatprep.mubr.bf16.mxu0 %v2788_v27  ;;  %1533 = vmatprep.mubr.bf16.mxu1 %v2790_v28 }
  0xb1   : > { %2613 = vmatprep.subr.bf16.mxu0 %v2834_v34 }
  0xb2   : > { %2614 = vmatpush3.bf16.msra.mxu0 %v2834_v34 }
  0xb7   : > { %1405 = vmatmul.mubr.bf16.gmra.mrb[20].mxu0 %v2792_v30  ;;  %1534 = vmatmul.mubr.bf16.gmra.mrb[20].mxu1 %v2793_v31 }
  0xb8   : > { %1412 = vmatprep.mubr.bf16.mxu0 %v2795_v32  ;;  %1541 = vmatprep.mubr.bf16.mxu1 %v2797_v33 }
  0xbf   : > { %1413 = vmatmul.mubr.bf16.gmra.mrb[24].mxu0 %v2799_v35  ;;  %1542 = vmatmul.mubr.bf16.gmra.mrb[24].mxu1 %v2800_v36 }
  0xc0   : > { %1420 = vmatprep.mubr.bf16.mxu0 %v2802_v37  ;;  %1549 = vmatprep.mubr.bf16.mxu1 %v2804_v38 }
  0xc7   : > { %1421 = vmatmul.mubr.bf16.gmra.mrb[28].mxu0 %v2806_v39  ;;  %1550 = vmatmul.mubr.bf16.gmra.mrb[28].mxu1 %v2807_v40 }
  0xc8   : > { %1428 = vmatprep.mubr.bf16.mxu0 %v2808_v41  ;;  %1557 = vmatprep.mubr.bf16.mxu1 %v2810_v42 }
  0xcf   : > { %1429 = vmatmul.mubr.bf16.gmra.mrb[32].mxu0 %v2812_v43  ;;  %1558 = vmatmul.mubr.bf16.gmra.mrb[32].mxu1 %v2813_v44 }
  0xd0   : > { %1436 = vmatprep.mubr.bf16.mxu0 %v2815_v45  ;;  %1565 = vmatprep.mubr.bf16.mxu1 %v2817_v46 }
  0xd7   : > { %1437 = vmatmul.mubr.bf16.gmra.mrb[36].mxu0 %v2819_v47  ;;  %1566 = vmatmul.mubr.bf16.gmra.mrb[36].mxu1 %v2820_v48 }
  0xd8   : > { %1444 = vmatprep.mubr.bf16.mxu0 %v2822_v49  ;;  %1573 = vmatprep.mubr.bf16.mxu1 %v2824_v50 }
  0xdf   : > { %1445 = vmatmul.mubr.bf16.gmra.mrb[40].mxu0 %v2826_v51  ;;  %1574 = vmatmul.mubr.bf16.gmra.mrb[40].mxu1 %v2827_v52 }
  0xe0   : > { %1452 = vmatprep.mubr.bf16.mxu0 %v2828_v53  ;;  %1581 = vmatprep.mubr.bf16.mxu1 %v2830_v54 }
  0xe7   : > { %1453 = vmatmul.mubr.bf16.gmra.mrb[44].mxu0 %v2832_v55  ;;  %1582 = vmatmul.mubr.bf16.gmra.mrb[44].mxu1 %v2833_v56 }
  0xe8   : > { %1589 = vmatprep.mubr.bf16.mxu1 %v2835_v57  ;;  %2615 = vmatprep.mubr.bf16.mxu0 %v2837_v58 }
  0xef   : > { %1590 = vmatmul.mubr.bf16.gmra.mrb[48].mxu1 %v2838_v59  ;;  %2616 = vmatmul.mubr.bf16.vlgmr.msra.gmra.mrb[48].mxu0 %v2839_v60 }
  0xf0   : > { %1597 = vmatprep.mubr.bf16.mxu1 %v2840_v61  ;;  %2619 = vmatprep.mubr.bf16.mxu0 %v2842_v62 }
  0xf7   : > { %1598 = vmatmul.mubr.bf16.gmra.mrb[52].mxu1 %v2843_v63  ;;  %2620 = vmatmul.mubr.bf16.gmra.mrb[52].mxu0 %v2844_v0 }
  0xf8   : > { %1605 = vmatprep.mubr.bf16.mxu1 %v2845_v1  ;;  %2623 = vmatprep.mubr.bf16.mxu0 %v2847_v2 }
  0xff   : > { %1606 = vmatmul.mubr.bf16.gmra.mrb[56].mxu1 %v2848_v3  ;;  %2624 = vmatmul.mubr.bf16.gmra.mrb[56].mxu0 %v2849_v4 }
 0x100   : > { %1613 = vmatprep.mubr.bf16.mxu1 %v2850_v5  ;;  %2627 = vmatprep.mubr.bf16.mxu0 %v2852_v6 }
 0x107   : > { %1614 = vmatmul.mubr.bf16.gmra.mrb[60].mxu1 %v2853_v7  ;;  %2628 = vmatmul.mubr.bf16.gmra.mrb[60].mxu0 %v2854_v8 }
 0x108   : > { %1621 = vmatprep.mubr.bf16.mxu1 %v2855_v9  ;;  %2631 = vmatprep.mubr.bf16.mxu0 %v2857_v10 }
 0x10f   : > { %1622 = vmatmul.mubr.bf16.gmra.mrb[64].mxu1 %v2858_v11  ;;  %2632 = vmatmul.mubr.bf16.gmra.mrb[64].mxu0 %v2859_v12 }
 0x110   : > { %1629 = vmatprep.mubr.bf16.mxu1 %v2860_v13  ;;  %2635 = vmatprep.mubr.bf16.mxu0 %v2862_v14 }
 0x117   : > { %1630 = vmatmul.mubr.bf16.gmra.mrb[68].mxu1 %v2863_v15  ;;  %2636 = vmatmul.mubr.bf16.gmra.mrb[68].mxu0 %v2864_v16 }
 0x118   : > { %1637 = vmatprep.mubr.bf16.mxu1 %v2865_v17  ;;  %2639 = vmatprep.mubr.bf16.mxu0 %v2867_v18 }
 0x11f   : > { %1638 = vmatmul.mubr.bf16.gmra.mrb[72].mxu1 %v2868_v19  ;;  %2640 = vmatmul.mubr.bf16.gmra.mrb[72].mxu0 %v2869_v20 }
 0x120   : > { %1645 = vmatprep.mubr.bf16.mxu1 %v2870_v21  ;;  %2643 = vmatprep.mubr.bf16.mxu0 %v2872_v22 }
 0x127   : > { %1646 = vmatmul.mubr.bf16.gmra.mrb[76].mxu1 %v2873_v23  ;;  %2644 = vmatmul.mubr.bf16.gmra.mrb[76].mxu0 %v2874_v24 }
 0x162   : > { %v2439_v25 = vpop.f32.mrb[0].mxu1  ;;  %v2367_v26 = vpop.f32.mrb[0].mxu0 }
 0x163   : > { %v2440_v27 = vpop.f32.mrb[1].mxu1  ;;  %v2368_v28 = vpop.f32.mrb[1].mxu0 }
 0x164   : > { %v3437_v29 = vadd.f32 %v2440_v27, %v2439_v25  ;;  %v2442_v30 = vpop.f32.mrb[2].mxu1  ;;  %v2369_v31 = vadd.f32 %v2368_v28, %v2367_v26  ;;  %v2370_v32 = vpop.f32.mrb[2].mxu0 }
 0x165   : > { %v2443_v33 = vpop.f32.mrb[3].mxu1  ;;  %v2371_v34 = vpop.f32.mrb[3].mxu0 }
 0x166   : > { %v3439_v35 = vadd.f32 %v2443_v33, %v2442_v30  ;;  %v2372_v36 = vadd.f32 %v2371_v34, %v2370_v32 }
 0x16a   : > { %v2445_v37 = vpop.f32.mrb[4].mxu1  ;;  %v2373_v38 = vpop.f32.mrb[4].mxu0 }
 0x16b   : > { %v2446_v39 = vpop.f32.mrb[5].mxu1  ;;  %v2374_v40 = vpop.f32.mrb[5].mxu0 }
 0x16c   : > { %v3441_v41 = vadd.f32 %v2446_v39, %v2445_v37  ;;  %v2448_v42 = vpop.f32.mrb[6].mxu1  ;;  %v2375_v43 = vadd.f32 %v2374_v40, %v2373_v38  ;;  %v2376_v44 = vpop.f32.mrb[6].mxu0 }
 0x16d   : > { %v2449_v45 = vpop.f32.mrb[7].mxu1  ;;  %v2377_v46 = vpop.f32.mrb[7].mxu0 }
 0x16e   : > { %v3443_v47 = vadd.f32 %v2449_v45, %v2448_v42  ;;  %v2378_v48 = vadd.f32 %v2377_v46, %v2376_v44 }
 0x172   : > { %v2451_v49 = vpop.f32.mrb[8].mxu1  ;;  %v2379_v50 = vpop.f32.mrb[8].mxu0 }
 0x173   : > { %v2452_v51 = vpop.f32.mrb[9].mxu1  ;;  %v2380_v52 = vpop.f32.mrb[9].mxu0 }
 0x174   : > { %v3445_v53 = vadd.f32 %v2452_v51, %v2451_v49  ;;  %v2454_v54 = vpop.f32.mrb[10].mxu1  ;;  %v2381_v55 = vadd.f32 %v2380_v52, %v2379_v50  ;;  %v2382_v56 = vpop.f32.mrb[10].mxu0 }
 0x175   : > { %v2455_v57 = vpop.f32.mrb[11].mxu1  ;;  %v2383_v58 = vpop.f32.mrb[11].mxu0 }
 0x176   : > { %v3447_v59 = vadd.f32 %v2455_v57, %v2454_v54  ;;  %v2384_v60 = vadd.f32 %v2383_v58, %v2382_v56 }
 0x17a   : > { %v2457_v61 = vpop.f32.mrb[12].mxu1  ;;  %v2385_v62 = vpop.f32.mrb[12].mxu0 }
 0x17b   : > { %v2458_v63 = vpop.f32.mrb[13].mxu1  ;;  %v2386_v0 = vpop.f32.mrb[13].mxu0 }
 0x17c   : > { %v3449_v1 = vadd.f32 %v2458_v63, %v2457_v61  ;;  %v2460_v2 = vpop.f32.mrb[14].mxu1  ;;  %v2387_v3 = vadd.f32 %v2386_v0, %v2385_v62  ;;  %v2388_v4 = vpop.f32.mrb[14].mxu0 }
 0x17d   : > { %v2461_v5 = vpop.f32.mrb[15].mxu1  ;;  %v2389_v6 = vpop.f32.mrb[15].mxu0 }
 0x17e   : > { %v3451_v7 = vadd.f32 %v2461_v5, %v2460_v2  ;;  %v2390_v8 = vadd.f32 %v2389_v6, %v2388_v4 }
 0x182   : > { %v2479_v9 = vpop.f32.mrb[16].mxu1  ;;  %v2391_v10 = vpop.f32.mrb[16].mxu0 }
 0x183   : > { %v2480_v11 = vpop.f32.mrb[17].mxu1  ;;  %v2392_v12 = vpop.f32.mrb[17].mxu0 }
 0x184   : > { %v2481_v13 = vadd.f32 %v2480_v11, %v2479_v9  ;;  %v2482_v14 = vpop.f32.mrb[18].mxu1  ;;  %v2393_v15 = vadd.f32 %v2392_v12, %v2391_v10  ;;  %v2394_v16 = vpop.f32.mrb[18].mxu0 }
 0x185   : > { %v2483_v17 = vpop.f32.mrb[19].mxu1  ;;  %v2395_v18 = vpop.f32.mrb[19].mxu0 }
 0x186   : > { %v2484_v19 = vadd.f32 %v2483_v17, %v2482_v14  ;;  %v2396_v20 = vadd.f32 %v2395_v18, %v2394_v16  ;;  %v3453_v21 = vadd.f32 %v2481_v13, %v2369_v31 }
 0x188   : > { %v3455_v22 = vadd.f32 %v2484_v19, %v2372_v36 }
 0x18a   : > { %v2485_v23 = vpop.f32.mrb[20].mxu1  ;;  %v2397_v24 = vpop.f32.mrb[20].mxu0 }
 0x18b   : > { %v2486_v25 = vpop.f32.mrb[21].mxu1  ;;  %v2398_v26 = vpop.f32.mrb[21].mxu0 }
 0x18c   : > { %v2487_v27 = vadd.f32 %v2486_v25, %v2485_v23  ;;  %v2488_v28 = vpop.f32.mrb[22].mxu1  ;;  %v2399_v30 = vadd.f32 %v2398_v26, %v2397_v24  ;;  %v2400_v32 = vpop.f32.mrb[22].mxu0 }
 0x18d   : > { %v2489_v33 = vpop.f32.mrb[23].mxu1  ;;  %v2401_v34 = vpop.f32.mrb[23].mxu0 }
 0x18e   : > { %v2490_v37 = vadd.f32 %v2489_v33, %v2488_v28  ;;  %v2402_v38 = vadd.f32 %v2401_v34, %v2400_v32  ;;  %v3457_v39 = vadd.f32 %v2487_v27, %v2375_v43 }
 0x190   : > { %v3459_v40 = vadd.f32 %v2490_v37, %v2378_v48 }
 0x192   : > { %v2491_v31 = vpop.f32.mrb[24].mxu1  ;;  %v2403_v42 = vpop.f32.mrb[24].mxu0 }
 0x193   : > { %v2492_v36 = vpop.f32.mrb[25].mxu1  ;;  %v2404_v44 = vpop.f32.mrb[25].mxu0 }
 0x194   : > { %v2493_v45 = vadd.f32 %v2492_v36, %v2491_v31  ;;  %v2494_v46 = vpop.f32.mrb[26].mxu1  ;;  %v2405_v49 = vadd.f32 %v2404_v44, %v2403_v42  ;;  %v2406_v50 = vpop.f32.mrb[26].mxu0 }
 0x195   : > { %v2495_v51 = vpop.f32.mrb[27].mxu1  ;;  %v2407_v52 = vpop.f32.mrb[27].mxu0 }
 0x196   : > { %v2496_v54 = vadd.f32 %v2495_v51, %v2494_v46  ;;  %v2408_v56 = vadd.f32 %v2407_v52, %v2406_v50  ;;  %v3461_v57 = vadd.f32 %v2493_v45, %v2381_v55 }
 0x198   : > { %v3463_v58 = vadd.f32 %v2496_v54, %v2384_v60 }
 0x19a   : > { %v2497_v43 = vpop.f32.mrb[28].mxu1  ;;  %v2409_v61 = vpop.f32.mrb[28].mxu0 }
 0x19b   : > { %v2498_v48 = vpop.f32.mrb[29].mxu1  ;;  %v2410_v62 = vpop.f32.mrb[29].mxu0 }
 0x19c   : > { %v2499_v63 = vadd.f32 %v2498_v48, %v2497_v43  ;;  %v2500_v0 = vpop.f32.mrb[30].mxu1  ;;  %v2411_v2 = vadd.f32 %v2410_v62, %v2409_v61  ;;  %v2412_v4 = vpop.f32.mrb[30].mxu0 }
 0x19d   : > { %v2501_v5 = vpop.f32.mrb[31].mxu1  ;;  %v2413_v6 = vpop.f32.mrb[31].mxu0 }
 0x19e   : > { %v2502_v9 = vadd.f32 %v2501_v5, %v2500_v0  ;;  %v2414_v10 = vadd.f32 %v2413_v6, %v2412_v4  ;;  %v3465_v11 = vadd.f32 %v2499_v63, %v2387_v3 }
 0x1a0   : > { %v3467_v12 = vadd.f32 %v2502_v9, %v2390_v8 }
 0x1a2   : > { %v2503_v55 = vpop.f32.mrb[32].mxu1  ;;  %v2415_v13 = vpop.f32.mrb[32].mxu0 }
 0x1a3   : > { %v2504_v60 = vpop.f32.mrb[33].mxu1  ;;  %v2416_v14 = vpop.f32.mrb[33].mxu0 }
 0x1a4   : > { %v2505_v16 = vadd.f32 %v2504_v60, %v2503_v55  ;;  %v2506_v17 = vpop.f32.mrb[34].mxu1  ;;  %v3469_v18 = vadd.f32 %v2416_v14, %v2415_v13  ;;  %v2418_v19 = vpop.f32.mrb[34].mxu0 }
 0x1a5   : > { %v2507_v23 = vpop.f32.mrb[35].mxu1  ;;  %v2419_v24 = vpop.f32.mrb[35].mxu0 }
 0x1a6   : > { %v2508_v25 = vadd.f32 %v2507_v23, %v2506_v17  ;;  %v3471_v26 = vadd.f32 %v2419_v24, %v2418_v19  ;;  %v3473_v27 = vadd.f32 %v2505_v16, %v2393_v15 }
 0x1a8   : > { %v3475_v3 = vadd.f32 %v2508_v25, %v2396_v20 }
 0x1aa   : > { %v2509_v8 = vpop.f32.mrb[36].mxu1  ;;  %v2421_v28 = vpop.f32.mrb[36].mxu0 }
 0x1ab   : > { %v2510_v32 = vpop.f32.mrb[37].mxu1  ;;  %v2422_v33 = vpop.f32.mrb[37].mxu0 }
 0x1ac   : > { %v2511_v34 = vadd.f32 %v2510_v32, %v2509_v8  ;;  %v2512_v37 = vpop.f32.mrb[38].mxu1  ;;  %v3477_v31 = vadd.f32 %v2422_v33, %v2421_v28  ;;  %v2424_v42 = vpop.f32.mrb[38].mxu0  ;;  %v470_v28 = vld [vmem:[%s3280_s26 + $0x10] sm:$0xff] }
 0x1ad   : > { %v2513_v36 = vpop.f32.mrb[39].mxu1  ;;  %v2425_v44 = vpop.f32.mrb[39].mxu0 }
 0x1ae   : > { %v2514_v45 = vadd.f32 %v2513_v36, %v2512_v37  ;;  %v3479_v46 = vadd.f32 %v2425_v44, %v2424_v42  ;;  %v3481_v50 = vadd.f32 %v2511_v34, %v2399_v30  ;;  %v468_v37 = vld [vmem:[%s3280_s26] sm:$0xff] }
 0x1b0   : > { %v3483_v15 = vadd.f32 %v2514_v45, %v2402_v38 }
 0x1b2   : > { %v2515_v20 = vpop.f32.mrb[40].mxu1  ;;  %v2427_v51 = vpop.f32.mrb[40].mxu0 }
 0x1b3   : > { %v2516_v52 = vpop.f32.mrb[41].mxu1  ;;  %v2428_v54 = vpop.f32.mrb[41].mxu0 }
 0x1b4   : > { %v2517_v43 = vadd.f32 %v2516_v52, %v2515_v20  ;;  %v2518_v61 = vpop.f32.mrb[42].mxu1  ;;  %v3485_v48 = vadd.f32 %v2428_v54, %v2427_v51  ;;  %v2430_v62 = vpop.f32.mrb[42].mxu0  ;;  %v471_v20 = vld [vmem:[%s3280_s26 + $0x18] sm:$0xff]  ;;  %v469_v54 = vld [vmem:[%s3280_s26 + $0x8] sm:$0xff] }
 0x1b5   : > { %v2519_v63 = vpop.f32.mrb[43].mxu1  ;;  %v2431_v0 = vpop.f32.mrb[43].mxu0 }
 0x1b6   : > { %v2520_v4 = vadd.f32 %v2519_v63, %v2518_v61  ;;  %v3487_v5 = vadd.f32 %v2431_v0, %v2430_v62  ;;  %v3489_v6 = vadd.f32 %v2517_v43, %v2405_v49 }
 0x1b8   : > { %v3491_v30 = vadd.f32 %v2520_v4, %v2408_v56 }
 0x1ba   : > { %v2521_v38 = vpop.f32.mrb[44].mxu1  ;;  %v2433_v9 = vpop.f32.mrb[44].mxu0 }
 0x1bb   : > { %v2522_v55 = vpop.f32.mrb[45].mxu1  ;;  %v2434_v13 = vpop.f32.mrb[45].mxu0 }
 0x1bc   : > { %v2523_v60 = vadd.f32 %v2522_v55, %v2521_v38  ;;  %v2524_v14 = vpop.f32.mrb[46].mxu1  ;;  %v3493_v16 = vadd.f32 %v2434_v13, %v2433_v9  ;;  %v2436_v17 = vpop.f32.mrb[46].mxu0  ;;  %v474_v38 = vld [vmem:[%s3280_s26 + $0x30] sm:$0xff]  ;;  %v472_v13 = vld [vmem:[%s3280_s26 + $0x20] sm:$0xff] }
 0x1bd   : > { %v2525_v19 = vpop.f32.mrb[47].mxu1  ;;  %v2437_v23 = vpop.f32.mrb[47].mxu0 }
 0x1be   : > { %v2526_v24 = vadd.f32 %v2525_v19, %v2524_v14  ;;  %v3495_v25 = vadd.f32 %v2437_v23, %v2436_v17  ;;  %v3497_v49 = vadd.f32 %v2523_v60, %v2411_v2  ;;  %v475_v19 = vld [vmem:[%s3280_s26 + $0x38] sm:$0xff] }
 0x1c0   : > { %v3499_v56 = vadd.f32 %v2526_v24, %v2414_v10 }
 0x1c2   : > { %v2527_v8 = vpop.f32.mrb[48].mxu1  ;;  %v2617_v32 = vpop.f32.mrb[48].mxu0 }
 0x1c3   : > { %v1697_v33 = vadd.f32 %v2617_v32, %v3457_v39  ;;  %v2528_v34 = vpop.f32.mrb[49].mxu1  ;;  %v1688_v42 = vpop.f32.mrb[49].mxu0 }
 0x1c4   : > { %v2529_v36 = vadd.f32 %v2528_v34, %v2527_v8  ;;  %v1689_v44 = vadd.f32 %v1688_v42, %v3453_v21  ;;  %v2530_v45 = vpop.f32.mrb[50].mxu1  ;;  %v2618_v2 = vpop.f32.mrb[50].mxu0 }
 0x1c5   : > { %v1817_v10 = vadd.f32 %v1697_v33, %v470_v28  ;;  %v1700_v51 = vadd.f32 %v2618_v2, %v3459_v40  ;;  %v2531_v52 = vpop.f32.mrb[51].mxu1  ;;  %v1691_v39 = vpop.f32.mrb[51].mxu0  ;;  %v473_v28 = vld [vmem:[%s3280_s26 + $0x28] sm:$0xff]  ;;  %v476_v2 = vld [vmem:[%s3280_s26 + $0x40] sm:$0xff] }
 0x1c6   : > { %v1815_v43 = vadd.f32 %v1689_v44, %v468_v37  ;;  %v2532_v61 = vadd.f32 %v2531_v52, %v2530_v45  ;;  %v1692_v62 = vadd.f32 %v1691_v39, %v3455_v22  ;;  %v3510_v63 = vadd.f32 %v2529_v36, %v3469_v18  ;;  %v478_v44 = vld [vmem:[%s3280_s26 + $0x50] sm:$0xff] }
 0x1c7   : > { %1849 = vst [vmem:[%s3280_s26 + $0x10] sm:$0xff] %v1817_v10  ;;  %v1818_v21 = vadd.f32 %v1700_v51, %v471_v20 }
 0x1c8   : > { %1847 = vst [vmem:[%s3280_s26] sm:$0xff] %v1815_v43  ;;  %v1816_v0 = vadd.f32 %v1692_v62, %v469_v54  ;;  %v3515_v4 = vadd.f32 %v2532_v61, %v3471_v26  ;;  %v479_v54 = vld [vmem:[%s3280_s26 + $0x58] sm:$0xff]  ;;  %v477_v62 = vld [vmem:[%s3280_s26 + $0x48] sm:$0xff] }
 0x1c9   : > { %1850 = vst [vmem:[%s3280_s26 + $0x18] sm:$0xff] %v1818_v21 }
 0x1ca   : > { %1848 = vst [vmem:[%s3280_s26 + $0x8] sm:$0xff] %v1816_v0  ;;  %v2533_v40 = vpop.f32.mrb[52].mxu1  ;;  %v2621_v9 = vpop.f32.mrb[52].mxu0 }
 0x1cb   : > { %v1713_v55 = vadd.f32 %v2621_v9, %v3465_v11  ;;  %v2534_v22 = vpop.f32.mrb[53].mxu1  ;;  %v1704_v18 = vpop.f32.mrb[53].mxu0 }
 0x1cc   : > { %v2535_v60 = vadd.f32 %v2534_v22, %v2533_v40  ;;  %v1705_v14 = vadd.f32 %v1704_v18, %v3461_v57  ;;  %v2536_v17 = vpop.f32.mrb[54].mxu1  ;;  %v2622_v26 = vpop.f32.mrb[54].mxu0  ;;  %v482_v22 = vld [vmem:[%s3280_s26 + $0x70] sm:$0xff] }
 0x1cd   : > { %v1821_v23 = vadd.f32 %v1713_v55, %v474_v38  ;;  %v1716_v24 = vadd.f32 %v2622_v26, %v3467_v12  ;;  %v2537_v8 = vpop.f32.mrb[55].mxu1  ;;  %v1707_v11 = vpop.f32.mrb[55].mxu0  ;;  %v483_v26 = vld [vmem:[%s3280_s26 + $0x78] sm:$0xff] }
 0x1ce   : > { %v1819_v32 = vadd.f32 %v1705_v14, %v472_v13  ;;  %v2538_v33 = vadd.f32 %v2537_v8, %v2536_v17  ;;  %v1708_v34 = vadd.f32 %v1707_v11, %v3463_v58  ;;  %v3528_v37 = vadd.f32 %v2535_v60, %v3477_v31  ;;  %v480_v60 = vld [vmem:[%s3280_s26 + $0x60] sm:$0xff] }
 0x1cf   : > { %1853 = vst [vmem:[%s3280_s26 + $0x30] sm:$0xff] %v1821_v23  ;;  %v1822_v57 = vadd.f32 %v1716_v24, %v475_v19 }
 0x1d0   : > { %1851 = vst [vmem:[%s3280_s26 + $0x20] sm:$0xff] %v1819_v32  ;;  %v1820_v42 = vadd.f32 %v1708_v34, %v473_v28  ;;  %v3533_v36 = vadd.f32 %v2538_v33, %v3479_v46  ;;  %v481_v28 = vld [vmem:[%s3280_s26 + $0x68] sm:$0xff] }
 0x1d1   : > { %1854 = vst [vmem:[%s3280_s26 + $0x38] sm:$0xff] %v1822_v57 }
 0x1d2   : > { %1852 = vst [vmem:[%s3280_s26 + $0x28] sm:$0xff] %v1820_v42  ;;  %v2539_v12 = vpop.f32.mrb[56].mxu1  ;;  %v2625_v45 = vpop.f32.mrb[56].mxu0 }
 0x1d3   : > { %v1729_v20 = vadd.f32 %v2625_v45, %v3481_v50  ;;  %v2540_v58 = vpop.f32.mrb[57].mxu1  ;;  %v1720_v31 = vpop.f32.mrb[57].mxu0 }
 0x1d4   : > { %v2541_v10 = vadd.f32 %v2540_v58, %v2539_v12  ;;  %v1721_v51 = vadd.f32 %v1720_v31, %v3473_v27  ;;  %v2542_v52 = vpop.f32.mrb[58].mxu1  ;;  %v2626_v46 = vpop.f32.mrb[58].mxu0  ;;  %v486_v12 = vld [vmem:[%s3280_s26 + $0x90] sm:$0xff]  ;;  %v484_v58 = vld [vmem:[%s3280_s26 + $0x80] sm:$0xff] }
 0x1d5   : > { %v1825_v39 = vadd.f32 %v1729_v20, %v478_v44  ;;  %v1732_v43 = vadd.f32 %v2626_v46, %v3483_v15  ;;  %v2543_v61 = vpop.f32.mrb[59].mxu1  ;;  %v1723_v50 = vpop.f32.mrb[59].mxu0  ;;  %v485_v46 = vld [vmem:[%s3280_s26 + $0x88] sm:$0xff] }
 0x1d6   : > { %v1823_v21 = vadd.f32 %v1721_v51, %v476_v2  ;;  %v2544_v0 = vadd.f32 %v2543_v61, %v2542_v52  ;;  %v1724_v40 = vadd.f32 %v1723_v50, %v3475_v3  ;;  %v3546_v38 = vadd.f32 %v2541_v10, %v3485_v48  ;;  %v487_v10 = vld [vmem:[%s3280_s26 + $0x98] sm:$0xff] }
 0x1d7   : > { %1857 = vst [vmem:[%s3280_s26 + $0x50] sm:$0xff] %v1825_v39  ;;  %v1826_v27 = vadd.f32 %v1732_v43, %v479_v54 }
 0x1d8   : > { %1855 = vst [vmem:[%s3280_s26 + $0x40] sm:$0xff] %v1823_v21  ;;  %v1824_v9 = vadd.f32 %v1724_v40, %v477_v62  ;;  %v3551_v55 = vadd.f32 %v2544_v0, %v3487_v5  ;;  %v490_v0 = vld [vmem:[%s3280_s26 + $0xb0] sm:$0xff] }
 0x1d9   : > { %1858 = vst [vmem:[%s3280_s26 + $0x58] sm:$0xff] %v1826_v27 }
 0x1da   : > { %1856 = vst [vmem:[%s3280_s26 + $0x48] sm:$0xff] %v1824_v9  ;;  %v2545_v15 = vpop.f32.mrb[60].mxu1  ;;  %v2629_v13 = vpop.f32.mrb[60].mxu0 }
 0x1db   : > { %v1745_v18 = vadd.f32 %v2629_v13, %v3497_v49  ;;  %v2546_v3 = vpop.f32.mrb[61].mxu1  ;;  %v1736_v48 = vpop.f32.mrb[61].mxu0 }
 0x1dc   : > { %v2547_v14 = vadd.f32 %v2546_v3, %v2545_v15  ;;  %v1737_v17 = vadd.f32 %v1736_v48, %v3489_v6  ;;  %v2548_v19 = vpop.f32.mrb[62].mxu1  ;;  %v2630_v5 = vpop.f32.mrb[62].mxu0  ;;  %v488_v15 = vld [vmem:[%s3280_s26 + $0xa0] sm:$0xff] }
 0x1dd   : > { %v1829_v23 = vadd.f32 %v1745_v18, %v482_v22  ;;  %v1748_v24 = vadd.f32 %v2630_v5, %v3499_v56  ;;  %v2549_v8 = vpop.f32.mrb[63].mxu1  ;;  %v1739_v49 = vpop.f32.mrb[63].mxu0  ;;  %v491_v18 = vld [vmem:[%s3280_s26 + $0xb8] sm:$0xff] }
 0x1de   : > { %v1827_v11 = vadd.f32 %v1737_v17, %v480_v60  ;;  %v2550_v32 = vadd.f32 %v2549_v8, %v2548_v19  ;;  %v1740_v33 = vadd.f32 %v1739_v49, %v3491_v30  ;;  %v1616_v34 = vadd.f32 %v2547_v14, %v3493_v16  ;;  %v489_v14 = vld [vmem:[%s3280_s26 + $0xa8] sm:$0xff]  ;;  %v494_v49 = vld [vmem:[%s3280_s26 + $0xd0] sm:$0xff] }
 0x1df   : > { %1861 = vst [vmem:[%s3280_s26 + $0x70] sm:$0xff] %v1829_v23  ;;  %v1830_v6 = vadd.f32 %v1748_v24, %v483_v26 }
 0x1e0   : > { %1859 = vst [vmem:[%s3280_s26 + $0x60] sm:$0xff] %v1827_v11  ;;  %v1828_v57 = vadd.f32 %v1740_v33, %v481_v28  ;;  %v1619_v42 = vadd.f32 %v2550_v32, %v3495_v25 }
 0x1e1   : > { %1862 = vst [vmem:[%s3280_s26 + $0x78] sm:$0xff] %v1830_v6 }
 0x1e2   : > { %1860 = vst [vmem:[%s3280_s26 + $0x68] sm:$0xff] %v1828_v57  ;;  %v2551_v56 = vpop.f32.mrb[64].mxu1  ;;  %v2633_v44 = vpop.f32.mrb[64].mxu0 }
 0x1e3   : > { %v1761_v45 = vadd.f32 %v2633_v44, %v3528_v37  ;;  %v2552_v20 = vpop.f32.mrb[65].mxu1  ;;  %v1752_v30 = vpop.f32.mrb[65].mxu0 }
 0x1e4   : > { %v2553_v16 = vadd.f32 %v2552_v20, %v2551_v56  ;;  %v1753_v2 = vadd.f32 %v1752_v30, %v3510_v63  ;;  %v2554_v31 = vpop.f32.mrb[66].mxu1  ;;  %v2634_v25 = vpop.f32.mrb[66].mxu0 }
 0x1e5   : > { %v1833_v51 = vadd.f32 %v1761_v45, %v486_v12  ;;  %v1764_v52 = vadd.f32 %v2634_v25, %v3533_v36  ;;  %v2555_v54 = vpop.f32.mrb[67].mxu1  ;;  %v1755_v37 = vpop.f32.mrb[67].mxu0  ;;  %v493_v45 = vld [vmem:[%s3280_s26 + $0xc8] sm:$0xff] }
 0x1e6   : > { %v1831_v39 = vadd.f32 %v1753_v2, %v484_v58  ;;  %v2556_v43 = vadd.f32 %v2555_v54, %v2554_v31  ;;  %v1756_v61 = vadd.f32 %v1755_v37, %v3515_v4  ;;  %v1624_v62 = vadd.f32 %v2553_v16, %v3437_v29 }
 0x1e7   : > { %1865 = vst [vmem:[%s3280_s26 + $0x90] sm:$0xff] %v1833_v51  ;;  %v1834_v63 = vadd.f32 %v1764_v52, %v487_v10 }
 0x1e8   : > { %1863 = vst [vmem:[%s3280_s26 + $0x80] sm:$0xff] %v1831_v39  ;;  %v1832_v50 = vadd.f32 %v1756_v61, %v485_v46  ;;  %v1627_v21 = vadd.f32 %v2556_v43, %v3439_v35  ;;  %v496_v46 = vld [vmem:[%s3280_s26 + $0xe0] sm:$0xff] }
 0x1e9   : > { %1866 = vst [vmem:[%s3280_s26 + $0x98] sm:$0xff] %v1834_v63  ;;  %v497_v63 = vld [vmem:[%s3280_s26 + $0xe8] sm:$0xff] }
 0x1ea   : > { %1864 = vst [vmem:[%s3280_s26 + $0x88] sm:$0xff] %v1832_v50  ;;  %v2557_v36 = vpop.f32.mrb[68].mxu1  ;;  %v2637_v40 = vpop.f32.mrb[68].mxu0 }
 0x1eb   : > { %v1777_v27 = vadd.f32 %v2637_v40, %v1616_v34  ;;  %v2558_v9 = vpop.f32.mrb[69].mxu1  ;;  %v1768_v4 = vpop.f32.mrb[69].mxu0  ;;  %v492_v34 = vld [vmem:[%s3280_s26 + $0xc0] sm:$0xff]  ;;  %v498_v40 = vld [vmem:[%s3280_s26 + $0xf0] sm:$0xff] }
 0x1ec   : > { %v2559_v22 = vadd.f32 %v2558_v9, %v2557_v36  ;;  %v1769_v29 = vadd.f32 %v1768_v4, %v3546_v38  ;;  %v2560_v13 = vpop.f32.mrb[70].mxu1  ;;  %v2638_v3 = vpop.f32.mrb[70].mxu0  ;;  %v499_v4 = vld [vmem:[%s3280_s26 + $0xf8] sm:$0xff] }
 0x1ed   : > { %v1837_v35 = vadd.f32 %v1777_v27, %v490_v0  ;;  %v1780_v60 = vadd.f32 %v2638_v3, %v1619_v42  ;;  %v2561_v48 = vpop.f32.mrb[71].mxu1  ;;  %v1771_v17 = vpop.f32.mrb[71].mxu0  ;;  %v495_v42 = vld [vmem:[%s3280_s26 + $0xd8] sm:$0xff] }
 0x1ee   : > { %v1835_v19 = vadd.f32 %v1769_v29, %v488_v15  ;;  %v2562_v26 = vadd.f32 %v2561_v48, %v2560_v13  ;;  %v1772_v5 = vadd.f32 %v1771_v17, %v3551_v55  ;;  %v1632_v23 = vadd.f32 %v2559_v22, %v3441_v41  ;;  %v1886_v3 = vld [vmem:[%s3280_s26 + $0x18] sm:$0xff] (!%p2348_p13)  ;;  %v1889_v48 = vld [vmem:[%s3280_s26 + $0x30] sm:$0xff] (!%p2348_p13)  ;;  %v1891_v17 = vld [vmem:[%s3280_s26 + $0x40] sm:$0xff] (!%p2348_p13) }
 0x1ef   : > { %1869 = vst [vmem:[%s3280_s26 + $0xb0] sm:$0xff] %v1837_v35  ;;  %v1838_v38 = vadd.f32 %v1780_v60, %v491_v18  ;;  %v1885_v18 = vld [vmem:[%s3280_s26 + $0x10] sm:$0xff] (!%p2348_p13)  ;;  %v1887_v35 = vld [vmem:[%s3280_s26 + $0x20] sm:$0xff] (!%p2348_p13)  ;;  %v1888_v60 = vld [vmem:[%s3280_s26 + $0x28] sm:$0xff] (!%p2348_p13) }
 0x1f0   : > { %1867 = vst [vmem:[%s3280_s26 + $0xa0] sm:$0xff] %v1835_v19  ;;  %v1836_v24 = vadd.f32 %v1772_v5, %v489_v14  ;;  %v1635_v8 = vadd.f32 %v2562_v26, %v3443_v47  ;;  %v1890_v14 = vld [vmem:[%s3280_s26 + $0x38] sm:$0xff] (!%p2348_p13)  ;;  %v1892_v19 = vld [vmem:[%s3280_s26 + $0x48] sm:$0xff] (!%p2348_p13)  ;;  %v1893_v26 = vld [vmem:[%s3280_s26 + $0x50] sm:$0xff] (!%p2348_p13) }
 0x1f1   : > { %1870 = vst [vmem:[%s3280_s26 + $0xb8] sm:$0xff] %v1838_v38  ;;  %v1894_v5 = vld [vmem:[%s3280_s26 + $0x58] sm:$0xff] (!%p2348_p13) }
 0x1f2   : > { %1868 = vst [vmem:[%s3280_s26 + $0xa8] sm:$0xff] %v1836_v24  ;;  %v2563_v28 = vpop.f32.mrb[72].mxu1  ;;  %v2641_v11 = vpop.f32.mrb[72].mxu0  ;;  %v1896_v24 = vld [vmem:[%s3280_s26 + $0x68] sm:$0xff] (!%p2348_p13) }
 0x1f3   : > { %v1793_v32 = vadd.f32 %v2641_v11, %v1632_v23  ;;  %v2564_v33 = vpop.f32.mrb[73].mxu1  ;;  %v1784_v55 = vpop.f32.mrb[73].mxu0  ;;  %v1895_v23 = vld [vmem:[%s3280_s26 + $0x60] sm:$0xff] (!%p2348_p13) }
 0x1f4   : > { %v2565_v6 = vadd.f32 %v2564_v33, %v2563_v28  ;;  %v1785_v41 = vadd.f32 %v1784_v55, %v1624_v62  ;;  %v2566_v57 = vpop.f32.mrb[74].mxu1  ;;  %v2642_v56 = vpop.f32.mrb[74].mxu0  ;;  %v1898_v33 = vld [vmem:[%s3280_s26 + $0x78] sm:$0xff] (!%p2348_p13) }
 0x1f5   : > { %v1841_v47 = vadd.f32 %v1793_v32, %v494_v49  ;;  %v1796_v12 = vadd.f32 %v2642_v56, %v1635_v8  ;;  %v2567_v44 = vpop.f32.mrb[75].mxu1  ;;  %v1787_v20 = vpop.f32.mrb[75].mxu0  ;;  %v1897_v49 = vld [vmem:[%s3280_s26 + $0x70] sm:$0xff] (!%p2348_p13) }
 0x1f6   : > { %v1839_v58 = vadd.f32 %v1785_v41, %v492_v34  ;;  %v2568_v30 = vadd.f32 %v2567_v44, %v2566_v57  ;;  %v1788_v16 = vadd.f32 %v1787_v20, %v1627_v21  ;;  %v1640_v2 = vadd.f32 %v2565_v6, %v3445_v53  ;;  %v1899_v41 = vld [vmem:[%s3280_s26 + $0x80] sm:$0xff] (!%p2348_p13)  ;;  %v1901_v20 = vld [vmem:[%s3280_s26 + $0x90] sm:$0xff] (!%p2348_p13) }
 0x1f7   : > { %1873 = vst [vmem:[%s3280_s26 + $0xd0] sm:$0xff] %v1841_v47  ;;  %v1842_v31 = vadd.f32 %v1796_v12, %v495_v42  ;;  %v1900_v47 = vld [vmem:[%s3280_s26 + $0x88] sm:$0xff] (!%p2348_p13) }
 0x1f8   : > { %1871 = vst [vmem:[%s3280_s26 + $0xc0] sm:$0xff] %v1839_v58  ;;  %v1840_v10 = vadd.f32 %v1788_v16, %v493_v45  ;;  %v1643_v25 = vadd.f32 %v2568_v30, %v3447_v59 }
 0x1f9   : > { %1874 = vst [vmem:[%s3280_s26 + $0xd8] sm:$0xff] %v1842_v31 }
 0x1fa   : > { %1872 = vst [vmem:[%s3280_s26 + $0xc8] sm:$0xff] %v1840_v10  ;;  %v2569_v51 = vpop.f32.mrb[76].mxu1  ;;  %v2645_v52 = vpop.f32.mrb[76].mxu0 }
 0x1fb   : > { %v2570_v54 = vpop.f32.mrb[77].mxu1  ;;  %v1800_v37 = vpop.f32.mrb[77].mxu0 }
 0x1fc   : > { %v2571_v39 = vadd.f32 %v2570_v54, %v2569_v51  ;;  %v1801_v43 = vadd.f32 %v1800_v37, %v1640_v2  ;;  %v2572_v53 = vpop.f32.mrb[78].mxu1  ;;  %v2646_v61 = vpop.f32.mrb[78].mxu0  ;;  %v1902_v2 = vld [vmem:[%s3280_s26 + $0x98] sm:$0xff] (!%p2348_p13)  ;;  %v1903_v51 = vld [vmem:[%s3280_s26 + $0xa0] sm:$0xff] (!%p2348_p13)  ;;  %v1904_v37 = vld [vmem:[%s3280_s26 + $0xa8] sm:$0xff] (!%p2348_p13) }
 0x1fd   : > { %v2573_v62 = vpop.f32.mrb[79].mxu1  ;;  %v1803_v50 = vpop.f32.mrb[79].mxu0 }
 0x1fe   : > { %v1648_v59 = vadd.f32 %v2571_v39, %v3449_v1  ;;  %v1843_v21 = vadd.f32 %v1801_v43, %v496_v46  ;;  %v2574_v36 = vadd.f32 %v2573_v62, %v2572_v53  ;;  %v1804_v0 = vadd.f32 %v1803_v50, %v1643_v25  ;;  %v1883_v1 = vld [vmem:[%s3280_s26] sm:$0xff] (!%p2348_p13) }
 0x1ff   : > { %2875 = vtanh.f32 (!%p2348_p13), %v1883_v1  ;;  %v1909_v1 = vld [vmem:[%s3280_s26 + $0xd0] sm:$0xff] (!%p2348_p13) }
 0x200   : > { %v1809_v27 = vadd.f32 %v2645_v52, %v1648_v59  ;;  %1875 = vst [vmem:[%s3280_s26 + $0xe0] sm:$0xff] %v1843_v21  ;;  %v1651_v9 = vadd.f32 %v2574_v36, %v3451_v7  ;;  %v1844_v15 = vadd.f32 %v1804_v0, %v497_v63  ;;  %1882 = sbr.rel (%p2348_p13) target bundleno = 559 (0x22f), region = 62  ;;  %v1884_v7 = vld [vmem:[%s3280_s26 + $0x8] sm:$0xff] (!%p2348_p13)  ;;  %v1906_v59 = vld [vmem:[%s3280_s26 + $0xb8] sm:$0xff] (!%p2348_p13) }
 0x201   : > { %2877 = vtanh.f32 (!%p2348_p13), %v1884_v7 }
 0x202   : > { %v1845_v22 = vadd.f32 %v1809_v27, %v498_v40  ;;  %v1812_v29 = vadd.f32 %v2646_v61, %v1651_v9  ;;  %1876 = vst [vmem:[%s3280_s26 + $0xe8] sm:$0xff] %v1844_v15  ;;  %2879 = vtanh.f32 (!%p2348_p13), %v1885_v18  ;;  %v1905_v61 = vld [vmem:[%s3280_s26 + $0xb0] sm:$0xff] (!%p2348_p13)  ;;  %v1907_v40 = vld [vmem:[%s3280_s26 + $0xc0] sm:$0xff] (!%p2348_p13) }
 0x203   : > { %2881 = vtanh.f32 (!%p2348_p13), %v1886_v3 }
 0x204   : > { %1877 = vst [vmem:[%s3280_s26 + $0xf0] sm:$0xff] %v1845_v22  ;;  %v1846_v13 = vadd.f32 %v1812_v29, %v499_v4  ;;  %2883 = vtanh.f32 (!%p2348_p13), %v1887_v35  ;;  %v1908_v4 = vld [vmem:[%s3280_s26 + $0xc8] sm:$0xff] (!%p2348_p13)  ;;  %v1910_v35 = vld [vmem:[%s3280_s26 + $0xd8] sm:$0xff] (!%p2348_p13) }
 0x205   : > { %2885 = vtanh.f32 (!%p2348_p13), %v1888_v60 }
 0x206   : > { %1878 = vst [vmem:[%s3280_s26 + $0xf8] sm:$0xff] %v1846_v13  ;;  %2887 = vtanh.f32 (!%p2348_p13), %v1889_v48 }
 0x207   : > { %2889 = vtanh.f32 %v1890_v14 }
 0x208   : > { %2891 = vtanh.f32 %v1891_v17  ;;  %v1911_v17 = vld [vmem:[%s3280_s26 + $0xe0] sm:$0xff] }
 0x209   : > { %2893 = vtanh.f32 %v1892_v19  ;;  %v2876_v38 = vpop.eup %2875 }
 0x20a   : > { %2895 = vtanh.f32 %v1893_v26  ;;  %v1947_v28 = vadd.f32 1.0, %v2876_v38 }
 0x20b   : > { %v2878_v8 = vpop.eup %2877  ;;  %2897 = vtanh.f32 %v1894_v5 }
 0x20c   : > { %v2880_v11 = vpop.eup %2879  ;;  %v1948_v32 = vadd.f32 1.0, %v2878_v8  ;;  %2899 = vtanh.f32 %v1895_v23  ;;  %v1979_v55 = vmul.f32 0.5, %v1947_v28  ;;  %v1912_v23 = vld [vmem:[%s3280_s26 + $0xe8] sm:$0xff]  ;;  %v1913_v28 = vld [vmem:[%s3280_s26 + $0xf0] sm:$0xff] }
 0x20d   : > { %v2882_v34 = vpop.eup %2881  ;;  %v1949_v6 = vadd.f32 1.0, %v2880_v11  ;;  %2901 = vtanh.f32 %v1896_v24 }
 0x20e   : > { %v2884_v57 = vpop.eup %2883  ;;  %v1980_v42 = vmul.f32 0.5, %v1948_v32  ;;  %v1950_v56 = vadd.f32 1.0, %v2882_v34  ;;  %2903 = vtanh.f32 %v1897_v49  ;;  %2011 = vst [vmem:[%s3280_s26] sm:$0xff] %v1979_v55 }
 0x20f   : > { %v2886_v12 = vpop.eup %2885  ;;  %v1981_v44 = vmul.f32 0.5, %v1949_v6  ;;  %v1951_v45 = vadd.f32 1.0, %v2884_v57  ;;  %2905 = vtanh.f32 %v1898_v33  ;;  %v1914_v33 = vld [vmem:[%s3280_s26 + $0xf8] sm:$0xff] }
 0x210   : > { %v2888_v58 = vpop.eup %2887  ;;  %2012 = vst [vmem:[%s3280_s26 + $0x8] sm:$0xff] %v1980_v42  ;;  %v1982_v30 = vmul.f32 0.5, %v1950_v56  ;;  %v1952_v16 = vadd.f32 1.0, %v2886_v12  ;;  %2907 = vtanh.f32 %v1899_v41 }
 0x211   : > { %v2890_v31 = vpop.eup %2889  ;;  %2013 = vst [vmem:[%s3280_s26 + $0x10] sm:$0xff] %v1981_v44  ;;  %v1983_v10 = vmul.f32 0.5, %v1951_v45  ;;  %v1953_v25 = vadd.f32 1.0, %v2888_v58  ;;  %2909 = vtanh.f32 %v1900_v47 }
 0x212   : > { %v2892_v52 = vpop.eup %2891  ;;  %2014 = vst [vmem:[%s3280_s26 + $0x18] sm:$0xff] %v1982_v30  ;;  %v1984_v54 = vmul.f32 0.5, %v1952_v16  ;;  %v1954_v46 = vadd.f32 1.0, %v2890_v31  ;;  %2911 = vtanh.f32 %v1901_v20 }
 0x213   : > { %v2894_v39 = vpop.eup %2893  ;;  %2015 = vst [vmem:[%s3280_s26 + $0x20] sm:$0xff] %v1983_v10  ;;  %v1985_v43 = vmul.f32 0.5, %v1953_v25  ;;  %v1955_v53 = vadd.f32 1.0, %v2892_v52  ;;  %2913 = vtanh.f32 %v1902_v2 }
 0x214   : > { %v2896_v62 = vpop.eup %2895  ;;  %2016 = vst [vmem:[%s3280_s26 + $0x28] sm:$0xff] %v1984_v54  ;;  %v1986_v63 = vmul.f32 0.5, %v1954_v46  ;;  %v1956_v50 = vadd.f32 1.0, %v2894_v39  ;;  %2915 = vtanh.f32 %v1903_v51 }
 0x215   : > { %v2898_v21 = vpop.eup %2897  ;;  %2017 = vst [vmem:[%s3280_s26 + $0x30] sm:$0xff] %v1985_v43  ;;  %v1987_v36 = vmul.f32 0.5, %v1955_v53  ;;  %v1957_v0 = vadd.f32 1.0, %v2896_v62  ;;  %2917 = vtanh.f32 %v1904_v37 }
 0x216   : > { %v2900_v27 = vpop.eup %2899  ;;  %2018 = vst [vmem:[%s3280_s26 + $0x38] sm:$0xff] %v1986_v63  ;;  %v1988_v9 = vmul.f32 0.5, %v1956_v50  ;;  %v1958_v15 = vadd.f32 1.0, %v2898_v21  ;;  %2919 = vtanh.f32 %v1905_v61 }
 0x217   : > { %v2902_v22 = vpop.eup %2901  ;;  %2019 = vst [vmem:[%s3280_s26 + $0x40] sm:$0xff] %v1987_v36  ;;  %v1989_v29 = vmul.f32 0.5, %v1957_v0  ;;  %v1959_v13 = vadd.f32 1.0, %v2900_v27  ;;  %2921 = vtanh.f32 %v1906_v59 }
 0x218   : > { %v2904_v7 = vpop.eup %2903  ;;  %2020 = vst [vmem:[%s3280_s26 + $0x48] sm:$0xff] %v1988_v9  ;;  %v1990_v18 = vmul.f32 0.5, %v1958_v15  ;;  %v1960_v3 = vadd.f32 1.0, %v2902_v22  ;;  %2923 = vtanh.f32 %v1907_v40 }
 0x219   : > { %v2906_v60 = vpop.eup %2905  ;;  %2021 = vst [vmem:[%s3280_s26 + $0x50] sm:$0xff] %v1989_v29  ;;  %v1991_v48 = vmul.f32 0.5, %v1959_v13  ;;  %v1961_v14 = vadd.f32 1.0, %v2904_v7  ;;  %2925 = vtanh.f32 %v1908_v4 }
 0x21a   : > { %v2908_v19 = vpop.eup %2907  ;;  %2022 = vst [vmem:[%s3280_s26 + $0x58] sm:$0xff] %v1990_v18  ;;  %v1992_v26 = vmul.f32 0.5, %v1960_v3  ;;  %v1962_v5 = vadd.f32 1.0, %v2906_v60  ;;  %2927 = vtanh.f32 %v1909_v1 }
 0x21b   : > { %v2910_v38 = vpop.eup %2909  ;;  %2023 = vst [vmem:[%s3280_s26 + $0x60] sm:$0xff] %v1991_v48  ;;  %v1993_v24 = vmul.f32 0.5, %v1961_v14  ;;  %v1963_v8 = vadd.f32 1.0, %v2908_v19  ;;  %2929 = vtanh.f32 %v1910_v35 }
 0x21c   : > { %v2912_v49 = vpop.eup %2911  ;;  %2024 = vst [vmem:[%s3280_s26 + $0x68] sm:$0xff] %v1992_v26  ;;  %v1994_v11 = vmul.f32 0.5, %v1962_v5  ;;  %v1964_v32 = vadd.f32 1.0, %v2910_v38  ;;  %2931 = vtanh.f32 %v1911_v17 }
 0x21d   : > { %v2914_v34 = vpop.eup %2913  ;;  %2025 = vst [vmem:[%s3280_s26 + $0x70] sm:$0xff] %v1993_v24  ;;  %v1995_v55 = vmul.f32 0.5, %v1963_v8  ;;  %v1965_v6 = vadd.f32 1.0, %v2912_v49  ;;  %2933 = vtanh.f32 %v1912_v23 }
 0x21e   : > { %v2916_v41 = vpop.eup %2915  ;;  %2026 = vst [vmem:[%s3280_s26 + $0x78] sm:$0xff] %v1994_v11  ;;  %v1996_v57 = vmul.f32 0.5, %v1964_v32  ;;  %v1966_v42 = vadd.f32 1.0, %v2914_v34  ;;  %2935 = vtanh.f32 %v1913_v28 }
 0x21f   : > { %v2918_v56 = vpop.eup %2917  ;;  %2027 = vst [vmem:[%s3280_s26 + $0x80] sm:$0xff] %v1995_v55  ;;  %v1997_v47 = vmul.f32 0.5, %v1965_v6  ;;  %v1967_v12 = vadd.f32 1.0, %v2916_v41  ;;  %2937 = vtanh.f32 %v1914_v33 }
 0x220   : > { %v2920_v44 = vpop.eup %2919  ;;  %2028 = vst [vmem:[%s3280_s26 + $0x88] sm:$0xff] %v1996_v57  ;;  %v1998_v45 = vmul.f32 0.5, %v1966_v42  ;;  %v1968_v20 = vadd.f32 1.0, %v2918_v56 }
 0x221   : > { %v2922_v58 = vpop.eup %2921  ;;  %2029 = vst [vmem:[%s3280_s26 + $0x90] sm:$0xff] %v1997_v47  ;;  %v1999_v30 = vmul.f32 0.5, %v1967_v12  ;;  %v1969_v16 = vadd.f32 1.0, %v2920_v44 }
 0x222   : > { %v2924_v2 = vpop.eup %2923  ;;  %2030 = vst [vmem:[%s3280_s26 + $0x98] sm:$0xff] %v1998_v45  ;;  %v2000_v31 = vmul.f32 0.5, %v1968_v20  ;;  %v1970_v10 = vadd.f32 1.0, %v2922_v58 }
 0x223   : > { %v2926_v25 = vpop.eup %2925  ;;  %2031 = vst [vmem:[%s3280_s26 + $0xa0] sm:$0xff] %v1999_v30  ;;  %v2001_v51 = vmul.f32 0.5, %v1969_v16  ;;  %v1971_v52 = vadd.f32 1.0, %v2924_v2 }
 0x224   : > { %v2928_v54 = vpop.eup %2927  ;;  %2032 = vst [vmem:[%s3280_s26 + $0xa8] sm:$0xff] %v2000_v31  ;;  %v2002_v46 = vmul.f32 0.5, %v1970_v10  ;;  %v1972_v37 = vadd.f32 1.0, %v2926_v25 }
 0x225   : > { %v2930_v39 = vpop.eup %2929  ;;  %2033 = vst [vmem:[%s3280_s26 + $0xb0] sm:$0xff] %v2001_v51  ;;  %v2003_v43 = vmul.f32 0.5, %v1971_v52  ;;  %v1973_v53 = vadd.f32 1.0, %v2928_v54 }
 0x226   : > { %v2932_v61 = vpop.eup %2931  ;;  %2034 = vst [vmem:[%s3280_s26 + $0xb8] sm:$0xff] %v2002_v46  ;;  %v2004_v62 = vmul.f32 0.5, %v1972_v37  ;;  %v1974_v63 = vadd.f32 1.0, %v2930_v39 }
 0x227   : > { %v2934_v50 = vpop.eup %2933  ;;  %2035 = vst [vmem:[%s3280_s26 + $0xc0] sm:$0xff] %v2003_v43  ;;  %v2005_v59 = vmul.f32 0.5, %v1973_v53  ;;  %v1975_v21 = vadd.f32 1.0, %v2932_v61 }
 0x228   : > { %v2936_v36 = vpop.eup %2935  ;;  %2036 = vst [vmem:[%s3280_s26 + $0xc8] sm:$0xff] %v2004_v62  ;;  %v2006_v0 = vmul.f32 0.5, %v1974_v63  ;;  %v1976_v40 = vadd.f32 1.0, %v2934_v50 }
 0x229   : > { %v2938_v27 = vpop.eup %2937  ;;  %2037 = vst [vmem:[%s3280_s26 + $0xd0] sm:$0xff] %v2005_v59  ;;  %v2007_v9 = vmul.f32 0.5, %v1975_v21  ;;  %v1977_v15 = vadd.f32 1.0, %v2936_v36 }
 0x22a   : > { %2038 = vst [vmem:[%s3280_s26 + $0xd8] sm:$0xff] %v2006_v0  ;;  %v2008_v4 = vmul.f32 0.5, %v1976_v40  ;;  %v1978_v22 = vadd.f32 1.0, %v2938_v27 }
 0x22b   : > { %2039 = vst [vmem:[%s3280_s26 + $0xe0] sm:$0xff] %v2007_v9  ;;  %v2009_v29 = vmul.f32 0.5, %v1977_v15 }
 0x22c   : > { %2040 = vst [vmem:[%s3280_s26 + $0xe8] sm:$0xff] %v2008_v4  ;;  %v2010_v13 = vmul.f32 0.5, %v1978_v22 }
 0x22d   : > { %2041 = vst [vmem:[%s3280_s26 + $0xf0] sm:$0xff] %v2009_v29 }
 0x22e   : > { %2042 = vst [vmem:[%s3280_s26 + $0xf8] sm:$0xff] %v2010_v13 }
 0x22f PF: > { %s12_s15 = sadd.s32 1, %s2993_s15   ;;  %s3704_s9 = smov %s2973_s10 }
 0x230   : > { %p9_p0 = scmp.ge.s32.totalorder %s12_s15, 12   ;;  %s3705_s10 = smov %s3062_s22 }
 0x231   : > { %s3706_s11 = smov %s2985_s13  ;;  %s3707_s12 = smov %s2989_s14 }
 0x232   : > { %s3708_s13 = smov %s3711_s16  ;;  %s3709_s14 = smov %s3715_s17 }
 0x233   :  { %11 = sbr.rel (!%p9_p0) target bundleno = 4 (0x4), region = 106 }

</bundles_post_ra>
